<compile_context>
chip_gen: v7x
topology: tpu7x:2x2x1
jax: 0.10.0
libtpu: 0.0.40
codegen_flags: <defaults>
</compile_context>

<pallas_src>
import functools

import numpy as np
import jax
import jax.numpy as jnp
from jax.experimental import pallas as pl
from jax.experimental.pallas import tpu as pltpu

n_qubits = 4
q_depth = 6
DIM = 2 ** n_qubits          # 16
PDIM = 2 * DIM               # 32 (packed real dimension: [re; im])
MAX_B_TILE = 512             # max batch tile (lane dimension per half)
_PREC = jax.lax.Precision.HIGHEST


def _cdiv(a, b):
    return (a + b - 1) // b


def _round_up(a, b):
    return _cdiv(a, b) * b


# ----------------------------------------------------------------------------
# Static circuit construction (host-side, parameter-independent structure).
# ----------------------------------------------------------------------------
def _bit(i, w):
    # PennyLane convention: wire 0 is the most-significant bit of the basis index.
    return (i >> (n_qubits - 1 - w)) & 1


def embed(U, wires):
    """Embed a 2^k x 2^k gate acting on `wires` into the full 16x16 unitary."""
    M = np.zeros((DIM, DIM), dtype=np.complex128)
    for i in range(DIM):
        for o in range(DIM):
            if any(_bit(i, w) != _bit(o, w) for w in range(n_qubits) if w not in wires):
                continue
            i_sub = 0
            o_sub = 0
            for w in wires:
                i_sub = (i_sub << 1) | _bit(i, w)
                o_sub = (o_sub << 1) | _bit(o, w)
            M[o, i] = U[o_sub, i_sub]
    return M


def perm_gate(k, fn):
    d = 2 ** k
    M = np.zeros((d, d), dtype=np.complex128)
    for i in range(d):
        M[fn(i), i] = 1.0
    return M


H2 = np.array([[1, 1], [1, -1]], dtype=np.complex128) / np.sqrt(2.0)
PX = np.array([[0, 1], [1, 0]], dtype=np.complex128)
PY = np.array([[0, -1j], [1j, 0]], dtype=np.complex128)
PZ = np.array([[1, 0], [0, -1]], dtype=np.complex128)
CNOT = perm_gate(2, lambda i: (i >> 1) * 2 + ((i & 1) ^ (i >> 1)))
CZ = np.diag([1, 1, 1, -1]).astype(np.complex128)


def _cswap_map(i):
    c, a, b = (i >> 2) & 1, (i >> 1) & 1, i & 1
    if c:
        a, b = b, a
    return (c << 2) | (a << 1) | b


def _tof_map(i):
    c1, c2, t = (i >> 2) & 1, (i >> 1) & 1, i & 1
    if c1 and c2:
        t ^= 1
    return (c1 << 2) | (c2 << 1) | t


CSWAP = perm_gate(3, _cswap_map)
TOF = perm_gate(3, _tof_map)

# RY(theta) = cos(theta/2) * I + sin(theta/2) * RY_GEN  (real generator).
RY_GEN = np.array([[0.0, -1.0], [1.0, 0.0]], dtype=np.complex128)

# Elementary single-qubit embeddings E[w][i, j] = embed(|i><j|, [w]) (real 0/1 matrices),
# used to embed 2x2 rotation matrices linearly.
E_SINGLE = np.zeros((n_qubits, 2, 2, DIM, DIM), dtype=np.float64)
for _w in range(n_qubits):
    for _i in range(2):
        for _j in range(2):
            _eij = np.zeros((2, 2), dtype=np.complex128)
            _eij[_i, _j] = 1.0
            E_SINGLE[_w, _i, _j] = embed(_eij, [_w]).real


def build_base_ops(design):
    """Parse the (static) design dict into an op list for quantum_net (forward only)."""
    ops = []
    for w in range(n_qubits):
        ops.append(("fixed", embed(H2, [w])))
    for layer in range(q_depth):
        for node in range(n_qubits):
            key = str(layer % 6) + str(node % 4)
            if design[key + "0"]:
                ops.append(("ry_x", node))                     # RY(x[node]) on wire node
            g1 = design[key + "1"]
            if g1 in ("x", "y", "z"):
                ops.append(("rot_w", g1, node, layer, node))   # R(q_weights[layer,node])
            g2 = design[key + "2"]
            if g2 == "H":
                ops.append(("fixed", embed(H2, [node])))
            elif g2 == "Px":
                ops.append(("fixed", embed(PX, [node])))
            elif g2 == "Py":
                ops.append(("fixed", embed(PY, [node])))
            elif g2 == "Pz":
                ops.append(("fixed", embed(PZ, [node])))
            elif g2 == "CNot":
                ops.append(("fixed", embed(CNOT, [node, (node + 1) % n_qubits])))
            elif g2 == "CSwap":
                ops.append(("fixed", embed(CSWAP, [node, (node + 1) % n_qubits,
                                                   (node + 2) % n_qubits])))
            elif g2 == "Tof":
                ops.append(("fixed", embed(TOF, [node, (node + 1) % n_qubits,
                                                 (node + 2) % n_qubits])))
            elif g2 == "CZ":
                ops.append(("fixed", embed(CZ, [node, (node + 1) % n_qubits])))
    return ops


def make_schedule(base_ops):
    """Split the forward op list into folded batch-independent runs and per-batch RYs."""
    schedule, fold_specs, ry_wires = [], [], []
    run = []
    for op in base_ops:
        if op[0] == "ry_x":
            if run:
                schedule.append(("fold", len(fold_specs)))
                fold_specs.append(run)
                run = []
            schedule.append(("ry", len(ry_wires)))
            ry_wires.append(op[1])
        else:
            run.append(op)
    if run:
        schedule.append(("fold", len(fold_specs)))
        fold_specs.append(run)
    return tuple(schedule), fold_specs, ry_wires


# ----------------------------------------------------------------------------
# JAX-side construction of the folded (batch-independent) gate products.
# ----------------------------------------------------------------------------
def _rot_gate_c64(kind, wire, theta):
    """embed(R_kind(theta), [wire]) as a complex64 (16,16) matrix (theta is traced)."""
    half = 0.5 * theta
    c = jnp.cos(half).astype(jnp.complex64)
    s = jnp.sin(half).astype(jnp.complex64)
    i1 = jnp.asarray(1j, jnp.complex64)
    z = jnp.zeros((), jnp.complex64)
    if kind == "x":
        row0 = jnp.stack([c, -i1 * s])
        row1 = jnp.stack([-i1 * s, c])
    elif kind == "y":
        row0 = jnp.stack([c, -s])
        row1 = jnp.stack([s, c])
    else:  # "z"
        row0 = jnp.stack([c - i1 * s, z])
        row1 = jnp.stack([z, c + i1 * s])
    R = jnp.stack([row0, row1])                                        # (2,2) c64
    E = jnp.asarray(E_SINGLE[wire].astype(np.complex64))               # (2,2,16,16)
    return jnp.einsum("ij,ijkl->kl", R, E, precision=_PREC)


def _pack_complex_to_real(F):
    """(..., 16, 16) complex -> (..., 32, 32) real block form [[Re, -Im], [Im, Re]]."""
    fr = jnp.real(F).astype(jnp.float32)
    fi = jnp.imag(F).astype(jnp.float32)
    top = jnp.concatenate([fr, -fi], axis=-1)
    bot = jnp.concatenate([fi, fr], axis=-1)
    return jnp.concatenate([top, bot], axis=-2)


def _fold_matrices(fold_specs, qw):
    """Product of each batch-independent run -> packed real (NF, 32, 32) float32."""
    mats = []
    for run_ops in fold_specs:
        M = None
        for op in run_ops:
            if op[0] == "fixed":
                G = jnp.asarray(op[1].astype(np.complex64))
            else:
                _, kind, wire, layer, node = op
                G = _rot_gate_c64(kind, wire, qw[layer, node])
            M = G if M is None else jnp.matmul(G, M, precision=_PREC)  # application order
        mats.append(M)
    return _pack_complex_to_real(jnp.stack(mats))                      # (NF,32,32) f32


# ----------------------------------------------------------------------------
# Pallas kernel: fully-unrolled forward state propagation, lane-dense batch,
# psi1 (x1 batch) and psi2 (x2 batch) side by side in the lane dimension.
# ----------------------------------------------------------------------------
def _fidelity_kernel(fold_ref, a_ref, cos_ref, sin_ref, out_ref, *, schedule):
    b_tile = out_ref.shape[-1]
    wlanes = cos_ref.shape[-1]                                  # == 2 * b_tile

    # |0000> for every lane; state packed [re; im] along the 32-row sublane axis.
    row = jax.lax.broadcasted_iota(jnp.int32, (PDIM, wlanes), 0)
    st = jnp.where(row == 0, 1.0, 0.0).astype(jnp.float32)

    # Static schedule -> fully unrolled gate loop.  Each gate is ONE real 32x32 matmul.
    for kind, idx in schedule:
        if kind == "fold":
            st = jnp.dot(fold_ref[idx], st,
                         preferred_element_type=jnp.float32, precision=_PREC)
        else:  # per-batch RY:  new = cos * S + sin * (A_packed @ S)
            a_st = jnp.dot(a_ref[idx], st,
                           preferred_element_type=jnp.float32, precision=_PREC)
            c = cos_ref[pl.ds(idx, 1), :]                       # (1, wlanes)
            s = sin_ref[pl.ds(idx, 1), :]
            st = c * st + s * a_st

    # fidelity = |<psi2|psi1>|^2 ; psi1 in lanes [0, b_tile), psi2 in [b_tile, 2*b_tile).
    re1 = st[0:DIM, 0:b_tile]
    im1 = st[DIM:PDIM, 0:b_tile]
    re2 = st[0:DIM, b_tile:2 * b_tile]
    im2 = st[DIM:PDIM, b_tile:2 * b_tile]
    ip_re = jnp.sum(re1 * re2 + im1 * im2, axis=0, keepdims=True)      # (1, b_tile)
    ip_im = jnp.sum(re2 * im1 - im2 * re1, axis=0, keepdims=True)
    out_ref[...] = ip_re * ip_re + ip_im * ip_im


# ----------------------------------------------------------------------------
# Forward wrapper (Pallas-backed equivalent of QuantumLayer.forward, float32).
# ----------------------------------------------------------------------------
def make_quantum_layer_forward(design):
    base_ops = build_base_ops(design)
    schedule, fold_specs, ry_wires = make_schedule(base_ops)
    nf = len(fold_specs)
    nr_real = len(ry_wires)
    nr = max(nr_real, 1)

    # Packed RY generators blockdiag(A_w, A_w): constant real (NR, 32, 32).
    if ry_wires:
        a_list = []
        for wv in ry_wires:
            A = embed(RY_GEN, [wv]).real
            Ap = np.zeros((PDIM, PDIM), np.float64)
            Ap[:DIM, :DIM] = A
            Ap[DIM:, DIM:] = A
            a_list.append(Ap)
        a_packed_np = np.stack(a_list).astype(np.float32)
    else:
        a_packed_np = np.zeros((1, PDIM, PDIM), np.float32)
    wire_idx_np = np.asarray(ry_wires if ry_wires else [0], np.int32)

    kernel = functools.partial(_fidelity_kernel, schedule=schedule)

    def forward(x1, x2, q_params):
        B = x1.shape[0]
        # Largest tile up to MAX_B_TILE, but keep >= 2 grid steps when the batch allows
        # it so the "parallel" axis can shard across v7x's 2 TensorCores.
        b_tile = min(MAX_B_TILE, max(128, _round_up(_cdiv(B, 2), 128)))
        b_pad = _round_up(B, b_tile)
        nb = b_pad // b_tile
        wlanes = 2 * b_tile

        qw = q_params.reshape(q_depth, n_qubits).astype(jnp.float32)
        fold_packed = _fold_matrices(fold_specs, qw)                   # (NF,32,32)

        if ry_wires:
            th1 = x1[:, wire_idx_np].astype(jnp.float32).T             # (NR, B)
            th2 = x2[:, wire_idx_np].astype(jnp.float32).T
        else:
            th1 = jnp.zeros((1, B), jnp.float32)
            th2 = jnp.zeros((1, B), jnp.float32)
        th1 = jnp.pad(th1, ((0, 0), (0, b_pad - B)))                   # padded lanes: RY=I
        th2 = jnp.pad(th2, ((0, 0), (0, b_pad - B)))
        # Per-tile lane layout: [x1 tile b | x2 tile b]  -> total width nb * 2*b_tile.
        theta = jnp.concatenate(
            [th1.reshape(nr, nb, 1, b_tile), th2.reshape(nr, nb, 1, b_tile)],
            axis=2).reshape(nr, nb * wlanes)
        cos_t = jnp.cos(0.5 * theta)
        sin_t = jnp.sin(0.5 * theta)

        n_mm = nf + nr_real
        flops = nb * (n_mm * 2 * PDIM * PDIM * wlanes
                      + nr_real * 3 * PDIM * wlanes
                      + 10 * DIM * b_tile)
        bytes_accessed = (nf * PDIM * PDIM * 4 + nr * PDIM * PDIM * 4
                          + 2 * nr * nb * wlanes * 4 + b_pad * 4)

        probs0 = pl.pallas_call(
            kernel,
            out_shape=jax.ShapeDtypeStruct((1, b_pad), jnp.float32),
            grid=(nb,),
            in_specs=[
                pl.BlockSpec((nf, PDIM, PDIM), lambda b: (0, 0, 0)),   # packed folds
                pl.BlockSpec((nr, PDIM, PDIM), lambda b: (0, 0, 0)),   # packed RY gens
                pl.BlockSpec((nr, wlanes), lambda b: (0, b)),          # cos(theta/2)
                pl.BlockSpec((nr, wlanes), lambda b: (0, b)),          # sin(theta/2)
            ],
            out_specs=pl.BlockSpec((1, b_tile), lambda b: (0, b)),
            compiler_params=pltpu.CompilerParams(
                dimension_semantics=("parallel",)),
            cost_estimate=pl.CostEstimate(
                flops=int(flops), transcendentals=0,
                bytes_accessed=int(bytes_accessed)),
        )(fold_packed, jnp.asarray(a_packed_np), cos_t, sin_t)

        return probs0[0, :B]                                           # fidelities (B,)

    return jax.jit(forward)


# ----------------------------------------------------------------------------
# Independent float64 NumPy reference (forward + adjoint, like the PyTorch module).
# ----------------------------------------------------------------------------
def _np_rot(kind, theta):
    c, s = np.cos(theta / 2.0), np.sin(theta / 2.0)
    if kind == "x":
        return np.array([[c, -1j * s], [-1j * s, c]], dtype=np.complex128)
    if kind == "y":
        return np.array([[c, -s], [s, c]], dtype=np.complex128)
    return np.array([[c - 1j * s, 0], [0, c + 1j * s]], dtype=np.complex128)


def reference_fidelities(base_ops, x1, x2, q_params):
    x1 = np.asarray(x1, np.float64)
    x2 = np.asarray(x2, np.float64)
    qw = np.asarray(q_params, np.float64).reshape(q_depth, n_qubits)
    out = np.zeros(x1.shape[0], np.float64)
    for b in range(x1.shape[0]):
        s = np.zeros(DIM, np.complex128)
        s[0] = 1.0
        for adj, x in ((False, x1[b]), (True, x2[b])):
            seq = list(reversed(base_ops)) if adj else list(base_ops)
            for op in seq:
                if op[0] == "fixed":
                    M = op[1].conj().T if adj else op[1]
                elif op[0] == "rot_w":
                    _, kind, wire, layer, node = op
                    theta = -qw[layer, node] if adj else qw[layer, node]
                    M = embed(_np_rot(kind, theta), [wire])
                else:  # ry_x
                    wire = op[1]
                    theta = -x[wire] if adj else x[wire]
                    M = embed(_np_rot("y", theta), [wire])
                s = M @ s
        out[b] = np.abs(s[0]) ** 2
    return out


if __name__ == "__main__":
    # Deterministic design dict (static circuit structure, as in the PyTorch module).
    gate2_cycle = ["H", "Px", "Py", "Pz", "CNot", "CZ", "CSwap", "Tof"]
    rot_cycle = ["x", "y", "z"]
    design = {}
    for l in range(q_depth):
        for n in range(n_qubits):
            design[f"{l}{n}0"] = int((l + n) % 2 == 0)
            design[f"{l}{n}1"] = rot_cycle[(l + n) % 3]
            design[f"{l}{n}2"] = gate2_cycle[(l * n_qubits + n) % 8]

    forward = make_quantum_layer_forward(design)

    key = jax.random.PRNGKey(0)
    k1, k2, k3 = jax.random.split(key, 3)
    B = 2
    x1 = jax.random.normal(k1, (B, n_qubits), dtype=jnp.float32)
    x2 = jax.random.normal(k2, (B, n_qubits), dtype=jnp.float32)
    q_params = jax.random.normal(k3, (q_depth * n_qubits,), dtype=jnp.float32)

    fid = forward(x1, x2, q_params)
    fid = jax.block_until_ready(fid)

    base_ops = build_base_ops(design)
    ref = reference_fidelities(base_ops, x1, x2, q_params)
    np.testing.assert_allclose(np.asarray(fid), ref, rtol=5e-4, atol=5e-5)
    print("KERNEL_OK")
</pallas_src>

<mosaic_0001>
module attributes {stable_mosaic.version = 11 : i64} {
  func.func @_fidelity_kernel(%arg0: i32, %arg1: memref<13x32x32xf32, #tpu.memory_space<vmem>>, %arg2: memref<12x32x32xf32, #tpu.memory_space<vmem>>, %arg3: memref<12x256xf32, #tpu.memory_space<vmem>>, %arg4: memref<12x256xf32, #tpu.memory_space<vmem>>, %arg5: memref<1x128xf32, #tpu.memory_space<vmem>>) attributes {dimension_semantics = [#tpu.dimension_semantics<parallel>], iteration_bounds = array<i64: 1>, scalar_prefetch = 0 : i64, scratch_operands = 0 : i64, tpu.core_type = #tpu.core_type<tc>, window_params = [{pipeline_mode = #tpu.pipeline_mode<synchronous>, transform_indices = @transform_0, window_bounds = array<i64: 13, 32, 32>}, {pipeline_mode = #tpu.pipeline_mode<synchronous>, transform_indices = @transform_1, window_bounds = array<i64: 12, 32, 32>}, {transform_indices = @transform_2, window_bounds = array<i64: 12, 256>}, {transform_indices = @transform_3, window_bounds = array<i64: 12, 256>}, {transform_indices = @transform_4, window_bounds = array<i64: 1, 128>}]} {
    %0 = tpu.iota {dimensions = array<i32: 0>} : vector<32x256xi32>
    %c0_i32 = arith.constant 0 : i32
    %1 = vector.broadcast %c0_i32 : i32 to vector<32x256xi32>
    %2 = arith.cmpi eq, %0, %1 : vector<32x256xi32>
    %cst = arith.constant 1.000000e+00 : f32
    %cst_0 = arith.constant 0.000000e+00 : f32
    %3 = vector.broadcast %cst : f32 to vector<32x256xf32>
    %4 = vector.broadcast %cst_0 : f32 to vector<32x256xf32>
    %5 = arith.select %2, %3, %4 : vector<32x256xi1>, vector<32x256xf32>
    %c0 = arith.constant 0 : index
    %c0_1 = arith.constant 0 : index
    %c0_2 = arith.constant 0 : index
    %6 = vector.load %arg1[%c0, %c0_1, %c0_2] : memref<13x32x32xf32, #tpu.memory_space<vmem>>, vector<1x32x32xf32>
    %7 = vector.shape_cast %6 : vector<1x32x32xf32> to vector<32x32xf32>
    %cst_3 = arith.constant dense<0.000000e+00> : vector<32x256xf32>
    %8 = tpu.matmul %7, %5, %cst_3 {dimension_numbers = #tpu.dot_dimension_numbers<[1], [0], [0], [1], [0, 0, 1, 1], [], []>, precision = #tpu.contract_precision<fp32>} : vector<32x32xf32>, vector<32x256xf32>, vector<32x256xf32> -> vector<32x256xf32>
    %c0_4 = arith.constant 0 : index
    %c0_5 = arith.constant 0 : index
    %c0_6 = arith.constant 0 : index
    %9 = vector.load %arg2[%c0_4, %c0_5, %c0_6] : memref<12x32x32xf32, #tpu.memory_space<vmem>>, vector<1x32x32xf32>
    %10 = vector.shape_cast %9 : vector<1x32x32xf32> to vector<32x32xf32>
    %cst_7 = arith.constant dense<0.000000e+00> : vector<32x256xf32>
    %11 = tpu.matmul %10, %8, %cst_7 {dimension_numbers = #tpu.dot_dimension_numbers<[1], [0], [0], [1], [0, 0, 1, 1], [], []>, precision = #tpu.contract_precision<fp32>} : vector<32x32xf32>, vector<32x256xf32>, vector<32x256xf32> -> vector<32x256xf32>
    %c0_8 = arith.constant 0 : index
    %c0_9 = arith.constant 0 : index
    %12 = vector.load %arg3[%c0_8, %c0_9] : memref<12x256xf32, #tpu.memory_space<vmem>>, vector<1x256xf32>
    %c0_10 = arith.constant 0 : index
    %c0_11 = arith.constant 0 : index
    %13 = vector.load %arg4[%c0_10, %c0_11] : memref<12x256xf32, #tpu.memory_space<vmem>>, vector<1x256xf32>
    %14 = vector.broadcast %12 : vector<1x256xf32> to vector<32x256xf32>
    %15 = arith.mulf %14, %8 : vector<32x256xf32>
    %16 = vector.broadcast %13 : vector<1x256xf32> to vector<32x256xf32>
    %17 = arith.mulf %16, %11 : vector<32x256xf32>
    %18 = arith.addf %15, %17 : vector<32x256xf32>
    %c1 = arith.constant 1 : index
    %c0_12 = arith.constant 0 : index
    %c0_13 = arith.constant 0 : index
    %19 = vector.load %arg1[%c1, %c0_12, %c0_13] : memref<13x32x32xf32, #tpu.memory_space<vmem>>, vector<1x32x32xf32>
    %20 = vector.shape_cast %19 : vector<1x32x32xf32> to vector<32x32xf32>
    %cst_14 = arith.constant dense<0.000000e+00> : vector<32x256xf32>
    %21 = tpu.matmul %20, %18, %cst_14 {dimension_numbers = #tpu.dot_dimension_numbers<[1], [0], [0], [1], [0, 0, 1, 1], [], []>, precision = #tpu.contract_precision<fp32>} : vector<32x32xf32>, vector<32x256xf32>, vector<32x256xf32> -> vector<32x256xf32>
    %c1_15 = arith.constant 1 : index
    %c0_16 = arith.constant 0 : index
    %c0_17 = arith.constant 0 : index
    %22 = vector.load %arg2[%c1_15, %c0_16, %c0_17] : memref<12x32x32xf32, #tpu.memory_space<vmem>>, vector<1x32x32xf32>
    %23 = vector.shape_cast %22 : vector<1x32x32xf32> to vector<32x32xf32>
    %cst_18 = arith.constant dense<0.000000e+00> : vector<32x256xf32>
    %24 = tpu.matmul %23, %21, %cst_18 {dimension_numbers = #tpu.dot_dimension_numbers<[1], [0], [0], [1], [0, 0, 1, 1], [], []>, precision = #tpu.contract_precision<fp32>} : vector<32x32xf32>, vector<32x256xf32>, vector<32x256xf32> -> vector<32x256xf32>
    %c1_19 = arith.constant 1 : index
    %c0_20 = arith.constant 0 : index
    %25 = vector.load %arg3[%c1_19, %c0_20] : memref<12x256xf32, #tpu.memory_space<vmem>>, vector<1x256xf32>
    %c1_21 = arith.constant 1 : index
    %c0_22 = arith.constant 0 : index
    %26 = vector.load %arg4[%c1_21, %c0_22] : memref<12x256xf32, #tpu.memory_space<vmem>>, vector<1x256xf32>
    %27 = vector.broadcast %25 : vector<1x256xf32> to vector<32x256xf32>
    %28 = arith.mulf %27, %21 : vector<32x256xf32>
    %29 = vector.broadcast %26 : vector<1x256xf32> to vector<32x256xf32>
    %30 = arith.mulf %29, %24 : vector<32x256xf32>
    %31 = arith.addf %28, %30 : vector<32x256xf32>
    %c2 = arith.constant 2 : index
    %c0_23 = arith.constant 0 : index
    %c0_24 = arith.constant 0 : index
    %32 = vector.load %arg1[%c2, %c0_23, %c0_24] : memref<13x32x32xf32, #tpu.memory_space<vmem>>, vector<1x32x32xf32>
    %33 = vector.shape_cast %32 : vector<1x32x32xf32> to vector<32x32xf32>
    %cst_25 = arith.constant dense<0.000000e+00> : vector<32x256xf32>
    %34 = tpu.matmul %33, %31, %cst_25 {dimension_numbers = #tpu.dot_dimension_numbers<[1], [0], [0], [1], [0, 0, 1, 1], [], []>, precision = #tpu.contract_precision<fp32>} : vector<32x32xf32>, vector<32x256xf32>, vector<32x256xf32> -> vector<32x256xf32>
    %c2_26 = arith.constant 2 : index
    %c0_27 = arith.constant 0 : index
    %c0_28 = arith.constant 0 : index
    %35 = vector.load %arg2[%c2_26, %c0_27, %c0_28] : memref<12x32x32xf32, #tpu.memory_space<vmem>>, vector<1x32x32xf32>
    %36 = vector.shape_cast %35 : vector<1x32x32xf32> to vector<32x32xf32>
    %cst_29 = arith.constant dense<0.000000e+00> : vector<32x256xf32>
    %37 = tpu.matmul %36, %34, %cst_29 {dimension_numbers = #tpu.dot_dimension_numbers<[1], [0], [0], [1], [0, 0, 1, 1], [], []>, precision = #tpu.contract_precision<fp32>} : vector<32x32xf32>, vector<32x256xf32>, vector<32x256xf32> -> vector<32x256xf32>
    %c2_30 = arith.constant 2 : index
    %c0_31 = arith.constant 0 : index
    %38 = vector.load %arg3[%c2_30, %c0_31] : memref<12x256xf32, #tpu.memory_space<vmem>>, vector<1x256xf32>
    %c2_32 = arith.constant 2 : index
    %c0_33 = arith.constant 0 : index
    %39 = vector.load %arg4[%c2_32, %c0_33] : memref<12x256xf32, #tpu.memory_space<vmem>>, vector<1x256xf32>
    %40 = vector.broadcast %38 : vector<1x256xf32> to vector<32x256xf32>
    %41 = arith.mulf %40, %34 : vector<32x256xf32>
    %42 = vector.broadcast %39 : vector<1x256xf32> to vector<32x256xf32>
    %43 = arith.mulf %42, %37 : vector<32x256xf32>
    %44 = arith.addf %41, %43 : vector<32x256xf32>
    %c3 = arith.constant 3 : index
    %c0_34 = arith.constant 0 : index
    %c0_35 = arith.constant 0 : index
    %45 = vector.load %arg1[%c3, %c0_34, %c0_35] : memref<13x32x32xf32, #tpu.memory_space<vmem>>, vector<1x32x32xf32>
    %46 = vector.shape_cast %45 : vector<1x32x32xf32> to vector<32x32xf32>
    %cst_36 = arith.constant dense<0.000000e+00> : vector<32x256xf32>
    %47 = tpu.matmul %46, %44, %cst_36 {dimension_numbers = #tpu.dot_dimension_numbers<[1], [0], [0], [1], [0, 0, 1, 1], [], []>, precision = #tpu.contract_precision<fp32>} : vector<32x32xf32>, vector<32x256xf32>, vector<32x256xf32> -> vector<32x256xf32>
    %c3_37 = arith.constant 3 : index
    %c0_38 = arith.constant 0 : index
    %c0_39 = arith.constant 0 : index
    %48 = vector.load %arg2[%c3_37, %c0_38, %c0_39] : memref<12x32x32xf32, #tpu.memory_space<vmem>>, vector<1x32x32xf32>
    %49 = vector.shape_cast %48 : vector<1x32x32xf32> to vector<32x32xf32>
    %cst_40 = arith.constant dense<0.000000e+00> : vector<32x256xf32>
    %50 = tpu.matmul %49, %47, %cst_40 {dimension_numbers = #tpu.dot_dimension_numbers<[1], [0], [0], [1], [0, 0, 1, 1], [], []>, precision = #tpu.contract_precision<fp32>} : vector<32x32xf32>, vector<32x256xf32>, vector<32x256xf32> -> vector<32x256xf32>
    %c3_41 = arith.constant 3 : index
    %c0_42 = arith.constant 0 : index
    %51 = vector.load %arg3[%c3_41, %c0_42] : memref<12x256xf32, #tpu.memory_space<vmem>>, vector<1x256xf32>
    %c3_43 = arith.constant 3 : index
    %c0_44 = arith.constant 0 : index
    %52 = vector.load %arg4[%c3_43, %c0_44] : memref<12x256xf32, #tpu.memory_space<vmem>>, vector<1x256xf32>
    %53 = vector.broadcast %51 : vector<1x256xf32> to vector<32x256xf32>
    %54 = arith.mulf %53, %47 : vector<32x256xf32>
    %55 = vector.broadcast %52 : vector<1x256xf32> to vector<32x256xf32>
    %56 = arith.mulf %55, %50 : vector<32x256xf32>
    %57 = arith.addf %54, %56 : vector<32x256xf32>
    %c4 = arith.constant 4 : index
    %c0_45 = arith.constant 0 : index
    %c0_46 = arith.constant 0 : index
    %58 = vector.load %arg1[%c4, %c0_45, %c0_46] : memref<13x32x32xf32, #tpu.memory_space<vmem>>, vector<1x32x32xf32>
    %59 = vector.shape_cast %58 : vector<1x32x32xf32> to vector<32x32xf32>
    %cst_47 = arith.constant dense<0.000000e+00> : vector<32x256xf32>
    %60 = tpu.matmul %59, %57, %cst_47 {dimension_numbers = #tpu.dot_dimension_numbers<[1], [0], [0], [1], [0, 0, 1, 1], [], []>, precision = #tpu.contract_precision<fp32>} : vector<32x32xf32>, vector<32x256xf32>, vector<32x256xf32> -> vector<32x256xf32>
    %c4_48 = arith.constant 4 : index
    %c0_49 = arith.constant 0 : index
    %c0_50 = arith.constant 0 : index
    %61 = vector.load %arg2[%c4_48, %c0_49, %c0_50] : memref<12x32x32xf32, #tpu.memory_space<vmem>>, vector<1x32x32xf32>
    %62 = vector.shape_cast %61 : vector<1x32x32xf32> to vector<32x32xf32>
    %cst_51 = arith.constant dense<0.000000e+00> : vector<32x256xf32>
    %63 = tpu.matmul %62, %60, %cst_51 {dimension_numbers = #tpu.dot_dimension_numbers<[1], [0], [0], [1], [0, 0, 1, 1], [], []>, precision = #tpu.contract_precision<fp32>} : vector<32x32xf32>, vector<32x256xf32>, vector<32x256xf32> -> vector<32x256xf32>
    %c4_52 = arith.constant 4 : index
    %c0_53 = arith.constant 0 : index
    %64 = vector.load %arg3[%c4_52, %c0_53] : memref<12x256xf32, #tpu.memory_space<vmem>>, vector<1x256xf32>
    %c4_54 = arith.constant 4 : index
    %c0_55 = arith.constant 0 : index
    %65 = vector.load %arg4[%c4_54, %c0_55] : memref<12x256xf32, #tpu.memory_space<vmem>>, vector<1x256xf32>
    %66 = vector.broadcast %64 : vector<1x256xf32> to vector<32x256xf32>
    %67 = arith.mulf %66, %60 : vector<32x256xf32>
    %68 = vector.broadcast %65 : vector<1x256xf32> to vector<32x256xf32>
    %69 = arith.mulf %68, %63 : vector<32x256xf32>
    %70 = arith.addf %67, %69 : vector<32x256xf32>
    %c5 = arith.constant 5 : index
    %c0_56 = arith.constant 0 : index
    %c0_57 = arith.constant 0 : index
    %71 = vector.load %arg1[%c5, %c0_56, %c0_57] : memref<13x32x32xf32, #tpu.memory_space<vmem>>, vector<1x32x32xf32>
    %72 = vector.shape_cast %71 : vector<1x32x32xf32> to vector<32x32xf32>
    %cst_58 = arith.constant dense<0.000000e+00> : vector<32x256xf32>
    %73 = tpu.matmul %72, %70, %cst_58 {dimension_numbers = #tpu.dot_dimension_numbers<[1], [0], [0], [1], [0, 0, 1, 1], [], []>, precision = #tpu.contract_precision<fp32>} : vector<32x32xf32>, vector<32x256xf32>, vector<32x256xf32> -> vector<32x256xf32>
    %c5_59 = arith.constant 5 : index
    %c0_60 = arith.constant 0 : index
    %c0_61 = arith.constant 0 : index
    %74 = vector.load %arg2[%c5_59, %c0_60, %c0_61] : memref<12x32x32xf32, #tpu.memory_space<vmem>>, vector<1x32x32xf32>
    %75 = vector.shape_cast %74 : vector<1x32x32xf32> to vector<32x32xf32>
    %cst_62 = arith.constant dense<0.000000e+00> : vector<32x256xf32>
    %76 = tpu.matmul %75, %73, %cst_62 {dimension_numbers = #tpu.dot_dimension_numbers<[1], [0], [0], [1], [0, 0, 1, 1], [], []>, precision = #tpu.contract_precision<fp32>} : vector<32x32xf32>, vector<32x256xf32>, vector<32x256xf32> -> vector<32x256xf32>
    %c5_63 = arith.constant 5 : index
    %c0_64 = arith.constant 0 : index
    %77 = vector.load %arg3[%c5_63, %c0_64] : memref<12x256xf32, #tpu.memory_space<vmem>>, vector<1x256xf32>
    %c5_65 = arith.constant 5 : index
    %c0_66 = arith.constant 0 : index
    %78 = vector.load %arg4[%c5_65, %c0_66] : memref<12x256xf32, #tpu.memory_space<vmem>>, vector<1x256xf32>
    %79 = vector.broadcast %77 : vector<1x256xf32> to vector<32x256xf32>
    %80 = arith.mulf %79, %73 : vector<32x256xf32>
    %81 = vector.broadcast %78 : vector<1x256xf32> to vector<32x256xf32>
    %82 = arith.mulf %81, %76 : vector<32x256xf32>
    %83 = arith.addf %80, %82 : vector<32x256xf32>
    %c6 = arith.constant 6 : index
    %c0_67 = arith.constant 0 : index
    %c0_68 = arith.constant 0 : index
    %84 = vector.load %arg1[%c6, %c0_67, %c0_68] : memref<13x32x32xf32, #tpu.memory_space<vmem>>, vector<1x32x32xf32>
    %85 = vector.shape_cast %84 : vector<1x32x32xf32> to vector<32x32xf32>
    %cst_69 = arith.constant dense<0.000000e+00> : vector<32x256xf32>
    %86 = tpu.matmul %85, %83, %cst_69 {dimension_numbers = #tpu.dot_dimension_numbers<[1], [0], [0], [1], [0, 0, 1, 1], [], []>, precision = #tpu.contract_precision<fp32>} : vector<32x32xf32>, vector<32x256xf32>, vector<32x256xf32> -> vector<32x256xf32>
    %c6_70 = arith.constant 6 : index
    %c0_71 = arith.constant 0 : index
    %c0_72 = arith.constant 0 : index
    %87 = vector.load %arg2[%c6_70, %c0_71, %c0_72] : memref<12x32x32xf32, #tpu.memory_space<vmem>>, vector<1x32x32xf32>
    %88 = vector.shape_cast %87 : vector<1x32x32xf32> to vector<32x32xf32>
    %cst_73 = arith.constant dense<0.000000e+00> : vector<32x256xf32>
    %89 = tpu.matmul %88, %86, %cst_73 {dimension_numbers = #tpu.dot_dimension_numbers<[1], [0], [0], [1], [0, 0, 1, 1], [], []>, precision = #tpu.contract_precision<fp32>} : vector<32x32xf32>, vector<32x256xf32>, vector<32x256xf32> -> vector<32x256xf32>
    %c6_74 = arith.constant 6 : index
    %c0_75 = arith.constant 0 : index
    %90 = vector.load %arg3[%c6_74, %c0_75] : memref<12x256xf32, #tpu.memory_space<vmem>>, vector<1x256xf32>
    %c6_76 = arith.constant 6 : index
    %c0_77 = arith.constant 0 : index
    %91 = vector.load %arg4[%c6_76, %c0_77] : memref<12x256xf32, #tpu.memory_space<vmem>>, vector<1x256xf32>
    %92 = vector.broadcast %90 : vector<1x256xf32> to vector<32x256xf32>
    %93 = arith.mulf %92, %86 : vector<32x256xf32>
    %94 = vector.broadcast %91 : vector<1x256xf32> to vector<32x256xf32>
    %95 = arith.mulf %94, %89 : vector<32x256xf32>
    %96 = arith.addf %93, %95 : vector<32x256xf32>
    %c7 = arith.constant 7 : index
    %c0_78 = arith.constant 0 : index
    %c0_79 = arith.constant 0 : index
    %97 = vector.load %arg1[%c7, %c0_78, %c0_79] : memref<13x32x32xf32, #tpu.memory_space<vmem>>, vector<1x32x32xf32>
    %98 = vector.shape_cast %97 : vector<1x32x32xf32> to vector<32x32xf32>
    %cst_80 = arith.constant dense<0.000000e+00> : vector<32x256xf32>
    %99 = tpu.matmul %98, %96, %cst_80 {dimension_numbers = #tpu.dot_dimension_numbers<[1], [0], [0], [1], [0, 0, 1, 1], [], []>, precision = #tpu.contract_precision<fp32>} : vector<32x32xf32>, vector<32x256xf32>, vector<32x256xf32> -> vector<32x256xf32>
    %c7_81 = arith.constant 7 : index
    %c0_82 = arith.constant 0 : index
    %c0_83 = arith.constant 0 : index
    %100 = vector.load %arg2[%c7_81, %c0_82, %c0_83] : memref<12x32x32xf32, #tpu.memory_space<vmem>>, vector<1x32x32xf32>
    %101 = vector.shape_cast %100 : vector<1x32x32xf32> to vector<32x32xf32>
    %cst_84 = arith.constant dense<0.000000e+00> : vector<32x256xf32>
    %102 = tpu.matmul %101, %99, %cst_84 {dimension_numbers = #tpu.dot_dimension_numbers<[1], [0], [0], [1], [0, 0, 1, 1], [], []>, precision = #tpu.contract_precision<fp32>} : vector<32x32xf32>, vector<32x256xf32>, vector<32x256xf32> -> vector<32x256xf32>
    %c7_85 = arith.constant 7 : index
    %c0_86 = arith.constant 0 : index
    %103 = vector.load %arg3[%c7_85, %c0_86] : memref<12x256xf32, #tpu.memory_space<vmem>>, vector<1x256xf32>
    %c7_87 = arith.constant 7 : index
    %c0_88 = arith.constant 0 : index
    %104 = vector.load %arg4[%c7_87, %c0_88] : memref<12x256xf32, #tpu.memory_space<vmem>>, vector<1x256xf32>
    %105 = vector.broadcast %103 : vector<1x256xf32> to vector<32x256xf32>
    %106 = arith.mulf %105, %99 : vector<32x256xf32>
    %107 = vector.broadcast %104 : vector<1x256xf32> to vector<32x256xf32>
    %108 = arith.mulf %107, %102 : vector<32x256xf32>
    %109 = arith.addf %106, %108 : vector<32x256xf32>
    %c8 = arith.constant 8 : index
    %c0_89 = arith.constant 0 : index
    %c0_90 = arith.constant 0 : index
    %110 = vector.load %arg1[%c8, %c0_89, %c0_90] : memref<13x32x32xf32, #tpu.memory_space<vmem>>, vector<1x32x32xf32>
    %111 = vector.shape_cast %110 : vector<1x32x32xf32> to vector<32x32xf32>
    %cst_91 = arith.constant dense<0.000000e+00> : vector<32x256xf32>
    %112 = tpu.matmul %111, %109, %cst_91 {dimension_numbers = #tpu.dot_dimension_numbers<[1], [0], [0], [1], [0, 0, 1, 1], [], []>, precision = #tpu.contract_precision<fp32>} : vector<32x32xf32>, vector<32x256xf32>, vector<32x256xf32> -> vector<32x256xf32>
    %c8_92 = arith.constant 8 : index
    %c0_93 = arith.constant 0 : index
    %c0_94 = arith.constant 0 : index
    %113 = vector.load %arg2[%c8_92, %c0_93, %c0_94] : memref<12x32x32xf32, #tpu.memory_space<vmem>>, vector<1x32x32xf32>
    %114 = vector.shape_cast %113 : vector<1x32x32xf32> to vector<32x32xf32>
    %cst_95 = arith.constant dense<0.000000e+00> : vector<32x256xf32>
    %115 = tpu.matmul %114, %112, %cst_95 {dimension_numbers = #tpu.dot_dimension_numbers<[1], [0], [0], [1], [0, 0, 1, 1], [], []>, precision = #tpu.contract_precision<fp32>} : vector<32x32xf32>, vector<32x256xf32>, vector<32x256xf32> -> vector<32x256xf32>
    %c8_96 = arith.constant 8 : index
    %c0_97 = arith.constant 0 : index
    %116 = vector.load %arg3[%c8_96, %c0_97] : memref<12x256xf32, #tpu.memory_space<vmem>>, vector<1x256xf32>
    %c8_98 = arith.constant 8 : index
    %c0_99 = arith.constant 0 : index
    %117 = vector.load %arg4[%c8_98, %c0_99] : memref<12x256xf32, #tpu.memory_space<vmem>>, vector<1x256xf32>
    %118 = vector.broadcast %116 : vector<1x256xf32> to vector<32x256xf32>
    %119 = arith.mulf %118, %112 : vector<32x256xf32>
    %120 = vector.broadcast %117 : vector<1x256xf32> to vector<32x256xf32>
    %121 = arith.mulf %120, %115 : vector<32x256xf32>
    %122 = arith.addf %119, %121 : vector<32x256xf32>
    %c9 = arith.constant 9 : index
    %c0_100 = arith.constant 0 : index
    %c0_101 = arith.constant 0 : index
    %123 = vector.load %arg1[%c9, %c0_100, %c0_101] : memref<13x32x32xf32, #tpu.memory_space<vmem>>, vector<1x32x32xf32>
    %124 = vector.shape_cast %123 : vector<1x32x32xf32> to vector<32x32xf32>
    %cst_102 = arith.constant dense<0.000000e+00> : vector<32x256xf32>
    %125 = tpu.matmul %124, %122, %cst_102 {dimension_numbers = #tpu.dot_dimension_numbers<[1], [0], [0], [1], [0, 0, 1, 1], [], []>, precision = #tpu.contract_precision<fp32>} : vector<32x32xf32>, vector<32x256xf32>, vector<32x256xf32> -> vector<32x256xf32>
    %c9_103 = arith.constant 9 : index
    %c0_104 = arith.constant 0 : index
    %c0_105 = arith.constant 0 : index
    %126 = vector.load %arg2[%c9_103, %c0_104, %c0_105] : memref<12x32x32xf32, #tpu.memory_space<vmem>>, vector<1x32x32xf32>
    %127 = vector.shape_cast %126 : vector<1x32x32xf32> to vector<32x32xf32>
    %cst_106 = arith.constant dense<0.000000e+00> : vector<32x256xf32>
    %128 = tpu.matmul %127, %125, %cst_106 {dimension_numbers = #tpu.dot_dimension_numbers<[1], [0], [0], [1], [0, 0, 1, 1], [], []>, precision = #tpu.contract_precision<fp32>} : vector<32x32xf32>, vector<32x256xf32>, vector<32x256xf32> -> vector<32x256xf32>
    %c9_107 = arith.constant 9 : index
    %c0_108 = arith.constant 0 : index
    %129 = vector.load %arg3[%c9_107, %c0_108] : memref<12x256xf32, #tpu.memory_space<vmem>>, vector<1x256xf32>
    %c9_109 = arith.constant 9 : index
    %c0_110 = arith.constant 0 : index
    %130 = vector.load %arg4[%c9_109, %c0_110] : memref<12x256xf32, #tpu.memory_space<vmem>>, vector<1x256xf32>
    %131 = vector.broadcast %129 : vector<1x256xf32> to vector<32x256xf32>
    %132 = arith.mulf %131, %125 : vector<32x256xf32>
    %133 = vector.broadcast %130 : vector<1x256xf32> to vector<32x256xf32>
    %134 = arith.mulf %133, %128 : vector<32x256xf32>
    %135 = arith.addf %132, %134 : vector<32x256xf32>
    %c10 = arith.constant 10 : index
    %c0_111 = arith.constant 0 : index
    %c0_112 = arith.constant 0 : index
    %136 = vector.load %arg1[%c10, %c0_111, %c0_112] : memref<13x32x32xf32, #tpu.memory_space<vmem>>, vector<1x32x32xf32>
    %137 = vector.shape_cast %136 : vector<1x32x32xf32> to vector<32x32xf32>
    %cst_113 = arith.constant dense<0.000000e+00> : vector<32x256xf32>
    %138 = tpu.matmul %137, %135, %cst_113 {dimension_numbers = #tpu.dot_dimension_numbers<[1], [0], [0], [1], [0, 0, 1, 1], [], []>, precision = #tpu.contract_precision<fp32>} : vector<32x32xf32>, vector<32x256xf32>, vector<32x256xf32> -> vector<32x256xf32>
    %c10_114 = arith.constant 10 : index
    %c0_115 = arith.constant 0 : index
    %c0_116 = arith.constant 0 : index
    %139 = vector.load %arg2[%c10_114, %c0_115, %c0_116] : memref<12x32x32xf32, #tpu.memory_space<vmem>>, vector<1x32x32xf32>
    %140 = vector.shape_cast %139 : vector<1x32x32xf32> to vector<32x32xf32>
    %cst_117 = arith.constant dense<0.000000e+00> : vector<32x256xf32>
    %141 = tpu.matmul %140, %138, %cst_117 {dimension_numbers = #tpu.dot_dimension_numbers<[1], [0], [0], [1], [0, 0, 1, 1], [], []>, precision = #tpu.contract_precision<fp32>} : vector<32x32xf32>, vector<32x256xf32>, vector<32x256xf32> -> vector<32x256xf32>
    %c10_118 = arith.constant 10 : index
    %c0_119 = arith.constant 0 : index
    %142 = vector.load %arg3[%c10_118, %c0_119] : memref<12x256xf32, #tpu.memory_space<vmem>>, vector<1x256xf32>
    %c10_120 = arith.constant 10 : index
    %c0_121 = arith.constant 0 : index
    %143 = vector.load %arg4[%c10_120, %c0_121] : memref<12x256xf32, #tpu.memory_space<vmem>>, vector<1x256xf32>
    %144 = vector.broadcast %142 : vector<1x256xf32> to vector<32x256xf32>
    %145 = arith.mulf %144, %138 : vector<32x256xf32>
    %146 = vector.broadcast %143 : vector<1x256xf32> to vector<32x256xf32>
    %147 = arith.mulf %146, %141 : vector<32x256xf32>
    %148 = arith.addf %145, %147 : vector<32x256xf32>
    %c11 = arith.constant 11 : index
    %c0_122 = arith.constant 0 : index
    %c0_123 = arith.constant 0 : index
    %149 = vector.load %arg1[%c11, %c0_122, %c0_123] : memref<13x32x32xf32, #tpu.memory_space<vmem>>, vector<1x32x32xf32>
    %150 = vector.shape_cast %149 : vector<1x32x32xf32> to vector<32x32xf32>
    %cst_124 = arith.constant dense<0.000000e+00> : vector<32x256xf32>
    %151 = tpu.matmul %150, %148, %cst_124 {dimension_numbers = #tpu.dot_dimension_numbers<[1], [0], [0], [1], [0, 0, 1, 1], [], []>, precision = #tpu.contract_precision<fp32>} : vector<32x32xf32>, vector<32x256xf32>, vector<32x256xf32> -> vector<32x256xf32>
    %c11_125 = arith.constant 11 : index
    %c0_126 = arith.constant 0 : index
    %c0_127 = arith.constant 0 : index
    %152 = vector.load %arg2[%c11_125, %c0_126, %c0_127] : memref<12x32x32xf32, #tpu.memory_space<vmem>>, vector<1x32x32xf32>
    %153 = vector.shape_cast %152 : vector<1x32x32xf32> to vector<32x32xf32>
    %cst_128 = arith.constant dense<0.000000e+00> : vector<32x256xf32>
    %154 = tpu.matmul %153, %151, %cst_128 {dimension_numbers = #tpu.dot_dimension_numbers<[1], [0], [0], [1], [0, 0, 1, 1], [], []>, precision = #tpu.contract_precision<fp32>} : vector<32x32xf32>, vector<32x256xf32>, vector<32x256xf32> -> vector<32x256xf32>
    %c11_129 = arith.constant 11 : index
    %c0_130 = arith.constant 0 : index
    %155 = vector.load %arg3[%c11_129, %c0_130] : memref<12x256xf32, #tpu.memory_space<vmem>>, vector<1x256xf32>
    %c11_131 = arith.constant 11 : index
    %c0_132 = arith.constant 0 : index
    %156 = vector.load %arg4[%c11_131, %c0_132] : memref<12x256xf32, #tpu.memory_space<vmem>>, vector<1x256xf32>
    %157 = vector.broadcast %155 : vector<1x256xf32> to vector<32x256xf32>
    %158 = arith.mulf %157, %151 : vector<32x256xf32>
    %159 = vector.broadcast %156 : vector<1x256xf32> to vector<32x256xf32>
    %160 = arith.mulf %159, %154 : vector<32x256xf32>
    %161 = arith.addf %158, %160 : vector<32x256xf32>
    %c12 = arith.constant 12 : index
    %c0_133 = arith.constant 0 : index
    %c0_134 = arith.constant 0 : index
    %162 = vector.load %arg1[%c12, %c0_133, %c0_134] : memref<13x32x32xf32, #tpu.memory_space<vmem>>, vector<1x32x32xf32>
    %163 = vector.shape_cast %162 : vector<1x32x32xf32> to vector<32x32xf32>
    %cst_135 = arith.constant dense<0.000000e+00> : vector<32x256xf32>
    %164 = tpu.matmul %163, %161, %cst_135 {dimension_numbers = #tpu.dot_dimension_numbers<[1], [0], [0], [1], [0, 0, 1, 1], [], []>, precision = #tpu.contract_precision<fp32>} : vector<32x32xf32>, vector<32x256xf32>, vector<32x256xf32> -> vector<32x256xf32>
    %165 = vector.extract_strided_slice %164 {offsets = [0, 0], sizes = [16, 128], strides = [1, 1]} : vector<32x256xf32> to vector<16x128xf32>
    %166 = vector.extract_strided_slice %164 {offsets = [16, 0], sizes = [16, 128], strides = [1, 1]} : vector<32x256xf32> to vector<16x128xf32>
    %167 = vector.extract_strided_slice %164 {offsets = [0, 128], sizes = [16, 128], strides = [1, 1]} : vector<32x256xf32> to vector<16x128xf32>
    %168 = vector.extract_strided_slice %164 {offsets = [16, 128], sizes = [16, 128], strides = [1, 1]} : vector<32x256xf32> to vector<16x128xf32>
    %169 = arith.mulf %165, %167 : vector<16x128xf32>
    %170 = arith.mulf %166, %168 : vector<16x128xf32>
    %171 = arith.addf %169, %170 : vector<16x128xf32>
    %cst_136 = arith.constant dense<0.000000e+00> : vector<128xf32>
    %172 = vector.multi_reduction <add>, %171, %cst_136 [0] : vector<16x128xf32> to vector<128xf32>
    %173 = vector.shape_cast %172 : vector<128xf32> to vector<1x128xf32>
    %174 = arith.mulf %167, %166 : vector<16x128xf32>
    %175 = arith.mulf %168, %165 : vector<16x128xf32>
    %176 = arith.subf %174, %175 : vector<16x128xf32>
    %cst_137 = arith.constant dense<0.000000e+00> : vector<128xf32>
    %177 = vector.multi_reduction <add>, %176, %cst_137 [0] : vector<16x128xf32> to vector<128xf32>
    %178 = vector.shape_cast %177 : vector<128xf32> to vector<1x128xf32>
    %179 = arith.mulf %173, %173 : vector<1x128xf32>
    %180 = arith.mulf %178, %178 : vector<1x128xf32>
    %181 = arith.addf %179, %180 : vector<1x128xf32>
    %c0_138 = arith.constant 0 : index
    %c0_139 = arith.constant 0 : index
    %182 = vector.load %arg5[%c0_138, %c0_139] : memref<1x128xf32, #tpu.memory_space<vmem>>, vector<1x128xf32>
    tpu.vector_store %arg5[%c0_138, %c0_139], %181 {strides = array<i32>} : memref<1x128xf32, #tpu.memory_space<vmem>>, vector<1x128xf32>,
    return
  }
  func.func @transform_0(%arg0: i32) -> (i32, i32, i32) {
    %c0_i32 = arith.constant 0 : i32
    %c0_i32_0 = arith.constant 0 : i32
    %c0_i32_1 = arith.constant 0 : i32
    %c0_i32_2 = arith.constant 0 : i32
    return %c0_i32, %c0_i32_0, %c0_i32_1 : i32, i32, i32
  }
  func.func @transform_1(%arg0: i32) -> (i32, i32, i32) {
    %c0_i32 = arith.constant 0 : i32
    %c0_i32_0 = arith.constant 0 : i32
    %c0_i32_1 = arith.constant 0 : i32
    %c0_i32_2 = arith.constant 0 : i32
    return %c0_i32, %c0_i32_0, %c0_i32_1 : i32, i32, i32
  }
  func.func @transform_2(%arg0: i32) -> (i32, i32) {
    %c0_i32 = arith.constant 0 : i32
    %c0_i32_0 = arith.constant 0 : i32
    return %c0_i32, %arg0 : i32, i32
  }
  func.func @transform_3(%arg0: i32) -> (i32, i32) {
    %c0_i32 = arith.constant 0 : i32
    %c0_i32_0 = arith.constant 0 : i32
    return %c0_i32, %arg0 : i32, i32
  }
  func.func @transform_4(%arg0: i32) -> (i32, i32) {
    %c0_i32 = arith.constant 0 : i32
    %c0_i32_0 = arith.constant 0 : i32
    return %c0_i32, %arg0 : i32, i32
  }
}

</mosaic_0001>

<bundles_post_ra>
// kernel: neg.49
= control target key start
LH: loop header
LB: loop body
LE: loop exit
PB: predicated region body
PF: predicated region fallthrough
CT: control target
= control target key end

     0   :  { %s424_s0 = inlined_call_operand.vmem [shape: f32[13,16,16], index: 0, kind: input, shape index: {}]   ;;  %s425_s1 = inlined_call_operand.vmem [shape: f32[13,16,16], index: 1, kind: output, shape index: {}]  }
   0x1   :  { %v2_v0 = vld [vmem:[%s424_s0] sm:$0xff]  ;;  %v208_v1 = vld [vmem:[%s424_s0 + $0x10] sm:$0xff]  ;;  %v232_v25 = vld [vmem:[%s424_s0 + $0x8] sm:$0xff] }
   0x2   :  { %v210_v2 = vld [vmem:[%s424_s0 + $0x20] sm:$0xff]  ;;  %v5_v3 = vxor.u32 2147483648, %v2_v0  ;;  %v12_v4 = vxor.u32 2147483648, %v208_v1  ;;  %v212_v6 = vld [vmem:[%s424_s0 + $0x30] sm:$0xff]  ;;  %v234_v26 = vld [vmem:[%s424_s0 + $0x18] sm:$0xff]  ;;  %v108_v28 = vxor.u32 2147483648, %v232_v25 }
   0x3   :  { %v20_v5 = vxor.u32 2147483648, %v210_v2  ;;  %v214_v7 = vld [vmem:[%s424_s0 + $0x40] sm:$0xff]  ;;  %v216_v8 = vld [vmem:[%s424_s0 + $0x50] sm:$0xff]  ;;  %v28_v9 = vxor.u32 2147483648, %v212_v6  ;;  %v116_v29 = vxor.u32 2147483648, %v234_v26  ;;  %v236_v30 = vld [vmem:[%s424_s0 + $0x28] sm:$0xff] }
   0x4   :  { %v36_v10 = vxor.u32 2147483648, %v214_v7  ;;  %v44_v11 = vxor.u32 2147483648, %v216_v8  ;;  %v218_v12 = vld [vmem:[%s424_s0 + $0x60] sm:$0xff]  ;;  %v220_v13 = vld [vmem:[%s424_s0 + $0x70] sm:$0xff]  ;;  %7 = vst [vmem:[%s425_s1] sm:$0xff] %v5_v3  ;;  %209 = vst [vmem:[%s425_s1 + $0x10] sm:$0xff] %v12_v4  ;;  %v124_v33 = vxor.u32 2147483648, %v236_v30 }
   0x5   :  { %v222_v14 = vld [vmem:[%s424_s0 + $0x80] sm:$0xff]  ;;  %211 = vst [vmem:[%s425_s1 + $0x20] sm:$0xff] %v20_v5  ;;  %v52_v15 = vxor.u32 2147483648, %v218_v12  ;;  %v60_v16 = vxor.u32 2147483648, %v220_v13  ;;  %v224_v18 = vld [vmem:[%s424_s0 + $0x90] sm:$0xff]  ;;  %213 = vst [vmem:[%s425_s1 + $0x30] sm:$0xff] %v28_v9 }
   0x6   :  { %v68_v17 = vxor.u32 2147483648, %v222_v14  ;;  %v226_v19 = vld [vmem:[%s424_s0 + $0xa0] sm:$0xff]  ;;  %v228_v20 = vld [vmem:[%s424_s0 + $0xb0] sm:$0xff]  ;;  %215 = vst [vmem:[%s425_s1 + $0x40] sm:$0xff] %v36_v10  ;;  %217 = vst [vmem:[%s425_s1 + $0x50] sm:$0xff] %v44_v11  ;;  %v76_v21 = vxor.u32 2147483648, %v224_v18 }
   0x7   :  { %v84_v22 = vxor.u32 2147483648, %v226_v19  ;;  %v92_v23 = vxor.u32 2147483648, %v228_v20  ;;  %v230_v24 = vld [vmem:[%s424_s0 + $0xc0] sm:$0xff]  ;;  %219 = vst [vmem:[%s425_s1 + $0x60] sm:$0xff] %v52_v15  ;;  %221 = vst [vmem:[%s425_s1 + $0x70] sm:$0xff] %v60_v16  ;;  %v238_v31 = vld [vmem:[%s424_s0 + $0x38] sm:$0xff] }
   0x8   :  { %223 = vst [vmem:[%s425_s1 + $0x80] sm:$0xff] %v68_v17  ;;  %v100_v27 = vxor.u32 2147483648, %v230_v24  ;;  %v240_v32 = vld [vmem:[%s424_s0 + $0x48] sm:$0xff]  ;;  %225 = vst [vmem:[%s425_s1 + $0x90] sm:$0xff] %v76_v21  ;;  %v132_v34 = vxor.u32 2147483648, %v238_v31  ;;  %v242_v36 = vld [vmem:[%s424_s0 + $0x58] sm:$0xff] }
   0x9   :  { %227 = vst [vmem:[%s425_s1 + $0xa0] sm:$0xff] %v84_v22  ;;  %229 = vst [vmem:[%s425_s1 + $0xb0] sm:$0xff] %v92_v23  ;;  %v140_v35 = vxor.u32 2147483648, %v240_v32  ;;  %v244_v37 = vld [vmem:[%s424_s0 + $0x68] sm:$0xff]  ;;  %v246_v38 = vld [vmem:[%s424_s0 + $0x78] sm:$0xff]  ;;  %v148_v39 = vxor.u32 2147483648, %v242_v36 }
   0xa   :  { %231 = vst [vmem:[%s425_s1 + $0xc0] sm:$0xff] %v100_v27  ;;  %233 = vst [vmem:[%s425_s1 + $0x8] sm:$0xff] %v108_v28  ;;  %v156_v40 = vxor.u32 2147483648, %v244_v37  ;;  %v164_v41 = vxor.u32 2147483648, %v246_v38  ;;  %v248_v42 = vld [vmem:[%s424_s0 + $0x88] sm:$0xff]  ;;  %v250_v43 = vld [vmem:[%s424_s0 + $0x98] sm:$0xff] }
   0xb   :  { %235 = vst [vmem:[%s425_s1 + $0x18] sm:$0xff] %v116_v29  ;;  %v252_v44 = vld [vmem:[%s424_s0 + $0xa8] sm:$0xff]  ;;  %237 = vst [vmem:[%s425_s1 + $0x28] sm:$0xff] %v124_v33  ;;  %v172_v45 = vxor.u32 2147483648, %v248_v42  ;;  %v180_v46 = vxor.u32 2147483648, %v250_v43  ;;  %v254_v48 = vld [vmem:[%s424_s0 + $0xb8] sm:$0xff] }
   0xc   :  { %239 = vst [vmem:[%s425_s1 + $0x38] sm:$0xff] %v132_v34  ;;  %241 = vst [vmem:[%s425_s1 + $0x48] sm:$0xff] %v140_v35  ;;  %v188_v47 = vxor.u32 2147483648, %v252_v44  ;;  %v256_v49 = vld [vmem:[%s424_s0 + $0xc8] sm:$0xff]  ;;  %v196_v50 = vxor.u32 2147483648, %v254_v48 }
   0xd   :  { %243 = vst [vmem:[%s425_s1 + $0x58] sm:$0xff] %v148_v39  ;;  %245 = vst [vmem:[%s425_s1 + $0x68] sm:$0xff] %v156_v40  ;;  %v204_v51 = vxor.u32 2147483648, %v256_v49 }
   0xe   :  { %247 = vst [vmem:[%s425_s1 + $0x78] sm:$0xff] %v164_v41  ;;  %249 = vst [vmem:[%s425_s1 + $0x88] sm:$0xff] %v172_v45 }
   0xf   :  { %251 = vst [vmem:[%s425_s1 + $0x98] sm:$0xff] %v180_v46  ;;  %253 = vst [vmem:[%s425_s1 + $0xa8] sm:$0xff] %v188_v47 }
  0x10   :  { %255 = vst [vmem:[%s425_s1 + $0xb8] sm:$0xff] %v196_v50  ;;  %257 = vst [vmem:[%s425_s1 + $0xc8] sm:$0xff] %v204_v51 }

// kernel: forward.1
= control target key start
LH: loop header
LB: loop body
LE: loop exit
PB: predicated region body
PF: predicated region fallthrough
CT: control target
= control target key end

     0   :  { %v17_v0 = vlaneseq  ;;  %vm34_vm0 = vcmask 261120   ;;  %v20562_v1 = vmov 0.0   ;;  %v20563_v15 = vmov 1.0   ;;  %s24968_s0 = inlined_call_operand.vmem [shape: f32[13,32,32], index: 0, kind: input, shape index: {}]   ;;  %s24969_s1 = inlined_call_operand.vmem [shape: f32[12,32,32], index: 1, kind: input, shape index: {}]   ;;  %s24970_s2 = inlined_call_operand.vmem [shape: f32[12,256], index: 2, kind: input, shape index: {}]   ;;  %s24971_s3 = inlined_call_operand.vmem [shape: f32[12,256], index: 3, kind: input, shape index: {}]   ;;  %s24972_s4 = inlined_call_operand.vmem [shape: f32[1,128], index: 4, kind: output, shape index: {}]  }
   0x1   :  { %450 = vmatprep.mubr.f32.mxu0 %v20562_v1  ;;  %v30_v2 = vld [vmem:[%s24968_s0] sm:$0xff]  ;;  %111 = vmatprep.mubr.f32.mxu1 %v20562_v1  ;;  %v31_v3 = vld [vmem:[%s24968_s0 + $0x8] sm:$0xff]  ;;  %v32_v4 = vld [vmem:[%s24968_s0 + $0x10] sm:$0xff] }
   0x2   :  { %v20600_v5 = vshrl.u32 %v17_v0, 7  ;;  %v36_v6 = vsel %vm34_vm0, %v30_v2, 0  ;;  %v39_v7 = vsel %vm34_vm0, %v31_v3, 0  ;;  %v42_v8 = vsel %vm34_vm0, %v32_v4, 0  ;;  %v33_v9 = vld [vmem:[%s24968_s0 + $0x18] sm:$0xff]  ;;  %v689_v37 = vld [vmem:[%s24969_s1] sm:$0xff] }
   0x3   :  { %v20608_v10 = vand.u32 4294901760, %v36_v6  ;;  %v20610_v11 = vand.u32 4294901760, %v39_v7  ;;  %v20612_v12 = vand.u32 4294901760, %v42_v8  ;;  %v45_v13 = vsel %vm34_vm0, %v33_v9, 0  ;;  %v690_v39 = vld [vmem:[%s24969_s1 + $0x8] sm:$0xff]  ;;  %v691_v44 = vld [vmem:[%s24969_s1 + $0x10] sm:$0xff] }
   0x4   :  { %vm22_vm1 = vcmp.eq.s32.totalorder %v20600_v5, 0  ;;  %v20616_v14 = vand.u32 4294901760, %v45_v13  ;;  %v694_v38 = vsel %vm34_vm0, %v689_v37, 0  ;;  %v697_v43 = vsel %vm34_vm0, %v690_v39, 0  ;;  %v692_v60 = vld [vmem:[%s24969_s1 + $0x18] sm:$0xff] }
   0x5   :  { %18290 = vmatprep.subr.msk.mxu0 %vm22_vm1, %v20563_v15  ;;  %v20621_v16 = vsub.f32 %v36_v6, %v20608_v10  ;;  %18288 = vmatprep.subr.msk.mxu1 %vm22_vm1, %v20563_v15  ;;  %v20626_v17 = vsub.f32 %v39_v7, %v20610_v11  ;;  %v26_v18 = vsel %vm22_vm1, 1.0, %v20562_v1  ;;  %v20632_v19 = vsub.f32 %v42_v8, %v20612_v12 }
   0x6   :  { %18291 = vmatpush1.msk.msra.mxu0 %vm22_vm1, %v20563_v15  ;;  %18289 = vmatpush1.msk.msra.mxu1 %vm22_vm1, %v20563_v15  ;;  %v156_v20 = vsub.f32 %v26_v18, %v26_v18  ;;  %v146_v27 = vsub.f32 %v45_v13, %v20616_v14  ;;  %v20695_v41 = vand.u32 4294901760, %v694_v38  ;;  %v20704_v48 = vand.u32 4294901760, %v697_v43 }
   0x7   :  { %v114_v21 = vand.u32 4294901760, %v20621_v16  ;;  %v125_v22 = vand.u32 4294901760, %v20626_v17  ;;  %v136_v26 = vand.u32 4294901760, %v20632_v19  ;;  %v700_v53 = vsel %vm34_vm0, %v691_v44, 0 }
   0x8   :  { %v157_v23 = vand.u32 4294901760, %v156_v20  ;;  %v147_v33 = vand.u32 4294901760, %v146_v27  ;;  %v20702_v47 = vsub.f32 %v694_v38, %v20695_v41  ;;  %v20715_v59 = vsub.f32 %v697_v43, %v20704_v48 }
   0x9   :  { %454 = vmatmul.mubr.f32.vlgmr.msra.gmra.mrb[0].mxu0 %v114_v21  ;;  %v115_v24 = vsub.f32 %v20621_v16, %v114_v21  ;;  %v126_v25 = vsub.f32 %v20626_v17, %v125_v22  ;;  %v137_v32 = vsub.f32 %v20632_v19, %v136_v26  ;;  %v20725_v2 = vand.u32 4294901760, %v700_v53 }
   0xa   :  { %459 = vmatprep.mubr.f32.mxu0 %v20562_v1  ;;  %v158_v28 = vsub.f32 %v156_v20, %v157_v23  ;;  %489 = vmatprep.subr.mxu0 %v157_v23  ;;  %v148_v35 = vsub.f32 %v146_v27, %v147_v33  ;;  %v780_v58 = vand.u32 4294901760, %v20702_v47  ;;  %v703_v8 = vsel %vm34_vm0, %v692_v60, 0 }
   0xb   :  { %v116_v29 = vand.u32 4294901760, %v115_v24  ;;  %492 = vmatpush1.msra.mxu0 %v157_v23  ;;  %v127_v31 = vand.u32 4294901760, %v126_v25  ;;  %v138_v34 = vand.u32 4294901760, %v137_v32  ;;  %v20760_v24 = vand.u32 4294901760, %v703_v8 }
   0xc   :  { %v159_v30 = vand.u32 4294901760, %v158_v28  ;;  %18292 = vmatprep.subr.msk.mxu0 %vm22_vm1, %v20563_v15  ;;  %v149_v36 = vand.u32 4294901760, %v148_v35  ;;  %v20740_v13 = vsub.f32 %v20702_v47, %v780_v58 }
   0xd   :  { %117 = vmatmul.mubr.f32.vlgmr.msra.gmra.mrb[0].mxu1 %v116_v29  ;;  %463 = vmatmul.mubr.f32.gmra.mrb[2].mxu0 %v125_v22 }
   0xe   :  { %122 = vmatprep.mubr.f32.mxu1 %v20562_v1  ;;  %468 = vmatprep.mubr.f32.mxu0 %v20562_v1  ;;  %v782_v60 = vand.u32 4294901760, %v20740_v13 }
   0xf   :  { %160 = vmatprep.subr.mxu1 %v159_v30 }
  0x10   :  { %165 = vmatpush1.msra.mxu1 %v159_v30 }
  0x11   :  { %128 = vmatmul.mubr.f32.gmra.mrb[2].mxu1 %v127_v31  ;;  %472 = vmatmul.mubr.f32.gmra.mrb[4].mxu0 %v136_v26 }
  0x12   :  { %133 = vmatprep.mubr.f32.mxu1 %v20562_v1  ;;  %477 = vmatprep.mubr.f32.mxu0 %v20562_v1 }
  0x13   :  { %282 = vmatprep.subr.mxu1 %v156_v20 }
  0x15   :  { %139 = vmatmul.mubr.f32.gmra.mrb[4].mxu1 %v138_v34  ;;  %481 = vmatmul.mubr.f32.gmra.mrb[6].mxu0 %v147_v33 }
  0x16   :  { %144 = vmatprep.mubr.f32.mxu1 %v20562_v1  ;;  %567 = vmatprep.mubr.f32.mxu0 %v20562_v1 }
  0x19   :  { %150 = vmatmul.mubr.f32.gmra.mrb[6].mxu1 %v149_v36  ;;  %569 = vmatmul.mubr.f32.vlgmr.msra.gmra.mrb[0].mxu0 %v20608_v10 }
  0x1a   :  { %252 = vmatprep.mubr.f32.mxu1 %v20562_v1  ;;  %574 = vmatprep.mubr.f32.mxu0 %v20562_v1 }
  0x1b   :  { %18293 = vmatpush1.msk.msra.mxu0 %vm22_vm1, %v20563_v15 }
  0x1d   :  { %254 = vmatmul.mubr.f32.vlgmr.msra.gmra.mrb[0].mxu1 %v20608_v10  ;;  %576 = vmatmul.mubr.f32.gmra.mrb[2].mxu0 %v20610_v11 }
  0x1e   :  { %259 = vmatprep.mubr.f32.mxu1 %v20562_v1  ;;  %581 = vmatprep.mubr.f32.mxu0 %v20562_v1 }
  0x1f   :  { %284 = vmatpush1.msra.mxu1 %v156_v20  ;;  %v20751_v20 = vsub.f32 %v700_v53, %v20725_v2 }
  0x21   :  { %261 = vmatmul.mubr.f32.gmra.mrb[2].mxu1 %v20610_v11  ;;  %583 = vmatmul.mubr.f32.gmra.mrb[4].mxu0 %v20612_v12 }
  0x22   :  { %266 = vmatprep.mubr.f32.mxu1 %v20562_v1  ;;  %588 = vmatprep.mubr.f32.mxu0 %v20562_v1 }
  0x25   :  { %268 = vmatmul.mubr.f32.gmra.mrb[4].mxu1 %v20612_v12  ;;  %590 = vmatmul.mubr.f32.gmra.mrb[6].mxu0 %v20616_v14 }
  0x26   :  { %273 = vmatprep.mubr.f32.mxu1 %v20562_v1  ;;  %660 = vmatprep.mubr.f32.mxu0 %v20562_v1 }
  0x29   :  { %275 = vmatmul.mubr.f32.gmra.mrb[6].mxu1 %v20616_v14  ;;  %662 = vmatmul.mubr.f32.vlgmr.msra.gmra.mrb[0].mxu0 %v20608_v10 }
  0x2a   :  { %353 = vmatprep.mubr.f32.mxu1 %v20562_v1  ;;  %667 = vmatprep.mubr.f32.mxu0 %v20562_v1 }
  0x2d   :  { %356 = vmatmul.mubr.f32.vlgmr.msra.gmra.mrb[0].mxu1 %v20621_v16  ;;  %669 = vmatmul.mubr.f32.gmra.mrb[2].mxu0 %v20610_v11 }
  0x2e   :  { %361 = vmatprep.mubr.f32.mxu1 %v20562_v1  ;;  %674 = vmatprep.mubr.f32.mxu0 %v20562_v1 }
  0x31   :  { %364 = vmatmul.mubr.f32.gmra.mrb[2].mxu1 %v20626_v17  ;;  %676 = vmatmul.mubr.f32.gmra.mrb[4].mxu0 %v20612_v12 }
  0x32   :  { %369 = vmatprep.mubr.f32.mxu1 %v20562_v1  ;;  %681 = vmatprep.mubr.f32.mxu0 %v20562_v1 }
  0x35   :  { %372 = vmatmul.mubr.f32.gmra.mrb[4].mxu1 %v20632_v19  ;;  %683 = vmatmul.mubr.f32.gmra.mrb[6].mxu0 %v20616_v14  ;;  %v791_v14 = vand.u32 4294901760, %v20715_v59 }
  0x36   :  { %377 = vmatprep.mubr.f32.mxu1 %v20562_v1  ;;  %1532 = vmatprep.mubr.f32.mxu0 %v20562_v1 }
  0x39   :  { %380 = vmatmul.mubr.f32.gmra.mrb[6].mxu1 %v146_v27 }
  0x3a   :  { %777 = vmatprep.mubr.f32.mxu1 %v20562_v1 }
  0xfc   :  { %v663_v40 = vpop.f32.mrb[0].mxu0 }
  0xfd   :  { %v665_v42 = vpop.f32.mrb[1].mxu0 }
 0x100   :  { %v357_v45 = vpop.f32.mrb[0].mxu1  ;;  %v670_v46 = vpop.f32.mrb[2].mxu0 }
 0x101   :  { %v20706_v49 = vadd.f32 %v663_v40, %v357_v45  ;;  %v359_v50 = vpop.f32.mrb[1].mxu1  ;;  %v672_v51 = vpop.f32.mrb[3].mxu0 }
 0x102   :  { %v20708_v52 = vadd.f32 %v665_v42, %v359_v50 }
 0x103   :  { %v707_v54 = vand.u32 4294901760, %v20706_v49 }
 0x104   :  { %v705_v55 = vand.u32 4294901760, %v20708_v52  ;;  %v365_v56 = vpop.f32.mrb[2].mxu1  ;;  %v677_v57 = vpop.f32.mrb[4].mxu0 }
 0x105   :  { %v20721_v61 = vsub.f32 %v20706_v49, %v707_v54  ;;  %v20723_v62 = vadd.f32 %v670_v46, %v365_v56  ;;  %v367_v63 = vpop.f32.mrb[3].mxu1  ;;  %v679_v0 = vpop.f32.mrb[5].mxu0 }
 0x106   :  { %v20728_v3 = vsub.f32 %v20708_v52, %v705_v55  ;;  %v20730_v4 = vadd.f32 %v672_v51, %v367_v63 }
 0x107   :  { %v830_v6 = vand.u32 4294901760, %v20721_v61  ;;  %v711_v7 = vand.u32 4294901760, %v20723_v62 }
 0x108   :  { %v709_v9 = vand.u32 4294901760, %v20730_v4  ;;  %v373_v10 = vpop.f32.mrb[4].mxu1  ;;  %v684_v11 = vpop.f32.mrb[6].mxu0  ;;  %v824_v12 = vand.u32 4294901760, %v20728_v3 }
 0x109   :  { %v20743_v15 = vpack.c.bf16 %v711_v7, %v707_v54  ;;  %v20746_v16 = vsub.f32 %v20723_v62, %v711_v7  ;;  %v20748_v17 = vadd.f32 %v677_v57, %v373_v10  ;;  %v375_v18 = vpop.f32.mrb[5].mxu1  ;;  %v686_v19 = vpop.f32.mrb[7].mxu0  ;;  %v831_v25 = vsub.f32 %v20721_v61, %v830_v6 }
 0x10a   :  { %v20754_v21 = vsub.f32 %v20730_v4, %v709_v9  ;;  %v20756_v22 = vadd.f32 %v679_v0, %v375_v18  ;;  %v20758_v23 = vpack.c.bf16 %v709_v9, %v705_v55  ;;  %v825_v31 = vsub.f32 %v20728_v3, %v824_v12 }
 0x10b   :  { %v842_v26 = vand.u32 4294901760, %v20746_v16  ;;  %v715_v27 = vand.u32 4294901760, %v20748_v17  ;;  %v18426_v28 = vpack.c.bf16 %v20746_v16, %v20721_v61  ;;  %v832_v46 = vand.u32 4294901760, %v831_v25  ;;  %v1396_v61 = vld [vmem:[%s24971_s3] ss:$8 sm:$0x3] }
 0x10c   :  { %v713_v29 = vand.u32 4294901760, %v20756_v22  ;;  %v381_v30 = vpop.f32.mrb[6].mxu1  ;;  %18409 = vmatprep.subr.bf16.mxu1 %v20758_v23  ;;  %v836_v32 = vand.u32 4294901760, %v20754_v21  ;;  %v18424_v33 = vpack.c.bf16 %v20754_v21, %v20728_v3  ;;  %v826_v53 = vand.u32 4294901760, %v825_v31 }
 0x10d   :  { %v843_v34 = vsub.f32 %v20746_v16, %v842_v26  ;;  %v20775_v35 = vsub.f32 %v20748_v17, %v715_v27  ;;  %v20777_v36 = vadd.f32 %v684_v11, %v381_v30  ;;  %v383_v37 = vpop.f32.mrb[7].mxu1  ;;  %18411 = vmatpush1.bf16.msra.mxu1 %v20743_v15  ;;  %v20780_v38 = vpack.c.bf16 %v842_v26, %v830_v6 }
 0x10e   :  { %v847_v39 = vsub.f32 %v20756_v22, %v713_v29  ;;  %v20783_v40 = vadd.f32 %v686_v19, %v383_v37  ;;  %v837_v42 = vsub.f32 %v20754_v21, %v836_v32  ;;  %v20786_v43 = vpack.c.bf16 %v836_v32, %v824_v12 }
 0x10f   :  { %v854_v44 = vand.u32 4294901760, %v20775_v35  ;;  %v719_v45 = vand.u32 4294901760, %v20777_v36  ;;  %v844_v50 = vand.u32 4294901760, %v843_v34  ;;  %v792_v7 = vsub.f32 %v20715_v59, %v791_v14 }
 0x110   :  { %v717_v51 = vand.u32 4294901760, %v20783_v40  ;;  %v838_v54 = vand.u32 4294901760, %v837_v42  ;;  %v848_v55 = vand.u32 4294901760, %v847_v39  ;;  %v802_v11 = vand.u32 4294901760, %v20751_v20 }
 0x111   :  { %v20791_v56 = vpack.c.bf16 %v719_v45, %v715_v27  ;;  %v865_v57 = vsub.f32 %v20777_v36, %v719_v45  ;;  %v18418_v63 = vpack.c.bf16 %v844_v50, %v832_v46  ;;  %v855_v9 = vsub.f32 %v20775_v35, %v854_v44 }
 0x112   :  { %v859_v0 = vsub.f32 %v20783_v40, %v717_v51  ;;  %v20796_v3 = vpack.c.bf16 %v717_v51, %v713_v29  ;;  %v18416_v6 = vpack.c.bf16 %v838_v54, %v826_v53  ;;  %v849_v13 = vsub.f32 %v847_v39, %v848_v55 }
 0x113   :  { %v866_v10 = vand.u32 4294901760, %v865_v57  ;;  %v18430_v12 = vpack.c.bf16 %v865_v57, %v20775_v35  ;;  %v20806_v19 = vsub.f32 %v703_v8, %v20760_v24  ;;  %v793_v30 = vand.u32 4294901760, %v792_v7 }
 0x114   :  { %18413 = vmatprep.subr.bf16.mxu1 %v20796_v3  ;;  %v860_v18 = vand.u32 4294901760, %v859_v0  ;;  %v18428_v21 = vpack.c.bf16 %v859_v0, %v847_v39  ;;  %v856_v31 = vand.u32 4294901760, %v855_v9  ;;  %v850_v34 = vand.u32 4294901760, %v849_v13 }
 0x115   :  { %v867_v25 = vsub.f32 %v865_v57, %v866_v10  ;;  %18415 = vmatpush1.bf16.msra.mxu1 %v20791_v56  ;;  %v18446_v26 = vpack.c.bf16 %v866_v10, %v854_v44  ;;  %v803_v37 = vsub.f32 %v20751_v20, %v802_v11  ;;  %v813_v8 = vand.u32 4294901760, %v20806_v19 }
 0x116   :  { %18417 = vmatprep.subr.bf16.mxu1 %v18416_v6  ;;  %v861_v27 = vsub.f32 %v859_v0, %v860_v18  ;;  %v18444_v29 = vpack.c.bf16 %v860_v18, %v848_v55 }
 0x117   :  { %v868_v32 = vand.u32 4294901760, %v867_v25  ;;  %v804_v44 = vand.u32 4294901760, %v803_v37  ;;  %v814_v45 = vsub.f32 %v20806_v19, %v813_v8 }
 0x118   :  { %783 = vmatmul.mubr.f32.vlgmr.msra.gmra.mrb[8].mxu1 %v782_v60  ;;  %v862_v35 = vand.u32 4294901760, %v861_v27 }
 0x119   :  { %18419 = vmatpush1.bf16.msra.mxu1 %v18418_v63  ;;  %788 = vmatprep.mubr.f32.mxu1 %v20562_v1  ;;  %v18422_v39 = vpack.c.bf16 %v868_v32, %v856_v31  ;;  %v815_v46 = vand.u32 4294901760, %v814_v45 }
 0x11a   :  { %v18420_v42 = vpack.c.bf16 %v862_v35, %v850_v34 }
 0x11c   :  { %794 = vmatmul.mubr.f32.gmra.mrb[10].mxu1 %v793_v30  ;;  %18421 = vmatprep.subr.bf16.mxu1 %v18420_v42 }
 0x11d   :  { %18423 = vmatpush1.bf16.msra.mxu1 %v18422_v39  ;;  %799 = vmatprep.mubr.f32.mxu1 %v20562_v1 }
 0x11e   :  { %18425 = vmatprep.subr.bf16.mxu1 %v18424_v33 }
 0x120   :  { %805 = vmatmul.mubr.f32.gmra.mrb[12].mxu1 %v804_v44 }
 0x121   :  { %810 = vmatprep.mubr.f32.mxu1 %v20562_v1 }
 0x124   :  { %816 = vmatmul.mubr.f32.gmra.mrb[14].mxu1 %v815_v46 }
 0x125   :  { %926 = vmatprep.mubr.f32.mxu1 %v20562_v1 }
 0x128   :  { %928 = vmatmul.mubr.f32.vlgmr.msra.gmra.mrb[8].mxu1 %v20695_v41 }
 0x129   :  { %18427 = vmatpush1.bf16.msra.mxu1 %v18426_v28  ;;  %933 = vmatprep.mubr.f32.mxu1 %v20562_v1 }
 0x12a   :  { %18429 = vmatprep.subr.bf16.mxu1 %v18428_v21 }
 0x12c   :  { %935 = vmatmul.mubr.f32.gmra.mrb[10].mxu1 %v20704_v48 }
 0x12d   :  { %18431 = vmatpush1.bf16.msra.mxu1 %v18430_v12  ;;  %940 = vmatprep.mubr.f32.mxu1 %v20562_v1 }
 0x12e   :  { %18433 = vmatprep.subr.bf16.mxu1 %v20758_v23 }
 0x130   :  { %942 = vmatmul.mubr.f32.gmra.mrb[12].mxu1 %v20725_v2 }
 0x131   :  { %947 = vmatprep.mubr.f32.mxu1 %v20562_v1 }
 0x134   :  { %949 = vmatmul.mubr.f32.gmra.mrb[14].mxu1 %v20760_v24 }
 0x135   :  { %1035 = vmatprep.mubr.f32.mxu1 %v20562_v1 }
 0x138   :  { %1038 = vmatmul.mubr.f32.vlgmr.msra.gmra.mrb[8].mxu1 %v20702_v47  ;;  %v18294_v47 = vld [vmem:[%s24968_s0 + $0x20] sm:$0xff] }
 0x139   :  { %18435 = vmatpush1.bf16.msra.mxu1 %v20743_v15  ;;  %1043 = vmatprep.mubr.f32.mxu1 %v20562_v1 }
 0x13a   :  { %18437 = vmatprep.subr.bf16.mxu1 %v20796_v3 }
 0x13c   :  { %1046 = vmatmul.mubr.f32.gmra.mrb[10].mxu1 %v20715_v59  ;;  %v20884_v59 = vsub.s32 1, %v20600_v5 }
 0x13d   :  { %18439 = vmatpush1.bf16.msra.mxu1 %v20791_v56  ;;  %1051 = vmatprep.mubr.f32.mxu1 %v20562_v1 }
 0x13e   :  { %18441 = vmatprep.subr.bf16.mxu1 %v20786_v43 }
 0x140   :  { %1054 = vmatmul.mubr.f32.gmra.mrb[12].mxu1 %v20751_v20 }
 0x141   :  { %1059 = vmatprep.mubr.f32.mxu1 %v20562_v1 }
 0x144   :  { %1062 = vmatmul.mubr.f32.gmra.mrb[14].mxu1 %v20806_v19 }
 0x145   :  { %1140 = vmatprep.mubr.f32.mxu1 %v20562_v1 }
 0x148   :  { %1144 = vmatmul.mubr.f32.vlgmr.msra.gmra.mrb[8].mxu1 %v780_v58  ;;  %v1449_v58 = vsel %vm34_vm0, %v18294_v47, 0 }
 0x149   :  { %18443 = vmatpush1.bf16.msra.mxu1 %v20780_v38  ;;  %1149 = vmatprep.mubr.f32.mxu1 %v20562_v1 }
 0x14a   :  { %18445 = vmatprep.subr.bf16.mxu1 %v18444_v29 }
 0x14c   :  { %1153 = vmatmul.mubr.f32.gmra.mrb[10].mxu1 %v791_v14  ;;  %v20892_v14 = vand.u32 4294901760, %v1449_v58 }
 0x14d   :  { %18447 = vmatpush1.bf16.msra.mxu1 %v18446_v26  ;;  %1158 = vmatprep.mubr.f32.mxu1 %v20562_v1 }
 0x14e   :  { %18449 = vmatprep.subr.bf16.mxu1 %v20758_v23  ;;  %v20903_v33 = vsub.f32 %v1449_v58, %v20892_v14 }
 0x150   :  { %1162 = vmatmul.mubr.f32.gmra.mrb[12].mxu1 %v802_v11 }
 0x151   :  { %1167 = vmatprep.mubr.f32.mxu1 %v20562_v1 }
 0x154   :  { %1171 = vmatmul.mubr.f32.gmra.mrb[14].mxu1 %v813_v8 }
 0x155   :  { %1265 = vmatprep.mubr.f32.mxu1 %v20562_v1 }
 0x158   :  { %1267 = vmatmul.mubr.f32.vlgmr.msra.gmra.mrb[8].mxu1 %v20695_v41 }
 0x159   :  { %18451 = vmatpush1.bf16.msra.mxu1 %v20743_v15  ;;  %1272 = vmatprep.mubr.f32.mxu1 %v20562_v1 }
 0x15a   :  { %18453 = vmatprep.subr.bf16.mxu1 %v20796_v3  ;;  %v1535_v3 = vand.u32 4294901760, %v20903_v33 }
 0x15c   :  { %1274 = vmatmul.mubr.f32.gmra.mrb[10].mxu1 %v20704_v48  ;;  %v20935_v29 = vsub.f32 %v20903_v33, %v1535_v3 }
 0x15d   :  { %18455 = vmatpush1.bf16.msra.mxu1 %v20791_v56  ;;  %1279 = vmatprep.mubr.f32.mxu1 %v20562_v1 }
 0x160   :  { %1281 = vmatmul.mubr.f32.gmra.mrb[12].mxu1 %v20725_v2 }
 0x161   :  { %1286 = vmatprep.mubr.f32.mxu1 %v20562_v1 }
 0x164   :  { %1288 = vmatmul.mubr.f32.gmra.mrb[14].mxu1 %v20760_v24 }
 0x165   :  { %1366 = vmatprep.mubr.f32.mxu1 %v20562_v1 }
 0x168   :  { %1368 = vmatmul.mubr.f32.vlgmr.msra.gmra.mrb[8].mxu1 %v20695_v41  ;;  %v20877_v41 = vsub.s32 0, %v20600_v5  ;;  %v1424_v5 = vrot.slane %v1396_v61, %v20884_v59 }
 0x169   :  { %1373 = vmatprep.mubr.f32.mxu1 %v20562_v1 }
 0x16a   :  { %v1420_v16 = vrot.slane %v1396_v61, %v20877_v41 }
 0x16c   :  { %1375 = vmatmul.mubr.f32.gmra.mrb[10].mxu1 %v20704_v48  ;;  %v1395_v48 = vld [vmem:[%s24970_s2] ss:$8 sm:$0x3] }
 0x16d   :  { %1380 = vmatprep.mubr.f32.mxu1 %v20562_v1  ;;  %v1401_v15 = vrot.slane %v1395_v48, %v20877_v41  ;;  %v1405_v23 = vrot.slane %v1395_v48, %v20884_v59 }
 0x16f   :  { %v1408_v43 = vmul.f32 %v20706_v49, %v1401_v15  ;;  %v1409_v53 = vmul.f32 %v20708_v52, %v1405_v23  ;;  %v1410_v57 = vmul.f32 %v20723_v62, %v1401_v15  ;;  %v1411_v0 = vmul.f32 %v20730_v4, %v1405_v23  ;;  %v18297_v49 = vld [vmem:[%s24968_s0 + $0x38] sm:$0xff] }
 0x170   :  { %1382 = vmatmul.mubr.f32.gmra.mrb[12].mxu1 %v20725_v2  ;;  %v18295_v2 = vld [vmem:[%s24968_s0 + $0x28] sm:$0xff]  ;;  %v1412_v10 = vmul.f32 %v20748_v17, %v1401_v15  ;;  %v1413_v4 = vmul.f32 %v20756_v22, %v1405_v23  ;;  %v1414_v13 = vmul.f32 %v20777_v36, %v1401_v15  ;;  %v1415_v21 = vmul.f32 %v20783_v40, %v1405_v23 }
 0x171   :  { %1387 = vmatprep.mubr.f32.mxu1 %v20562_v1  ;;  %v1452_v20 = vsel %vm34_vm0, %v18295_v2, 0  ;;  %v20928_v25 = vsel %vm34_vm0, %v18297_v49, 0 }
 0x172   :  { %v20905_v38 = vand.u32 4294901760, %v1452_v20  ;;  %v20944_v8 = vand.u32 4294901760, %v20928_v25 }
 0x174   :  { %1389 = vmatmul.mubr.f32.gmra.mrb[14].mxu1 %v20760_v24  ;;  %v18296_v24 = vld [vmem:[%s24968_s0 + $0x30] sm:$0xff]  ;;  %v20914_v6 = vsub.f32 %v1452_v20, %v20905_v38 }
 0x175   :  { %2239 = vmatprep.mubr.f32.mxu1 %v20562_v1  ;;  %v1455_v55 = vsel %vm34_vm0, %v18296_v24, 0 }
 0x176   :  { %v20920_v11 = vand.u32 4294901760, %v1455_v55  ;;  %v1546_v22 = vand.u32 4294901760, %v20914_v6 }
 0x178   :  { %v20940_v40 = vsub.f32 %v1455_v55, %v20920_v11 }
 0x23b   :  { %v1369_v28 = vpop.f32.mrb[8].mxu1 }
 0x23c   :  { %v1427_v50 = vmul.f32 %v1420_v16, %v1369_v28  ;;  %v1371_v51 = vpop.f32.mrb[9].mxu1 }
 0x23d   :  { %v1428_v54 = vmul.f32 %v1424_v5, %v1371_v51 }
 0x23e   :  { %v1435_v56 = vadd.f32 %v1427_v50, %v1408_v43 }
 0x23f   :  { %v1436_v60 = vadd.f32 %v1428_v54, %v1409_v53  ;;  %v1376_v63 = vpop.f32.mrb[10].mxu1 }
 0x240   :  { %v1462_v52 = vand.u32 4294901760, %v1435_v56  ;;  %v1429_v7 = vmul.f32 %v1420_v16, %v1376_v63  ;;  %v1378_v9 = vpop.f32.mrb[11].mxu1 }
 0x241   :  { %v1460_v62 = vand.u32 4294901760, %v1436_v60  ;;  %v1430_v12 = vmul.f32 %v1424_v5, %v1378_v9 }
 0x242   :  { %v20924_v18 = vsub.f32 %v1435_v56, %v1462_v52  ;;  %v1437_v19 = vadd.f32 %v1429_v7, %v1410_v57 }
 0x243   :  { %v20930_v26 = vsub.f32 %v1436_v60, %v1460_v62  ;;  %v1438_v27 = vadd.f32 %v1430_v12, %v1411_v0  ;;  %v1383_v17 = vpop.f32.mrb[12].mxu1 }
 0x244   :  { %v1585_v36 = vand.u32 4294901760, %v20924_v18  ;;  %v1466_v30 = vand.u32 4294901760, %v1437_v19  ;;  %v1431_v31 = vmul.f32 %v1420_v16, %v1383_v17  ;;  %v1385_v32 = vpop.f32.mrb[13].mxu1 }
 0x245   :  { %v1464_v34 = vand.u32 4294901760, %v1438_v27  ;;  %v1432_v35 = vmul.f32 %v1424_v5, %v1385_v32  ;;  %v1579_v37 = vand.u32 4294901760, %v20930_v26 }
 0x246   :  { %v1586_v39 = vsub.f32 %v20924_v18, %v1585_v36  ;;  %v20947_v42 = vpack.c.bf16 %v1466_v30, %v1462_v52  ;;  %v20949_v44 = vsub.f32 %v1437_v19, %v1466_v30  ;;  %v1439_v45 = vadd.f32 %v1431_v31, %v1412_v10 }
 0x247   :  { %v20951_v46 = vsub.f32 %v1438_v27, %v1464_v34  ;;  %v1440_v47 = vadd.f32 %v1432_v35, %v1413_v4  ;;  %v1390_v48 = vpop.f32.mrb[14].mxu1  ;;  %v20953_v58 = vpack.c.bf16 %v1464_v34, %v1460_v62  ;;  %v1580_v61 = vsub.f32 %v20930_v26, %v1579_v37 }
 0x248   :  { %v1597_v2 = vand.u32 4294901760, %v20949_v44  ;;  %v1470_v15 = vand.u32 4294901760, %v1439_v45  ;;  %v1433_v20 = vmul.f32 %v1420_v16, %v1390_v48  ;;  %v1392_v23 = vpop.f32.mrb[15].mxu1  ;;  %v1587_v24 = vand.u32 4294901760, %v1586_v39 }
 0x249   :  { %v1468_v28 = vand.u32 4294901760, %v1440_v47  ;;  %v1434_v43 = vmul.f32 %v1424_v5, %v1392_v23  ;;  %18457 = vmatprep.subr.bf16.mxu0 %v20953_v58  ;;  %v1581_v50 = vand.u32 4294901760, %v1580_v61  ;;  %v1591_v51 = vand.u32 4294901760, %v20951_v46 }
 0x24a   :  { %v1598_v53 = vsub.f32 %v20949_v44, %v1597_v2  ;;  %v20960_v54 = vsub.f32 %v1439_v45, %v1470_v15  ;;  %v1441_v55 = vadd.f32 %v1433_v20, %v1414_v13  ;;  %18459 = vmatpush1.bf16.msra.mxu0 %v20947_v42  ;;  %v18472_v56 = vpack.c.bf16 %v20951_v46, %v20930_v26 }
 0x24b   :  { %v1602_v16 = vsub.f32 %v1440_v47, %v1468_v28  ;;  %v1442_v57 = vadd.f32 %v1434_v43, %v1415_v21  ;;  %v1592_v60 = vsub.f32 %v20951_v46, %v1591_v51  ;;  %v18474_v5 = vpack.c.bf16 %v20949_v44, %v20924_v18 }
 0x24c   :  { %v1609_v63 = vand.u32 4294901760, %v20960_v54  ;;  %v1474_v0 = vand.u32 4294901760, %v1441_v55  ;;  %v1599_v49 = vand.u32 4294901760, %v1598_v53  ;;  %v20969_v52 = vpack.c.bf16 %v1591_v51, %v1579_v37 }
 0x24d   :  { %v1472_v7 = vand.u32 4294901760, %v1442_v57  ;;  %v1593_v9 = vand.u32 4294901760, %v1592_v60  ;;  %v1603_v10 = vand.u32 4294901760, %v1602_v16  ;;  %v20971_v62 = vpack.c.bf16 %v1597_v2, %v1585_v36 }
 0x24e   :  { %v20973_v12 = vpack.c.bf16 %v1474_v0, %v1470_v15  ;;  %v1620_v4 = vsub.f32 %v1441_v55, %v1474_v0  ;;  %v1537_v13 = vand.u32 4294901760, %v20935_v29  ;;  %v18466_v19 = vpack.c.bf16 %v1599_v49, %v1587_v24 }
 0x24f   :  { %v1614_v21 = vsub.f32 %v1442_v57, %v1472_v7  ;;  %v20976_v26 = vpack.c.bf16 %v1472_v7, %v1468_v28  ;;  %v18464_v18 = vpack.c.bf16 %v1593_v9, %v1581_v50  ;;  %v1547_v27 = vsub.f32 %v20914_v6, %v1546_v22  ;;  %v18301_v57 = vld [vmem:[%s24969_s1 + $0x38] sm:$0xff] }
 0x250   :  { %v1610_v17 = vsub.f32 %v20960_v54, %v1609_v63  ;;  %v1621_v30 = vand.u32 4294901760, %v1620_v4  ;;  %v1557_v36 = vand.u32 4294901760, %v20940_v40  ;;  %v18478_v31 = vpack.c.bf16 %v1620_v4, %v20960_v54 }
 0x251   :  { %18461 = vmatprep.subr.bf16.mxu0 %v20976_v26  ;;  %v1604_v32 = vsub.f32 %v1602_v16, %v1603_v10  ;;  %v1615_v29 = vand.u32 4294901760, %v1614_v21  ;;  %v20987_v34 = vsub.f32 %v20928_v25, %v20944_v8  ;;  %v18476_v35 = vpack.c.bf16 %v1614_v21, %v1602_v16 }
 0x252   :  { %v1622_v37 = vsub.f32 %v1620_v4, %v1621_v30  ;;  %18463 = vmatpush1.bf16.msra.mxu0 %v20973_v12  ;;  %v18494_v39 = vpack.c.bf16 %v1621_v30, %v1609_v63  ;;  %v1548_v46 = vand.u32 4294901760, %v1547_v27  ;;  %v1611_v47 = vand.u32 4294901760, %v1610_v17 }
 0x253   :  { %18465 = vmatprep.subr.bf16.mxu0 %v18464_v18  ;;  %v1616_v44 = vsub.f32 %v1614_v21, %v1615_v29  ;;  %v18492_v45 = vpack.c.bf16 %v1615_v29, %v1603_v10  ;;  %v1605_v61 = vand.u32 4294901760, %v1604_v32  ;;  %v1558_v15 = vsub.f32 %v20940_v40, %v1557_v36 }
 0x254   :  { %v1623_v48 = vand.u32 4294901760, %v1622_v37  ;;  %v1568_v25 = vand.u32 4294901760, %v20987_v34  ;;  %v2165_v10 = vsel %vm34_vm0, %v18301_v57, 0 }
 0x255   :  { %1538 = vmatmul.mubr.f32.vlgmr.msra.gmra.mrb[8].mxu0 %v1537_v13  ;;  %v1617_v2 = vand.u32 4294901760, %v1616_v44  ;;  %v1559_v24 = vand.u32 4294901760, %v1558_v15  ;;  %v21128_v32 = vand.u32 4294901760, %v2165_v10 }
 0x256   :  { %18467 = vmatpush1.bf16.msra.mxu0 %v18466_v19  ;;  %1543 = vmatprep.mubr.f32.mxu0 %v20562_v1  ;;  %v18470_v20 = vpack.c.bf16 %v1623_v48, %v1611_v47  ;;  %v1569_v28 = vsub.f32 %v20987_v34, %v1568_v25 }
 0x257   :  { %v18468_v23 = vpack.c.bf16 %v1617_v2, %v1605_v61 }
 0x258   :  { %v1570_v43 = vand.u32 4294901760, %v1569_v28 }
 0x259   :  { %1549 = vmatmul.mubr.f32.gmra.mrb[10].mxu0 %v1548_v46  ;;  %18469 = vmatprep.subr.bf16.mxu0 %v18468_v23 }
 0x25a   :  { %18471 = vmatpush1.bf16.msra.mxu0 %v18470_v20  ;;  %1554 = vmatprep.mubr.f32.mxu0 %v20562_v1 }
 0x25b   :  { %18473 = vmatprep.subr.bf16.mxu0 %v18472_v56 }
 0x25d   :  { %1560 = vmatmul.mubr.f32.gmra.mrb[12].mxu0 %v1559_v24 }
 0x25e   :  { %1565 = vmatprep.mubr.f32.mxu0 %v20562_v1 }
 0x261   :  { %1571 = vmatmul.mubr.f32.gmra.mrb[14].mxu0 %v1570_v43 }
 0x262   :  { %1681 = vmatprep.mubr.f32.mxu0 %v20562_v1 }
 0x265   :  { %1683 = vmatmul.mubr.f32.vlgmr.msra.gmra.mrb[8].mxu0 %v20892_v14 }
 0x266   :  { %18475 = vmatpush1.bf16.msra.mxu0 %v18474_v5  ;;  %1688 = vmatprep.mubr.f32.mxu0 %v20562_v1 }
 0x267   :  { %18477 = vmatprep.subr.bf16.mxu0 %v18476_v35 }
 0x269   :  { %1690 = vmatmul.mubr.f32.gmra.mrb[10].mxu0 %v20905_v38 }
 0x26a   :  { %18479 = vmatpush1.bf16.msra.mxu0 %v18478_v31  ;;  %1695 = vmatprep.mubr.f32.mxu0 %v20562_v1 }
 0x26b   :  { %18481 = vmatprep.subr.bf16.mxu0 %v20953_v58 }
 0x26d   :  { %1697 = vmatmul.mubr.f32.gmra.mrb[12].mxu0 %v20920_v11 }
 0x26e   :  { %1702 = vmatprep.mubr.f32.mxu0 %v20562_v1 }
 0x271   :  { %1704 = vmatmul.mubr.f32.gmra.mrb[14].mxu0 %v20944_v8 }
 0x272   :  { %1790 = vmatprep.mubr.f32.mxu0 %v20562_v1 }
 0x275   :  { %1793 = vmatmul.mubr.f32.vlgmr.msra.gmra.mrb[8].mxu0 %v20903_v33  ;;  %v18298_v33 = vld [vmem:[%s24969_s1 + $0x20] sm:$0xff] }
 0x276   :  { %18483 = vmatpush1.bf16.msra.mxu0 %v20947_v42  ;;  %1798 = vmatprep.mubr.f32.mxu0 %v20562_v1 }
 0x277   :  { %18485 = vmatprep.subr.bf16.mxu0 %v20976_v26 }
 0x279   :  { %1801 = vmatmul.mubr.f32.gmra.mrb[10].mxu0 %v20914_v6 }
 0x27a   :  { %18487 = vmatpush1.bf16.msra.mxu0 %v20973_v12  ;;  %1806 = vmatprep.mubr.f32.mxu0 %v20562_v1 }
 0x27b   :  { %18489 = vmatprep.subr.bf16.mxu0 %v20969_v52 }
 0x27d   :  { %1809 = vmatmul.mubr.f32.gmra.mrb[12].mxu0 %v20940_v40 }
 0x27e   :  { %1814 = vmatprep.mubr.f32.mxu0 %v20562_v1 }
 0x281   :  { %1817 = vmatmul.mubr.f32.gmra.mrb[14].mxu0 %v20987_v34 }
 0x282   :  { %1895 = vmatprep.mubr.f32.mxu0 %v20562_v1 }
 0x285   :  { %1899 = vmatmul.mubr.f32.vlgmr.msra.gmra.mrb[8].mxu0 %v1535_v3 }
 0x286   :  { %18491 = vmatpush1.bf16.msra.mxu0 %v20971_v62  ;;  %1904 = vmatprep.mubr.f32.mxu0 %v20562_v1 }
 0x287   :  { %18493 = vmatprep.subr.bf16.mxu0 %v18492_v45 }
 0x289   :  { %1908 = vmatmul.mubr.f32.gmra.mrb[10].mxu0 %v1546_v22 }
 0x28a   :  { %18495 = vmatpush1.bf16.msra.mxu0 %v18494_v39  ;;  %1913 = vmatprep.mubr.f32.mxu0 %v20562_v1 }
 0x28b   :  { %18497 = vmatprep.subr.bf16.mxu0 %v20953_v58 }
 0x28d   :  { %1917 = vmatmul.mubr.f32.gmra.mrb[12].mxu0 %v1557_v36 }
 0x28e   :  { %1922 = vmatprep.mubr.f32.mxu0 %v20562_v1 }
 0x291   :  { %1926 = vmatmul.mubr.f32.gmra.mrb[14].mxu0 %v1568_v25 }
 0x292   :  { %2020 = vmatprep.mubr.f32.mxu0 %v20562_v1 }
 0x295   :  { %2022 = vmatmul.mubr.f32.vlgmr.msra.gmra.mrb[8].mxu0 %v20892_v14 }
 0x296   :  { %18499 = vmatpush1.bf16.msra.mxu0 %v20947_v42  ;;  %2027 = vmatprep.mubr.f32.mxu0 %v20562_v1 }
 0x297   :  { %18501 = vmatprep.subr.bf16.mxu0 %v20976_v26 }
 0x299   :  { %2029 = vmatmul.mubr.f32.gmra.mrb[10].mxu0 %v20905_v38 }
 0x29a   :  { %18503 = vmatpush1.bf16.msra.mxu0 %v20973_v12  ;;  %2034 = vmatprep.mubr.f32.mxu0 %v20562_v1 }
 0x29d   :  { %2036 = vmatmul.mubr.f32.gmra.mrb[12].mxu0 %v20920_v11 }
 0x29e   :  { %2041 = vmatprep.mubr.f32.mxu0 %v20562_v1 }
 0x2a1   :  { %2043 = vmatmul.mubr.f32.gmra.mrb[14].mxu0 %v20944_v8 }
 0x2a2   :  { %2121 = vmatprep.mubr.f32.mxu0 %v20562_v1 }
 0x2a5   :  { %2123 = vmatmul.mubr.f32.vlgmr.msra.gmra.mrb[8].mxu0 %v20892_v14  ;;  %v2156_v14 = vsel %vm34_vm0, %v18298_v33, 0 }
 0x2a6   :  { %2128 = vmatprep.mubr.f32.mxu0 %v20562_v1  ;;  %v21058_v3 = vand.u32 4294901760, %v2156_v14 }
 0x2a8   :  { %v21067_v40 = vsub.f32 %v2156_v14, %v21058_v3 }
 0x2a9   :  { %2130 = vmatmul.mubr.f32.gmra.mrb[10].mxu0 %v20905_v38  ;;  %v18299_v38 = vld [vmem:[%s24969_s1 + $0x28] sm:$0xff] }
 0x2aa   :  { %2135 = vmatprep.mubr.f32.mxu0 %v20562_v1  ;;  %v2159_v6 = vsel %vm34_vm0, %v18299_v38, 0  ;;  %v2242_v56 = vand.u32 4294901760, %v21067_v40 }
 0x2ac   :  { %v2243_v13 = vsub.f32 %v21067_v40, %v2242_v56 }
 0x2ad   :  { %2137 = vmatmul.mubr.f32.gmra.mrb[12].mxu0 %v20920_v11  ;;  %v18300_v11 = vld [vmem:[%s24969_s1 + $0x30] sm:$0xff] }
 0x2ae   :  { %2142 = vmatprep.mubr.f32.mxu0 %v20562_v1  ;;  %v2162_v51 = vsel %vm34_vm0, %v18300_v11, 0  ;;  %v2244_v14 = vand.u32 4294901760, %v2243_v13 }
 0x2af   :  { %v21095_v0 = vand.u32 4294901760, %v2162_v51 }
 0x2b1   :  { %2144 = vmatmul.mubr.f32.gmra.mrb[14].mxu0 %v20944_v8  ;;  %v21069_v8 = vand.u32 4294901760, %v2159_v6  ;;  %v21122_v17 = vsub.f32 %v2162_v51, %v21095_v0 }
 0x2b2   :  { %2996 = vmatprep.mubr.f32.mxu0 %v20562_v1 }
 0x2b3   :  { %v21086_v16 = vsub.f32 %v2159_v6, %v21069_v8 }
 0x2b5   :  { %v2253_v19 = vand.u32 4294901760, %v21086_v16 }
 0x378   :  { %v21064_v22 = vpop.f32.mrb[8].mxu0 }
 0x379   :  { %v2169_v42 = vand.u32 4294901760, %v21064_v22  ;;  %v21072_v58 = vpop.f32.mrb[9].mxu0 }
 0x37a   :  { %v2167_v50 = vand.u32 4294901760, %v21072_v58 }
 0x37b   :  { %v21077_v53 = vsub.f32 %v21064_v22, %v2169_v42 }
 0x37c   :  { %v21080_v54 = vsub.f32 %v21072_v58, %v2167_v50  ;;  %v21082_v55 = vpop.f32.mrb[10].mxu0 }
 0x37d   :  { %v2292_v60 = vand.u32 4294901760, %v21077_v53  ;;  %v2173_v5 = vand.u32 4294901760, %v21082_v55  ;;  %v21093_v63 = vpop.f32.mrb[11].mxu0 }
 0x37e   :  { %v2286_v49 = vand.u32 4294901760, %v21080_v54  ;;  %v2171_v52 = vand.u32 4294901760, %v21093_v63 }
 0x37f   :  { %v21099_v7 = vpack.c.bf16 %v2173_v5, %v2169_v42  ;;  %v21102_v9 = vsub.f32 %v21082_v55, %v2173_v5  ;;  %v2293_v21 = vsub.f32 %v21077_v53, %v2292_v60 }
 0x380   :  { %v21106_v62 = vsub.f32 %v21093_v63, %v2171_v52  ;;  %v21108_v12 = vpop.f32.mrb[12].mxu0  ;;  %v21110_v4 = vpack.c.bf16 %v2171_v52, %v2167_v50  ;;  %v2287_v31 = vsub.f32 %v21080_v54, %v2286_v49  ;;  %v2254_v50 = vsub.f32 %v21086_v16, %v2253_v19 }
 0x381   :  { %v2304_v26 = vand.u32 4294901760, %v21102_v9  ;;  %v2177_v18 = vand.u32 4294901760, %v21108_v12  ;;  %v21119_v27 = vpop.f32.mrb[13].mxu0  ;;  %v18522_v37 = vpack.c.bf16 %v21102_v9, %v21077_v53  ;;  %v2294_v48 = vand.u32 4294901760, %v2293_v21 }
 0x382   :  { %v2298_v30 = vand.u32 4294901760, %v21106_v62  ;;  %v2175_v36 = vand.u32 4294901760, %v21119_v27  ;;  %18505 = vmatprep.subr.bf16.mxu1 %v21110_v4  ;;  %v18520_v35 = vpack.c.bf16 %v21106_v62, %v21080_v54  ;;  %v2288_v24 = vand.u32 4294901760, %v2287_v31 }
 0x383   :  { %v2305_v29 = vsub.f32 %v21102_v9, %v2304_v26  ;;  %v21132_v34 = vsub.f32 %v21108_v12, %v2177_v18  ;;  %18507 = vmatpush1.bf16.msra.mxu1 %v21099_v7  ;;  %v21147_v47 = vpack.c.bf16 %v2304_v26, %v2292_v60  ;;  %v2264_v54 = vand.u32 4294901760, %v21122_v17 }
 0x384   :  { %v21140_v39 = vsub.f32 %v21119_v27, %v2175_v36  ;;  %v21142_v44 = vpop.f32.mrb[14].mxu0  ;;  %v2299_v45 = vsub.f32 %v21106_v62, %v2298_v30  ;;  %v21145_v46 = vpack.c.bf16 %v2298_v30, %v2286_v49  ;;  %v21170_v49 = vsub.f32 %v2165_v10, %v21128_v32 }
 0x385   :  { %v2306_v61 = vand.u32 4294901760, %v2305_v29  ;;  %v2316_v2 = vand.u32 4294901760, %v21132_v34  ;;  %v2181_v15 = vand.u32 4294901760, %v21142_v44  ;;  %v21151_v25 = vpop.f32.mrb[15].mxu0  ;;  %v2255_v30 = vand.u32 4294901760, %v2254_v50 }
 0x386   :  { %v2310_v20 = vand.u32 4294901760, %v21140_v39  ;;  %v2179_v23 = vand.u32 4294901760, %v21151_v25  ;;  %v2300_v28 = vand.u32 4294901760, %v2299_v45  ;;  %v2265_v10 = vsub.f32 %v21122_v17, %v2264_v54 }
 0x387   :  { %v21155_v43 = vpack.c.bf16 %v2181_v15, %v2177_v18  ;;  %v2327_v33 = vsub.f32 %v21142_v44, %v2181_v15  ;;  %v18514_v38 = vpack.c.bf16 %v2306_v61, %v2294_v48  ;;  %v2317_v51 = vsub.f32 %v21132_v34, %v2316_v2 }
 0x388   :  { %v2321_v6 = vsub.f32 %v21151_v25, %v2179_v23  ;;  %v21159_v11 = vpack.c.bf16 %v2179_v23, %v2175_v36  ;;  %v18512_v42 = vpack.c.bf16 %v2300_v28, %v2288_v24  ;;  %v2311_v5 = vsub.f32 %v21140_v39, %v2310_v20 }
 0x389   :  { %v2328_v53 = vand.u32 4294901760, %v2327_v33  ;;  %v18526_v57 = vpack.c.bf16 %v2327_v33, %v21132_v34  ;;  %v2318_v26 = vand.u32 4294901760, %v2317_v51  ;;  %v2275_v29 = vand.u32 4294901760, %v21170_v49 }
 0x38a   :  { %v2322_v60 = vand.u32 4294901760, %v2321_v6  ;;  %18509 = vmatprep.subr.bf16.mxu1 %v21159_v11  ;;  %v18524_v52 = vpack.c.bf16 %v2321_v6, %v21140_v39  ;;  %v2312_v36 = vand.u32 4294901760, %v2311_v5  ;;  %v2266_v45 = vand.u32 4294901760, %v2265_v10 }
 0x38b   :  { %v2329_v9 = vsub.f32 %v2327_v33, %v2328_v53  ;;  %18511 = vmatpush1.bf16.msra.mxu1 %v21155_v43  ;;  %v18542_v62 = vpack.c.bf16 %v2328_v53, %v2316_v2  ;;  %v2276_v48 = vsub.f32 %v21170_v49, %v2275_v29 }
 0x38c   :  { %18513 = vmatprep.subr.bf16.mxu1 %v18512_v42  ;;  %v2323_v13 = vsub.f32 %v2321_v6, %v2322_v60  ;;  %v18540_v21 = vpack.c.bf16 %v2322_v60, %v2310_v20 }
 0x38d   :  { %v2330_v18 = vand.u32 4294901760, %v2329_v9  ;;  %v2277_v61 = vand.u32 4294901760, %v2276_v48 }
 0x38e   :  { %2245 = vmatmul.mubr.f32.vlgmr.msra.gmra.mrb[16].mxu1 %v2244_v14  ;;  %v2324_v31 = vand.u32 4294901760, %v2323_v13 }
 0x38f   :  { %18515 = vmatpush1.bf16.msra.mxu1 %v18514_v38  ;;  %2250 = vmatprep.mubr.f32.mxu1 %v20562_v1  ;;  %v18518_v34 = vpack.c.bf16 %v2330_v18, %v2318_v26 }
 0x390   :  { %v18516_v39 = vpack.c.bf16 %v2324_v31, %v2312_v36 }
 0x392   :  { %2256 = vmatmul.mubr.f32.gmra.mrb[18].mxu1 %v2255_v30  ;;  %18517 = vmatprep.subr.bf16.mxu1 %v18516_v39 }
 0x393   :  { %18519 = vmatpush1.bf16.msra.mxu1 %v18518_v34  ;;  %2261 = vmatprep.mubr.f32.mxu1 %v20562_v1 }
 0x394   :  { %18521 = vmatprep.subr.bf16.mxu1 %v18520_v35  ;;  %v18306_v35 = vld [vmem:[%s24968_s0 + $0x50] sm:$0xff] }
 0x395   :  { %v2919_v28 = vsel %vm34_vm0, %v18306_v35, 0 }
 0x396   :  { %2267 = vmatmul.mubr.f32.gmra.mrb[20].mxu1 %v2266_v45 }
 0x397   :  { %2272 = vmatprep.mubr.f32.mxu1 %v20562_v1 }
 0x39a   :  { %2278 = vmatmul.mubr.f32.gmra.mrb[22].mxu1 %v2277_v61 }
 0x39b   :  { %2388 = vmatprep.mubr.f32.mxu1 %v20562_v1 }
 0x39e   :  { %2390 = vmatmul.mubr.f32.vlgmr.msra.gmra.mrb[16].mxu1 %v21058_v3 }
 0x39f   :  { %18523 = vmatpush1.bf16.msra.mxu1 %v18522_v37  ;;  %2395 = vmatprep.mubr.f32.mxu1 %v20562_v1 }
 0x3a0   :  { %18525 = vmatprep.subr.bf16.mxu1 %v18524_v52 }
 0x3a2   :  { %2397 = vmatmul.mubr.f32.gmra.mrb[18].mxu1 %v21069_v8 }
 0x3a3   :  { %18527 = vmatpush1.bf16.msra.mxu1 %v18526_v57  ;;  %2402 = vmatprep.mubr.f32.mxu1 %v20562_v1 }
 0x3a4   :  { %18529 = vmatprep.subr.bf16.mxu1 %v21110_v4 }
 0x3a6   :  { %2404 = vmatmul.mubr.f32.gmra.mrb[20].mxu1 %v21095_v0 }
 0x3a7   :  { %2409 = vmatprep.mubr.f32.mxu1 %v20562_v1 }
 0x3aa   :  { %2411 = vmatmul.mubr.f32.gmra.mrb[22].mxu1 %v21128_v32 }
 0x3ab   :  { %2497 = vmatprep.mubr.f32.mxu1 %v20562_v1 }
 0x3ae   :  { %2500 = vmatmul.mubr.f32.vlgmr.msra.gmra.mrb[16].mxu1 %v21067_v40  ;;  %v18304_v40 = vld [vmem:[%s24968_s0 + $0x40] sm:$0xff] }
 0x3af   :  { %18531 = vmatpush1.bf16.msra.mxu1 %v21099_v7  ;;  %2505 = vmatprep.mubr.f32.mxu1 %v20562_v1 }
 0x3b0   :  { %18533 = vmatprep.subr.bf16.mxu1 %v21159_v11 }
 0x3b2   :  { %2508 = vmatmul.mubr.f32.gmra.mrb[18].mxu1 %v21086_v16  ;;  %v18305_v16 = vld [vmem:[%s24968_s0 + $0x48] sm:$0xff] }
 0x3b3   :  { %18535 = vmatpush1.bf16.msra.mxu1 %v21155_v43  ;;  %2513 = vmatprep.mubr.f32.mxu1 %v20562_v1 }
 0x3b4   :  { %18537 = vmatprep.subr.bf16.mxu1 %v21145_v46 }
 0x3b6   :  { %2516 = vmatmul.mubr.f32.gmra.mrb[20].mxu1 %v21122_v17 }
 0x3b7   :  { %2521 = vmatprep.mubr.f32.mxu1 %v20562_v1 }
 0x3ba   :  { %2524 = vmatmul.mubr.f32.gmra.mrb[22].mxu1 %v21170_v49 }
 0x3bb   :  { %2602 = vmatprep.mubr.f32.mxu1 %v20562_v1 }
 0x3be   :  { %2606 = vmatmul.mubr.f32.vlgmr.msra.gmra.mrb[16].mxu1 %v2242_v56  ;;  %v18303_v56 = vld [vmem:[%s24971_s3 + $0x1] ss:$8 sm:$0x3] }
 0x3bf   :  { %18539 = vmatpush1.bf16.msra.mxu1 %v21147_v47  ;;  %2611 = vmatprep.mubr.f32.mxu1 %v20562_v1 }
 0x3c0   :  { %18541 = vmatprep.subr.bf16.mxu1 %v18540_v21 }
 0x3c2   :  { %2615 = vmatmul.mubr.f32.gmra.mrb[18].mxu1 %v2253_v19  ;;  %v2916_v19 = vsel %vm34_vm0, %v18305_v16, 0 }
 0x3c3   :  { %18543 = vmatpush1.bf16.msra.mxu1 %v18542_v62  ;;  %2620 = vmatprep.mubr.f32.mxu1 %v20562_v1  ;;  %v21261_v47 = vand.u32 4294901760, %v2916_v19 }
 0x3c4   :  { %18545 = vmatprep.subr.bf16.mxu1 %v21110_v4  ;;  %v2884_v4 = vrot.slane %v18303_v56, %v20877_v41 }
 0x3c5   :  { %v21270_v42 = vsub.f32 %v2916_v19, %v21261_v47 }
 0x3c6   :  { %2624 = vmatmul.mubr.f32.gmra.mrb[20].mxu1 %v2264_v54 }
 0x3c7   :  { %2629 = vmatprep.mubr.f32.mxu1 %v20562_v1 }
 0x3ca   :  { %2633 = vmatmul.mubr.f32.gmra.mrb[22].mxu1 %v2275_v29 }
 0x3cb   :  { %2727 = vmatprep.mubr.f32.mxu1 %v20562_v1 }
 0x3ce   :  { %2729 = vmatmul.mubr.f32.vlgmr.msra.gmra.mrb[16].mxu1 %v21058_v3 }
 0x3cf   :  { %18547 = vmatpush1.bf16.msra.mxu1 %v21099_v7  ;;  %2734 = vmatprep.mubr.f32.mxu1 %v20562_v1 }
 0x3d0   :  { %18549 = vmatprep.subr.bf16.mxu1 %v21159_v11 }
 0x3d2   :  { %2736 = vmatmul.mubr.f32.gmra.mrb[18].mxu1 %v21069_v8 }
 0x3d3   :  { %18551 = vmatpush1.bf16.msra.mxu1 %v21155_v43  ;;  %2741 = vmatprep.mubr.f32.mxu1 %v20562_v1 }
 0x3d6   :  { %2743 = vmatmul.mubr.f32.gmra.mrb[20].mxu1 %v21095_v0 }
 0x3d7   :  { %2748 = vmatprep.mubr.f32.mxu1 %v20562_v1 }
 0x3da   :  { %2750 = vmatmul.mubr.f32.gmra.mrb[22].mxu1 %v21128_v32 }
 0x3db   :  { %2828 = vmatprep.mubr.f32.mxu1 %v20562_v1 }
 0x3de   :  { %2830 = vmatmul.mubr.f32.vlgmr.msra.gmra.mrb[16].mxu1 %v21058_v3  ;;  %v18302_v3 = vld [vmem:[%s24970_s2 + $0x1] ss:$8 sm:$0x3] }
 0x3df   :  { %2835 = vmatprep.mubr.f32.mxu1 %v20562_v1  ;;  %v2865_v7 = vrot.slane %v18302_v3, %v20877_v41  ;;  %v2869_v17 = vrot.slane %v18302_v3, %v20884_v59 }
 0x3e1   :  { %v2872_v2 = vmul.f32 %v2865_v7, %v21064_v22  ;;  %v2873_v23 = vmul.f32 %v2869_v17, %v21072_v58  ;;  %v2874_v43 = vmul.f32 %v2865_v7, %v21082_v55  ;;  %v2875_v14 = vmul.f32 %v2869_v17, %v21093_v63  ;;  %v18307_v22 = vld [vmem:[%s24968_s0 + $0x58] sm:$0xff] }
 0x3e2   :  { %2837 = vmatmul.mubr.f32.gmra.mrb[18].mxu1 %v21069_v8  ;;  %v2913_v8 = vsel %vm34_vm0, %v18304_v40, 0  ;;  %v2876_v58 = vmul.f32 %v2865_v7, %v21108_v12  ;;  %v21276_v55 = vand.u32 4294901760, %v2919_v28  ;;  %v2877_v63 = vmul.f32 %v2869_v17, %v21119_v27 }
 0x3e3   :  { %2842 = vmatprep.mubr.f32.mxu1 %v20562_v1  ;;  %v2878_v54 = vmul.f32 %v2865_v7, %v21142_v44  ;;  %v2879_v5 = vmul.f32 %v2869_v17, %v21151_v25  ;;  %v21284_v9 = vsel %vm34_vm0, %v18307_v22, 0  ;;  %v3010_v44 = vand.u32 4294901760, %v21270_v42 }
 0x3e4   :  { %v21296_v30 = vsub.f32 %v2919_v28, %v21276_v55  ;;  %v21300_v29 = vand.u32 4294901760, %v21284_v9 }
 0x3e6   :  { %2844 = vmatmul.mubr.f32.gmra.mrb[20].mxu1 %v21095_v0  ;;  %v21248_v0 = vand.u32 4294901760, %v2913_v8 }
 0x3e7   :  { %2849 = vmatprep.mubr.f32.mxu1 %v20562_v1 }
 0x3e8   :  { %v21259_v46 = vsub.f32 %v2913_v8, %v21248_v0 }
 0x3ea   :  { %2851 = vmatmul.mubr.f32.gmra.mrb[22].mxu1 %v21128_v32  ;;  %v2888_v32 = vrot.slane %v18303_v56, %v20884_v59  ;;  %v2999_v11 = vand.u32 4294901760, %v21259_v46 }
 0x3eb   :  { %3703 = vmatprep.mubr.f32.mxu1 %v20562_v1 }
 0x3ec   :  { %v21291_v27 = vsub.f32 %v21259_v46, %v2999_v11 }
 0x4b1   :  { %v2831_v37 = vpop.f32.mrb[16].mxu1 }
 0x4b2   :  { %v2891_v15 = vmul.f32 %v2884_v4, %v2831_v37  ;;  %v2833_v20 = vpop.f32.mrb[17].mxu1 }
 0x4b3   :  { %v2892_v24 = vmul.f32 %v2888_v32, %v2833_v20 }
 0x4b4   :  { %v2899_v33 = vadd.f32 %v2891_v15, %v2872_v2 }
 0x4b5   :  { %v2900_v38 = vadd.f32 %v2892_v24, %v2873_v23  ;;  %v2838_v6 = vpop.f32.mrb[18].mxu1 }
 0x4b6   :  { %v2926_v50 = vand.u32 4294901760, %v2899_v33  ;;  %v2893_v51 = vmul.f32 %v2884_v4, %v2838_v6  ;;  %v2840_v53 = vpop.f32.mrb[19].mxu1 }
 0x4b7   :  { %v2924_v57 = vand.u32 4294901760, %v2900_v38  ;;  %v2894_v60 = vmul.f32 %v2888_v32, %v2840_v53 }
 0x4b8   :  { %v21281_v49 = vsub.f32 %v2899_v33, %v2926_v50  ;;  %v2901_v52 = vadd.f32 %v2893_v51, %v2874_v43 }
 0x4b9   :  { %v21286_v12 = vsub.f32 %v2900_v38, %v2924_v57  ;;  %v2902_v62 = vadd.f32 %v2894_v60, %v2875_v14  ;;  %v2845_v13 = vpop.f32.mrb[20].mxu1  ;;  %v3001_v60 = vand.u32 4294901760, %v21291_v27 }
 0x4ba   :  { %v3049_v21 = vand.u32 4294901760, %v21281_v49  ;;  %v2930_v25 = vand.u32 4294901760, %v2901_v52  ;;  %v2895_v26 = vmul.f32 %v2884_v4, %v2845_v13  ;;  %v2847_v18 = vpop.f32.mrb[21].mxu1 }
 0x4bb   :  { %v2928_v36 = vand.u32 4294901760, %v2902_v62  ;;  %v2896_v31 = vmul.f32 %v2888_v32, %v2847_v18  ;;  %v3043_v10 = vand.u32 4294901760, %v21286_v12 }
 0x4bc   :  { %v3050_v34 = vsub.f32 %v21281_v49, %v3049_v21  ;;  %v21303_v39 = vpack.c.bf16 %v2930_v25, %v2926_v50  ;;  %v21305_v45 = vsub.f32 %v2901_v52, %v2930_v25  ;;  %v2903_v48 = vadd.f32 %v2895_v26, %v2876_v58 }
 0x4bd   :  { %v21307_v61 = vsub.f32 %v2902_v62, %v2928_v36  ;;  %v2904_v40 = vadd.f32 %v2896_v31, %v2877_v63  ;;  %v2852_v3 = vpop.f32.mrb[22].mxu1  ;;  %v21309_v8 = vpack.c.bf16 %v2928_v36, %v2924_v57  ;;  %v3044_v56 = vsub.f32 %v21286_v12, %v3043_v10 }
 0x4be   :  { %v3061_v16 = vand.u32 4294901760, %v21305_v45  ;;  %v2934_v7 = vand.u32 4294901760, %v2903_v48  ;;  %v2897_v19 = vmul.f32 %v2884_v4, %v2852_v3  ;;  %v2854_v17 = vpop.f32.mrb[23].mxu1  ;;  %v3051_v35 = vand.u32 4294901760, %v3050_v34 }
 0x4bf   :  { %v2932_v37 = vand.u32 4294901760, %v2904_v40  ;;  %v2898_v2 = vmul.f32 %v2888_v32, %v2854_v17  ;;  %18553 = vmatprep.subr.bf16.mxu0 %v21309_v8  ;;  %v3045_v15 = vand.u32 4294901760, %v3044_v56  ;;  %v3055_v20 = vand.u32 4294901760, %v21307_v61 }
 0x4c0   :  { %v3062_v23 = vsub.f32 %v21305_v45, %v3061_v16  ;;  %v21316_v24 = vsub.f32 %v2903_v48, %v2934_v7  ;;  %v2905_v28 = vadd.f32 %v2897_v19, %v2878_v54  ;;  %18555 = vmatpush1.bf16.msra.mxu0 %v21303_v39  ;;  %v18568_v43 = vpack.c.bf16 %v21307_v61, %v21286_v12 }
 0x4c1   :  { %v3066_v4 = vsub.f32 %v2904_v40, %v2932_v37  ;;  %v2906_v33 = vadd.f32 %v2898_v2, %v2879_v5  ;;  %v3056_v14 = vsub.f32 %v21307_v61, %v3055_v20  ;;  %v18570_v32 = vpack.c.bf16 %v21305_v45, %v21281_v49 }
 0x4c2   :  { %v3073_v38 = vand.u32 4294901760, %v21316_v24  ;;  %v2938_v6 = vand.u32 4294901760, %v2905_v28  ;;  %v3063_v22 = vand.u32 4294901760, %v3062_v23  ;;  %v21325_v58 = vpack.c.bf16 %v3055_v20, %v3043_v10 }
 0x4c3   :  { %v2936_v50 = vand.u32 4294901760, %v2906_v33  ;;  %v3057_v51 = vand.u32 4294901760, %v3056_v14  ;;  %v3067_v53 = vand.u32 4294901760, %v3066_v4  ;;  %v21327_v63 = vpack.c.bf16 %v3061_v16, %v3049_v21 }
 0x4c4   :  { %v21329_v54 = vpack.c.bf16 %v2938_v6, %v2934_v7  ;;  %v3084_v57 = vsub.f32 %v2905_v28, %v2938_v6  ;;  %v18562_v5 = vpack.c.bf16 %v3063_v22, %v3051_v35  ;;  %v3011_v62 = vsub.f32 %v21270_v42, %v3010_v44 }
 0x4c5   :  { %v3078_v52 = vsub.f32 %v2906_v33, %v2936_v50  ;;  %v21332_v12 = vpack.c.bf16 %v2936_v50, %v2932_v37  ;;  %v18560_v49 = vpack.c.bf16 %v3057_v51, %v3045_v15  ;;  %v3074_v13 = vsub.f32 %v21316_v24, %v3073_v38  ;;  %v18311_v33 = vld [vmem:[%s24969_s1 + $0x58] sm:$0xff] }
 0x4c6   :  { %v3085_v25 = vand.u32 4294901760, %v3084_v57  ;;  %v3021_v21 = vand.u32 4294901760, %v21296_v30  ;;  %v18574_v26 = vpack.c.bf16 %v3084_v57, %v21316_v24  ;;  %v3068_v18 = vsub.f32 %v3066_v4, %v3067_v53 }
 0x4c7   :  { %18557 = vmatprep.subr.bf16.mxu0 %v21332_v12  ;;  %v3079_v27 = vand.u32 4294901760, %v3078_v52  ;;  %v21343_v36 = vsub.f32 %v21284_v9, %v21300_v29  ;;  %v18572_v31 = vpack.c.bf16 %v3078_v52, %v3066_v4  ;;  %v3012_v61 = vand.u32 4294901760, %v3011_v62 }
 0x4c8   :  { %v3086_v10 = vsub.f32 %v3084_v57, %v3085_v25  ;;  %18559 = vmatpush1.bf16.msra.mxu0 %v21329_v54  ;;  %v18590_v34 = vpack.c.bf16 %v3085_v25, %v3073_v38  ;;  %v3075_v40 = vand.u32 4294901760, %v3074_v13  ;;  %v3069_v56 = vand.u32 4294901760, %v3068_v18 }
 0x4c9   :  { %18561 = vmatprep.subr.bf16.mxu0 %v18560_v49  ;;  %v3080_v45 = vsub.f32 %v3078_v52, %v3079_v27  ;;  %v18588_v48 = vpack.c.bf16 %v3079_v27, %v3067_v53  ;;  %v3022_v7 = vsub.f32 %v21296_v30, %v3021_v21  ;;  %v3032_v9 = vand.u32 4294901760, %v21343_v36 }
 0x4ca   :  { %v3087_v3 = vand.u32 4294901760, %v3086_v10  ;;  %v3629_v53 = vsel %vm34_vm0, %v18311_v33, 0 }
 0x4cb   :  { %3002 = vmatmul.mubr.f32.vlgmr.msra.gmra.mrb[16].mxu0 %v3001_v60  ;;  %v3081_v16 = vand.u32 4294901760, %v3080_v45  ;;  %v3023_v35 = vand.u32 4294901760, %v3022_v7  ;;  %v3033_v37 = vsub.f32 %v21343_v36, %v3032_v9  ;;  %v21484_v18 = vand.u32 4294901760, %v3629_v53 }
 0x4cc   :  { %18563 = vmatpush1.bf16.msra.mxu0 %v18562_v5  ;;  %3007 = vmatprep.mubr.f32.mxu0 %v20562_v1  ;;  %v18566_v19 = vpack.c.bf16 %v3087_v3, %v3075_v40 }
 0x4cd   :  { %v18564_v17 = vpack.c.bf16 %v3081_v16, %v3069_v56  ;;  %v3034_v2 = vand.u32 4294901760, %v3033_v37 }
 0x4cf   :  { %3013 = vmatmul.mubr.f32.gmra.mrb[18].mxu0 %v3012_v61  ;;  %18565 = vmatprep.subr.bf16.mxu0 %v18564_v17 }
 0x4d0   :  { %18567 = vmatpush1.bf16.msra.mxu0 %v18566_v19  ;;  %3018 = vmatprep.mubr.f32.mxu0 %v20562_v1 }
 0x4d1   :  { %18569 = vmatprep.subr.bf16.mxu0 %v18568_v43 }
 0x4d3   :  { %3024 = vmatmul.mubr.f32.gmra.mrb[20].mxu0 %v3023_v35 }
 0x4d4   :  { %3029 = vmatprep.mubr.f32.mxu0 %v20562_v1 }
 0x4d7   :  { %3035 = vmatmul.mubr.f32.gmra.mrb[22].mxu0 %v3034_v2 }
 0x4d8   :  { %3145 = vmatprep.mubr.f32.mxu0 %v20562_v1 }
 0x4db   :  { %3147 = vmatmul.mubr.f32.vlgmr.msra.gmra.mrb[16].mxu0 %v21248_v0 }
 0x4dc   :  { %18571 = vmatpush1.bf16.msra.mxu0 %v18570_v32  ;;  %3152 = vmatprep.mubr.f32.mxu0 %v20562_v1 }
 0x4dd   :  { %18573 = vmatprep.subr.bf16.mxu0 %v18572_v31 }
 0x4df   :  { %3154 = vmatmul.mubr.f32.gmra.mrb[18].mxu0 %v21261_v47 }
 0x4e0   :  { %18575 = vmatpush1.bf16.msra.mxu0 %v18574_v26  ;;  %3159 = vmatprep.mubr.f32.mxu0 %v20562_v1 }
 0x4e1   :  { %18577 = vmatprep.subr.bf16.mxu0 %v21309_v8 }
 0x4e3   :  { %3161 = vmatmul.mubr.f32.gmra.mrb[20].mxu0 %v21276_v55 }
 0x4e4   :  { %3166 = vmatprep.mubr.f32.mxu0 %v20562_v1 }
 0x4e7   :  { %3168 = vmatmul.mubr.f32.gmra.mrb[22].mxu0 %v21300_v29 }
 0x4e8   :  { %3254 = vmatprep.mubr.f32.mxu0 %v20562_v1 }
 0x4eb   :  { %3257 = vmatmul.mubr.f32.vlgmr.msra.gmra.mrb[16].mxu0 %v21259_v46  ;;  %v18308_v46 = vld [vmem:[%s24969_s1 + $0x40] sm:$0xff] }
 0x4ec   :  { %18579 = vmatpush1.bf16.msra.mxu0 %v21303_v39  ;;  %3262 = vmatprep.mubr.f32.mxu0 %v20562_v1 }
 0x4ed   :  { %18581 = vmatprep.subr.bf16.mxu0 %v21332_v12 }
 0x4ef   :  { %3265 = vmatmul.mubr.f32.gmra.mrb[18].mxu0 %v21270_v42 }
 0x4f0   :  { %18583 = vmatpush1.bf16.msra.mxu0 %v21329_v54  ;;  %3270 = vmatprep.mubr.f32.mxu0 %v20562_v1 }
 0x4f1   :  { %18585 = vmatprep.subr.bf16.mxu0 %v21325_v58 }
 0x4f3   :  { %3273 = vmatmul.mubr.f32.gmra.mrb[20].mxu0 %v21296_v30 }
 0x4f4   :  { %3278 = vmatprep.mubr.f32.mxu0 %v20562_v1 }
 0x4f7   :  { %3281 = vmatmul.mubr.f32.gmra.mrb[22].mxu0 %v21343_v36 }
 0x4f8   :  { %3359 = vmatprep.mubr.f32.mxu0 %v20562_v1 }
 0x4fb   :  { %3363 = vmatmul.mubr.f32.vlgmr.msra.gmra.mrb[16].mxu0 %v2999_v11 }
 0x4fc   :  { %18587 = vmatpush1.bf16.msra.mxu0 %v21327_v63  ;;  %3368 = vmatprep.mubr.f32.mxu0 %v20562_v1 }
 0x4fd   :  { %18589 = vmatprep.subr.bf16.mxu0 %v18588_v48 }
 0x4ff   :  { %3372 = vmatmul.mubr.f32.gmra.mrb[18].mxu0 %v3010_v44 }
 0x500   :  { %18591 = vmatpush1.bf16.msra.mxu0 %v18590_v34  ;;  %3377 = vmatprep.mubr.f32.mxu0 %v20562_v1 }
 0x501   :  { %18593 = vmatprep.subr.bf16.mxu0 %v21309_v8 }
 0x503   :  { %3381 = vmatmul.mubr.f32.gmra.mrb[20].mxu0 %v3021_v21 }
 0x504   :  { %3386 = vmatprep.mubr.f32.mxu0 %v20562_v1 }
 0x507   :  { %3390 = vmatmul.mubr.f32.gmra.mrb[22].mxu0 %v3032_v9 }
 0x508   :  { %3484 = vmatprep.mubr.f32.mxu0 %v20562_v1 }
 0x50b   :  { %3486 = vmatmul.mubr.f32.vlgmr.msra.gmra.mrb[16].mxu0 %v21248_v0 }
 0x50c   :  { %18595 = vmatpush1.bf16.msra.mxu0 %v21303_v39  ;;  %3491 = vmatprep.mubr.f32.mxu0 %v20562_v1 }
 0x50d   :  { %18597 = vmatprep.subr.bf16.mxu0 %v21332_v12 }
 0x50f   :  { %3493 = vmatmul.mubr.f32.gmra.mrb[18].mxu0 %v21261_v47 }
 0x510   :  { %18599 = vmatpush1.bf16.msra.mxu0 %v21329_v54  ;;  %3498 = vmatprep.mubr.f32.mxu0 %v20562_v1 }
 0x513   :  { %3500 = vmatmul.mubr.f32.gmra.mrb[20].mxu0 %v21276_v55 }
 0x514   :  { %3505 = vmatprep.mubr.f32.mxu0 %v20562_v1 }
 0x517   :  { %3507 = vmatmul.mubr.f32.gmra.mrb[22].mxu0 %v21300_v29 }
 0x518   :  { %3585 = vmatprep.mubr.f32.mxu0 %v20562_v1 }
 0x51b   :  { %3587 = vmatmul.mubr.f32.vlgmr.msra.gmra.mrb[16].mxu0 %v21248_v0  ;;  %v3620_v0 = vsel %vm34_vm0, %v18308_v46, 0 }
 0x51c   :  { %3592 = vmatprep.mubr.f32.mxu0 %v20562_v1  ;;  %v21414_v11 = vand.u32 4294901760, %v3620_v0 }
 0x51e   :  { %v21423_v30 = vsub.f32 %v3620_v0, %v21414_v11 }
 0x51f   :  { %3594 = vmatmul.mubr.f32.gmra.mrb[18].mxu0 %v21261_v47  ;;  %v18309_v47 = vld [vmem:[%s24969_s1 + $0x48] sm:$0xff] }
 0x520   :  { %3599 = vmatprep.mubr.f32.mxu0 %v20562_v1  ;;  %v3623_v42 = vsel %vm34_vm0, %v18309_v47, 0  ;;  %v3706_v43 = vand.u32 4294901760, %v21423_v30 }
 0x522   :  { %v3707_v60 = vsub.f32 %v21423_v30, %v3706_v43 }
 0x523   :  { %3601 = vmatmul.mubr.f32.gmra.mrb[20].mxu0 %v21276_v55  ;;  %v18310_v55 = vld [vmem:[%s24969_s1 + $0x50] sm:$0xff] }
 0x524   :  { %3606 = vmatprep.mubr.f32.mxu0 %v20562_v1  ;;  %v3626_v20 = vsel %vm34_vm0, %v18310_v55, 0  ;;  %v3708_v0 = vand.u32 4294901760, %v3707_v60 }
 0x525   :  { %v21451_v6 = vand.u32 4294901760, %v3626_v20 }
 0x527   :  { %3608 = vmatmul.mubr.f32.gmra.mrb[22].mxu0 %v21300_v29  ;;  %v21425_v29 = vand.u32 4294901760, %v3623_v42  ;;  %v21478_v13 = vsub.f32 %v3626_v20, %v21451_v6 }
 0x528   :  { %4460 = vmatprep.mubr.f32.mxu0 %v20562_v1 }
 0x529   :  { %v21442_v4 = vsub.f32 %v3623_v42, %v21425_v29 }
 0x52b   :  { %v3717_v5 = vand.u32 4294901760, %v21442_v4 }
 0x5ee   :  { %v21420_v44 = vpop.f32.mrb[16].mxu0 }
 0x5ef   :  { %v3633_v39 = vand.u32 4294901760, %v21420_v44  ;;  %v21428_v8 = vpop.f32.mrb[17].mxu0 }
 0x5f0   :  { %v3631_v15 = vand.u32 4294901760, %v21428_v8 }
 0x5f1   :  { %v21433_v23 = vsub.f32 %v21420_v44, %v3633_v39 }
 0x5f2   :  { %v21436_v24 = vsub.f32 %v21428_v8, %v3631_v15  ;;  %v21438_v28 = vpop.f32.mrb[18].mxu0 }
 0x5f3   :  { %v3756_v14 = vand.u32 4294901760, %v21433_v23  ;;  %v3637_v32 = vand.u32 4294901760, %v21438_v28  ;;  %v21449_v38 = vpop.f32.mrb[19].mxu0 }
 0x5f4   :  { %v3750_v22 = vand.u32 4294901760, %v21436_v24  ;;  %v3635_v58 = vand.u32 4294901760, %v21449_v38 }
 0x5f5   :  { %v21455_v50 = vpack.c.bf16 %v3637_v32, %v3633_v39  ;;  %v21458_v51 = vsub.f32 %v21438_v28, %v3637_v32  ;;  %v3757_v52 = vsub.f32 %v21433_v23, %v3756_v14 }
 0x5f6   :  { %v21462_v63 = vsub.f32 %v21449_v38, %v3635_v58  ;;  %v21464_v54 = vpop.f32.mrb[20].mxu0  ;;  %v21466_v57 = vpack.c.bf16 %v3635_v58, %v3631_v15  ;;  %v3751_v26 = vsub.f32 %v21436_v24, %v3750_v22  ;;  %v3718_v15 = vsub.f32 %v21442_v4, %v3717_v5 }
 0x5f7   :  { %v3768_v12 = vand.u32 4294901760, %v21458_v51  ;;  %v3641_v49 = vand.u32 4294901760, %v21464_v54  ;;  %v21475_v62 = vpop.f32.mrb[21].mxu0  ;;  %v18618_v10 = vpack.c.bf16 %v21458_v51, %v21433_v23  ;;  %v3758_v3 = vand.u32 4294901760, %v3757_v52 }
 0x5f8   :  { %v3762_v25 = vand.u32 4294901760, %v21462_v63  ;;  %v3639_v21 = vand.u32 4294901760, %v21475_v62  ;;  %18601 = vmatprep.subr.bf16.mxu1 %v21466_v57  ;;  %v18616_v31 = vpack.c.bf16 %v21462_v63, %v21436_v24  ;;  %v3752_v35 = vand.u32 4294901760, %v3751_v26 }
 0x5f9   :  { %v3769_v27 = vsub.f32 %v21458_v51, %v3768_v12  ;;  %v21488_v36 = vsub.f32 %v21464_v54, %v3641_v49  ;;  %18603 = vmatpush1.bf16.msra.mxu1 %v21455_v50  ;;  %v21503_v40 = vpack.c.bf16 %v3768_v12, %v3756_v14  ;;  %v3728_v24 = vand.u32 4294901760, %v21478_v13 }
 0x5fa   :  { %v21496_v34 = vsub.f32 %v21475_v62, %v3639_v21  ;;  %v21498_v45 = vpop.f32.mrb[22].mxu0  ;;  %v3763_v48 = vsub.f32 %v21462_v63, %v3762_v25  ;;  %v21501_v61 = vpack.c.bf16 %v3762_v25, %v3750_v22  ;;  %v21526_v22 = vsub.f32 %v3629_v53, %v21484_v18 }
 0x5fb   :  { %v3770_v56 = vand.u32 4294901760, %v3769_v27  ;;  %v3780_v16 = vand.u32 4294901760, %v21488_v36  ;;  %v3645_v7 = vand.u32 4294901760, %v21498_v45  ;;  %v21507_v9 = vpop.f32.mrb[23].mxu0  ;;  %v3719_v25 = vand.u32 4294901760, %v3718_v15 }
 0x5fc   :  { %v3774_v19 = vand.u32 4294901760, %v21496_v34  ;;  %v3643_v17 = vand.u32 4294901760, %v21507_v9  ;;  %v3764_v37 = vand.u32 4294901760, %v3763_v48  ;;  %v3729_v53 = vsub.f32 %v21478_v13, %v3728_v24 }
 0x5fd   :  { %v21511_v2 = vpack.c.bf16 %v3645_v7, %v3641_v49  ;;  %v3791_v46 = vsub.f32 %v21498_v45, %v3645_v7  ;;  %v18610_v47 = vpack.c.bf16 %v3770_v56, %v3758_v3  ;;  %v3781_v20 = vsub.f32 %v21488_v36, %v3780_v16 }
 0x5fe   :  { %v3785_v42 = vsub.f32 %v21507_v9, %v3643_v17  ;;  %v21515_v55 = vpack.c.bf16 %v3643_v17, %v3639_v21  ;;  %v18608_v39 = vpack.c.bf16 %v3764_v37, %v3752_v35  ;;  %v3775_v32 = vsub.f32 %v21496_v34, %v3774_v19 }
 0x5ff   :  { %v3792_v23 = vand.u32 4294901760, %v3791_v46  ;;  %v18622_v33 = vpack.c.bf16 %v3791_v46, %v21488_v36  ;;  %v3782_v12 = vand.u32 4294901760, %v3781_v20  ;;  %v3739_v27 = vand.u32 4294901760, %v21526_v22 }
 0x600   :  { %v3786_v14 = vand.u32 4294901760, %v3785_v42  ;;  %18605 = vmatprep.subr.bf16.mxu1 %v21515_v55  ;;  %v18620_v58 = vpack.c.bf16 %v3785_v42, %v21496_v34  ;;  %v3776_v21 = vand.u32 4294901760, %v3775_v32  ;;  %v3730_v48 = vand.u32 4294901760, %v3729_v53 }
 0x601   :  { %v3793_v51 = vsub.f32 %v3791_v46, %v3792_v23  ;;  %18607 = vmatpush1.bf16.msra.mxu1 %v21511_v2  ;;  %v18638_v63 = vpack.c.bf16 %v3792_v23, %v3780_v16  ;;  %v3740_v3 = vsub.f32 %v21526_v22, %v3739_v27 }
 0x602   :  { %18609 = vmatprep.subr.bf16.mxu1 %v18608_v39  ;;  %v3787_v60 = vsub.f32 %v3785_v42, %v3786_v14  ;;  %v18636_v52 = vpack.c.bf16 %v3786_v14, %v3774_v19 }
 0x603   :  { %v3794_v49 = vand.u32 4294901760, %v3793_v51  ;;  %v3741_v56 = vand.u32 4294901760, %v3740_v3 }
 0x604   :  { %3709 = vmatmul.mubr.f32.vlgmr.msra.gmra.mrb[24].mxu1 %v3708_v0  ;;  %v3788_v26 = vand.u32 4294901760, %v3787_v60 }
 0x605   :  { %18611 = vmatpush1.bf16.msra.mxu1 %v18610_v47  ;;  %3714 = vmatprep.mubr.f32.mxu1 %v20562_v1  ;;  %v18614_v36 = vpack.c.bf16 %v3794_v49, %v3782_v12 }
 0x606   :  { %v18612_v34 = vpack.c.bf16 %v3788_v26, %v3776_v21 }
 0x608   :  { %3720 = vmatmul.mubr.f32.gmra.mrb[26].mxu1 %v3719_v25  ;;  %18613 = vmatprep.subr.bf16.mxu1 %v18612_v34 }
 0x609   :  { %18615 = vmatpush1.bf16.msra.mxu1 %v18614_v36  ;;  %3725 = vmatprep.mubr.f32.mxu1 %v20562_v1 }
 0x60a   :  { %18617 = vmatprep.subr.bf16.mxu1 %v18616_v31  ;;  %v18316_v31 = vld [vmem:[%s24968_s0 + $0x70] sm:$0xff] }
 0x60b   :  { %v4383_v37 = vsel %vm34_vm0, %v18316_v31, 0 }
 0x60c   :  { %3731 = vmatmul.mubr.f32.gmra.mrb[28].mxu1 %v3730_v48 }
 0x60d   :  { %3736 = vmatprep.mubr.f32.mxu1 %v20562_v1 }
 0x610   :  { %3742 = vmatmul.mubr.f32.gmra.mrb[30].mxu1 %v3741_v56 }
 0x611   :  { %3852 = vmatprep.mubr.f32.mxu1 %v20562_v1 }
 0x614   :  { %3854 = vmatmul.mubr.f32.vlgmr.msra.gmra.mrb[24].mxu1 %v21414_v11 }
 0x615   :  { %18619 = vmatpush1.bf16.msra.mxu1 %v18618_v10  ;;  %3859 = vmatprep.mubr.f32.mxu1 %v20562_v1 }
 0x616   :  { %18621 = vmatprep.subr.bf16.mxu1 %v18620_v58 }
 0x618   :  { %3861 = vmatmul.mubr.f32.gmra.mrb[26].mxu1 %v21425_v29 }
 0x619   :  { %18623 = vmatpush1.bf16.msra.mxu1 %v18622_v33  ;;  %3866 = vmatprep.mubr.f32.mxu1 %v20562_v1 }
 0x61a   :  { %18625 = vmatprep.subr.bf16.mxu1 %v21466_v57 }
 0x61c   :  { %3868 = vmatmul.mubr.f32.gmra.mrb[28].mxu1 %v21451_v6 }
 0x61d   :  { %3873 = vmatprep.mubr.f32.mxu1 %v20562_v1 }
 0x620   :  { %3875 = vmatmul.mubr.f32.gmra.mrb[30].mxu1 %v21484_v18 }
 0x621   :  { %3961 = vmatprep.mubr.f32.mxu1 %v20562_v1 }
 0x624   :  { %3964 = vmatmul.mubr.f32.vlgmr.msra.gmra.mrb[24].mxu1 %v21423_v30  ;;  %v18314_v30 = vld [vmem:[%s24968_s0 + $0x60] sm:$0xff] }
 0x625   :  { %18627 = vmatpush1.bf16.msra.mxu1 %v21455_v50  ;;  %3969 = vmatprep.mubr.f32.mxu1 %v20562_v1 }
 0x626   :  { %18629 = vmatprep.subr.bf16.mxu1 %v21515_v55 }
 0x628   :  { %3972 = vmatmul.mubr.f32.gmra.mrb[26].mxu1 %v21442_v4  ;;  %v18315_v4 = vld [vmem:[%s24968_s0 + $0x68] sm:$0xff] }
 0x629   :  { %18631 = vmatpush1.bf16.msra.mxu1 %v21511_v2  ;;  %3977 = vmatprep.mubr.f32.mxu1 %v20562_v1 }
 0x62a   :  { %18633 = vmatprep.subr.bf16.mxu1 %v21501_v61 }
 0x62c   :  { %3980 = vmatmul.mubr.f32.gmra.mrb[28].mxu1 %v21478_v13 }
 0x62d   :  { %3985 = vmatprep.mubr.f32.mxu1 %v20562_v1 }
 0x630   :  { %3988 = vmatmul.mubr.f32.gmra.mrb[30].mxu1 %v21526_v22 }
 0x631   :  { %4066 = vmatprep.mubr.f32.mxu1 %v20562_v1 }
 0x634   :  { %4070 = vmatmul.mubr.f32.vlgmr.msra.gmra.mrb[24].mxu1 %v3706_v43  ;;  %v18313_v43 = vld [vmem:[%s24971_s3 + $0x2] ss:$8 sm:$0x3] }
 0x635   :  { %18635 = vmatpush1.bf16.msra.mxu1 %v21503_v40  ;;  %4075 = vmatprep.mubr.f32.mxu1 %v20562_v1 }
 0x636   :  { %18637 = vmatprep.subr.bf16.mxu1 %v18636_v52 }
 0x638   :  { %4079 = vmatmul.mubr.f32.gmra.mrb[26].mxu1 %v3717_v5  ;;  %v4380_v5 = vsel %vm34_vm0, %v18315_v4, 0 }
 0x639   :  { %18639 = vmatpush1.bf16.msra.mxu1 %v18638_v63  ;;  %4084 = vmatprep.mubr.f32.mxu1 %v20562_v1  ;;  %v21617_v40 = vand.u32 4294901760, %v4380_v5 }
 0x63a   :  { %18641 = vmatprep.subr.bf16.mxu1 %v21466_v57  ;;  %v4348_v57 = vrot.slane %v18313_v43, %v20877_v41 }
 0x63b   :  { %v21626_v39 = vsub.f32 %v4380_v5, %v21617_v40 }
 0x63c   :  { %4088 = vmatmul.mubr.f32.gmra.mrb[28].mxu1 %v3728_v24 }
 0x63d   :  { %4093 = vmatprep.mubr.f32.mxu1 %v20562_v1 }
 0x640   :  { %4097 = vmatmul.mubr.f32.gmra.mrb[30].mxu1 %v3739_v27 }
 0x641   :  { %4191 = vmatprep.mubr.f32.mxu1 %v20562_v1 }
 0x644   :  { %4193 = vmatmul.mubr.f32.vlgmr.msra.gmra.mrb[24].mxu1 %v21414_v11 }
 0x645   :  { %18643 = vmatpush1.bf16.msra.mxu1 %v21455_v50  ;;  %4198 = vmatprep.mubr.f32.mxu1 %v20562_v1 }
 0x646   :  { %18645 = vmatprep.subr.bf16.mxu1 %v21515_v55 }
 0x648   :  { %4200 = vmatmul.mubr.f32.gmra.mrb[26].mxu1 %v21425_v29 }
 0x649   :  { %18647 = vmatpush1.bf16.msra.mxu1 %v21511_v2  ;;  %4205 = vmatprep.mubr.f32.mxu1 %v20562_v1 }
 0x64c   :  { %4207 = vmatmul.mubr.f32.gmra.mrb[28].mxu1 %v21451_v6 }
 0x64d   :  { %4212 = vmatprep.mubr.f32.mxu1 %v20562_v1 }
 0x650   :  { %4214 = vmatmul.mubr.f32.gmra.mrb[30].mxu1 %v21484_v18 }
 0x651   :  { %4292 = vmatprep.mubr.f32.mxu1 %v20562_v1 }
 0x654   :  { %4294 = vmatmul.mubr.f32.vlgmr.msra.gmra.mrb[24].mxu1 %v21414_v11  ;;  %v18312_v11 = vld [vmem:[%s24970_s2 + $0x2] ss:$8 sm:$0x3] }
 0x655   :  { %4299 = vmatprep.mubr.f32.mxu1 %v20562_v1  ;;  %v4329_v50 = vrot.slane %v18312_v11, %v20877_v41  ;;  %v4333_v13 = vrot.slane %v18312_v11, %v20884_v59 }
 0x657   :  { %v4336_v16 = vmul.f32 %v4329_v50, %v21420_v44  ;;  %v4337_v17 = vmul.f32 %v4333_v13, %v21428_v8  ;;  %v4338_v2 = vmul.f32 %v4329_v50, %v21438_v28  ;;  %v4339_v0 = vmul.f32 %v4333_v13, %v21449_v38  ;;  %v18317_v44 = vld [vmem:[%s24968_s0 + $0x78] sm:$0xff] }
 0x658   :  { %4301 = vmatmul.mubr.f32.gmra.mrb[26].mxu1 %v21425_v29  ;;  %v4377_v29 = vsel %vm34_vm0, %v18314_v30, 0  ;;  %v4340_v8 = vmul.f32 %v4329_v50, %v21464_v54  ;;  %v21632_v28 = vand.u32 4294901760, %v4383_v37  ;;  %v4341_v38 = vmul.f32 %v4333_v13, %v21475_v62 }
 0x659   :  { %4306 = vmatprep.mubr.f32.mxu1 %v20562_v1  ;;  %v4342_v24 = vmul.f32 %v4329_v50, %v21498_v45  ;;  %v4343_v32 = vmul.f32 %v4333_v13, %v21507_v9  ;;  %v21640_v51 = vsel %vm34_vm0, %v18317_v44, 0  ;;  %v4474_v45 = vand.u32 4294901760, %v21626_v39 }
 0x65a   :  { %v21652_v25 = vsub.f32 %v4383_v37, %v21632_v28  ;;  %v21656_v27 = vand.u32 4294901760, %v21640_v51 }
 0x65c   :  { %4308 = vmatmul.mubr.f32.gmra.mrb[28].mxu1 %v21451_v6  ;;  %v21604_v6 = vand.u32 4294901760, %v4377_v29 }
 0x65d   :  { %4313 = vmatprep.mubr.f32.mxu1 %v20562_v1 }
 0x65e   :  { %v21615_v61 = vsub.f32 %v4377_v29, %v21604_v6 }
 0x660   :  { %4315 = vmatmul.mubr.f32.gmra.mrb[30].mxu1 %v21484_v18  ;;  %v4352_v18 = vrot.slane %v18313_v43, %v20884_v59  ;;  %v4463_v55 = vand.u32 4294901760, %v21615_v61 }
 0x661   :  { %5167 = vmatprep.mubr.f32.mxu1 %v20562_v1 }
 0x662   :  { %v21647_v62 = vsub.f32 %v21615_v61, %v4463_v55 }
 0x727   :  { %v4295_v10 = vpop.f32.mrb[24].mxu1 }
 0x728   :  { %v4355_v7 = vmul.f32 %v4348_v57, %v4295_v10  ;;  %v4297_v19 = vpop.f32.mrb[25].mxu1 }
 0x729   :  { %v4356_v35 = vmul.f32 %v4352_v18, %v4297_v19 }
 0x72a   :  { %v4363_v46 = vadd.f32 %v4355_v7, %v4336_v16 }
 0x72b   :  { %v4364_v47 = vadd.f32 %v4356_v35, %v4337_v17  ;;  %v4302_v42 = vpop.f32.mrb[26].mxu1 }
 0x72c   :  { %v4390_v15 = vand.u32 4294901760, %v4363_v46  ;;  %v4357_v20 = vmul.f32 %v4348_v57, %v4302_v42  ;;  %v4304_v23 = vpop.f32.mrb[27].mxu1 }
 0x72d   :  { %v4388_v33 = vand.u32 4294901760, %v4364_v47  ;;  %v4358_v14 = vmul.f32 %v4352_v18, %v4304_v23 }
 0x72e   :  { %v21637_v22 = vsub.f32 %v4363_v46, %v4390_v15  ;;  %v4365_v58 = vadd.f32 %v4357_v20, %v4338_v2 }
 0x72f   :  { %v21642_v54 = vsub.f32 %v4364_v47, %v4388_v33  ;;  %v4366_v63 = vadd.f32 %v4358_v14, %v4339_v0  ;;  %v4309_v60 = vpop.f32.mrb[28].mxu1  ;;  %v4465_v14 = vand.u32 4294901760, %v21647_v62 }
 0x730   :  { %v4513_v52 = vand.u32 4294901760, %v21637_v22  ;;  %v4394_v9 = vand.u32 4294901760, %v4365_v58  ;;  %v4359_v12 = vmul.f32 %v4348_v57, %v4309_v60  ;;  %v4311_v49 = vpop.f32.mrb[29].mxu1 }
 0x731   :  { %v4392_v21 = vand.u32 4294901760, %v4366_v63  ;;  %v4360_v26 = vmul.f32 %v4352_v18, %v4311_v49  ;;  %v4507_v53 = vand.u32 4294901760, %v21642_v54 }
 0x732   :  { %v4514_v36 = vsub.f32 %v21637_v22, %v4513_v52  ;;  %v21659_v34 = vpack.c.bf16 %v4394_v9, %v4390_v15  ;;  %v21661_v48 = vsub.f32 %v4365_v58, %v4394_v9  ;;  %v4367_v3 = vadd.f32 %v4359_v12, %v4340_v8 }
 0x733   :  { %v21663_v56 = vsub.f32 %v4366_v63, %v4392_v21  ;;  %v4368_v30 = vadd.f32 %v4360_v26, %v4341_v38  ;;  %v4316_v11 = vpop.f32.mrb[30].mxu1  ;;  %v21665_v29 = vpack.c.bf16 %v4392_v21, %v4388_v33  ;;  %v4508_v43 = vsub.f32 %v21642_v54, %v4507_v53 }
 0x734   :  { %v4525_v4 = vand.u32 4294901760, %v21661_v48  ;;  %v4398_v50 = vand.u32 4294901760, %v4367_v3  ;;  %v4361_v5 = vmul.f32 %v4348_v57, %v4316_v11  ;;  %v4318_v13 = vpop.f32.mrb[31].mxu1  ;;  %v4515_v31 = vand.u32 4294901760, %v4514_v36 }
 0x735   :  { %v4396_v10 = vand.u32 4294901760, %v4368_v30  ;;  %v4362_v16 = vmul.f32 %v4352_v18, %v4318_v13  ;;  %18649 = vmatprep.subr.bf16.mxu0 %v21665_v29  ;;  %v4509_v7 = vand.u32 4294901760, %v4508_v43  ;;  %v4519_v19 = vand.u32 4294901760, %v21663_v56 }
 0x736   :  { %v4526_v17 = vsub.f32 %v21661_v48, %v4525_v4  ;;  %v21672_v35 = vsub.f32 %v4367_v3, %v4398_v50  ;;  %v4369_v37 = vadd.f32 %v4361_v5, %v4342_v24  ;;  %18651 = vmatpush1.bf16.msra.mxu0 %v21659_v34  ;;  %v18664_v2 = vpack.c.bf16 %v21663_v56, %v21642_v54 }
 0x737   :  { %v4530_v57 = vsub.f32 %v4368_v30, %v4396_v10  ;;  %v4370_v46 = vadd.f32 %v4362_v16, %v4343_v32  ;;  %v4520_v0 = vsub.f32 %v21663_v56, %v4519_v19  ;;  %v18666_v18 = vpack.c.bf16 %v21661_v48, %v21637_v22 }
 0x738   :  { %v4537_v47 = vand.u32 4294901760, %v21672_v35  ;;  %v4402_v42 = vand.u32 4294901760, %v4369_v37  ;;  %v4527_v44 = vand.u32 4294901760, %v4526_v17  ;;  %v21681_v8 = vpack.c.bf16 %v4519_v19, %v4507_v53 }
 0x739   :  { %v4400_v15 = vand.u32 4294901760, %v4370_v46  ;;  %v4521_v20 = vand.u32 4294901760, %v4520_v0  ;;  %v4531_v23 = vand.u32 4294901760, %v4530_v57  ;;  %v21683_v38 = vpack.c.bf16 %v4525_v4, %v4513_v52 }
 0x73a   :  { %v21685_v24 = vpack.c.bf16 %v4402_v42, %v4398_v50  ;;  %v4548_v33 = vsub.f32 %v4369_v37, %v4402_v42  ;;  %v18658_v32 = vpack.c.bf16 %v4527_v44, %v4515_v31  ;;  %v4475_v63 = vsub.f32 %v21626_v39, %v4474_v45 }
 0x73b   :  { %v4542_v58 = vsub.f32 %v4370_v46, %v4400_v15  ;;  %v21688_v54 = vpack.c.bf16 %v4400_v15, %v4396_v10  ;;  %v18656_v22 = vpack.c.bf16 %v4521_v20, %v4509_v7  ;;  %v4538_v60 = vsub.f32 %v21672_v35, %v4537_v47  ;;  %v18321_v46 = vld [vmem:[%s24969_s1 + $0x78] sm:$0xff] }
 0x73c   :  { %v4549_v9 = vand.u32 4294901760, %v4548_v33  ;;  %v4485_v52 = vand.u32 4294901760, %v21652_v25  ;;  %v18670_v12 = vpack.c.bf16 %v4548_v33, %v21672_v35  ;;  %v4532_v49 = vsub.f32 %v4530_v57, %v4531_v23 }
 0x73d   :  { %18653 = vmatprep.subr.bf16.mxu0 %v21688_v54  ;;  %v4543_v62 = vand.u32 4294901760, %v4542_v58  ;;  %v21699_v21 = vsub.f32 %v21640_v51, %v21656_v27  ;;  %v18668_v26 = vpack.c.bf16 %v4542_v58, %v4530_v57  ;;  %v4476_v56 = vand.u32 4294901760, %v4475_v63 }
 0x73e   :  { %v4550_v53 = vsub.f32 %v4548_v33, %v4549_v9  ;;  %18655 = vmatpush1.bf16.msra.mxu0 %v21685_v24  ;;  %v18686_v36 = vpack.c.bf16 %v4549_v9, %v4537_v47  ;;  %v4539_v30 = vand.u32 4294901760, %v4538_v60  ;;  %v4533_v43 = vand.u32 4294901760, %v4532_v49 }
 0x73f   :  { %18657 = vmatprep.subr.bf16.mxu0 %v18656_v22  ;;  %v4544_v48 = vsub.f32 %v4542_v58, %v4543_v62  ;;  %v18684_v3 = vpack.c.bf16 %v4543_v62, %v4531_v23  ;;  %v4486_v50 = vsub.f32 %v21652_v25, %v4485_v52  ;;  %v4496_v51 = vand.u32 4294901760, %v21699_v21 }
 0x740   :  { %v4551_v11 = vand.u32 4294901760, %v4550_v53  ;;  %v5093_v23 = vsel %vm34_vm0, %v18321_v46, 0 }
 0x741   :  { %4466 = vmatmul.mubr.f32.vlgmr.msra.gmra.mrb[24].mxu0 %v4465_v14  ;;  %v4545_v4 = vand.u32 4294901760, %v4544_v48  ;;  %v4487_v31 = vand.u32 4294901760, %v4486_v50  ;;  %v4497_v10 = vsub.f32 %v21699_v21, %v4496_v51  ;;  %v21840_v49 = vand.u32 4294901760, %v5093_v23 }
 0x742   :  { %18659 = vmatpush1.bf16.msra.mxu0 %v18658_v32  ;;  %4471 = vmatprep.mubr.f32.mxu0 %v20562_v1  ;;  %v18662_v5 = vpack.c.bf16 %v4551_v11, %v4539_v30 }
 0x743   :  { %v18660_v13 = vpack.c.bf16 %v4545_v4, %v4533_v43  ;;  %v4498_v16 = vand.u32 4294901760, %v4497_v10 }
 0x745   :  { %4477 = vmatmul.mubr.f32.gmra.mrb[26].mxu0 %v4476_v56  ;;  %18661 = vmatprep.subr.bf16.mxu0 %v18660_v13 }
 0x746   :  { %18663 = vmatpush1.bf16.msra.mxu0 %v18662_v5  ;;  %4482 = vmatprep.mubr.f32.mxu0 %v20562_v1 }
 0x747   :  { %18665 = vmatprep.subr.bf16.mxu0 %v18664_v2 }
 0x749   :  { %4488 = vmatmul.mubr.f32.gmra.mrb[28].mxu0 %v4487_v31 }
 0x74a   :  { %4493 = vmatprep.mubr.f32.mxu0 %v20562_v1 }
 0x74d   :  { %4499 = vmatmul.mubr.f32.gmra.mrb[30].mxu0 %v4498_v16 }
 0x74e   :  { %4609 = vmatprep.mubr.f32.mxu0 %v20562_v1 }
 0x751   :  { %4611 = vmatmul.mubr.f32.vlgmr.msra.gmra.mrb[24].mxu0 %v21604_v6 }
 0x752   :  { %18667 = vmatpush1.bf16.msra.mxu0 %v18666_v18  ;;  %4616 = vmatprep.mubr.f32.mxu0 %v20562_v1 }
 0x753   :  { %18669 = vmatprep.subr.bf16.mxu0 %v18668_v26 }
 0x755   :  { %4618 = vmatmul.mubr.f32.gmra.mrb[26].mxu0 %v21617_v40 }
 0x756   :  { %18671 = vmatpush1.bf16.msra.mxu0 %v18670_v12  ;;  %4623 = vmatprep.mubr.f32.mxu0 %v20562_v1 }
 0x757   :  { %18673 = vmatprep.subr.bf16.mxu0 %v21665_v29 }
 0x759   :  { %4625 = vmatmul.mubr.f32.gmra.mrb[28].mxu0 %v21632_v28 }
 0x75a   :  { %4630 = vmatprep.mubr.f32.mxu0 %v20562_v1 }
 0x75d   :  { %4632 = vmatmul.mubr.f32.gmra.mrb[30].mxu0 %v21656_v27 }
 0x75e   :  { %4718 = vmatprep.mubr.f32.mxu0 %v20562_v1 }
 0x761   :  { %4721 = vmatmul.mubr.f32.vlgmr.msra.gmra.mrb[24].mxu0 %v21615_v61  ;;  %v18318_v61 = vld [vmem:[%s24969_s1 + $0x60] sm:$0xff] }
 0x762   :  { %18675 = vmatpush1.bf16.msra.mxu0 %v21659_v34  ;;  %4726 = vmatprep.mubr.f32.mxu0 %v20562_v1 }
 0x763   :  { %18677 = vmatprep.subr.bf16.mxu0 %v21688_v54 }
 0x765   :  { %4729 = vmatmul.mubr.f32.gmra.mrb[26].mxu0 %v21626_v39 }
 0x766   :  { %18679 = vmatpush1.bf16.msra.mxu0 %v21685_v24  ;;  %4734 = vmatprep.mubr.f32.mxu0 %v20562_v1 }
 0x767   :  { %18681 = vmatprep.subr.bf16.mxu0 %v21681_v8 }
 0x769   :  { %4737 = vmatmul.mubr.f32.gmra.mrb[28].mxu0 %v21652_v25 }
 0x76a   :  { %4742 = vmatprep.mubr.f32.mxu0 %v20562_v1 }
 0x76d   :  { %4745 = vmatmul.mubr.f32.gmra.mrb[30].mxu0 %v21699_v21 }
 0x76e   :  { %4823 = vmatprep.mubr.f32.mxu0 %v20562_v1 }
 0x771   :  { %4827 = vmatmul.mubr.f32.vlgmr.msra.gmra.mrb[24].mxu0 %v4463_v55 }
 0x772   :  { %18683 = vmatpush1.bf16.msra.mxu0 %v21683_v38  ;;  %4832 = vmatprep.mubr.f32.mxu0 %v20562_v1 }
 0x773   :  { %18685 = vmatprep.subr.bf16.mxu0 %v18684_v3 }
 0x775   :  { %4836 = vmatmul.mubr.f32.gmra.mrb[26].mxu0 %v4474_v45 }
 0x776   :  { %18687 = vmatpush1.bf16.msra.mxu0 %v18686_v36  ;;  %4841 = vmatprep.mubr.f32.mxu0 %v20562_v1 }
 0x777   :  { %18689 = vmatprep.subr.bf16.mxu0 %v21665_v29 }
 0x779   :  { %4845 = vmatmul.mubr.f32.gmra.mrb[28].mxu0 %v4485_v52 }
 0x77a   :  { %4850 = vmatprep.mubr.f32.mxu0 %v20562_v1 }
 0x77d   :  { %4854 = vmatmul.mubr.f32.gmra.mrb[30].mxu0 %v4496_v51 }
 0x77e   :  { %4948 = vmatprep.mubr.f32.mxu0 %v20562_v1 }
 0x781   :  { %4950 = vmatmul.mubr.f32.vlgmr.msra.gmra.mrb[24].mxu0 %v21604_v6 }
 0x782   :  { %18691 = vmatpush1.bf16.msra.mxu0 %v21659_v34  ;;  %4955 = vmatprep.mubr.f32.mxu0 %v20562_v1 }
 0x783   :  { %18693 = vmatprep.subr.bf16.mxu0 %v21688_v54 }
 0x785   :  { %4957 = vmatmul.mubr.f32.gmra.mrb[26].mxu0 %v21617_v40 }
 0x786   :  { %18695 = vmatpush1.bf16.msra.mxu0 %v21685_v24  ;;  %4962 = vmatprep.mubr.f32.mxu0 %v20562_v1 }
 0x789   :  { %4964 = vmatmul.mubr.f32.gmra.mrb[28].mxu0 %v21632_v28 }
 0x78a   :  { %4969 = vmatprep.mubr.f32.mxu0 %v20562_v1 }
 0x78d   :  { %4971 = vmatmul.mubr.f32.gmra.mrb[30].mxu0 %v21656_v27 }
 0x78e   :  { %5049 = vmatprep.mubr.f32.mxu0 %v20562_v1 }
 0x791   :  { %5051 = vmatmul.mubr.f32.vlgmr.msra.gmra.mrb[24].mxu0 %v21604_v6  ;;  %v5084_v6 = vsel %vm34_vm0, %v18318_v61, 0 }
 0x792   :  { %5056 = vmatprep.mubr.f32.mxu0 %v20562_v1  ;;  %v21770_v55 = vand.u32 4294901760, %v5084_v6 }
 0x794   :  { %v21779_v25 = vsub.f32 %v5084_v6, %v21770_v55 }
 0x795   :  { %5058 = vmatmul.mubr.f32.gmra.mrb[26].mxu0 %v21617_v40  ;;  %v18319_v40 = vld [vmem:[%s24969_s1 + $0x68] sm:$0xff] }
 0x796   :  { %5063 = vmatprep.mubr.f32.mxu0 %v20562_v1  ;;  %v5087_v39 = vsel %vm34_vm0, %v18319_v40, 0  ;;  %v5170_v2 = vand.u32 4294901760, %v21779_v25 }
 0x798   :  { %v5171_v14 = vsub.f32 %v21779_v25, %v5170_v2 }
 0x799   :  { %5065 = vmatmul.mubr.f32.gmra.mrb[28].mxu0 %v21632_v28  ;;  %v18320_v28 = vld [vmem:[%s24969_s1 + $0x70] sm:$0xff] }
 0x79a   :  { %5070 = vmatprep.mubr.f32.mxu0 %v20562_v1  ;;  %v5090_v19 = vsel %vm34_vm0, %v18320_v28, 0  ;;  %v5172_v6 = vand.u32 4294901760, %v5171_v14 }
 0x79b   :  { %v21807_v42 = vand.u32 4294901760, %v5090_v19 }
 0x79d   :  { %5072 = vmatmul.mubr.f32.gmra.mrb[30].mxu0 %v21656_v27  ;;  %v21781_v27 = vand.u32 4294901760, %v5087_v39  ;;  %v21834_v60 = vsub.f32 %v5090_v19, %v21807_v42 }
 0x79e   :  { %5924 = vmatprep.mubr.f32.mxu0 %v20562_v1 }
 0x79f   :  { %v21798_v57 = vsub.f32 %v5087_v39, %v21781_v27 }
 0x7a1   :  { %v5181_v32 = vand.u32 4294901760, %v21798_v57 }
 0x864   :  { %v21776_v45 = vpop.f32.mrb[24].mxu0 }
 0x865   :  { %v5097_v34 = vand.u32 4294901760, %v21776_v45  ;;  %v21784_v29 = vpop.f32.mrb[25].mxu0 }
 0x866   :  { %v5095_v7 = vand.u32 4294901760, %v21784_v29 }
 0x867   :  { %v21789_v17 = vsub.f32 %v21776_v45, %v5097_v34 }
 0x868   :  { %v21792_v35 = vsub.f32 %v21784_v29, %v5095_v7  ;;  %v21794_v37 = vpop.f32.mrb[26].mxu0 }
 0x869   :  { %v5220_v0 = vand.u32 4294901760, %v21789_v17  ;;  %v5101_v18 = vand.u32 4294901760, %v21794_v37  ;;  %v21805_v47 = vpop.f32.mrb[27].mxu0 }
 0x86a   :  { %v5214_v44 = vand.u32 4294901760, %v21792_v35  ;;  %v5099_v8 = vand.u32 4294901760, %v21805_v47 }
 0x86b   :  { %v21811_v15 = vpack.c.bf16 %v5101_v18, %v5097_v34  ;;  %v21814_v20 = vsub.f32 %v21794_v37, %v5101_v18  ;;  %v5221_v58 = vsub.f32 %v21789_v17, %v5220_v0 }
 0x86c   :  { %v21818_v38 = vsub.f32 %v21805_v47, %v5099_v8  ;;  %v21820_v24 = vpop.f32.mrb[28].mxu0  ;;  %v21822_v33 = vpack.c.bf16 %v5099_v8, %v5095_v7  ;;  %v5215_v12 = vsub.f32 %v21792_v35, %v5214_v44  ;;  %v5182_v7 = vsub.f32 %v21798_v57, %v5181_v32 }
 0x86d   :  { %v5232_v54 = vand.u32 4294901760, %v21814_v20  ;;  %v5105_v22 = vand.u32 4294901760, %v21820_v24  ;;  %v21831_v63 = vpop.f32.mrb[29].mxu0  ;;  %v18714_v53 = vpack.c.bf16 %v21814_v20, %v21789_v17  ;;  %v5222_v11 = vand.u32 4294901760, %v5221_v58 }
 0x86e   :  { %v5226_v9 = vand.u32 4294901760, %v21818_v38  ;;  %v5103_v52 = vand.u32 4294901760, %v21831_v63  ;;  %18697 = vmatprep.subr.bf16.mxu1 %v21822_v33  ;;  %v18712_v26 = vpack.c.bf16 %v21818_v38, %v21792_v35  ;;  %v5216_v31 = vand.u32 4294901760, %v5215_v12 }
 0x86f   :  { %v5233_v62 = vsub.f32 %v21814_v20, %v5232_v54  ;;  %v21844_v21 = vsub.f32 %v21820_v24, %v5105_v22  ;;  %18699 = vmatpush1.bf16.msra.mxu1 %v21811_v15  ;;  %v21859_v30 = vpack.c.bf16 %v5232_v54, %v5220_v0  ;;  %v5192_v35 = vand.u32 4294901760, %v21834_v60 }
 0x870   :  { %v21852_v36 = vsub.f32 %v21831_v63, %v5103_v52  ;;  %v21854_v48 = vpop.f32.mrb[30].mxu0  ;;  %v5227_v3 = vsub.f32 %v21818_v38, %v5226_v9  ;;  %v21857_v56 = vpack.c.bf16 %v5226_v9, %v5214_v44  ;;  %v21882_v44 = vsub.f32 %v5093_v23, %v21840_v49 }
 0x871   :  { %v5234_v43 = vand.u32 4294901760, %v5233_v62  ;;  %v5244_v4 = vand.u32 4294901760, %v21844_v21  ;;  %v5109_v50 = vand.u32 4294901760, %v21854_v48  ;;  %v21863_v51 = vpop.f32.mrb[31].mxu0  ;;  %v5183_v9 = vand.u32 4294901760, %v5182_v7 }
 0x872   :  { %v5238_v5 = vand.u32 4294901760, %v21852_v36  ;;  %v5107_v13 = vand.u32 4294901760, %v21863_v51  ;;  %v5228_v10 = vand.u32 4294901760, %v5227_v3  ;;  %v5193_v23 = vsub.f32 %v21834_v60, %v5192_v35 }
 0x873   :  { %v21867_v16 = vpack.c.bf16 %v5109_v50, %v5105_v22  ;;  %v5255_v61 = vsub.f32 %v21854_v48, %v5109_v50  ;;  %v18706_v40 = vpack.c.bf16 %v5234_v43, %v5222_v11  ;;  %v5245_v19 = vsub.f32 %v21844_v21, %v5244_v4 }
 0x874   :  { %v5249_v39 = vsub.f32 %v21863_v51, %v5107_v13  ;;  %v21871_v28 = vpack.c.bf16 %v5107_v13, %v5103_v52  ;;  %v18704_v34 = vpack.c.bf16 %v5228_v10, %v5216_v31  ;;  %v5239_v18 = vsub.f32 %v21852_v36, %v5238_v5 }
 0x875   :  { %v5256_v17 = vand.u32 4294901760, %v5255_v61  ;;  %v18718_v46 = vpack.c.bf16 %v5255_v61, %v21844_v21  ;;  %v5246_v54 = vand.u32 4294901760, %v5245_v19  ;;  %v5203_v62 = vand.u32 4294901760, %v21882_v44 }
 0x876   :  { %v5250_v0 = vand.u32 4294901760, %v5249_v39  ;;  %18701 = vmatprep.subr.bf16.mxu1 %v21871_v28  ;;  %v18716_v8 = vpack.c.bf16 %v5249_v39, %v21852_v36  ;;  %v5240_v52 = vand.u32 4294901760, %v5239_v18  ;;  %v5194_v3 = vand.u32 4294901760, %v5193_v23 }
 0x877   :  { %v5257_v20 = vsub.f32 %v5255_v61, %v5256_v17  ;;  %18703 = vmatpush1.bf16.msra.mxu1 %v21867_v16  ;;  %v18734_v38 = vpack.c.bf16 %v5256_v17, %v5244_v4  ;;  %v5204_v11 = vsub.f32 %v21882_v44, %v5203_v62 }
 0x878   :  { %18705 = vmatprep.subr.bf16.mxu1 %v18704_v34  ;;  %v5251_v14 = vsub.f32 %v5249_v39, %v5250_v0  ;;  %v18732_v58 = vpack.c.bf16 %v5250_v0, %v5238_v5 }
 0x879   :  { %v5258_v22 = vand.u32 4294901760, %v5257_v20  ;;  %v5205_v43 = vand.u32 4294901760, %v5204_v11 }
 0x87a   :  { %5173 = vmatmul.mubr.f32.vlgmr.msra.gmra.mrb[32].mxu1 %v5172_v6  ;;  %v5252_v12 = vand.u32 4294901760, %v5251_v14 }
 0x87b   :  { %18707 = vmatpush1.bf16.msra.mxu1 %v18706_v40  ;;  %5178 = vmatprep.mubr.f32.mxu1 %v20562_v1  ;;  %v18710_v21 = vpack.c.bf16 %v5258_v22, %v5246_v54 }
 0x87c   :  { %v18708_v36 = vpack.c.bf16 %v5252_v12, %v5240_v52 }
 0x87e   :  { %5184 = vmatmul.mubr.f32.gmra.mrb[34].mxu1 %v5183_v9  ;;  %18709 = vmatprep.subr.bf16.mxu1 %v18708_v36 }
 0x87f   :  { %18711 = vmatpush1.bf16.msra.mxu1 %v18710_v21  ;;  %5189 = vmatprep.mubr.f32.mxu1 %v20562_v1 }
 0x880   :  { %18713 = vmatprep.subr.bf16.mxu1 %v18712_v26  ;;  %v18326_v26 = vld [vmem:[%s24968_s0 + $0x90] sm:$0xff] }
 0x881   :  { %v5847_v10 = vsel %vm34_vm0, %v18326_v26, 0 }
 0x882   :  { %5195 = vmatmul.mubr.f32.gmra.mrb[36].mxu1 %v5194_v3 }
 0x883   :  { %5200 = vmatprep.mubr.f32.mxu1 %v20562_v1 }
 0x886   :  { %5206 = vmatmul.mubr.f32.gmra.mrb[38].mxu1 %v5205_v43 }
 0x887   :  { %5316 = vmatprep.mubr.f32.mxu1 %v20562_v1 }
 0x88a   :  { %5318 = vmatmul.mubr.f32.vlgmr.msra.gmra.mrb[32].mxu1 %v21770_v55 }
 0x88b   :  { %18715 = vmatpush1.bf16.msra.mxu1 %v18714_v53  ;;  %5323 = vmatprep.mubr.f32.mxu1 %v20562_v1 }
 0x88c   :  { %18717 = vmatprep.subr.bf16.mxu1 %v18716_v8 }
 0x88e   :  { %5325 = vmatmul.mubr.f32.gmra.mrb[34].mxu1 %v21781_v27 }
 0x88f   :  { %18719 = vmatpush1.bf16.msra.mxu1 %v18718_v46  ;;  %5330 = vmatprep.mubr.f32.mxu1 %v20562_v1 }
 0x890   :  { %18721 = vmatprep.subr.bf16.mxu1 %v21822_v33 }
 0x892   :  { %5332 = vmatmul.mubr.f32.gmra.mrb[36].mxu1 %v21807_v42 }
 0x893   :  { %5337 = vmatprep.mubr.f32.mxu1 %v20562_v1 }
 0x896   :  { %5339 = vmatmul.mubr.f32.gmra.mrb[38].mxu1 %v21840_v49 }
 0x897   :  { %5425 = vmatprep.mubr.f32.mxu1 %v20562_v1 }
 0x89a   :  { %5428 = vmatmul.mubr.f32.vlgmr.msra.gmra.mrb[32].mxu1 %v21779_v25  ;;  %v18324_v25 = vld [vmem:[%s24968_s0 + $0x80] sm:$0xff] }
 0x89b   :  { %18723 = vmatpush1.bf16.msra.mxu1 %v21811_v15  ;;  %5433 = vmatprep.mubr.f32.mxu1 %v20562_v1 }
 0x89c   :  { %18725 = vmatprep.subr.bf16.mxu1 %v21871_v28 }
 0x89e   :  { %5436 = vmatmul.mubr.f32.gmra.mrb[34].mxu1 %v21798_v57  ;;  %v18325_v57 = vld [vmem:[%s24968_s0 + $0x88] sm:$0xff] }
 0x89f   :  { %18727 = vmatpush1.bf16.msra.mxu1 %v21867_v16  ;;  %5441 = vmatprep.mubr.f32.mxu1 %v20562_v1 }
 0x8a0   :  { %18729 = vmatprep.subr.bf16.mxu1 %v21857_v56 }
 0x8a2   :  { %5444 = vmatmul.mubr.f32.gmra.mrb[36].mxu1 %v21834_v60 }
 0x8a3   :  { %5449 = vmatprep.mubr.f32.mxu1 %v20562_v1 }
 0x8a6   :  { %5452 = vmatmul.mubr.f32.gmra.mrb[38].mxu1 %v21882_v44 }
 0x8a7   :  { %5530 = vmatprep.mubr.f32.mxu1 %v20562_v1 }
 0x8aa   :  { %5534 = vmatmul.mubr.f32.vlgmr.msra.gmra.mrb[32].mxu1 %v5170_v2  ;;  %v18323_v2 = vld [vmem:[%s24971_s3 + $0x3] ss:$8 sm:$0x3] }
 0x8ab   :  { %18731 = vmatpush1.bf16.msra.mxu1 %v21859_v30  ;;  %5539 = vmatprep.mubr.f32.mxu1 %v20562_v1 }
 0x8ac   :  { %18733 = vmatprep.subr.bf16.mxu1 %v18732_v58 }
 0x8ae   :  { %5543 = vmatmul.mubr.f32.gmra.mrb[34].mxu1 %v5181_v32  ;;  %v5844_v32 = vsel %vm34_vm0, %v18325_v57, 0 }
 0x8af   :  { %18735 = vmatpush1.bf16.msra.mxu1 %v18734_v38  ;;  %5548 = vmatprep.mubr.f32.mxu1 %v20562_v1  ;;  %v21973_v30 = vand.u32 4294901760, %v5844_v32 }
 0x8b0   :  { %18737 = vmatprep.subr.bf16.mxu1 %v21822_v33  ;;  %v5812_v33 = vrot.slane %v18323_v2, %v20877_v41 }
 0x8b1   :  { %v21982_v34 = vsub.f32 %v5844_v32, %v21973_v30 }
 0x8b2   :  { %5552 = vmatmul.mubr.f32.gmra.mrb[36].mxu1 %v5192_v35 }
 0x8b3   :  { %5557 = vmatprep.mubr.f32.mxu1 %v20562_v1 }
 0x8b6   :  { %5561 = vmatmul.mubr.f32.gmra.mrb[38].mxu1 %v5203_v62 }
 0x8b7   :  { %5655 = vmatprep.mubr.f32.mxu1 %v20562_v1 }
 0x8ba   :  { %5657 = vmatmul.mubr.f32.vlgmr.msra.gmra.mrb[32].mxu1 %v21770_v55 }
 0x8bb   :  { %18739 = vmatpush1.bf16.msra.mxu1 %v21811_v15  ;;  %5662 = vmatprep.mubr.f32.mxu1 %v20562_v1 }
 0x8bc   :  { %18741 = vmatprep.subr.bf16.mxu1 %v21871_v28 }
 0x8be   :  { %5664 = vmatmul.mubr.f32.gmra.mrb[34].mxu1 %v21781_v27 }
 0x8bf   :  { %18743 = vmatpush1.bf16.msra.mxu1 %v21867_v16  ;;  %5669 = vmatprep.mubr.f32.mxu1 %v20562_v1 }
 0x8c2   :  { %5671 = vmatmul.mubr.f32.gmra.mrb[36].mxu1 %v21807_v42 }
 0x8c3   :  { %5676 = vmatprep.mubr.f32.mxu1 %v20562_v1 }
 0x8c6   :  { %5678 = vmatmul.mubr.f32.gmra.mrb[38].mxu1 %v21840_v49 }
 0x8c7   :  { %5756 = vmatprep.mubr.f32.mxu1 %v20562_v1 }
 0x8ca   :  { %5758 = vmatmul.mubr.f32.vlgmr.msra.gmra.mrb[32].mxu1 %v21770_v55  ;;  %v18322_v55 = vld [vmem:[%s24970_s2 + $0x3] ss:$8 sm:$0x3] }
 0x8cb   :  { %5763 = vmatprep.mubr.f32.mxu1 %v20562_v1  ;;  %v5793_v15 = vrot.slane %v18322_v55, %v20877_v41  ;;  %v5797_v60 = vrot.slane %v18322_v55, %v20884_v59 }
 0x8cd   :  { %v5800_v4 = vmul.f32 %v5793_v15, %v21776_v45  ;;  %v5801_v13 = vmul.f32 %v5797_v60, %v21784_v29  ;;  %v5802_v16 = vmul.f32 %v5793_v15, %v21794_v37  ;;  %v5803_v6 = vmul.f32 %v5797_v60, %v21805_v47  ;;  %v18327_v45 = vld [vmem:[%s24968_s0 + $0x98] sm:$0xff] }
 0x8ce   :  { %5765 = vmatmul.mubr.f32.gmra.mrb[34].mxu1 %v21781_v27  ;;  %v5841_v27 = vsel %vm34_vm0, %v18324_v25, 0  ;;  %v5804_v29 = vmul.f32 %v5793_v15, %v21820_v24  ;;  %v21988_v37 = vand.u32 4294901760, %v5847_v10  ;;  %v5805_v47 = vmul.f32 %v5797_v60, %v21831_v63 }
 0x8cf   :  { %5770 = vmatprep.mubr.f32.mxu1 %v20562_v1  ;;  %v5806_v35 = vmul.f32 %v5793_v15, %v21854_v48  ;;  %v5807_v18 = vmul.f32 %v5797_v60, %v21863_v51  ;;  %v21996_v20 = vsel %vm34_vm0, %v18327_v45, 0  ;;  %v5938_v48 = vand.u32 4294901760, %v21982_v34 }
 0x8d0   :  { %v22008_v9 = vsub.f32 %v5847_v10, %v21988_v37  ;;  %v22012_v62 = vand.u32 4294901760, %v21996_v20 }
 0x8d2   :  { %5772 = vmatmul.mubr.f32.gmra.mrb[36].mxu1 %v21807_v42  ;;  %v21960_v42 = vand.u32 4294901760, %v5841_v27 }
 0x8d3   :  { %5777 = vmatprep.mubr.f32.mxu1 %v20562_v1 }
 0x8d4   :  { %v21971_v56 = vsub.f32 %v5841_v27, %v21960_v42 }
 0x8d6   :  { %5779 = vmatmul.mubr.f32.gmra.mrb[38].mxu1 %v21840_v49  ;;  %v5816_v49 = vrot.slane %v18323_v2, %v20884_v59  ;;  %v5927_v28 = vand.u32 4294901760, %v21971_v56 }
 0x8d7   :  { %6631 = vmatprep.mubr.f32.mxu1 %v20562_v1 }
 0x8d8   :  { %v22003_v63 = vsub.f32 %v21971_v56, %v5927_v28 }
 0x99d   :  { %v5759_v53 = vpop.f32.mrb[32].mxu1 }
 0x99e   :  { %v5819_v50 = vmul.f32 %v5812_v33, %v5759_v53  ;;  %v5761_v5 = vpop.f32.mrb[33].mxu1 }
 0x99f   :  { %v5820_v31 = vmul.f32 %v5816_v49, %v5761_v5 }
 0x9a0   :  { %v5827_v61 = vadd.f32 %v5819_v50, %v5800_v4 }
 0x9a1   :  { %v5828_v40 = vadd.f32 %v5820_v31, %v5801_v13  ;;  %v5766_v39 = vpop.f32.mrb[34].mxu1 }
 0x9a2   :  { %v5854_v7 = vand.u32 4294901760, %v5827_v61  ;;  %v5821_v19 = vmul.f32 %v5812_v33, %v5766_v39  ;;  %v5768_v17 = vpop.f32.mrb[35].mxu1 }
 0x9a3   :  { %v5852_v46 = vand.u32 4294901760, %v5828_v40  ;;  %v5822_v0 = vmul.f32 %v5816_v49, %v5768_v17 }
 0x9a4   :  { %v21993_v44 = vsub.f32 %v5827_v61, %v5854_v7  ;;  %v5829_v8 = vadd.f32 %v5821_v19, %v5802_v16 }
 0x9a5   :  { %v21998_v24 = vsub.f32 %v5828_v40, %v5852_v46  ;;  %v5830_v38 = vadd.f32 %v5822_v0, %v5803_v6  ;;  %v5773_v14 = vpop.f32.mrb[36].mxu1  ;;  %v5929_v0 = vand.u32 4294901760, %v22003_v63 }
 0x9a6   :  { %v5977_v58 = vand.u32 4294901760, %v21993_v44  ;;  %v5858_v51 = vand.u32 4294901760, %v5829_v8  ;;  %v5823_v54 = vmul.f32 %v5812_v33, %v5773_v14  ;;  %v5775_v22 = vpop.f32.mrb[37].mxu1 }
 0x9a7   :  { %v5856_v52 = vand.u32 4294901760, %v5830_v38  ;;  %v5824_v12 = vmul.f32 %v5816_v49, %v5775_v22  ;;  %v5971_v23 = vand.u32 4294901760, %v21998_v24 }
 0x9a8   :  { %v5978_v21 = vsub.f32 %v21993_v44, %v5977_v58  ;;  %v22015_v36 = vpack.c.bf16 %v5858_v51, %v5854_v7  ;;  %v22017_v3 = vsub.f32 %v5829_v8, %v5858_v51  ;;  %v5831_v11 = vadd.f32 %v5823_v54, %v5804_v29 }
 0x9a9   :  { %v22019_v43 = vsub.f32 %v5830_v38, %v5856_v52  ;;  %v5832_v25 = vadd.f32 %v5824_v12, %v5805_v47  ;;  %v5780_v55 = vpop.f32.mrb[38].mxu1  ;;  %v22021_v27 = vpack.c.bf16 %v5856_v52, %v5852_v46  ;;  %v5972_v2 = vsub.f32 %v21998_v24, %v5971_v23 }
 0x9aa   :  { %v5989_v57 = vand.u32 4294901760, %v22017_v3  ;;  %v5862_v15 = vand.u32 4294901760, %v5831_v11  ;;  %v5825_v32 = vmul.f32 %v5812_v33, %v5780_v55  ;;  %v5782_v60 = vpop.f32.mrb[39].mxu1  ;;  %v5979_v26 = vand.u32 4294901760, %v5978_v21 }
 0x9ab   :  { %v5860_v53 = vand.u32 4294901760, %v5832_v25  ;;  %v5826_v4 = vmul.f32 %v5816_v49, %v5782_v60  ;;  %18745 = vmatprep.subr.bf16.mxu0 %v22021_v27  ;;  %v5973_v50 = vand.u32 4294901760, %v5972_v2  ;;  %v5983_v5 = vand.u32 4294901760, %v22019_v43 }
 0x9ac   :  { %v5990_v13 = vsub.f32 %v22017_v3, %v5989_v57  ;;  %v22028_v31 = vsub.f32 %v5831_v11, %v5862_v15  ;;  %v5833_v10 = vadd.f32 %v5825_v32, %v5806_v35  ;;  %18747 = vmatpush1.bf16.msra.mxu0 %v22015_v36  ;;  %v18760_v16 = vpack.c.bf16 %v22019_v43, %v21998_v24 }
 0x9ad   :  { %v5994_v33 = vsub.f32 %v5832_v25, %v5860_v53  ;;  %v5834_v61 = vadd.f32 %v5826_v4, %v5807_v18  ;;  %v5984_v6 = vsub.f32 %v22019_v43, %v5983_v5  ;;  %v18762_v49 = vpack.c.bf16 %v22017_v3, %v21993_v44 }
 0x9ae   :  { %v6001_v40 = vand.u32 4294901760, %v22028_v31  ;;  %v5866_v39 = vand.u32 4294901760, %v5833_v10  ;;  %v5991_v45 = vand.u32 4294901760, %v5990_v13  ;;  %v22037_v29 = vpack.c.bf16 %v5983_v5, %v5971_v23 }
 0x9af   :  { %v5864_v7 = vand.u32 4294901760, %v5834_v61  ;;  %v5985_v19 = vand.u32 4294901760, %v5984_v6  ;;  %v5995_v17 = vand.u32 4294901760, %v5994_v33  ;;  %v22039_v47 = vpack.c.bf16 %v5989_v57, %v5977_v58 }
 0x9b0   :  { %v22041_v35 = vpack.c.bf16 %v5866_v39, %v5862_v15  ;;  %v6012_v46 = vsub.f32 %v5833_v10, %v5866_v39  ;;  %v18754_v18 = vpack.c.bf16 %v5991_v45, %v5979_v26  ;;  %v5939_v38 = vsub.f32 %v21982_v34, %v5938_v48 }
 0x9b1   :  { %v6006_v8 = vsub.f32 %v5834_v61, %v5864_v7  ;;  %v22044_v24 = vpack.c.bf16 %v5864_v7, %v5860_v53  ;;  %v18752_v44 = vpack.c.bf16 %v5985_v19, %v5973_v50  ;;  %v6002_v14 = vsub.f32 %v22028_v31, %v6001_v40  ;;  %v18331_v61 = vld [vmem:[%s24969_s1 + $0x98] sm:$0xff] }
 0x9b2   :  { %v6013_v51 = vand.u32 4294901760, %v6012_v46  ;;  %v5949_v58 = vand.u32 4294901760, %v22008_v9  ;;  %v18766_v54 = vpack.c.bf16 %v6012_v46, %v22028_v31  ;;  %v5996_v22 = vsub.f32 %v5994_v33, %v5995_v17 }
 0x9b3   :  { %18749 = vmatprep.subr.bf16.mxu0 %v22044_v24  ;;  %v6007_v63 = vand.u32 4294901760, %v6006_v8  ;;  %v22055_v52 = vsub.f32 %v21996_v20, %v22012_v62  ;;  %v18764_v12 = vpack.c.bf16 %v6006_v8, %v5994_v33  ;;  %v5940_v43 = vand.u32 4294901760, %v5939_v38 }
 0x9b4   :  { %v6014_v23 = vsub.f32 %v6012_v46, %v6013_v51  ;;  %18751 = vmatpush1.bf16.msra.mxu0 %v22041_v35  ;;  %v18782_v21 = vpack.c.bf16 %v6013_v51, %v6001_v40  ;;  %v6003_v25 = vand.u32 4294901760, %v6002_v14  ;;  %v5997_v2 = vand.u32 4294901760, %v5996_v22 }
 0x9b5   :  { %18753 = vmatprep.subr.bf16.mxu0 %v18752_v44  ;;  %v6008_v3 = vsub.f32 %v6006_v8, %v6007_v63  ;;  %v18780_v11 = vpack.c.bf16 %v6007_v63, %v5995_v17  ;;  %v5950_v15 = vsub.f32 %v22008_v9, %v5949_v58  ;;  %v5960_v20 = vand.u32 4294901760, %v22055_v52 }
 0x9b6   :  { %v6015_v55 = vand.u32 4294901760, %v6014_v23  ;;  %v6557_v17 = vsel %vm34_vm0, %v18331_v61, 0 }
 0x9b7   :  { %5930 = vmatmul.mubr.f32.vlgmr.msra.gmra.mrb[32].mxu0 %v5929_v0  ;;  %v6009_v57 = vand.u32 4294901760, %v6008_v3  ;;  %v5951_v26 = vand.u32 4294901760, %v5950_v15  ;;  %v5961_v53 = vsub.f32 %v22055_v52, %v5960_v20  ;;  %v22196_v22 = vand.u32 4294901760, %v6557_v17 }
 0x9b8   :  { %18755 = vmatpush1.bf16.msra.mxu0 %v18754_v18  ;;  %5935 = vmatprep.mubr.f32.mxu0 %v20562_v1  ;;  %v18758_v32 = vpack.c.bf16 %v6015_v55, %v6003_v25 }
 0x9b9   :  { %v18756_v60 = vpack.c.bf16 %v6009_v57, %v5997_v2  ;;  %v5962_v4 = vand.u32 4294901760, %v5961_v53 }
 0x9bb   :  { %5941 = vmatmul.mubr.f32.gmra.mrb[34].mxu0 %v5940_v43  ;;  %18757 = vmatprep.subr.bf16.mxu0 %v18756_v60 }
 0x9bc   :  { %18759 = vmatpush1.bf16.msra.mxu0 %v18758_v32  ;;  %5946 = vmatprep.mubr.f32.mxu0 %v20562_v1 }
 0x9bd   :  { %18761 = vmatprep.subr.bf16.mxu0 %v18760_v16 }
 0x9bf   :  { %5952 = vmatmul.mubr.f32.gmra.mrb[36].mxu0 %v5951_v26 }
 0x9c0   :  { %5957 = vmatprep.mubr.f32.mxu0 %v20562_v1 }
 0x9c3   :  { %5963 = vmatmul.mubr.f32.gmra.mrb[38].mxu0 %v5962_v4 }
 0x9c4   :  { %6073 = vmatprep.mubr.f32.mxu0 %v20562_v1 }
 0x9c7   :  { %6075 = vmatmul.mubr.f32.vlgmr.msra.gmra.mrb[32].mxu0 %v21960_v42 }
 0x9c8   :  { %18763 = vmatpush1.bf16.msra.mxu0 %v18762_v49  ;;  %6080 = vmatprep.mubr.f32.mxu0 %v20562_v1 }
 0x9c9   :  { %18765 = vmatprep.subr.bf16.mxu0 %v18764_v12 }
 0x9cb   :  { %6082 = vmatmul.mubr.f32.gmra.mrb[34].mxu0 %v21973_v30 }
 0x9cc   :  { %18767 = vmatpush1.bf16.msra.mxu0 %v18766_v54  ;;  %6087 = vmatprep.mubr.f32.mxu0 %v20562_v1 }
 0x9cd   :  { %18769 = vmatprep.subr.bf16.mxu0 %v22021_v27 }
 0x9cf   :  { %6089 = vmatmul.mubr.f32.gmra.mrb[36].mxu0 %v21988_v37 }
 0x9d0   :  { %6094 = vmatprep.mubr.f32.mxu0 %v20562_v1 }
 0x9d3   :  { %6096 = vmatmul.mubr.f32.gmra.mrb[38].mxu0 %v22012_v62 }
 0x9d4   :  { %6182 = vmatprep.mubr.f32.mxu0 %v20562_v1 }
 0x9d7   :  { %6185 = vmatmul.mubr.f32.vlgmr.msra.gmra.mrb[32].mxu0 %v21971_v56  ;;  %v18328_v56 = vld [vmem:[%s24969_s1 + $0x80] sm:$0xff] }
 0x9d8   :  { %18771 = vmatpush1.bf16.msra.mxu0 %v22015_v36  ;;  %6190 = vmatprep.mubr.f32.mxu0 %v20562_v1 }
 0x9d9   :  { %18773 = vmatprep.subr.bf16.mxu0 %v22044_v24 }
 0x9db   :  { %6193 = vmatmul.mubr.f32.gmra.mrb[34].mxu0 %v21982_v34 }
 0x9dc   :  { %18775 = vmatpush1.bf16.msra.mxu0 %v22041_v35  ;;  %6198 = vmatprep.mubr.f32.mxu0 %v20562_v1 }
 0x9dd   :  { %18777 = vmatprep.subr.bf16.mxu0 %v22037_v29 }
 0x9df   :  { %6201 = vmatmul.mubr.f32.gmra.mrb[36].mxu0 %v22008_v9 }
 0x9e0   :  { %6206 = vmatprep.mubr.f32.mxu0 %v20562_v1 }
 0x9e3   :  { %6209 = vmatmul.mubr.f32.gmra.mrb[38].mxu0 %v22055_v52 }
 0x9e4   :  { %6287 = vmatprep.mubr.f32.mxu0 %v20562_v1 }
 0x9e7   :  { %6291 = vmatmul.mubr.f32.vlgmr.msra.gmra.mrb[32].mxu0 %v5927_v28 }
 0x9e8   :  { %18779 = vmatpush1.bf16.msra.mxu0 %v22039_v47  ;;  %6296 = vmatprep.mubr.f32.mxu0 %v20562_v1 }
 0x9e9   :  { %18781 = vmatprep.subr.bf16.mxu0 %v18780_v11 }
 0x9eb   :  { %6300 = vmatmul.mubr.f32.gmra.mrb[34].mxu0 %v5938_v48 }
 0x9ec   :  { %18783 = vmatpush1.bf16.msra.mxu0 %v18782_v21  ;;  %6305 = vmatprep.mubr.f32.mxu0 %v20562_v1 }
 0x9ed   :  { %18785 = vmatprep.subr.bf16.mxu0 %v22021_v27 }
 0x9ef   :  { %6309 = vmatmul.mubr.f32.gmra.mrb[36].mxu0 %v5949_v58 }
 0x9f0   :  { %6314 = vmatprep.mubr.f32.mxu0 %v20562_v1 }
 0x9f3   :  { %6318 = vmatmul.mubr.f32.gmra.mrb[38].mxu0 %v5960_v20 }
 0x9f4   :  { %6412 = vmatprep.mubr.f32.mxu0 %v20562_v1 }
 0x9f7   :  { %6414 = vmatmul.mubr.f32.vlgmr.msra.gmra.mrb[32].mxu0 %v21960_v42 }
 0x9f8   :  { %18787 = vmatpush1.bf16.msra.mxu0 %v22015_v36  ;;  %6419 = vmatprep.mubr.f32.mxu0 %v20562_v1 }
 0x9f9   :  { %18789 = vmatprep.subr.bf16.mxu0 %v22044_v24 }
 0x9fb   :  { %6421 = vmatmul.mubr.f32.gmra.mrb[34].mxu0 %v21973_v30 }
 0x9fc   :  { %18791 = vmatpush1.bf16.msra.mxu0 %v22041_v35  ;;  %6426 = vmatprep.mubr.f32.mxu0 %v20562_v1 }
 0x9ff   :  { %6428 = vmatmul.mubr.f32.gmra.mrb[36].mxu0 %v21988_v37 }
 0xa00   :  { %6433 = vmatprep.mubr.f32.mxu0 %v20562_v1 }
 0xa03   :  { %6435 = vmatmul.mubr.f32.gmra.mrb[38].mxu0 %v22012_v62 }
 0xa04   :  { %6513 = vmatprep.mubr.f32.mxu0 %v20562_v1 }
 0xa07   :  { %6515 = vmatmul.mubr.f32.vlgmr.msra.gmra.mrb[32].mxu0 %v21960_v42  ;;  %v6548_v42 = vsel %vm34_vm0, %v18328_v56, 0 }
 0xa08   :  { %6520 = vmatprep.mubr.f32.mxu0 %v20562_v1  ;;  %v22126_v28 = vand.u32 4294901760, %v6548_v42 }
 0xa0a   :  { %v22135_v9 = vsub.f32 %v6548_v42, %v22126_v28 }
 0xa0b   :  { %6522 = vmatmul.mubr.f32.gmra.mrb[34].mxu0 %v21973_v30  ;;  %v18329_v30 = vld [vmem:[%s24969_s1 + $0x88] sm:$0xff] }
 0xa0c   :  { %6527 = vmatprep.mubr.f32.mxu0 %v20562_v1  ;;  %v6551_v34 = vsel %vm34_vm0, %v18329_v30, 0  ;;  %v6634_v16 = vand.u32 4294901760, %v22135_v9 }
 0xa0e   :  { %v6635_v0 = vsub.f32 %v22135_v9, %v6634_v16 }
 0xa0f   :  { %6529 = vmatmul.mubr.f32.gmra.mrb[36].mxu0 %v21988_v37  ;;  %v18330_v37 = vld [vmem:[%s24969_s1 + $0x90] sm:$0xff] }
 0xa10   :  { %6534 = vmatprep.mubr.f32.mxu0 %v20562_v1  ;;  %v6554_v5 = vsel %vm34_vm0, %v18330_v37, 0  ;;  %v6636_v42 = vand.u32 4294901760, %v6635_v0 }
 0xa11   :  { %v22163_v39 = vand.u32 4294901760, %v6554_v5 }
 0xa13   :  { %6536 = vmatmul.mubr.f32.gmra.mrb[38].mxu0 %v22012_v62  ;;  %v22137_v62 = vand.u32 4294901760, %v6551_v34  ;;  %v22190_v14 = vsub.f32 %v6554_v5, %v22163_v39 }
 0xa14   :  { %7388 = vmatprep.mubr.f32.mxu0 %v20562_v1 }
 0xa15   :  { %v22154_v33 = vsub.f32 %v6551_v34, %v22137_v62 }
 0xa17   :  { %v6645_v18 = vand.u32 4294901760, %v22154_v33 }
 0xada   :  { %v22132_v48 = vpop.f32.mrb[32].mxu0 }
 0xadb   :  { %v6561_v36 = vand.u32 4294901760, %v22132_v48  ;;  %v22140_v27 = vpop.f32.mrb[33].mxu0 }
 0xadc   :  { %v6559_v50 = vand.u32 4294901760, %v22140_v27 }
 0xadd   :  { %v22145_v13 = vsub.f32 %v22132_v48, %v6561_v36 }
 0xade   :  { %v22148_v31 = vsub.f32 %v22140_v27, %v6559_v50  ;;  %v22150_v10 = vpop.f32.mrb[34].mxu0 }
 0xadf   :  { %v6684_v6 = vand.u32 4294901760, %v22145_v13  ;;  %v6565_v49 = vand.u32 4294901760, %v22150_v10  ;;  %v22161_v40 = vpop.f32.mrb[35].mxu0 }
 0xae0   :  { %v6678_v45 = vand.u32 4294901760, %v22148_v31  ;;  %v6563_v29 = vand.u32 4294901760, %v22161_v40 }
 0xae1   :  { %v22167_v7 = vpack.c.bf16 %v6565_v49, %v6561_v36  ;;  %v22170_v19 = vsub.f32 %v22150_v10, %v6565_v49  ;;  %v6685_v8 = vsub.f32 %v22145_v13, %v6684_v6 }
 0xae2   :  { %v22174_v47 = vsub.f32 %v22161_v40, %v6563_v29  ;;  %v22176_v35 = vpop.f32.mrb[36].mxu0  ;;  %v22178_v46 = vpack.c.bf16 %v6563_v29, %v6559_v50  ;;  %v6679_v54 = vsub.f32 %v22148_v31, %v6678_v45  ;;  %v6646_v50 = vsub.f32 %v22154_v33, %v6645_v18 }
 0xae3   :  { %v6696_v24 = vand.u32 4294901760, %v22170_v19  ;;  %v6569_v44 = vand.u32 4294901760, %v22176_v35  ;;  %v22187_v38 = vpop.f32.mrb[37].mxu0  ;;  %v18810_v23 = vpack.c.bf16 %v22170_v19, %v22145_v13  ;;  %v6686_v55 = vand.u32 4294901760, %v6685_v8 }
 0xae4   :  { %v6690_v51 = vand.u32 4294901760, %v22174_v47  ;;  %v6567_v58 = vand.u32 4294901760, %v22187_v38  ;;  %18793 = vmatprep.subr.bf16.mxu1 %v22178_v46  ;;  %v18808_v12 = vpack.c.bf16 %v22174_v47, %v22148_v31  ;;  %v6680_v26 = vand.u32 4294901760, %v6679_v54 }
 0xae5   :  { %v6697_v63 = vsub.f32 %v22170_v19, %v6696_v24  ;;  %v22200_v52 = vsub.f32 %v22176_v35, %v6569_v44  ;;  %18795 = vmatpush1.bf16.msra.mxu1 %v22167_v7  ;;  %v22215_v25 = vpack.c.bf16 %v6696_v24, %v6684_v6  ;;  %v6656_v31 = vand.u32 4294901760, %v22190_v14 }
 0xae6   :  { %v22208_v21 = vsub.f32 %v22187_v38, %v6567_v58  ;;  %v22210_v3 = vpop.f32.mrb[38].mxu0  ;;  %v6691_v11 = vsub.f32 %v22174_v47, %v6690_v51  ;;  %v22213_v43 = vpack.c.bf16 %v6690_v51, %v6678_v45  ;;  %v22238_v45 = vsub.f32 %v6557_v17, %v22196_v22 }
 0xae7   :  { %v6698_v2 = vand.u32 4294901760, %v6697_v63  ;;  %v6708_v57 = vand.u32 4294901760, %v22200_v52  ;;  %v6573_v15 = vand.u32 4294901760, %v22210_v3  ;;  %v22219_v20 = vpop.f32.mrb[39].mxu0  ;;  %v6647_v51 = vand.u32 4294901760, %v6646_v50 }
 0xae8   :  { %v6702_v32 = vand.u32 4294901760, %v22208_v21  ;;  %v6571_v60 = vand.u32 4294901760, %v22219_v20  ;;  %v6692_v53 = vand.u32 4294901760, %v6691_v11  ;;  %v6657_v17 = vsub.f32 %v22190_v14, %v6656_v31 }
 0xae9   :  { %v22223_v4 = vpack.c.bf16 %v6573_v15, %v6569_v44  ;;  %v6719_v56 = vsub.f32 %v22210_v3, %v6573_v15  ;;  %v18802_v30 = vpack.c.bf16 %v6698_v2, %v6686_v55  ;;  %v6709_v5 = vsub.f32 %v22200_v52, %v6708_v57 }
 0xaea   :  { %v6713_v34 = vsub.f32 %v22219_v20, %v6571_v60  ;;  %v22227_v37 = vpack.c.bf16 %v6571_v60, %v6567_v58  ;;  %v18800_v36 = vpack.c.bf16 %v6692_v53, %v6680_v26  ;;  %v6703_v49 = vsub.f32 %v22208_v21, %v6702_v32 }
 0xaeb   :  { %v6720_v13 = vand.u32 4294901760, %v6719_v56  ;;  %v18814_v61 = vpack.c.bf16 %v6719_v56, %v22200_v52  ;;  %v6710_v24 = vand.u32 4294901760, %v6709_v5  ;;  %v6667_v63 = vand.u32 4294901760, %v22238_v45 }
 0xaec   :  { %v6714_v6 = vand.u32 4294901760, %v6713_v34  ;;  %18797 = vmatprep.subr.bf16.mxu1 %v22227_v37  ;;  %v18812_v29 = vpack.c.bf16 %v6713_v34, %v22208_v21  ;;  %v6704_v58 = vand.u32 4294901760, %v6703_v49  ;;  %v6658_v11 = vand.u32 4294901760, %v6657_v17 }
 0xaed   :  { %v6721_v19 = vsub.f32 %v6719_v56, %v6720_v13  ;;  %18799 = vmatpush1.bf16.msra.mxu1 %v22223_v4  ;;  %v18830_v47 = vpack.c.bf16 %v6720_v13, %v6708_v57  ;;  %v6668_v55 = vsub.f32 %v22238_v45, %v6667_v63 }
 0xaee   :  { %18801 = vmatprep.subr.bf16.mxu1 %v18800_v36  ;;  %v6715_v0 = vsub.f32 %v6713_v34, %v6714_v6  ;;  %v18828_v8 = vpack.c.bf16 %v6714_v6, %v6702_v32 }
 0xaef   :  { %v6722_v44 = vand.u32 4294901760, %v6721_v19  ;;  %v6669_v2 = vand.u32 4294901760, %v6668_v55 }
 0xaf0   :  { %6637 = vmatmul.mubr.f32.vlgmr.msra.gmra.mrb[40].mxu1 %v6636_v42  ;;  %v6716_v54 = vand.u32 4294901760, %v6715_v0 }
 0xaf1   :  { %18803 = vmatpush1.bf16.msra.mxu1 %v18802_v30  ;;  %6642 = vmatprep.mubr.f32.mxu1 %v20562_v1  ;;  %v18806_v52 = vpack.c.bf16 %v6722_v44, %v6710_v24 }
 0xaf2   :  { %v18804_v21 = vpack.c.bf16 %v6716_v54, %v6704_v58 }
 0xaf4   :  { %6648 = vmatmul.mubr.f32.gmra.mrb[42].mxu1 %v6647_v51  ;;  %18805 = vmatprep.subr.bf16.mxu1 %v18804_v21 }
 0xaf5   :  { %18807 = vmatpush1.bf16.msra.mxu1 %v18806_v52  ;;  %6653 = vmatprep.mubr.f32.mxu1 %v20562_v1 }
 0xaf6   :  { %18809 = vmatprep.subr.bf16.mxu1 %v18808_v12  ;;  %v18336_v12 = vld [vmem:[%s24968_s0 + $0xb0] sm:$0xff] }
 0xaf7   :  { %v7311_v53 = vsel %vm34_vm0, %v18336_v12, 0 }
 0xaf8   :  { %6659 = vmatmul.mubr.f32.gmra.mrb[44].mxu1 %v6658_v11 }
 0xaf9   :  { %6664 = vmatprep.mubr.f32.mxu1 %v20562_v1 }
 0xafc   :  { %6670 = vmatmul.mubr.f32.gmra.mrb[46].mxu1 %v6669_v2 }
 0xafd   :  { %6780 = vmatprep.mubr.f32.mxu1 %v20562_v1 }
 0xb00   :  { %6782 = vmatmul.mubr.f32.vlgmr.msra.gmra.mrb[40].mxu1 %v22126_v28 }
 0xb01   :  { %18811 = vmatpush1.bf16.msra.mxu1 %v18810_v23  ;;  %6787 = vmatprep.mubr.f32.mxu1 %v20562_v1 }
 0xb02   :  { %18813 = vmatprep.subr.bf16.mxu1 %v18812_v29 }
 0xb04   :  { %6789 = vmatmul.mubr.f32.gmra.mrb[42].mxu1 %v22137_v62 }
 0xb05   :  { %18815 = vmatpush1.bf16.msra.mxu1 %v18814_v61  ;;  %6794 = vmatprep.mubr.f32.mxu1 %v20562_v1 }
 0xb06   :  { %18817 = vmatprep.subr.bf16.mxu1 %v22178_v46 }
 0xb08   :  { %6796 = vmatmul.mubr.f32.gmra.mrb[44].mxu1 %v22163_v39 }
 0xb09   :  { %6801 = vmatprep.mubr.f32.mxu1 %v20562_v1 }
 0xb0c   :  { %6803 = vmatmul.mubr.f32.gmra.mrb[46].mxu1 %v22196_v22 }
 0xb0d   :  { %6889 = vmatprep.mubr.f32.mxu1 %v20562_v1 }
 0xb10   :  { %6892 = vmatmul.mubr.f32.vlgmr.msra.gmra.mrb[40].mxu1 %v22135_v9  ;;  %v18334_v9 = vld [vmem:[%s24968_s0 + $0xa0] sm:$0xff] }
 0xb11   :  { %18819 = vmatpush1.bf16.msra.mxu1 %v22167_v7  ;;  %6897 = vmatprep.mubr.f32.mxu1 %v20562_v1 }
 0xb12   :  { %18821 = vmatprep.subr.bf16.mxu1 %v22227_v37 }
 0xb14   :  { %6900 = vmatmul.mubr.f32.gmra.mrb[42].mxu1 %v22154_v33  ;;  %v18335_v33 = vld [vmem:[%s24968_s0 + $0xa8] sm:$0xff] }
 0xb15   :  { %18823 = vmatpush1.bf16.msra.mxu1 %v22223_v4  ;;  %6905 = vmatprep.mubr.f32.mxu1 %v20562_v1 }
 0xb16   :  { %18825 = vmatprep.subr.bf16.mxu1 %v22213_v43 }
 0xb18   :  { %6908 = vmatmul.mubr.f32.gmra.mrb[44].mxu1 %v22190_v14 }
 0xb19   :  { %6913 = vmatprep.mubr.f32.mxu1 %v20562_v1 }
 0xb1c   :  { %6916 = vmatmul.mubr.f32.gmra.mrb[46].mxu1 %v22238_v45 }
 0xb1d   :  { %6994 = vmatprep.mubr.f32.mxu1 %v20562_v1 }
 0xb20   :  { %6998 = vmatmul.mubr.f32.vlgmr.msra.gmra.mrb[40].mxu1 %v6634_v16  ;;  %v18333_v16 = vld [vmem:[%s24971_s3 + $0x4] ss:$8 sm:$0x3] }
 0xb21   :  { %18827 = vmatpush1.bf16.msra.mxu1 %v22215_v25  ;;  %7003 = vmatprep.mubr.f32.mxu1 %v20562_v1 }
 0xb22   :  { %18829 = vmatprep.subr.bf16.mxu1 %v18828_v8 }
 0xb24   :  { %7007 = vmatmul.mubr.f32.gmra.mrb[42].mxu1 %v6645_v18  ;;  %v7308_v18 = vsel %vm34_vm0, %v18335_v33, 0 }
 0xb25   :  { %18831 = vmatpush1.bf16.msra.mxu1 %v18830_v47  ;;  %7012 = vmatprep.mubr.f32.mxu1 %v20562_v1  ;;  %v22329_v25 = vand.u32 4294901760, %v7308_v18 }
 0xb26   :  { %18833 = vmatprep.subr.bf16.mxu1 %v22178_v46  ;;  %v7276_v46 = vrot.slane %v18333_v16, %v20877_v41 }
 0xb27   :  { %v22338_v36 = vsub.f32 %v7308_v18, %v22329_v25 }
 0xb28   :  { %7016 = vmatmul.mubr.f32.gmra.mrb[44].mxu1 %v6656_v31 }
 0xb29   :  { %7021 = vmatprep.mubr.f32.mxu1 %v20562_v1 }
 0xb2c   :  { %7025 = vmatmul.mubr.f32.gmra.mrb[46].mxu1 %v6667_v63 }
 0xb2d   :  { %7119 = vmatprep.mubr.f32.mxu1 %v20562_v1 }
 0xb30   :  { %7121 = vmatmul.mubr.f32.vlgmr.msra.gmra.mrb[40].mxu1 %v22126_v28 }
 0xb31   :  { %18835 = vmatpush1.bf16.msra.mxu1 %v22167_v7  ;;  %7126 = vmatprep.mubr.f32.mxu1 %v20562_v1 }
 0xb32   :  { %18837 = vmatprep.subr.bf16.mxu1 %v22227_v37 }
 0xb34   :  { %7128 = vmatmul.mubr.f32.gmra.mrb[42].mxu1 %v22137_v62 }
 0xb35   :  { %18839 = vmatpush1.bf16.msra.mxu1 %v22223_v4  ;;  %7133 = vmatprep.mubr.f32.mxu1 %v20562_v1 }
 0xb38   :  { %7135 = vmatmul.mubr.f32.gmra.mrb[44].mxu1 %v22163_v39 }
 0xb39   :  { %7140 = vmatprep.mubr.f32.mxu1 %v20562_v1 }
 0xb3c   :  { %7142 = vmatmul.mubr.f32.gmra.mrb[46].mxu1 %v22196_v22 }
 0xb3d   :  { %7220 = vmatprep.mubr.f32.mxu1 %v20562_v1 }
 0xb40   :  { %7222 = vmatmul.mubr.f32.vlgmr.msra.gmra.mrb[40].mxu1 %v22126_v28  ;;  %v18332_v28 = vld [vmem:[%s24970_s2 + $0x4] ss:$8 sm:$0x3] }
 0xb41   :  { %7227 = vmatprep.mubr.f32.mxu1 %v20562_v1  ;;  %v7257_v7 = vrot.slane %v18332_v28, %v20877_v41  ;;  %v7261_v14 = vrot.slane %v18332_v28, %v20884_v59 }
 0xb43   :  { %v7264_v57 = vmul.f32 %v7257_v7, %v22132_v48  ;;  %v7265_v60 = vmul.f32 %v7261_v14, %v22140_v27  ;;  %v7266_v4 = vmul.f32 %v7257_v7, %v22150_v10  ;;  %v7267_v42 = vmul.f32 %v7261_v14, %v22161_v40  ;;  %v18337_v48 = vld [vmem:[%s24968_s0 + $0xb8] sm:$0xff] }
 0xb44   :  { %7229 = vmatmul.mubr.f32.gmra.mrb[42].mxu1 %v22137_v62  ;;  %v7305_v62 = vsel %vm34_vm0, %v18334_v9, 0  ;;  %v7268_v27 = vmul.f32 %v7257_v7, %v22176_v35  ;;  %v22344_v10 = vand.u32 4294901760, %v7311_v53  ;;  %v7269_v40 = vmul.f32 %v7261_v14, %v22187_v38 }
 0xb45   :  { %7234 = vmatprep.mubr.f32.mxu1 %v20562_v1  ;;  %v7270_v31 = vmul.f32 %v7257_v7, %v22210_v3  ;;  %v7271_v49 = vmul.f32 %v7261_v14, %v22219_v20  ;;  %v22352_v19 = vsel %vm34_vm0, %v18337_v48, 0  ;;  %v7402_v3 = vand.u32 4294901760, %v22338_v36 }
 0xb46   :  { %v22364_v51 = vsub.f32 %v7311_v53, %v22344_v10  ;;  %v22368_v63 = vand.u32 4294901760, %v22352_v19 }
 0xb48   :  { %7236 = vmatmul.mubr.f32.gmra.mrb[44].mxu1 %v22163_v39  ;;  %v22316_v39 = vand.u32 4294901760, %v7305_v62 }
 0xb49   :  { %7241 = vmatprep.mubr.f32.mxu1 %v20562_v1 }
 0xb4a   :  { %v22327_v43 = vsub.f32 %v7305_v62, %v22316_v39 }
 0xb4c   :  { %7243 = vmatmul.mubr.f32.gmra.mrb[46].mxu1 %v22196_v22  ;;  %v7280_v22 = vrot.slane %v18333_v16, %v20884_v59  ;;  %v7391_v37 = vand.u32 4294901760, %v22327_v43 }
 0xb4d   :  { %8095 = vmatprep.mubr.f32.mxu1 %v20562_v1 }
 0xb4e   :  { %v22359_v38 = vsub.f32 %v22327_v43, %v7391_v37 }
 0xc13   :  { %v7223_v23 = vpop.f32.mrb[40].mxu1 }
 0xc14   :  { %v7283_v15 = vmul.f32 %v7276_v46, %v7223_v23  ;;  %v7225_v32 = vpop.f32.mrb[41].mxu1 }
 0xc15   :  { %v7284_v26 = vmul.f32 %v7280_v22, %v7225_v32 }
 0xc16   :  { %v7291_v56 = vadd.f32 %v7283_v15, %v7264_v57 }
 0xc17   :  { %v7292_v30 = vadd.f32 %v7284_v26, %v7265_v60  ;;  %v7230_v34 = vpop.f32.mrb[42].mxu1 }
 0xc18   :  { %v7318_v50 = vand.u32 4294901760, %v7291_v56  ;;  %v7285_v5 = vmul.f32 %v7276_v46, %v7230_v34  ;;  %v7232_v13 = vpop.f32.mrb[43].mxu1 }
 0xc19   :  { %v7316_v61 = vand.u32 4294901760, %v7292_v30  ;;  %v7286_v6 = vmul.f32 %v7280_v22, %v7232_v13 }
 0xc1a   :  { %v22349_v45 = vsub.f32 %v7291_v56, %v7318_v50  ;;  %v7293_v29 = vadd.f32 %v7285_v5, %v7266_v4 }
 0xc1b   :  { %v22354_v35 = vsub.f32 %v7292_v30, %v7316_v61  ;;  %v7294_v47 = vadd.f32 %v7286_v6, %v7267_v42  ;;  %v7237_v0 = vpop.f32.mrb[44].mxu1  ;;  %v7393_v6 = vand.u32 4294901760, %v22359_v38 }
 0xc1c   :  { %v7441_v8 = vand.u32 4294901760, %v22349_v45  ;;  %v7322_v20 = vand.u32 4294901760, %v7293_v29  ;;  %v7287_v24 = vmul.f32 %v7276_v46, %v7237_v0  ;;  %v7239_v44 = vpop.f32.mrb[45].mxu1 }
 0xc1d   :  { %v7320_v58 = vand.u32 4294901760, %v7294_v47  ;;  %v7288_v54 = vmul.f32 %v7280_v22, %v7239_v44  ;;  %v7435_v17 = vand.u32 4294901760, %v22354_v35 }
 0xc1e   :  { %v7442_v52 = vsub.f32 %v22349_v45, %v7441_v8  ;;  %v22371_v21 = vpack.c.bf16 %v7322_v20, %v7318_v50  ;;  %v22373_v11 = vsub.f32 %v7293_v29, %v7322_v20  ;;  %v7295_v55 = vadd.f32 %v7287_v24, %v7268_v27 }
 0xc1f   :  { %v22375_v2 = vsub.f32 %v7294_v47, %v7320_v58  ;;  %v7296_v9 = vadd.f32 %v7288_v54, %v7269_v40  ;;  %v7244_v28 = vpop.f32.mrb[46].mxu1  ;;  %v22377_v62 = vpack.c.bf16 %v7320_v58, %v7316_v61  ;;  %v7436_v16 = vsub.f32 %v22354_v35, %v7435_v17 }
 0xc20   :  { %v7453_v33 = vand.u32 4294901760, %v22373_v11  ;;  %v7326_v7 = vand.u32 4294901760, %v7295_v55  ;;  %v7289_v18 = vmul.f32 %v7276_v46, %v7244_v28  ;;  %v7246_v14 = vpop.f32.mrb[47].mxu1  ;;  %v7443_v12 = vand.u32 4294901760, %v7442_v52 }
 0xc21   :  { %v7324_v23 = vand.u32 4294901760, %v7296_v9  ;;  %v7290_v57 = vmul.f32 %v7280_v22, %v7246_v14  ;;  %18841 = vmatprep.subr.bf16.mxu0 %v22377_v62  ;;  %v7437_v15 = vand.u32 4294901760, %v7436_v16  ;;  %v7447_v32 = vand.u32 4294901760, %v22375_v2 }
 0xc22   :  { %v7454_v60 = vsub.f32 %v22373_v11, %v7453_v33  ;;  %v22384_v26 = vsub.f32 %v7295_v55, %v7326_v7  ;;  %v7297_v53 = vadd.f32 %v7289_v18, %v7270_v31  ;;  %18843 = vmatpush1.bf16.msra.mxu0 %v22371_v21  ;;  %v18856_v4 = vpack.c.bf16 %v22375_v2, %v22354_v35 }
 0xc23   :  { %v7458_v46 = vsub.f32 %v7296_v9, %v7324_v23  ;;  %v7298_v56 = vadd.f32 %v7290_v57, %v7271_v49  ;;  %v7448_v42 = vsub.f32 %v22375_v2, %v7447_v32  ;;  %v18858_v22 = vpack.c.bf16 %v22373_v11, %v22349_v45 }
 0xc24   :  { %v7465_v30 = vand.u32 4294901760, %v22384_v26  ;;  %v7330_v34 = vand.u32 4294901760, %v7297_v53  ;;  %v7455_v48 = vand.u32 4294901760, %v7454_v60  ;;  %v22393_v27 = vpack.c.bf16 %v7447_v32, %v7435_v17 }
 0xc25   :  { %v7328_v50 = vand.u32 4294901760, %v7298_v56  ;;  %v7449_v5 = vand.u32 4294901760, %v7448_v42  ;;  %v7459_v13 = vand.u32 4294901760, %v7458_v46  ;;  %v22395_v40 = vpack.c.bf16 %v7453_v33, %v7441_v8 }
 0xc26   :  { %v22397_v31 = vpack.c.bf16 %v7330_v34, %v7326_v7  ;;  %v7476_v61 = vsub.f32 %v7297_v53, %v7330_v34  ;;  %v18850_v49 = vpack.c.bf16 %v7455_v48, %v7443_v12  ;;  %v7403_v47 = vsub.f32 %v22338_v36, %v7402_v3 }
 0xc27   :  { %v7470_v29 = vsub.f32 %v7298_v56, %v7328_v50  ;;  %v22400_v35 = vpack.c.bf16 %v7328_v50, %v7324_v23  ;;  %v18848_v45 = vpack.c.bf16 %v7449_v5, %v7437_v15  ;;  %v7466_v0 = vsub.f32 %v22384_v26, %v7465_v30  ;;  %v18341_v56 = vld [vmem:[%s24969_s1 + $0xb8] sm:$0xff] }
 0xc28   :  { %v7477_v20 = vand.u32 4294901760, %v7476_v61  ;;  %v7413_v8 = vand.u32 4294901760, %v22364_v51  ;;  %v18862_v24 = vpack.c.bf16 %v7476_v61, %v22384_v26  ;;  %v7460_v44 = vsub.f32 %v7458_v46, %v7459_v13 }
 0xc29   :  { %18845 = vmatprep.subr.bf16.mxu0 %v22400_v35  ;;  %v7471_v38 = vand.u32 4294901760, %v7470_v29  ;;  %v22411_v58 = vsub.f32 %v22352_v19, %v22368_v63  ;;  %v18860_v54 = vpack.c.bf16 %v7470_v29, %v7458_v46  ;;  %v7404_v2 = vand.u32 4294901760, %v7403_v47 }
 0xc2a   :  { %v7478_v17 = vsub.f32 %v7476_v61, %v7477_v20  ;;  %18847 = vmatpush1.bf16.msra.mxu0 %v22397_v31  ;;  %v18878_v52 = vpack.c.bf16 %v7477_v20, %v7465_v30  ;;  %v7467_v9 = vand.u32 4294901760, %v7466_v0  ;;  %v7461_v16 = vand.u32 4294901760, %v7460_v44 }
 0xc2b   :  { %18849 = vmatprep.subr.bf16.mxu0 %v18848_v45  ;;  %v7472_v11 = vsub.f32 %v7470_v29, %v7471_v38  ;;  %v18876_v55 = vpack.c.bf16 %v7471_v38, %v7459_v13  ;;  %v7414_v7 = vsub.f32 %v22364_v51, %v7413_v8  ;;  %v7424_v19 = vand.u32 4294901760, %v22411_v58 }
 0xc2c   :  { %v7479_v28 = vand.u32 4294901760, %v7478_v17  ;;  %v8021_v13 = vsel %vm34_vm0, %v18341_v56, 0 }
 0xc2d   :  { %7394 = vmatmul.mubr.f32.vlgmr.msra.gmra.mrb[40].mxu0 %v7393_v6  ;;  %v7473_v33 = vand.u32 4294901760, %v7472_v11  ;;  %v7415_v12 = vand.u32 4294901760, %v7414_v7  ;;  %v7425_v23 = vsub.f32 %v22411_v58, %v7424_v19  ;;  %v22552_v44 = vand.u32 4294901760, %v8021_v13 }
 0xc2e   :  { %18851 = vmatpush1.bf16.msra.mxu0 %v18850_v49  ;;  %7399 = vmatprep.mubr.f32.mxu0 %v20562_v1  ;;  %v18854_v18 = vpack.c.bf16 %v7479_v28, %v7467_v9 }
 0xc2f   :  { %v18852_v14 = vpack.c.bf16 %v7473_v33, %v7461_v16  ;;  %v7426_v57 = vand.u32 4294901760, %v7425_v23 }
 0xc31   :  { %7405 = vmatmul.mubr.f32.gmra.mrb[42].mxu0 %v7404_v2  ;;  %18853 = vmatprep.subr.bf16.mxu0 %v18852_v14 }
 0xc32   :  { %18855 = vmatpush1.bf16.msra.mxu0 %v18854_v18  ;;  %7410 = vmatprep.mubr.f32.mxu0 %v20562_v1 }
 0xc33   :  { %18857 = vmatprep.subr.bf16.mxu0 %v18856_v4 }
 0xc35   :  { %7416 = vmatmul.mubr.f32.gmra.mrb[44].mxu0 %v7415_v12 }
 0xc36   :  { %7421 = vmatprep.mubr.f32.mxu0 %v20562_v1 }
 0xc39   :  { %7427 = vmatmul.mubr.f32.gmra.mrb[46].mxu0 %v7426_v57 }
 0xc3a   :  { %7537 = vmatprep.mubr.f32.mxu0 %v20562_v1 }
 0xc3d   :  { %7539 = vmatmul.mubr.f32.vlgmr.msra.gmra.mrb[40].mxu0 %v22316_v39 }
 0xc3e   :  { %18859 = vmatpush1.bf16.msra.mxu0 %v18858_v22  ;;  %7544 = vmatprep.mubr.f32.mxu0 %v20562_v1 }
 0xc3f   :  { %18861 = vmatprep.subr.bf16.mxu0 %v18860_v54 }
 0xc41   :  { %7546 = vmatmul.mubr.f32.gmra.mrb[42].mxu0 %v22329_v25 }
 0xc42   :  { %18863 = vmatpush1.bf16.msra.mxu0 %v18862_v24  ;;  %7551 = vmatprep.mubr.f32.mxu0 %v20562_v1 }
 0xc43   :  { %18865 = vmatprep.subr.bf16.mxu0 %v22377_v62 }
 0xc45   :  { %7553 = vmatmul.mubr.f32.gmra.mrb[44].mxu0 %v22344_v10 }
 0xc46   :  { %7558 = vmatprep.mubr.f32.mxu0 %v20562_v1 }
 0xc49   :  { %7560 = vmatmul.mubr.f32.gmra.mrb[46].mxu0 %v22368_v63 }
 0xc4a   :  { %7646 = vmatprep.mubr.f32.mxu0 %v20562_v1 }
 0xc4d   :  { %7649 = vmatmul.mubr.f32.vlgmr.msra.gmra.mrb[40].mxu0 %v22327_v43  ;;  %v18338_v43 = vld [vmem:[%s24969_s1 + $0xa0] sm:$0xff] }
 0xc4e   :  { %18867 = vmatpush1.bf16.msra.mxu0 %v22371_v21  ;;  %7654 = vmatprep.mubr.f32.mxu0 %v20562_v1 }
 0xc4f   :  { %18869 = vmatprep.subr.bf16.mxu0 %v22400_v35 }
 0xc51   :  { %7657 = vmatmul.mubr.f32.gmra.mrb[42].mxu0 %v22338_v36 }
 0xc52   :  { %18871 = vmatpush1.bf16.msra.mxu0 %v22397_v31  ;;  %7662 = vmatprep.mubr.f32.mxu0 %v20562_v1 }
 0xc53   :  { %18873 = vmatprep.subr.bf16.mxu0 %v22393_v27 }
 0xc55   :  { %7665 = vmatmul.mubr.f32.gmra.mrb[44].mxu0 %v22364_v51 }
 0xc56   :  { %7670 = vmatprep.mubr.f32.mxu0 %v20562_v1 }
 0xc59   :  { %7673 = vmatmul.mubr.f32.gmra.mrb[46].mxu0 %v22411_v58 }
 0xc5a   :  { %7751 = vmatprep.mubr.f32.mxu0 %v20562_v1 }
 0xc5d   :  { %7755 = vmatmul.mubr.f32.vlgmr.msra.gmra.mrb[40].mxu0 %v7391_v37 }
 0xc5e   :  { %18875 = vmatpush1.bf16.msra.mxu0 %v22395_v40  ;;  %7760 = vmatprep.mubr.f32.mxu0 %v20562_v1 }
 0xc5f   :  { %18877 = vmatprep.subr.bf16.mxu0 %v18876_v55 }
 0xc61   :  { %7764 = vmatmul.mubr.f32.gmra.mrb[42].mxu0 %v7402_v3 }
 0xc62   :  { %18879 = vmatpush1.bf16.msra.mxu0 %v18878_v52  ;;  %7769 = vmatprep.mubr.f32.mxu0 %v20562_v1 }
 0xc63   :  { %18881 = vmatprep.subr.bf16.mxu0 %v22377_v62 }
 0xc65   :  { %7773 = vmatmul.mubr.f32.gmra.mrb[44].mxu0 %v7413_v8 }
 0xc66   :  { %7778 = vmatprep.mubr.f32.mxu0 %v20562_v1 }
 0xc69   :  { %7782 = vmatmul.mubr.f32.gmra.mrb[46].mxu0 %v7424_v19 }
 0xc6a   :  { %7876 = vmatprep.mubr.f32.mxu0 %v20562_v1 }
 0xc6d   :  { %7878 = vmatmul.mubr.f32.vlgmr.msra.gmra.mrb[40].mxu0 %v22316_v39 }
 0xc6e   :  { %18883 = vmatpush1.bf16.msra.mxu0 %v22371_v21  ;;  %7883 = vmatprep.mubr.f32.mxu0 %v20562_v1 }
 0xc6f   :  { %18885 = vmatprep.subr.bf16.mxu0 %v22400_v35 }
 0xc71   :  { %7885 = vmatmul.mubr.f32.gmra.mrb[42].mxu0 %v22329_v25 }
 0xc72   :  { %18887 = vmatpush1.bf16.msra.mxu0 %v22397_v31  ;;  %7890 = vmatprep.mubr.f32.mxu0 %v20562_v1 }
 0xc75   :  { %7892 = vmatmul.mubr.f32.gmra.mrb[44].mxu0 %v22344_v10 }
 0xc76   :  { %7897 = vmatprep.mubr.f32.mxu0 %v20562_v1 }
 0xc79   :  { %7899 = vmatmul.mubr.f32.gmra.mrb[46].mxu0 %v22368_v63 }
 0xc7a   :  { %7977 = vmatprep.mubr.f32.mxu0 %v20562_v1 }
 0xc7d   :  { %7979 = vmatmul.mubr.f32.vlgmr.msra.gmra.mrb[40].mxu0 %v22316_v39  ;;  %v8012_v39 = vsel %vm34_vm0, %v18338_v43, 0 }
 0xc7e   :  { %7984 = vmatprep.mubr.f32.mxu0 %v20562_v1  ;;  %v22482_v37 = vand.u32 4294901760, %v8012_v39 }
 0xc80   :  { %v22491_v51 = vsub.f32 %v8012_v39, %v22482_v37 }
 0xc81   :  { %7986 = vmatmul.mubr.f32.gmra.mrb[42].mxu0 %v22329_v25  ;;  %v18339_v25 = vld [vmem:[%s24969_s1 + $0xa8] sm:$0xff] }
 0xc82   :  { %7991 = vmatprep.mubr.f32.mxu0 %v20562_v1  ;;  %v8015_v36 = vsel %vm34_vm0, %v18339_v25, 0  ;;  %v8098_v4 = vand.u32 4294901760, %v22491_v51 }
 0xc84   :  { %v8099_v6 = vsub.f32 %v22491_v51, %v8098_v4 }
 0xc85   :  { %7993 = vmatmul.mubr.f32.gmra.mrb[44].mxu0 %v22344_v10  ;;  %v18340_v10 = vld [vmem:[%s24969_s1 + $0xb0] sm:$0xff] }
 0xc86   :  { %7998 = vmatprep.mubr.f32.mxu0 %v20562_v1  ;;  %v8018_v32 = vsel %vm34_vm0, %v18340_v10, 0  ;;  %v8100_v39 = vand.u32 4294901760, %v8099_v6 }
 0xc87   :  { %v22519_v34 = vand.u32 4294901760, %v8018_v32 }
 0xc89   :  { %8000 = vmatmul.mubr.f32.gmra.mrb[46].mxu0 %v22368_v63  ;;  %v22493_v63 = vand.u32 4294901760, %v8015_v36  ;;  %v22546_v0 = vsub.f32 %v8018_v32, %v22519_v34 }
 0xc8a   :  { %8852 = vmatprep.mubr.f32.mxu0 %v20562_v1 }
 0xc8b   :  { %v22510_v46 = vsub.f32 %v8015_v36, %v22493_v63 }
 0xc8d   :  { %v8109_v49 = vand.u32 4294901760, %v22510_v46 }
 0xd50   :  { %v22488_v3 = vpop.f32.mrb[40].mxu0 }
 0xd51   :  { %v8025_v21 = vand.u32 4294901760, %v22488_v3  ;;  %v22496_v62 = vpop.f32.mrb[41].mxu0 }
 0xd52   :  { %v8023_v15 = vand.u32 4294901760, %v22496_v62 }
 0xd53   :  { %v22501_v60 = vsub.f32 %v22488_v3, %v8025_v21 }
 0xd54   :  { %v22504_v26 = vsub.f32 %v22496_v62, %v8023_v15  ;;  %v22506_v53 = vpop.f32.mrb[42].mxu0 }
 0xd55   :  { %v8148_v42 = vand.u32 4294901760, %v22501_v60  ;;  %v8029_v22 = vand.u32 4294901760, %v22506_v53  ;;  %v22517_v30 = vpop.f32.mrb[43].mxu0 }
 0xd56   :  { %v8142_v48 = vand.u32 4294901760, %v22504_v26  ;;  %v8027_v27 = vand.u32 4294901760, %v22517_v30 }
 0xd57   :  { %v22523_v50 = vpack.c.bf16 %v8029_v22, %v8025_v21  ;;  %v22526_v5 = vsub.f32 %v22506_v53, %v8029_v22  ;;  %v8149_v29 = vsub.f32 %v22501_v60, %v8148_v42 }
 0xd58   :  { %v22530_v40 = vsub.f32 %v22517_v30, %v8027_v27  ;;  %v22532_v31 = vpop.f32.mrb[44].mxu0  ;;  %v22534_v61 = vpack.c.bf16 %v8027_v27, %v8023_v15  ;;  %v8143_v24 = vsub.f32 %v22504_v26, %v8142_v48  ;;  %v8110_v15 = vsub.f32 %v22510_v46, %v8109_v49 }
 0xd59   :  { %v8160_v35 = vand.u32 4294901760, %v22526_v5  ;;  %v8033_v45 = vand.u32 4294901760, %v22532_v31  ;;  %v22543_v47 = vpop.f32.mrb[45].mxu0  ;;  %v18906_v17 = vpack.c.bf16 %v22526_v5, %v22501_v60  ;;  %v8150_v28 = vand.u32 4294901760, %v8149_v29 }
 0xd5a   :  { %v8154_v20 = vand.u32 4294901760, %v22530_v40  ;;  %v8031_v8 = vand.u32 4294901760, %v22543_v47  ;;  %18889 = vmatprep.subr.bf16.mxu1 %v22534_v61  ;;  %v18904_v54 = vpack.c.bf16 %v22530_v40, %v22504_v26  ;;  %v8144_v12 = vand.u32 4294901760, %v8143_v24 }
 0xd5b   :  { %v8161_v38 = vsub.f32 %v22526_v5, %v8160_v35  ;;  %v22556_v58 = vsub.f32 %v22532_v31, %v8033_v45  ;;  %18891 = vmatpush1.bf16.msra.mxu1 %v22523_v50  ;;  %v22571_v9 = vpack.c.bf16 %v8160_v35, %v8148_v42  ;;  %v8120_v26 = vand.u32 4294901760, %v22546_v0 }
 0xd5c   :  { %v22564_v52 = vsub.f32 %v22543_v47, %v8031_v8  ;;  %v22566_v11 = vpop.f32.mrb[46].mxu0  ;;  %v8155_v55 = vsub.f32 %v22530_v40, %v8154_v20  ;;  %v22569_v2 = vpack.c.bf16 %v8154_v20, %v8142_v48  ;;  %v22594_v48 = vsub.f32 %v8021_v13, %v22552_v44 }
 0xd5d   :  { %v8162_v16 = vand.u32 4294901760, %v8161_v38  ;;  %v8172_v33 = vand.u32 4294901760, %v22556_v58  ;;  %v8037_v7 = vand.u32 4294901760, %v22566_v11  ;;  %v22575_v19 = vpop.f32.mrb[47].mxu0  ;;  %v8111_v20 = vand.u32 4294901760, %v8110_v15 }
 0xd5e   :  { %v8166_v18 = vand.u32 4294901760, %v22564_v52  ;;  %v8035_v14 = vand.u32 4294901760, %v22575_v19  ;;  %v8156_v23 = vand.u32 4294901760, %v8155_v55  ;;  %v8121_v13 = vsub.f32 %v22546_v0, %v8120_v26 }
 0xd5f   :  { %v22579_v57 = vpack.c.bf16 %v8037_v7, %v8033_v45  ;;  %v8183_v43 = vsub.f32 %v22566_v11, %v8037_v7  ;;  %v18898_v25 = vpack.c.bf16 %v8162_v16, %v8150_v28  ;;  %v8173_v32 = vsub.f32 %v22556_v58, %v8172_v33 }
 0xd60   :  { %v8177_v36 = vsub.f32 %v22575_v19, %v8035_v14  ;;  %v22583_v10 = vpack.c.bf16 %v8035_v14, %v8031_v8  ;;  %v18896_v21 = vpack.c.bf16 %v8156_v23, %v8144_v12  ;;  %v8167_v22 = vsub.f32 %v22564_v52, %v8166_v18 }
 0xd61   :  { %v8184_v60 = vand.u32 4294901760, %v8183_v43  ;;  %v18910_v56 = vpack.c.bf16 %v8183_v43, %v22556_v58  ;;  %v8174_v35 = vand.u32 4294901760, %v8173_v32  ;;  %v8131_v38 = vand.u32 4294901760, %v22594_v48 }
 0xd62   :  { %v8178_v42 = vand.u32 4294901760, %v8177_v36  ;;  %18893 = vmatprep.subr.bf16.mxu1 %v22583_v10  ;;  %v18908_v27 = vpack.c.bf16 %v8177_v36, %v22564_v52  ;;  %v8168_v8 = vand.u32 4294901760, %v8167_v22  ;;  %v8122_v55 = vand.u32 4294901760, %v8121_v13 }
 0xd63   :  { %v8185_v5 = vsub.f32 %v8183_v43, %v8184_v60  ;;  %18895 = vmatpush1.bf16.msra.mxu1 %v22579_v57  ;;  %v18926_v40 = vpack.c.bf16 %v8184_v60, %v8172_v33  ;;  %v8132_v28 = vsub.f32 %v22594_v48, %v8131_v38 }
 0xd64   :  { %18897 = vmatprep.subr.bf16.mxu1 %v18896_v21  ;;  %v8179_v6 = vsub.f32 %v8177_v36, %v8178_v42  ;;  %v18924_v29 = vpack.c.bf16 %v8178_v42, %v8166_v18 }
 0xd65   :  { %v8186_v45 = vand.u32 4294901760, %v8185_v5  ;;  %v8133_v16 = vand.u32 4294901760, %v8132_v28 }
 0xd66   :  { %8101 = vmatmul.mubr.f32.vlgmr.msra.gmra.mrb[48].mxu1 %v8100_v39  ;;  %v8180_v24 = vand.u32 4294901760, %v8179_v6 }
 0xd67   :  { %18899 = vmatpush1.bf16.msra.mxu1 %v18898_v25  ;;  %8106 = vmatprep.mubr.f32.mxu1 %v20562_v1  ;;  %v18902_v58 = vpack.c.bf16 %v8186_v45, %v8174_v35 }
 0xd68   :  { %v18900_v52 = vpack.c.bf16 %v8180_v24, %v8168_v8 }
 0xd6a   :  { %8112 = vmatmul.mubr.f32.gmra.mrb[50].mxu1 %v8111_v20  ;;  %18901 = vmatprep.subr.bf16.mxu1 %v18900_v52 }
 0xd6b   :  { %18903 = vmatpush1.bf16.msra.mxu1 %v18902_v58  ;;  %8117 = vmatprep.mubr.f32.mxu1 %v20562_v1 }
 0xd6c   :  { %18905 = vmatprep.subr.bf16.mxu1 %v18904_v54  ;;  %v18346_v54 = vld [vmem:[%s24968_s0 + $0xd0] sm:$0xff] }
 0xd6d   :  { %v8775_v23 = vsel %vm34_vm0, %v18346_v54, 0 }
 0xd6e   :  { %8123 = vmatmul.mubr.f32.gmra.mrb[52].mxu1 %v8122_v55 }
 0xd6f   :  { %8128 = vmatprep.mubr.f32.mxu1 %v20562_v1 }
 0xd72   :  { %8134 = vmatmul.mubr.f32.gmra.mrb[54].mxu1 %v8133_v16 }
 0xd73   :  { %8244 = vmatprep.mubr.f32.mxu1 %v20562_v1 }
 0xd76   :  { %8246 = vmatmul.mubr.f32.vlgmr.msra.gmra.mrb[48].mxu1 %v22482_v37 }
 0xd77   :  { %18907 = vmatpush1.bf16.msra.mxu1 %v18906_v17  ;;  %8251 = vmatprep.mubr.f32.mxu1 %v20562_v1 }
 0xd78   :  { %18909 = vmatprep.subr.bf16.mxu1 %v18908_v27 }
 0xd7a   :  { %8253 = vmatmul.mubr.f32.gmra.mrb[50].mxu1 %v22493_v63 }
 0xd7b   :  { %18911 = vmatpush1.bf16.msra.mxu1 %v18910_v56  ;;  %8258 = vmatprep.mubr.f32.mxu1 %v20562_v1 }
 0xd7c   :  { %18913 = vmatprep.subr.bf16.mxu1 %v22534_v61 }
 0xd7e   :  { %8260 = vmatmul.mubr.f32.gmra.mrb[52].mxu1 %v22519_v34 }
 0xd7f   :  { %8265 = vmatprep.mubr.f32.mxu1 %v20562_v1 }
 0xd82   :  { %8267 = vmatmul.mubr.f32.gmra.mrb[54].mxu1 %v22552_v44 }
 0xd83   :  { %8353 = vmatprep.mubr.f32.mxu1 %v20562_v1 }
 0xd86   :  { %8356 = vmatmul.mubr.f32.vlgmr.msra.gmra.mrb[48].mxu1 %v22491_v51  ;;  %v18344_v51 = vld [vmem:[%s24968_s0 + $0xc0] sm:$0xff] }
 0xd87   :  { %18915 = vmatpush1.bf16.msra.mxu1 %v22523_v50  ;;  %8361 = vmatprep.mubr.f32.mxu1 %v20562_v1 }
 0xd88   :  { %18917 = vmatprep.subr.bf16.mxu1 %v22583_v10 }
 0xd8a   :  { %8364 = vmatmul.mubr.f32.gmra.mrb[50].mxu1 %v22510_v46  ;;  %v18345_v46 = vld [vmem:[%s24968_s0 + $0xc8] sm:$0xff] }
 0xd8b   :  { %18919 = vmatpush1.bf16.msra.mxu1 %v22579_v57  ;;  %8369 = vmatprep.mubr.f32.mxu1 %v20562_v1 }
 0xd8c   :  { %18921 = vmatprep.subr.bf16.mxu1 %v22569_v2 }
 0xd8e   :  { %8372 = vmatmul.mubr.f32.gmra.mrb[52].mxu1 %v22546_v0 }
 0xd8f   :  { %8377 = vmatprep.mubr.f32.mxu1 %v20562_v1 }
 0xd92   :  { %8380 = vmatmul.mubr.f32.gmra.mrb[54].mxu1 %v22594_v48 }
 0xd93   :  { %8458 = vmatprep.mubr.f32.mxu1 %v20562_v1 }
 0xd96   :  { %8462 = vmatmul.mubr.f32.vlgmr.msra.gmra.mrb[48].mxu1 %v8098_v4  ;;  %v18343_v4 = vld [vmem:[%s24971_s3 + $0x5] ss:$8 sm:$0x3] }
 0xd97   :  { %18923 = vmatpush1.bf16.msra.mxu1 %v22571_v9  ;;  %8467 = vmatprep.mubr.f32.mxu1 %v20562_v1 }
 0xd98   :  { %18925 = vmatprep.subr.bf16.mxu1 %v18924_v29 }
 0xd9a   :  { %8471 = vmatmul.mubr.f32.gmra.mrb[50].mxu1 %v8109_v49  ;;  %v8772_v49 = vsel %vm34_vm0, %v18345_v46, 0 }
 0xd9b   :  { %18927 = vmatpush1.bf16.msra.mxu1 %v18926_v40  ;;  %8476 = vmatprep.mubr.f32.mxu1 %v20562_v1  ;;  %v22685_v9 = vand.u32 4294901760, %v8772_v49 }
 0xd9c   :  { %18929 = vmatprep.subr.bf16.mxu1 %v22534_v61  ;;  %v8740_v61 = vrot.slane %v18343_v4, %v20877_v41 }
 0xd9d   :  { %v22694_v21 = vsub.f32 %v8772_v49, %v22685_v9 }
 0xd9e   :  { %8480 = vmatmul.mubr.f32.gmra.mrb[52].mxu1 %v8120_v26 }
 0xd9f   :  { %8485 = vmatprep.mubr.f32.mxu1 %v20562_v1 }
 0xda2   :  { %8489 = vmatmul.mubr.f32.gmra.mrb[54].mxu1 %v8131_v38 }
 0xda3   :  { %8583 = vmatprep.mubr.f32.mxu1 %v20562_v1 }
 0xda6   :  { %8585 = vmatmul.mubr.f32.vlgmr.msra.gmra.mrb[48].mxu1 %v22482_v37 }
 0xda7   :  { %18931 = vmatpush1.bf16.msra.mxu1 %v22523_v50  ;;  %8590 = vmatprep.mubr.f32.mxu1 %v20562_v1 }
 0xda8   :  { %18933 = vmatprep.subr.bf16.mxu1 %v22583_v10 }
 0xdaa   :  { %8592 = vmatmul.mubr.f32.gmra.mrb[50].mxu1 %v22493_v63 }
 0xdab   :  { %18935 = vmatpush1.bf16.msra.mxu1 %v22579_v57  ;;  %8597 = vmatprep.mubr.f32.mxu1 %v20562_v1 }
 0xdae   :  { %8599 = vmatmul.mubr.f32.gmra.mrb[52].mxu1 %v22519_v34 }
 0xdaf   :  { %8604 = vmatprep.mubr.f32.mxu1 %v20562_v1 }
 0xdb2   :  { %8606 = vmatmul.mubr.f32.gmra.mrb[54].mxu1 %v22552_v44 }
 0xdb3   :  { %8684 = vmatprep.mubr.f32.mxu1 %v20562_v1 }
 0xdb6   :  { %8686 = vmatmul.mubr.f32.vlgmr.msra.gmra.mrb[48].mxu1 %v22482_v37  ;;  %v18342_v37 = vld [vmem:[%s24970_s2 + $0x5] ss:$8 sm:$0x3] }
 0xdb7   :  { %8691 = vmatprep.mubr.f32.mxu1 %v20562_v1  ;;  %v8721_v50 = vrot.slane %v18342_v37, %v20877_v41  ;;  %v8725_v0 = vrot.slane %v18342_v37, %v20884_v59 }
 0xdb9   :  { %v8728_v33 = vmul.f32 %v8721_v50, %v22488_v3  ;;  %v8729_v14 = vmul.f32 %v8725_v0, %v22496_v62  ;;  %v8730_v57 = vmul.f32 %v8721_v50, %v22506_v53  ;;  %v8731_v39 = vmul.f32 %v8725_v0, %v22517_v30  ;;  %v18347_v3 = vld [vmem:[%s24968_s0 + $0xd8] sm:$0xff] }
 0xdba   :  { %8693 = vmatmul.mubr.f32.gmra.mrb[50].mxu1 %v22493_v63  ;;  %v8769_v63 = vsel %vm34_vm0, %v18344_v51, 0  ;;  %v8732_v62 = vmul.f32 %v8721_v50, %v22532_v31  ;;  %v22700_v53 = vand.u32 4294901760, %v8775_v23  ;;  %v8733_v30 = vmul.f32 %v8725_v0, %v22543_v47 }
 0xdbb   :  { %8698 = vmatprep.mubr.f32.mxu1 %v20562_v1  ;;  %v8734_v26 = vmul.f32 %v8721_v50, %v22566_v11  ;;  %v8735_v22 = vmul.f32 %v8725_v0, %v22575_v19  ;;  %v22708_v5 = vsel %vm34_vm0, %v18347_v3, 0  ;;  %v8866_v11 = vand.u32 4294901760, %v22694_v21 }
 0xdbc   :  { %v22720_v20 = vsub.f32 %v8775_v23, %v22700_v53  ;;  %v22724_v38 = vand.u32 4294901760, %v22708_v5 }
 0xdbe   :  { %8700 = vmatmul.mubr.f32.gmra.mrb[52].mxu1 %v22519_v34  ;;  %v22672_v34 = vand.u32 4294901760, %v8769_v63 }
 0xdbf   :  { %8705 = vmatprep.mubr.f32.mxu1 %v20562_v1 }
 0xdc0   :  { %v22683_v2 = vsub.f32 %v8769_v63, %v22672_v34 }
 0xdc2   :  { %8707 = vmatmul.mubr.f32.gmra.mrb[54].mxu1 %v22552_v44  ;;  %v8744_v44 = vrot.slane %v18343_v4, %v20884_v59  ;;  %v8855_v10 = vand.u32 4294901760, %v22683_v2 }
 0xdc3   :  { %9559 = vmatprep.mubr.f32.mxu1 %v20562_v1 }
 0xdc4   :  { %v22715_v47 = vsub.f32 %v22683_v2, %v8855_v10 }
 0xe89   :  { %v8687_v17 = vpop.f32.mrb[48].mxu1 }
 0xe8a   :  { %v8747_v7 = vmul.f32 %v8740_v61, %v8687_v17  ;;  %v8689_v18 = vpop.f32.mrb[49].mxu1 }
 0xe8b   :  { %v8748_v12 = vmul.f32 %v8744_v44, %v8689_v18 }
 0xe8c   :  { %v8755_v43 = vadd.f32 %v8747_v7, %v8728_v33 }
 0xe8d   :  { %v8756_v25 = vadd.f32 %v8748_v12, %v8729_v14  ;;  %v8694_v36 = vpop.f32.mrb[50].mxu1 }
 0xe8e   :  { %v8782_v15 = vand.u32 4294901760, %v8755_v43  ;;  %v8749_v32 = vmul.f32 %v8740_v61, %v8694_v36  ;;  %v8696_v60 = vpop.f32.mrb[51].mxu1 }
 0xe8f   :  { %v8780_v56 = vand.u32 4294901760, %v8756_v25  ;;  %v8750_v42 = vmul.f32 %v8744_v44, %v8696_v60 }
 0xe90   :  { %v22705_v48 = vsub.f32 %v8755_v43, %v8782_v15  ;;  %v8757_v27 = vadd.f32 %v8749_v32, %v8730_v57 }
 0xe91   :  { %v22710_v31 = vsub.f32 %v8756_v25, %v8780_v56  ;;  %v8758_v40 = vadd.f32 %v8750_v42, %v8731_v39  ;;  %v8701_v6 = vpop.f32.mrb[52].mxu1  ;;  %v8857_v42 = vand.u32 4294901760, %v22715_v47 }
 0xe92   :  { %v8905_v29 = vand.u32 4294901760, %v22705_v48  ;;  %v8786_v19 = vand.u32 4294901760, %v8757_v27  ;;  %v8751_v35 = vmul.f32 %v8740_v61, %v8701_v6  ;;  %v8703_v45 = vpop.f32.mrb[53].mxu1 }
 0xe93   :  { %v8784_v8 = vand.u32 4294901760, %v8758_v40  ;;  %v8752_v24 = vmul.f32 %v8744_v44, %v8703_v45  ;;  %v8899_v13 = vand.u32 4294901760, %v22710_v31 }
 0xe94   :  { %v8906_v58 = vsub.f32 %v22705_v48, %v8905_v29  ;;  %v22727_v52 = vpack.c.bf16 %v8786_v19, %v8782_v15  ;;  %v22729_v55 = vsub.f32 %v8757_v27, %v8786_v19  ;;  %v8759_v28 = vadd.f32 %v8751_v35, %v8732_v62 }
 0xe95   :  { %v22731_v16 = vsub.f32 %v8758_v40, %v8784_v8  ;;  %v8760_v51 = vadd.f32 %v8752_v24, %v8733_v30  ;;  %v8708_v37 = vpop.f32.mrb[54].mxu1  ;;  %v22733_v63 = vpack.c.bf16 %v8784_v8, %v8780_v56  ;;  %v8900_v4 = vsub.f32 %v22710_v31, %v8899_v13 }
 0xe96   :  { %v8917_v46 = vand.u32 4294901760, %v22729_v55  ;;  %v8790_v50 = vand.u32 4294901760, %v8759_v28  ;;  %v8753_v49 = vmul.f32 %v8740_v61, %v8708_v37  ;;  %v8710_v0 = vpop.f32.mrb[55].mxu1  ;;  %v8907_v54 = vand.u32 4294901760, %v8906_v58 }
 0xe97   :  { %v8788_v17 = vand.u32 4294901760, %v8760_v51  ;;  %v8754_v33 = vmul.f32 %v8744_v44, %v8710_v0  ;;  %18937 = vmatprep.subr.bf16.mxu0 %v22733_v63  ;;  %v8901_v7 = vand.u32 4294901760, %v8900_v4  ;;  %v8911_v18 = vand.u32 4294901760, %v22731_v16 }
 0xe98   :  { %v8918_v14 = vsub.f32 %v22729_v55, %v8917_v46  ;;  %v22740_v12 = vsub.f32 %v8759_v28, %v8790_v50  ;;  %v8761_v23 = vadd.f32 %v8753_v49, %v8734_v26  ;;  %18939 = vmatpush1.bf16.msra.mxu0 %v22727_v52  ;;  %v18952_v57 = vpack.c.bf16 %v22731_v16, %v22710_v31 }
 0xe99   :  { %v8922_v61 = vsub.f32 %v8760_v51, %v8788_v17  ;;  %v8762_v43 = vadd.f32 %v8754_v33, %v8735_v22  ;;  %v8912_v39 = vsub.f32 %v22731_v16, %v8911_v18  ;;  %v18954_v44 = vpack.c.bf16 %v22729_v55, %v22705_v48 }
 0xe9a   :  { %v8929_v25 = vand.u32 4294901760, %v22740_v12  ;;  %v8794_v36 = vand.u32 4294901760, %v8761_v23  ;;  %v8919_v3 = vand.u32 4294901760, %v8918_v14  ;;  %v22749_v62 = vpack.c.bf16 %v8911_v18, %v8899_v13 }
 0xe9b   :  { %v8792_v15 = vand.u32 4294901760, %v8762_v43  ;;  %v8913_v32 = vand.u32 4294901760, %v8912_v39  ;;  %v8923_v60 = vand.u32 4294901760, %v8922_v61  ;;  %v22751_v30 = vpack.c.bf16 %v8917_v46, %v8905_v29 }
 0xe9c   :  { %v22753_v26 = vpack.c.bf16 %v8794_v36, %v8790_v50  ;;  %v8940_v56 = vsub.f32 %v8761_v23, %v8794_v36  ;;  %v18946_v22 = vpack.c.bf16 %v8919_v3, %v8907_v54  ;;  %v8867_v40 = vsub.f32 %v22694_v21, %v8866_v11 }
 0xe9d   :  { %v8934_v27 = vsub.f32 %v8762_v43, %v8792_v15  ;;  %v22756_v31 = vpack.c.bf16 %v8792_v15, %v8788_v17  ;;  %v18944_v48 = vpack.c.bf16 %v8913_v32, %v8901_v7  ;;  %v8930_v6 = vsub.f32 %v22740_v12, %v8929_v25  ;;  %v18351_v43 = vld [vmem:[%s24969_s1 + $0xd8] sm:$0xff] }
 0xe9e   :  { %v8941_v19 = vand.u32 4294901760, %v8940_v56  ;;  %v8877_v29 = vand.u32 4294901760, %v22720_v20  ;;  %v18958_v35 = vpack.c.bf16 %v8940_v56, %v22740_v12  ;;  %v8924_v45 = vsub.f32 %v8922_v61, %v8923_v60 }
 0xe9f   :  { %18941 = vmatprep.subr.bf16.mxu0 %v22756_v31  ;;  %v8935_v47 = vand.u32 4294901760, %v8934_v27  ;;  %v22767_v8 = vsub.f32 %v22708_v5, %v22724_v38  ;;  %v18956_v24 = vpack.c.bf16 %v8934_v27, %v8922_v61  ;;  %v8868_v16 = vand.u32 4294901760, %v8867_v40 }
 0xea0   :  { %v8942_v13 = vsub.f32 %v8940_v56, %v8941_v19  ;;  %18943 = vmatpush1.bf16.msra.mxu0 %v22753_v26  ;;  %v18974_v58 = vpack.c.bf16 %v8941_v19, %v8929_v25  ;;  %v8931_v51 = vand.u32 4294901760, %v8930_v6  ;;  %v8925_v4 = vand.u32 4294901760, %v8924_v45 }
 0xea1   :  { %18945 = vmatprep.subr.bf16.mxu0 %v18944_v48  ;;  %v8936_v55 = vsub.f32 %v8934_v27, %v8935_v47  ;;  %v18972_v28 = vpack.c.bf16 %v8935_v47, %v8923_v60  ;;  %v8878_v50 = vsub.f32 %v22720_v20, %v8877_v29  ;;  %v8888_v5 = vand.u32 4294901760, %v22767_v8 }
 0xea2   :  { %v8943_v37 = vand.u32 4294901760, %v8942_v13  ;;  %v9485_v60 = vsel %vm34_vm0, %v18351_v43, 0 }
 0xea3   :  { %8858 = vmatmul.mubr.f32.vlgmr.msra.gmra.mrb[48].mxu0 %v8857_v42  ;;  %v8937_v46 = vand.u32 4294901760, %v8936_v55  ;;  %v8879_v54 = vand.u32 4294901760, %v8878_v50  ;;  %v8889_v17 = vsub.f32 %v22767_v8, %v8888_v5  ;;  %v22908_v45 = vand.u32 4294901760, %v9485_v60 }
 0xea4   :  { %18947 = vmatpush1.bf16.msra.mxu0 %v18946_v22  ;;  %8863 = vmatprep.mubr.f32.mxu0 %v20562_v1  ;;  %v18950_v49 = vpack.c.bf16 %v8943_v37, %v8931_v51 }
 0xea5   :  { %v18948_v0 = vpack.c.bf16 %v8937_v46, %v8925_v4  ;;  %v8890_v33 = vand.u32 4294901760, %v8889_v17 }
 0xea7   :  { %8869 = vmatmul.mubr.f32.gmra.mrb[50].mxu0 %v8868_v16  ;;  %18949 = vmatprep.subr.bf16.mxu0 %v18948_v0 }
 0xea8   :  { %18951 = vmatpush1.bf16.msra.mxu0 %v18950_v49  ;;  %8874 = vmatprep.mubr.f32.mxu0 %v20562_v1 }
 0xea9   :  { %18953 = vmatprep.subr.bf16.mxu0 %v18952_v57 }
 0xeab   :  { %8880 = vmatmul.mubr.f32.gmra.mrb[52].mxu0 %v8879_v54 }
 0xeac   :  { %8885 = vmatprep.mubr.f32.mxu0 %v20562_v1 }
 0xeaf   :  { %8891 = vmatmul.mubr.f32.gmra.mrb[54].mxu0 %v8890_v33 }
 0xeb0   :  { %9001 = vmatprep.mubr.f32.mxu0 %v20562_v1 }
 0xeb3   :  { %9003 = vmatmul.mubr.f32.vlgmr.msra.gmra.mrb[48].mxu0 %v22672_v34 }
 0xeb4   :  { %18955 = vmatpush1.bf16.msra.mxu0 %v18954_v44  ;;  %9008 = vmatprep.mubr.f32.mxu0 %v20562_v1 }
 0xeb5   :  { %18957 = vmatprep.subr.bf16.mxu0 %v18956_v24 }
 0xeb7   :  { %9010 = vmatmul.mubr.f32.gmra.mrb[50].mxu0 %v22685_v9 }
 0xeb8   :  { %18959 = vmatpush1.bf16.msra.mxu0 %v18958_v35  ;;  %9015 = vmatprep.mubr.f32.mxu0 %v20562_v1 }
 0xeb9   :  { %18961 = vmatprep.subr.bf16.mxu0 %v22733_v63 }
 0xebb   :  { %9017 = vmatmul.mubr.f32.gmra.mrb[52].mxu0 %v22700_v53 }
 0xebc   :  { %9022 = vmatprep.mubr.f32.mxu0 %v20562_v1 }
 0xebf   :  { %9024 = vmatmul.mubr.f32.gmra.mrb[54].mxu0 %v22724_v38 }
 0xec0   :  { %9110 = vmatprep.mubr.f32.mxu0 %v20562_v1 }
 0xec3   :  { %9113 = vmatmul.mubr.f32.vlgmr.msra.gmra.mrb[48].mxu0 %v22683_v2  ;;  %v18348_v2 = vld [vmem:[%s24969_s1 + $0xc0] sm:$0xff] }
 0xec4   :  { %18963 = vmatpush1.bf16.msra.mxu0 %v22727_v52  ;;  %9118 = vmatprep.mubr.f32.mxu0 %v20562_v1 }
 0xec5   :  { %18965 = vmatprep.subr.bf16.mxu0 %v22756_v31 }
 0xec7   :  { %9121 = vmatmul.mubr.f32.gmra.mrb[50].mxu0 %v22694_v21 }
 0xec8   :  { %18967 = vmatpush1.bf16.msra.mxu0 %v22753_v26  ;;  %9126 = vmatprep.mubr.f32.mxu0 %v20562_v1 }
 0xec9   :  { %18969 = vmatprep.subr.bf16.mxu0 %v22749_v62 }
 0xecb   :  { %9129 = vmatmul.mubr.f32.gmra.mrb[52].mxu0 %v22720_v20 }
 0xecc   :  { %9134 = vmatprep.mubr.f32.mxu0 %v20562_v1 }
 0xecf   :  { %9137 = vmatmul.mubr.f32.gmra.mrb[54].mxu0 %v22767_v8 }
 0xed0   :  { %9215 = vmatprep.mubr.f32.mxu0 %v20562_v1 }
 0xed3   :  { %9219 = vmatmul.mubr.f32.vlgmr.msra.gmra.mrb[48].mxu0 %v8855_v10 }
 0xed4   :  { %18971 = vmatpush1.bf16.msra.mxu0 %v22751_v30  ;;  %9224 = vmatprep.mubr.f32.mxu0 %v20562_v1 }
 0xed5   :  { %18973 = vmatprep.subr.bf16.mxu0 %v18972_v28 }
 0xed7   :  { %9228 = vmatmul.mubr.f32.gmra.mrb[50].mxu0 %v8866_v11 }
 0xed8   :  { %18975 = vmatpush1.bf16.msra.mxu0 %v18974_v58  ;;  %9233 = vmatprep.mubr.f32.mxu0 %v20562_v1 }
 0xed9   :  { %18977 = vmatprep.subr.bf16.mxu0 %v22733_v63 }
 0xedb   :  { %9237 = vmatmul.mubr.f32.gmra.mrb[52].mxu0 %v8877_v29 }
 0xedc   :  { %9242 = vmatprep.mubr.f32.mxu0 %v20562_v1 }
 0xedf   :  { %9246 = vmatmul.mubr.f32.gmra.mrb[54].mxu0 %v8888_v5 }
 0xee0   :  { %9340 = vmatprep.mubr.f32.mxu0 %v20562_v1 }
 0xee3   :  { %9342 = vmatmul.mubr.f32.vlgmr.msra.gmra.mrb[48].mxu0 %v22672_v34 }
 0xee4   :  { %18979 = vmatpush1.bf16.msra.mxu0 %v22727_v52  ;;  %9347 = vmatprep.mubr.f32.mxu0 %v20562_v1 }
 0xee5   :  { %18981 = vmatprep.subr.bf16.mxu0 %v22756_v31 }
 0xee7   :  { %9349 = vmatmul.mubr.f32.gmra.mrb[50].mxu0 %v22685_v9 }
 0xee8   :  { %18983 = vmatpush1.bf16.msra.mxu0 %v22753_v26  ;;  %9354 = vmatprep.mubr.f32.mxu0 %v20562_v1 }
 0xeeb   :  { %9356 = vmatmul.mubr.f32.gmra.mrb[52].mxu0 %v22700_v53 }
 0xeec   :  { %9361 = vmatprep.mubr.f32.mxu0 %v20562_v1 }
 0xeef   :  { %9363 = vmatmul.mubr.f32.gmra.mrb[54].mxu0 %v22724_v38 }
 0xef0   :  { %9441 = vmatprep.mubr.f32.mxu0 %v20562_v1 }
 0xef3   :  { %9443 = vmatmul.mubr.f32.vlgmr.msra.gmra.mrb[48].mxu0 %v22672_v34  ;;  %v9476_v34 = vsel %vm34_vm0, %v18348_v2, 0 }
 0xef4   :  { %9448 = vmatprep.mubr.f32.mxu0 %v20562_v1  ;;  %v22838_v10 = vand.u32 4294901760, %v9476_v34 }
 0xef6   :  { %v22847_v20 = vsub.f32 %v9476_v34, %v22838_v10 }
 0xef7   :  { %9450 = vmatmul.mubr.f32.gmra.mrb[50].mxu0 %v22685_v9  ;;  %v18349_v9 = vld [vmem:[%s24969_s1 + $0xc8] sm:$0xff] }
 0xef8   :  { %9455 = vmatprep.mubr.f32.mxu0 %v20562_v1  ;;  %v9479_v21 = vsel %vm34_vm0, %v18349_v9, 0  ;;  %v9562_v57 = vand.u32 4294901760, %v22847_v20 }
 0xefa   :  { %v9563_v42 = vsub.f32 %v22847_v20, %v9562_v57 }
 0xefb   :  { %9457 = vmatmul.mubr.f32.gmra.mrb[52].mxu0 %v22700_v53  ;;  %v18350_v53 = vld [vmem:[%s24969_s1 + $0xd0] sm:$0xff] }
 0xefc   :  { %9462 = vmatprep.mubr.f32.mxu0 %v20562_v1  ;;  %v9482_v18 = vsel %vm34_vm0, %v18350_v53, 0  ;;  %v9564_v34 = vand.u32 4294901760, %v9563_v42 }
 0xefd   :  { %v22875_v36 = vand.u32 4294901760, %v9482_v18 }
 0xeff   :  { %9464 = vmatmul.mubr.f32.gmra.mrb[54].mxu0 %v22724_v38  ;;  %v22849_v38 = vand.u32 4294901760, %v9479_v21  ;;  %v22902_v6 = vsub.f32 %v9482_v18, %v22875_v36 }
 0xf00   :  { %10316 = vmatprep.mubr.f32.mxu0 %v20562_v1 }
 0xf01   :  { %v22866_v61 = vsub.f32 %v9479_v21, %v22849_v38 }
 0xf03   :  { %v9573_v22 = vand.u32 4294901760, %v22866_v61 }
 0xfc6   :  { %v22844_v11 = vpop.f32.mrb[48].mxu0 }
 0xfc7   :  { %v9489_v52 = vand.u32 4294901760, %v22844_v11  ;;  %v22852_v63 = vpop.f32.mrb[49].mxu0 }
 0xfc8   :  { %v9487_v7 = vand.u32 4294901760, %v22852_v63 }
 0xfc9   :  { %v22857_v14 = vsub.f32 %v22844_v11, %v9489_v52 }
 0xfca   :  { %v22860_v12 = vsub.f32 %v22852_v63, %v9487_v7  ;;  %v22862_v23 = vpop.f32.mrb[50].mxu0 }
 0xfcb   :  { %v9612_v39 = vand.u32 4294901760, %v22857_v14  ;;  %v9493_v44 = vand.u32 4294901760, %v22862_v23  ;;  %v22873_v25 = vpop.f32.mrb[51].mxu0 }
 0xfcc   :  { %v9606_v3 = vand.u32 4294901760, %v22860_v12  ;;  %v9491_v62 = vand.u32 4294901760, %v22873_v25 }
 0xfcd   :  { %v22879_v15 = vpack.c.bf16 %v9493_v44, %v9489_v52  ;;  %v22882_v32 = vsub.f32 %v22862_v23, %v9493_v44  ;;  %v9613_v27 = vsub.f32 %v22857_v14, %v9612_v39 }
 0xfce   :  { %v22886_v30 = vsub.f32 %v22873_v25, %v9491_v62  ;;  %v22888_v26 = vpop.f32.mrb[52].mxu0  ;;  %v22890_v56 = vpack.c.bf16 %v9491_v62, %v9487_v7  ;;  %v9607_v35 = vsub.f32 %v22860_v12, %v9606_v3  ;;  %v9574_v7 = vsub.f32 %v22866_v61, %v9573_v22 }
 0xfcf   :  { %v9624_v31 = vand.u32 4294901760, %v22882_v32  ;;  %v9497_v48 = vand.u32 4294901760, %v22888_v26  ;;  %v22899_v40 = vpop.f32.mrb[53].mxu0  ;;  %v19002_v13 = vpack.c.bf16 %v22882_v32, %v22857_v14  ;;  %v9614_v37 = vand.u32 4294901760, %v9613_v27 }
 0xfd0   :  { %v9618_v19 = vand.u32 4294901760, %v22886_v30  ;;  %v9495_v29 = vand.u32 4294901760, %v22899_v40  ;;  %18985 = vmatprep.subr.bf16.mxu1 %v22890_v56  ;;  %v19000_v24 = vpack.c.bf16 %v22886_v30, %v22860_v12  ;;  %v9608_v54 = vand.u32 4294901760, %v9607_v35 }
 0xfd1   :  { %v9625_v47 = vsub.f32 %v22882_v32, %v9624_v31  ;;  %v22912_v8 = vsub.f32 %v22888_v26, %v9497_v48  ;;  %18987 = vmatpush1.bf16.msra.mxu1 %v22879_v15  ;;  %v22927_v51 = vpack.c.bf16 %v9624_v31, %v9612_v39  ;;  %v9584_v12 = vand.u32 4294901760, %v22902_v6 }
 0xfd2   :  { %v22920_v58 = vsub.f32 %v22899_v40, %v9495_v29  ;;  %v22922_v55 = vpop.f32.mrb[54].mxu0  ;;  %v9619_v28 = vsub.f32 %v22886_v30, %v9618_v19  ;;  %v22925_v16 = vpack.c.bf16 %v9618_v19, %v9606_v3  ;;  %v22950_v3 = vsub.f32 %v9485_v60, %v22908_v45 }
 0xfd3   :  { %v9626_v4 = vand.u32 4294901760, %v9625_v47  ;;  %v9636_v46 = vand.u32 4294901760, %v22912_v8  ;;  %v9501_v50 = vand.u32 4294901760, %v22922_v55  ;;  %v22931_v5 = vpop.f32.mrb[55].mxu0  ;;  %v9575_v19 = vand.u32 4294901760, %v9574_v7 }
 0xfd4   :  { %v9630_v49 = vand.u32 4294901760, %v22920_v58  ;;  %v9499_v0 = vand.u32 4294901760, %v22931_v5  ;;  %v9620_v17 = vand.u32 4294901760, %v9619_v28  ;;  %v9585_v60 = vsub.f32 %v22902_v6, %v9584_v12 }
 0xfd5   :  { %v22935_v33 = vpack.c.bf16 %v9501_v50, %v9497_v48  ;;  %v9647_v2 = vsub.f32 %v22922_v55, %v9501_v50  ;;  %v18994_v9 = vpack.c.bf16 %v9626_v4, %v9614_v37  ;;  %v9637_v18 = vsub.f32 %v22912_v8, %v9636_v46 }
 0xfd6   :  { %v9641_v21 = vsub.f32 %v22931_v5, %v9499_v0  ;;  %v22939_v53 = vpack.c.bf16 %v9499_v0, %v9495_v29  ;;  %v18992_v52 = vpack.c.bf16 %v9620_v17, %v9608_v54  ;;  %v9631_v44 = vsub.f32 %v22920_v58, %v9630_v49 }
 0xfd7   :  { %v9648_v14 = vand.u32 4294901760, %v9647_v2  ;;  %v19006_v43 = vpack.c.bf16 %v9647_v2, %v22912_v8  ;;  %v9638_v31 = vand.u32 4294901760, %v9637_v18  ;;  %v9595_v47 = vand.u32 4294901760, %v22950_v3 }
 0xfd8   :  { %v9642_v39 = vand.u32 4294901760, %v9641_v21  ;;  %18989 = vmatprep.subr.bf16.mxu1 %v22939_v53  ;;  %v19004_v62 = vpack.c.bf16 %v9641_v21, %v22920_v58  ;;  %v9632_v29 = vand.u32 4294901760, %v9631_v44  ;;  %v9586_v28 = vand.u32 4294901760, %v9585_v60 }
 0xfd9   :  { %v9649_v32 = vsub.f32 %v9647_v2, %v9648_v14  ;;  %18991 = vmatpush1.bf16.msra.mxu1 %v22935_v33  ;;  %v19022_v30 = vpack.c.bf16 %v9648_v14, %v9636_v46  ;;  %v9596_v37 = vsub.f32 %v22950_v3, %v9595_v47 }
 0xfda   :  { %18993 = vmatprep.subr.bf16.mxu1 %v18992_v52  ;;  %v9643_v42 = vsub.f32 %v9641_v21, %v9642_v39  ;;  %v19020_v27 = vpack.c.bf16 %v9642_v39, %v9630_v49 }
 0xfdb   :  { %v9650_v48 = vand.u32 4294901760, %v9649_v32  ;;  %v9597_v4 = vand.u32 4294901760, %v9596_v37 }
 0xfdc   :  { %9565 = vmatmul.mubr.f32.vlgmr.msra.gmra.mrb[56].mxu1 %v9564_v34  ;;  %v9644_v35 = vand.u32 4294901760, %v9643_v42 }
 0xfdd   :  { %18995 = vmatpush1.bf16.msra.mxu1 %v18994_v9  ;;  %9570 = vmatprep.mubr.f32.mxu1 %v20562_v1  ;;  %v18998_v8 = vpack.c.bf16 %v9650_v48, %v9638_v31 }
 0xfde   :  { %v18996_v58 = vpack.c.bf16 %v9644_v35, %v9632_v29 }
 0xfe0   :  { %9576 = vmatmul.mubr.f32.gmra.mrb[58].mxu1 %v9575_v19  ;;  %18997 = vmatprep.subr.bf16.mxu1 %v18996_v58 }
 0xfe1   :  { %18999 = vmatpush1.bf16.msra.mxu1 %v18998_v8  ;;  %9581 = vmatprep.mubr.f32.mxu1 %v20562_v1 }
 0xfe2   :  { %19001 = vmatprep.subr.bf16.mxu1 %v19000_v24  ;;  %v18356_v24 = vld [vmem:[%s24968_s0 + $0xf0] sm:$0xff] }
 0xfe3   :  { %v10239_v17 = vsel %vm34_vm0, %v18356_v24, 0 }
 0xfe4   :  { %9587 = vmatmul.mubr.f32.gmra.mrb[60].mxu1 %v9586_v28 }
 0xfe5   :  { %9592 = vmatprep.mubr.f32.mxu1 %v20562_v1 }
 0xfe8   :  { %9598 = vmatmul.mubr.f32.gmra.mrb[62].mxu1 %v9597_v4 }
 0xfe9   :  { %9708 = vmatprep.mubr.f32.mxu1 %v20562_v1 }
 0xfec   :  { %9710 = vmatmul.mubr.f32.vlgmr.msra.gmra.mrb[56].mxu1 %v22838_v10 }
 0xfed   :  { %19003 = vmatpush1.bf16.msra.mxu1 %v19002_v13  ;;  %9715 = vmatprep.mubr.f32.mxu1 %v20562_v1 }
 0xfee   :  { %19005 = vmatprep.subr.bf16.mxu1 %v19004_v62 }
 0xff0   :  { %9717 = vmatmul.mubr.f32.gmra.mrb[58].mxu1 %v22849_v38 }
 0xff1   :  { %19007 = vmatpush1.bf16.msra.mxu1 %v19006_v43  ;;  %9722 = vmatprep.mubr.f32.mxu1 %v20562_v1 }
 0xff2   :  { %19009 = vmatprep.subr.bf16.mxu1 %v22890_v56 }
 0xff4   :  { %9724 = vmatmul.mubr.f32.gmra.mrb[60].mxu1 %v22875_v36 }
 0xff5   :  { %9729 = vmatprep.mubr.f32.mxu1 %v20562_v1 }
 0xff8   :  { %9731 = vmatmul.mubr.f32.gmra.mrb[62].mxu1 %v22908_v45 }
 0xff9   :  { %9817 = vmatprep.mubr.f32.mxu1 %v20562_v1 }
 0xffc   :  { %9820 = vmatmul.mubr.f32.vlgmr.msra.gmra.mrb[56].mxu1 %v22847_v20  ;;  %v18354_v20 = vld [vmem:[%s24968_s0 + $0xe0] sm:$0xff] }
 0xffd   :  { %19011 = vmatpush1.bf16.msra.mxu1 %v22879_v15  ;;  %9825 = vmatprep.mubr.f32.mxu1 %v20562_v1 }
 0xffe   :  { %19013 = vmatprep.subr.bf16.mxu1 %v22939_v53 }
0x1000   :  { %9828 = vmatmul.mubr.f32.gmra.mrb[58].mxu1 %v22866_v61  ;;  %v18355_v61 = vld [vmem:[%s24968_s0 + $0xe8] sm:$0xff] }
0x1001   :  { %19015 = vmatpush1.bf16.msra.mxu1 %v22935_v33  ;;  %9833 = vmatprep.mubr.f32.mxu1 %v20562_v1 }
0x1002   :  { %19017 = vmatprep.subr.bf16.mxu1 %v22925_v16 }
0x1004   :  { %9836 = vmatmul.mubr.f32.gmra.mrb[60].mxu1 %v22902_v6 }
0x1005   :  { %9841 = vmatprep.mubr.f32.mxu1 %v20562_v1 }
0x1008   :  { %9844 = vmatmul.mubr.f32.gmra.mrb[62].mxu1 %v22950_v3 }
0x1009   :  { %9922 = vmatprep.mubr.f32.mxu1 %v20562_v1 }
0x100c   :  { %9926 = vmatmul.mubr.f32.vlgmr.msra.gmra.mrb[56].mxu1 %v9562_v57  ;;  %v18353_v57 = vld [vmem:[%s24971_s3 + $0x6] ss:$8 sm:$0x3] }
0x100d   :  { %19019 = vmatpush1.bf16.msra.mxu1 %v22927_v51  ;;  %9931 = vmatprep.mubr.f32.mxu1 %v20562_v1 }
0x100e   :  { %19021 = vmatprep.subr.bf16.mxu1 %v19020_v27 }
0x1010   :  { %9935 = vmatmul.mubr.f32.gmra.mrb[58].mxu1 %v9573_v22  ;;  %v10236_v22 = vsel %vm34_vm0, %v18355_v61, 0 }
0x1011   :  { %19023 = vmatpush1.bf16.msra.mxu1 %v19022_v30  ;;  %9940 = vmatprep.mubr.f32.mxu1 %v20562_v1  ;;  %v23041_v51 = vand.u32 4294901760, %v10236_v22 }
0x1012   :  { %19025 = vmatprep.subr.bf16.mxu1 %v22890_v56  ;;  %v10204_v56 = vrot.slane %v18353_v57, %v20877_v41 }
0x1013   :  { %v23050_v52 = vsub.f32 %v10236_v22, %v23041_v51 }
0x1014   :  { %9944 = vmatmul.mubr.f32.gmra.mrb[60].mxu1 %v9584_v12 }
0x1015   :  { %9949 = vmatprep.mubr.f32.mxu1 %v20562_v1 }
0x1018   :  { %9953 = vmatmul.mubr.f32.gmra.mrb[62].mxu1 %v9595_v47 }
0x1019   :  { %10047 = vmatprep.mubr.f32.mxu1 %v20562_v1 }
0x101c   :  { %10049 = vmatmul.mubr.f32.vlgmr.msra.gmra.mrb[56].mxu1 %v22838_v10 }
0x101d   :  { %19027 = vmatpush1.bf16.msra.mxu1 %v22879_v15  ;;  %10054 = vmatprep.mubr.f32.mxu1 %v20562_v1 }
0x101e   :  { %19029 = vmatprep.subr.bf16.mxu1 %v22939_v53 }
0x1020   :  { %10056 = vmatmul.mubr.f32.gmra.mrb[58].mxu1 %v22849_v38 }
0x1021   :  { %19031 = vmatpush1.bf16.msra.mxu1 %v22935_v33  ;;  %10061 = vmatprep.mubr.f32.mxu1 %v20562_v1 }
0x1024   :  { %10063 = vmatmul.mubr.f32.gmra.mrb[60].mxu1 %v22875_v36 }
0x1025   :  { %10068 = vmatprep.mubr.f32.mxu1 %v20562_v1 }
0x1028   :  { %10070 = vmatmul.mubr.f32.gmra.mrb[62].mxu1 %v22908_v45 }
0x1029   :  { %10148 = vmatprep.mubr.f32.mxu1 %v20562_v1 }
0x102c   :  { %10150 = vmatmul.mubr.f32.vlgmr.msra.gmra.mrb[56].mxu1 %v22838_v10  ;;  %v18352_v10 = vld [vmem:[%s24970_s2 + $0x6] ss:$8 sm:$0x3] }
0x102d   :  { %10155 = vmatprep.mubr.f32.mxu1 %v20562_v1  ;;  %v10185_v15 = vrot.slane %v18352_v10, %v20877_v41  ;;  %v10189_v6 = vrot.slane %v18352_v10, %v20884_v59 }
0x102f   :  { %v10192_v46 = vmul.f32 %v10185_v15, %v22844_v11  ;;  %v10193_v0 = vmul.f32 %v10189_v6, %v22852_v63  ;;  %v10194_v33 = vmul.f32 %v10185_v15, %v22862_v23  ;;  %v10195_v34 = vmul.f32 %v10189_v6, %v22873_v25  ;;  %v18357_v11 = vld [vmem:[%s24968_s0 + $0xf8] sm:$0xff] }
0x1030   :  { %10157 = vmatmul.mubr.f32.gmra.mrb[58].mxu1 %v22849_v38  ;;  %v10233_v38 = vsel %vm34_vm0, %v18354_v20, 0  ;;  %v10196_v63 = vmul.f32 %v10185_v15, %v22888_v26  ;;  %v23056_v23 = vand.u32 4294901760, %v10239_v17  ;;  %v10197_v25 = vmul.f32 %v10189_v6, %v22899_v40 }
0x1031   :  { %10162 = vmatprep.mubr.f32.mxu1 %v20562_v1  ;;  %v10198_v12 = vmul.f32 %v10185_v15, %v22922_v55  ;;  %v10199_v44 = vmul.f32 %v10189_v6, %v22931_v5  ;;  %v23064_v32 = vsel %vm34_vm0, %v18357_v11, 0  ;;  %v10330_v55 = vand.u32 4294901760, %v23050_v52 }
0x1032   :  { %v23076_v19 = vsub.f32 %v10239_v17, %v23056_v23  ;;  %v23080_v47 = vand.u32 4294901760, %v23064_v32 }
0x1034   :  { %10164 = vmatmul.mubr.f32.gmra.mrb[60].mxu1 %v22875_v36  ;;  %v23028_v36 = vand.u32 4294901760, %v10233_v38 }
0x1035   :  { %10169 = vmatprep.mubr.f32.mxu1 %v20562_v1 }
0x1036   :  { %v23039_v16 = vsub.f32 %v10233_v38, %v23028_v36 }
0x1038   :  { %10171 = vmatmul.mubr.f32.gmra.mrb[62].mxu1 %v22908_v45  ;;  %v10208_v45 = vrot.slane %v18353_v57, %v20884_v59  ;;  %v10319_v53 = vand.u32 4294901760, %v23039_v16 }
0x1039   :  { %11023 = vmatprep.mubr.f32.mxu1 %v20562_v1 }
0x103a   :  { %v23071_v40 = vsub.f32 %v23039_v16, %v10319_v53 }
0x10ff   :  { %v10151_v13 = vpop.f32.mrb[56].mxu1 }
0x1100   :  { %v10211_v50 = vmul.f32 %v10204_v56, %v10151_v13  ;;  %v10153_v49 = vpop.f32.mrb[57].mxu1 }
0x1101   :  { %v10212_v54 = vmul.f32 %v10208_v45, %v10153_v49 }
0x1102   :  { %v10219_v2 = vadd.f32 %v10211_v50, %v10192_v46 }
0x1103   :  { %v10220_v9 = vadd.f32 %v10212_v54, %v10193_v0  ;;  %v10158_v21 = vpop.f32.mrb[58].mxu1 }
0x1104   :  { %v10246_v7 = vand.u32 4294901760, %v10219_v2  ;;  %v10213_v18 = vmul.f32 %v10204_v56, %v10158_v21  ;;  %v10160_v14 = vpop.f32.mrb[59].mxu1 }
0x1105   :  { %v10244_v43 = vand.u32 4294901760, %v10220_v9  ;;  %v10214_v39 = vmul.f32 %v10208_v45, %v10160_v14 }
0x1106   :  { %v23061_v3 = vsub.f32 %v10219_v2, %v10246_v7  ;;  %v10221_v62 = vadd.f32 %v10213_v18, %v10194_v33 }
0x1107   :  { %v23066_v26 = vsub.f32 %v10220_v9, %v10244_v43  ;;  %v10222_v30 = vadd.f32 %v10214_v39, %v10195_v34  ;;  %v10165_v42 = vpop.f32.mrb[60].mxu1  ;;  %v10321_v39 = vand.u32 4294901760, %v23071_v40 }
0x1108   :  { %v10369_v27 = vand.u32 4294901760, %v23061_v3  ;;  %v10250_v5 = vand.u32 4294901760, %v10221_v62  ;;  %v10215_v31 = vmul.f32 %v10204_v56, %v10165_v42  ;;  %v10167_v48 = vpop.f32.mrb[61].mxu1 }
0x1109   :  { %v10248_v29 = vand.u32 4294901760, %v10222_v30  ;;  %v10216_v35 = vmul.f32 %v10208_v45, %v10167_v48  ;;  %v10363_v60 = vand.u32 4294901760, %v23066_v26 }
0x110a   :  { %v10370_v8 = vsub.f32 %v23061_v3, %v10369_v27  ;;  %v23083_v58 = vpack.c.bf16 %v10250_v5, %v10246_v7  ;;  %v23085_v28 = vsub.f32 %v10221_v62, %v10250_v5  ;;  %v10223_v37 = vadd.f32 %v10215_v31, %v10196_v63 }
0x110b   :  { %v23087_v4 = vsub.f32 %v10222_v30, %v10248_v29  ;;  %v10224_v20 = vadd.f32 %v10216_v35, %v10197_v25  ;;  %v10172_v10 = vpop.f32.mrb[62].mxu1  ;;  %v23089_v38 = vpack.c.bf16 %v10248_v29, %v10244_v43  ;;  %v10364_v57 = vsub.f32 %v23066_v26, %v10363_v60 }
0x110c   :  { %v10381_v61 = vand.u32 4294901760, %v23085_v28  ;;  %v10254_v15 = vand.u32 4294901760, %v10223_v37  ;;  %v10217_v22 = vmul.f32 %v10204_v56, %v10172_v10  ;;  %v10174_v6 = vpop.f32.mrb[63].mxu1  ;;  %v10371_v24 = vand.u32 4294901760, %v10370_v8 }
0x110d   :  { %v10252_v13 = vand.u32 4294901760, %v10224_v20  ;;  %v10218_v46 = vmul.f32 %v10208_v45, %v10174_v6  ;;  %19033 = vmatprep.subr.bf16.mxu0 %v23089_v38  ;;  %v10365_v50 = vand.u32 4294901760, %v10364_v57  ;;  %v10375_v49 = vand.u32 4294901760, %v23087_v4 }
0x110e   :  { %v10382_v0 = vsub.f32 %v23085_v28, %v10381_v61  ;;  %v23096_v54 = vsub.f32 %v10223_v37, %v10254_v15  ;;  %v10225_v17 = vadd.f32 %v10217_v22, %v10198_v12  ;;  %19035 = vmatpush1.bf16.msra.mxu0 %v23083_v58  ;;  %v19048_v33 = vpack.c.bf16 %v23087_v4, %v23066_v26 }
0x110f   :  { %v10386_v56 = vsub.f32 %v10224_v20, %v10252_v13  ;;  %v10226_v2 = vadd.f32 %v10218_v46, %v10199_v44  ;;  %v10376_v34 = vsub.f32 %v23087_v4, %v10375_v49  ;;  %v19050_v45 = vpack.c.bf16 %v23085_v28, %v23061_v3 }
0x1110   :  { %v10393_v9 = vand.u32 4294901760, %v23096_v54  ;;  %v10258_v21 = vand.u32 4294901760, %v10225_v17  ;;  %v10383_v11 = vand.u32 4294901760, %v10382_v0  ;;  %v23105_v63 = vpack.c.bf16 %v10375_v49, %v10363_v60 }
0x1111   :  { %v10256_v7 = vand.u32 4294901760, %v10226_v2  ;;  %v10377_v18 = vand.u32 4294901760, %v10376_v34  ;;  %v10387_v14 = vand.u32 4294901760, %v10386_v56  ;;  %v23107_v25 = vpack.c.bf16 %v10381_v61, %v10369_v27 }
0x1112   :  { %v23109_v12 = vpack.c.bf16 %v10258_v21, %v10254_v15  ;;  %v10404_v43 = vsub.f32 %v10225_v17, %v10258_v21  ;;  %v19042_v44 = vpack.c.bf16 %v10383_v11, %v10371_v24  ;;  %v10331_v30 = vsub.f32 %v23050_v52, %v10330_v55 }
0x1113   :  { %v10398_v62 = vsub.f32 %v10226_v2, %v10256_v7  ;;  %v23112_v26 = vpack.c.bf16 %v10256_v7, %v10252_v13  ;;  %v19040_v3 = vpack.c.bf16 %v10377_v18, %v10365_v50  ;;  %v10394_v42 = vsub.f32 %v23096_v54, %v10393_v9  ;;  %v18361_v2 = vld [vmem:[%s24969_s1 + $0xf8] sm:$0xff] }
0x1114   :  { %v10405_v5 = vand.u32 4294901760, %v10404_v43  ;;  %v10341_v27 = vand.u32 4294901760, %v23076_v19  ;;  %v19054_v31 = vpack.c.bf16 %v10404_v43, %v23096_v54  ;;  %v10388_v48 = vsub.f32 %v10386_v56, %v10387_v14 }
0x1115   :  { %19037 = vmatprep.subr.bf16.mxu0 %v23112_v26  ;;  %v10399_v40 = vand.u32 4294901760, %v10398_v62  ;;  %v23123_v29 = vsub.f32 %v23064_v32, %v23080_v47  ;;  %v19052_v35 = vpack.c.bf16 %v10398_v62, %v10386_v56  ;;  %v10332_v4 = vand.u32 4294901760, %v10331_v30 }
0x1116   :  { %v10406_v60 = vsub.f32 %v10404_v43, %v10405_v5  ;;  %19039 = vmatpush1.bf16.msra.mxu0 %v23109_v12  ;;  %v19070_v8 = vpack.c.bf16 %v10405_v5, %v10393_v9  ;;  %v10395_v20 = vand.u32 4294901760, %v10394_v42  ;;  %v10389_v57 = vand.u32 4294901760, %v10388_v48 }
0x1117   :  { %19041 = vmatprep.subr.bf16.mxu0 %v19040_v3  ;;  %v10400_v28 = vsub.f32 %v10398_v62, %v10399_v40  ;;  %v19068_v37 = vpack.c.bf16 %v10399_v40, %v10387_v14  ;;  %v10342_v15 = vsub.f32 %v23076_v19, %v10341_v27  ;;  %v10352_v32 = vand.u32 4294901760, %v23123_v29 }
0x1118   :  { %v10407_v10 = vand.u32 4294901760, %v10406_v60  ;;  %v10949_v14 = vsel %vm34_vm0, %v18361_v2, 0 }
0x1119   :  { %10322 = vmatmul.mubr.f32.vlgmr.msra.gmra.mrb[56].mxu0 %v10321_v39  ;;  %v10401_v61 = vand.u32 4294901760, %v10400_v28  ;;  %v10343_v24 = vand.u32 4294901760, %v10342_v15  ;;  %v10353_v13 = vsub.f32 %v23123_v29, %v10352_v32  ;;  %v23264_v48 = vand.u32 4294901760, %v10949_v14 }
0x111a   :  { %19043 = vmatpush1.bf16.msra.mxu0 %v19042_v44  ;;  %10327 = vmatprep.mubr.f32.mxu0 %v20562_v1  ;;  %v19046_v22 = vpack.c.bf16 %v10407_v10, %v10395_v20 }
0x111b   :  { %v19044_v6 = vpack.c.bf16 %v10401_v61, %v10389_v57  ;;  %v10354_v46 = vand.u32 4294901760, %v10353_v13 }
0x111d   :  { %10333 = vmatmul.mubr.f32.gmra.mrb[58].mxu0 %v10332_v4  ;;  %19045 = vmatprep.subr.bf16.mxu0 %v19044_v6 }
0x111e   :  { %19047 = vmatpush1.bf16.msra.mxu0 %v19046_v22  ;;  %10338 = vmatprep.mubr.f32.mxu0 %v20562_v1 }
0x111f   :  { %19049 = vmatprep.subr.bf16.mxu0 %v19048_v33 }
0x1121   :  { %10344 = vmatmul.mubr.f32.gmra.mrb[60].mxu0 %v10343_v24 }
0x1122   :  { %10349 = vmatprep.mubr.f32.mxu0 %v20562_v1 }
0x1125   :  { %10355 = vmatmul.mubr.f32.gmra.mrb[62].mxu0 %v10354_v46 }
0x1126   :  { %10465 = vmatprep.mubr.f32.mxu0 %v20562_v1 }
0x1129   :  { %10467 = vmatmul.mubr.f32.vlgmr.msra.gmra.mrb[56].mxu0 %v23028_v36 }
0x112a   :  { %19051 = vmatpush1.bf16.msra.mxu0 %v19050_v45  ;;  %10472 = vmatprep.mubr.f32.mxu0 %v20562_v1 }
0x112b   :  { %19053 = vmatprep.subr.bf16.mxu0 %v19052_v35 }
0x112d   :  { %10474 = vmatmul.mubr.f32.gmra.mrb[58].mxu0 %v23041_v51 }
0x112e   :  { %19055 = vmatpush1.bf16.msra.mxu0 %v19054_v31  ;;  %10479 = vmatprep.mubr.f32.mxu0 %v20562_v1 }
0x112f   :  { %19057 = vmatprep.subr.bf16.mxu0 %v23089_v38 }
0x1131   :  { %10481 = vmatmul.mubr.f32.gmra.mrb[60].mxu0 %v23056_v23 }
0x1132   :  { %10486 = vmatprep.mubr.f32.mxu0 %v20562_v1 }
0x1135   :  { %10488 = vmatmul.mubr.f32.gmra.mrb[62].mxu0 %v23080_v47 }
0x1136   :  { %10574 = vmatprep.mubr.f32.mxu0 %v20562_v1 }
0x1139   :  { %10577 = vmatmul.mubr.f32.vlgmr.msra.gmra.mrb[56].mxu0 %v23039_v16  ;;  %v18358_v16 = vld [vmem:[%s24969_s1 + $0xe0] sm:$0xff] }
0x113a   :  { %19059 = vmatpush1.bf16.msra.mxu0 %v23083_v58  ;;  %10582 = vmatprep.mubr.f32.mxu0 %v20562_v1 }
0x113b   :  { %19061 = vmatprep.subr.bf16.mxu0 %v23112_v26 }
0x113d   :  { %10585 = vmatmul.mubr.f32.gmra.mrb[58].mxu0 %v23050_v52 }
0x113e   :  { %19063 = vmatpush1.bf16.msra.mxu0 %v23109_v12  ;;  %10590 = vmatprep.mubr.f32.mxu0 %v20562_v1 }
0x113f   :  { %19065 = vmatprep.subr.bf16.mxu0 %v23105_v63 }
0x1141   :  { %10593 = vmatmul.mubr.f32.gmra.mrb[60].mxu0 %v23076_v19 }
0x1142   :  { %10598 = vmatprep.mubr.f32.mxu0 %v20562_v1 }
0x1145   :  { %10601 = vmatmul.mubr.f32.gmra.mrb[62].mxu0 %v23123_v29 }
0x1146   :  { %10679 = vmatprep.mubr.f32.mxu0 %v20562_v1 }
0x1149   :  { %10683 = vmatmul.mubr.f32.vlgmr.msra.gmra.mrb[56].mxu0 %v10319_v53 }
0x114a   :  { %19067 = vmatpush1.bf16.msra.mxu0 %v23107_v25  ;;  %10688 = vmatprep.mubr.f32.mxu0 %v20562_v1 }
0x114b   :  { %19069 = vmatprep.subr.bf16.mxu0 %v19068_v37 }
0x114d   :  { %10692 = vmatmul.mubr.f32.gmra.mrb[58].mxu0 %v10330_v55 }
0x114e   :  { %19071 = vmatpush1.bf16.msra.mxu0 %v19070_v8  ;;  %10697 = vmatprep.mubr.f32.mxu0 %v20562_v1 }
0x114f   :  { %19073 = vmatprep.subr.bf16.mxu0 %v23089_v38 }
0x1151   :  { %10701 = vmatmul.mubr.f32.gmra.mrb[60].mxu0 %v10341_v27 }
0x1152   :  { %10706 = vmatprep.mubr.f32.mxu0 %v20562_v1 }
0x1155   :  { %10710 = vmatmul.mubr.f32.gmra.mrb[62].mxu0 %v10352_v32 }
0x1156   :  { %10804 = vmatprep.mubr.f32.mxu0 %v20562_v1 }
0x1159   :  { %10806 = vmatmul.mubr.f32.vlgmr.msra.gmra.mrb[56].mxu0 %v23028_v36 }
0x115a   :  { %19075 = vmatpush1.bf16.msra.mxu0 %v23083_v58  ;;  %10811 = vmatprep.mubr.f32.mxu0 %v20562_v1 }
0x115b   :  { %19077 = vmatprep.subr.bf16.mxu0 %v23112_v26 }
0x115d   :  { %10813 = vmatmul.mubr.f32.gmra.mrb[58].mxu0 %v23041_v51 }
0x115e   :  { %19079 = vmatpush1.bf16.msra.mxu0 %v23109_v12  ;;  %10818 = vmatprep.mubr.f32.mxu0 %v20562_v1 }
0x1161   :  { %10820 = vmatmul.mubr.f32.gmra.mrb[60].mxu0 %v23056_v23 }
0x1162   :  { %10825 = vmatprep.mubr.f32.mxu0 %v20562_v1 }
0x1165   :  { %10827 = vmatmul.mubr.f32.gmra.mrb[62].mxu0 %v23080_v47 }
0x1166   :  { %10905 = vmatprep.mubr.f32.mxu0 %v20562_v1 }
0x1169   :  { %10907 = vmatmul.mubr.f32.vlgmr.msra.gmra.mrb[56].mxu0 %v23028_v36  ;;  %v10940_v36 = vsel %vm34_vm0, %v18358_v16, 0 }
0x116a   :  { %10912 = vmatprep.mubr.f32.mxu0 %v20562_v1  ;;  %v23194_v53 = vand.u32 4294901760, %v10940_v36 }
0x116c   :  { %v23203_v19 = vsub.f32 %v10940_v36, %v23194_v53 }
0x116d   :  { %10914 = vmatmul.mubr.f32.gmra.mrb[58].mxu0 %v23041_v51  ;;  %v18359_v51 = vld [vmem:[%s24969_s1 + $0xe8] sm:$0xff] }
0x116e   :  { %10919 = vmatprep.mubr.f32.mxu0 %v20562_v1  ;;  %v10943_v52 = vsel %vm34_vm0, %v18359_v51, 0  ;;  %v11026_v33 = vand.u32 4294901760, %v23203_v19 }
0x1170   :  { %v11027_v39 = vsub.f32 %v23203_v19, %v11026_v33 }
0x1171   :  { %10921 = vmatmul.mubr.f32.gmra.mrb[60].mxu0 %v23056_v23  ;;  %v18360_v23 = vld [vmem:[%s24969_s1 + $0xf0] sm:$0xff] }
0x1172   :  { %10926 = vmatprep.mubr.f32.mxu0 %v20562_v1  ;;  %v10946_v49 = vsel %vm34_vm0, %v18360_v23, 0  ;;  %v11028_v36 = vand.u32 4294901760, %v11027_v39 }
0x1173   :  { %v23231_v21 = vand.u32 4294901760, %v10946_v49 }
0x1175   :  { %10928 = vmatmul.mubr.f32.gmra.mrb[62].mxu0 %v23080_v47  ;;  %v23205_v47 = vand.u32 4294901760, %v10943_v52  ;;  %v23258_v42 = vsub.f32 %v10946_v49, %v23231_v21 }
0x1176   :  { %11780 = vmatprep.mubr.f32.mxu0 %v20562_v1 }
0x1177   :  { %v23222_v56 = vsub.f32 %v10943_v52, %v23205_v47 }
0x1179   :  { %v11037_v44 = vand.u32 4294901760, %v23222_v56 }
0x123c   :  { %v23200_v55 = vpop.f32.mrb[56].mxu0 }
0x123d   :  { %v10953_v58 = vand.u32 4294901760, %v23200_v55  ;;  %v23208_v38 = vpop.f32.mrb[57].mxu0 }
0x123e   :  { %v10951_v50 = vand.u32 4294901760, %v23208_v38 }
0x123f   :  { %v23213_v0 = vsub.f32 %v23200_v55, %v10953_v58 }
0x1240   :  { %v23216_v54 = vsub.f32 %v23208_v38, %v10951_v50  ;;  %v23218_v17 = vpop.f32.mrb[58].mxu0 }
0x1241   :  { %v11076_v34 = vand.u32 4294901760, %v23213_v0  ;;  %v10957_v45 = vand.u32 4294901760, %v23218_v17  ;;  %v23229_v9 = vpop.f32.mrb[59].mxu0 }
0x1242   :  { %v11070_v11 = vand.u32 4294901760, %v23216_v54  ;;  %v10955_v63 = vand.u32 4294901760, %v23229_v9 }
0x1243   :  { %v23235_v7 = vpack.c.bf16 %v10957_v45, %v10953_v58  ;;  %v23238_v18 = vsub.f32 %v23218_v17, %v10957_v45  ;;  %v11077_v62 = vsub.f32 %v23213_v0, %v11076_v34 }
0x1244   :  { %v23242_v25 = vsub.f32 %v23229_v9, %v10955_v63  ;;  %v23244_v12 = vpop.f32.mrb[60].mxu0  ;;  %v23246_v43 = vpack.c.bf16 %v10955_v63, %v10951_v50  ;;  %v11071_v31 = vsub.f32 %v23216_v54, %v11070_v11  ;;  %v11038_v50 = vsub.f32 %v23222_v56, %v11037_v44 }
0x1245   :  { %v11088_v26 = vand.u32 4294901760, %v23238_v18  ;;  %v10961_v3 = vand.u32 4294901760, %v23244_v12  ;;  %v23255_v30 = vpop.f32.mrb[61].mxu0  ;;  %v19098_v60 = vpack.c.bf16 %v23238_v18, %v23213_v0  ;;  %v11078_v10 = vand.u32 4294901760, %v11077_v62 }
0x1246   :  { %v11082_v5 = vand.u32 4294901760, %v23242_v25  ;;  %v10959_v27 = vand.u32 4294901760, %v23255_v30  ;;  %19081 = vmatprep.subr.bf16.mxu1 %v23246_v43  ;;  %v19096_v35 = vpack.c.bf16 %v23242_v25, %v23216_v54  ;;  %v11072_v24 = vand.u32 4294901760, %v11071_v31 }
0x1247   :  { %v11089_v40 = vsub.f32 %v23238_v18, %v11088_v26  ;;  %v23268_v29 = vsub.f32 %v23244_v12, %v10961_v3  ;;  %19083 = vmatpush1.bf16.msra.mxu1 %v23235_v7  ;;  %v23283_v20 = vpack.c.bf16 %v11088_v26, %v11076_v34  ;;  %v11048_v54 = vand.u32 4294901760, %v23258_v42 }
0x1248   :  { %v23276_v8 = vsub.f32 %v23255_v30, %v10959_v27  ;;  %v23278_v28 = vpop.f32.mrb[62].mxu0  ;;  %v11083_v37 = vsub.f32 %v23242_v25, %v11082_v5  ;;  %v23281_v4 = vpack.c.bf16 %v11082_v5, %v11070_v11  ;;  %v23306_v11 = vsub.f32 %v10949_v14, %v23264_v48 }
0x1249   :  { %v11090_v57 = vand.u32 4294901760, %v11089_v40  ;;  %v11100_v61 = vand.u32 4294901760, %v23268_v29  ;;  %v10965_v15 = vand.u32 4294901760, %v23278_v28  ;;  %v23287_v32 = vpop.f32.mrb[63].mxu0  ;;  %v11039_v5 = vand.u32 4294901760, %v11038_v50 }
0x124a   :  { %v11094_v22 = vand.u32 4294901760, %v23276_v8  ;;  %v10963_v6 = vand.u32 4294901760, %v23287_v32  ;;  %v11084_v13 = vand.u32 4294901760, %v11083_v37  ;;  %v11049_v14 = vsub.f32 %v23258_v42, %v11048_v54 }
0x124b   :  { %v23291_v46 = vpack.c.bf16 %v10965_v15, %v10961_v3  ;;  %v11111_v16 = vsub.f32 %v23278_v28, %v10965_v15  ;;  %v19090_v51 = vpack.c.bf16 %v11090_v57, %v11078_v10  ;;  %v11101_v49 = vsub.f32 %v23268_v29, %v11100_v61 }
0x124c   :  { %v11105_v52 = vsub.f32 %v23287_v32, %v10963_v6  ;;  %v23295_v23 = vpack.c.bf16 %v10963_v6, %v10959_v27  ;;  %v19088_v58 = vpack.c.bf16 %v11084_v13, %v11072_v24  ;;  %v11095_v45 = vsub.f32 %v23276_v8, %v11094_v22 }
0x124d   :  { %v11112_v0 = vand.u32 4294901760, %v11111_v16  ;;  %v19102_v2 = vpack.c.bf16 %v11111_v16, %v23268_v29  ;;  %v11102_v26 = vand.u32 4294901760, %v11101_v49  ;;  %v11059_v40 = vand.u32 4294901760, %v23306_v11 }
0x124e   :  { %v11106_v34 = vand.u32 4294901760, %v11105_v52  ;;  %19085 = vmatprep.subr.bf16.mxu1 %v23295_v23  ;;  %v19100_v63 = vpack.c.bf16 %v11105_v52, %v23276_v8  ;;  %v11096_v27 = vand.u32 4294901760, %v11095_v45  ;;  %v11050_v37 = vand.u32 4294901760, %v11049_v14 }
0x124f   :  { %v11113_v18 = vsub.f32 %v11111_v16, %v11112_v0  ;;  %19087 = vmatpush1.bf16.msra.mxu1 %v23291_v46  ;;  %v19118_v25 = vpack.c.bf16 %v11112_v0, %v11100_v61  ;;  %v11060_v10 = vsub.f32 %v23306_v11, %v11059_v40 }
0x1250   :  { %19089 = vmatprep.subr.bf16.mxu1 %v19088_v58  ;;  %v11107_v39 = vsub.f32 %v11105_v52, %v11106_v34  ;;  %v19116_v62 = vpack.c.bf16 %v11106_v34, %v11094_v22 }
0x1251   :  { %v11114_v3 = vand.u32 4294901760, %v11113_v18  ;;  %v11061_v57 = vand.u32 4294901760, %v11060_v10 }
0x1252   :  { %11029 = vmatmul.mubr.f32.vlgmr.msra.gmra.mrb[64].mxu1 %v11028_v36  ;;  %v11108_v31 = vand.u32 4294901760, %v11107_v39 }
0x1253   :  { %19091 = vmatpush1.bf16.msra.mxu1 %v19090_v51  ;;  %11034 = vmatprep.mubr.f32.mxu1 %v20562_v1  ;;  %v19094_v29 = vpack.c.bf16 %v11114_v3, %v11102_v26 }
0x1254   :  { %v19092_v8 = vpack.c.bf16 %v11108_v31, %v11096_v27 }
0x1256   :  { %11040 = vmatmul.mubr.f32.gmra.mrb[66].mxu1 %v11039_v5  ;;  %19093 = vmatprep.subr.bf16.mxu1 %v19092_v8 }
0x1257   :  { %19095 = vmatpush1.bf16.msra.mxu1 %v19094_v29  ;;  %11045 = vmatprep.mubr.f32.mxu1 %v20562_v1 }
0x1258   :  { %19097 = vmatprep.subr.bf16.mxu1 %v19096_v35  ;;  %v18366_v35 = vld [vmem:[%s24968_s0 + $0x110] sm:$0xff] }
0x1259   :  { %v11703_v13 = vsel %vm34_vm0, %v18366_v35, 0 }
0x125a   :  { %11051 = vmatmul.mubr.f32.gmra.mrb[68].mxu1 %v11050_v37 }
0x125b   :  { %11056 = vmatprep.mubr.f32.mxu1 %v20562_v1 }
0x125e   :  { %11062 = vmatmul.mubr.f32.gmra.mrb[70].mxu1 %v11061_v57 }
0x125f   :  { %11172 = vmatprep.mubr.f32.mxu1 %v20562_v1 }
0x1262   :  { %11174 = vmatmul.mubr.f32.vlgmr.msra.gmra.mrb[64].mxu1 %v23194_v53 }
0x1263   :  { %19099 = vmatpush1.bf16.msra.mxu1 %v19098_v60  ;;  %11179 = vmatprep.mubr.f32.mxu1 %v20562_v1 }
0x1264   :  { %19101 = vmatprep.subr.bf16.mxu1 %v19100_v63 }
0x1266   :  { %11181 = vmatmul.mubr.f32.gmra.mrb[66].mxu1 %v23205_v47 }
0x1267   :  { %19103 = vmatpush1.bf16.msra.mxu1 %v19102_v2  ;;  %11186 = vmatprep.mubr.f32.mxu1 %v20562_v1 }
0x1268   :  { %19105 = vmatprep.subr.bf16.mxu1 %v23246_v43 }
0x126a   :  { %11188 = vmatmul.mubr.f32.gmra.mrb[68].mxu1 %v23231_v21 }
0x126b   :  { %11193 = vmatprep.mubr.f32.mxu1 %v20562_v1 }
0x126e   :  { %11195 = vmatmul.mubr.f32.gmra.mrb[70].mxu1 %v23264_v48 }
0x126f   :  { %11281 = vmatprep.mubr.f32.mxu1 %v20562_v1 }
0x1272   :  { %11284 = vmatmul.mubr.f32.vlgmr.msra.gmra.mrb[64].mxu1 %v23203_v19  ;;  %v18364_v19 = vld [vmem:[%s24968_s0 + $0x100] sm:$0xff] }
0x1273   :  { %19107 = vmatpush1.bf16.msra.mxu1 %v23235_v7  ;;  %11289 = vmatprep.mubr.f32.mxu1 %v20562_v1 }
0x1274   :  { %19109 = vmatprep.subr.bf16.mxu1 %v23295_v23 }
0x1276   :  { %11292 = vmatmul.mubr.f32.gmra.mrb[66].mxu1 %v23222_v56  ;;  %v18365_v56 = vld [vmem:[%s24968_s0 + $0x108] sm:$0xff] }
0x1277   :  { %19111 = vmatpush1.bf16.msra.mxu1 %v23291_v46  ;;  %11297 = vmatprep.mubr.f32.mxu1 %v20562_v1 }
0x1278   :  { %19113 = vmatprep.subr.bf16.mxu1 %v23281_v4 }
0x127a   :  { %11300 = vmatmul.mubr.f32.gmra.mrb[68].mxu1 %v23258_v42 }
0x127b   :  { %11305 = vmatprep.mubr.f32.mxu1 %v20562_v1 }
0x127e   :  { %11308 = vmatmul.mubr.f32.gmra.mrb[70].mxu1 %v23306_v11 }
0x127f   :  { %11386 = vmatprep.mubr.f32.mxu1 %v20562_v1 }
0x1282   :  { %11390 = vmatmul.mubr.f32.vlgmr.msra.gmra.mrb[64].mxu1 %v11026_v33  ;;  %v18363_v33 = vld [vmem:[%s24971_s3 + $0x7] ss:$8 sm:$0x3] }
0x1283   :  { %19115 = vmatpush1.bf16.msra.mxu1 %v23283_v20  ;;  %11395 = vmatprep.mubr.f32.mxu1 %v20562_v1 }
0x1284   :  { %19117 = vmatprep.subr.bf16.mxu1 %v19116_v62 }
0x1286   :  { %11399 = vmatmul.mubr.f32.gmra.mrb[66].mxu1 %v11037_v44  ;;  %v11700_v44 = vsel %vm34_vm0, %v18365_v56, 0 }
0x1287   :  { %19119 = vmatpush1.bf16.msra.mxu1 %v19118_v25  ;;  %11404 = vmatprep.mubr.f32.mxu1 %v20562_v1  ;;  %v23397_v20 = vand.u32 4294901760, %v11700_v44 }
0x1288   :  { %19121 = vmatprep.subr.bf16.mxu1 %v23246_v43  ;;  %v11668_v43 = vrot.slane %v18363_v33, %v20877_v41 }
0x1289   :  { %v23406_v58 = vsub.f32 %v11700_v44, %v23397_v20 }
0x128a   :  { %11408 = vmatmul.mubr.f32.gmra.mrb[68].mxu1 %v11048_v54 }
0x128b   :  { %11413 = vmatprep.mubr.f32.mxu1 %v20562_v1 }
0x128e   :  { %11417 = vmatmul.mubr.f32.gmra.mrb[70].mxu1 %v11059_v40 }
0x128f   :  { %11511 = vmatprep.mubr.f32.mxu1 %v20562_v1 }
0x1292   :  { %11513 = vmatmul.mubr.f32.vlgmr.msra.gmra.mrb[64].mxu1 %v23194_v53 }
0x1293   :  { %19123 = vmatpush1.bf16.msra.mxu1 %v23235_v7  ;;  %11518 = vmatprep.mubr.f32.mxu1 %v20562_v1 }
0x1294   :  { %19125 = vmatprep.subr.bf16.mxu1 %v23295_v23 }
0x1296   :  { %11520 = vmatmul.mubr.f32.gmra.mrb[66].mxu1 %v23205_v47 }
0x1297   :  { %19127 = vmatpush1.bf16.msra.mxu1 %v23291_v46  ;;  %11525 = vmatprep.mubr.f32.mxu1 %v20562_v1 }
0x129a   :  { %11527 = vmatmul.mubr.f32.gmra.mrb[68].mxu1 %v23231_v21 }
0x129b   :  { %11532 = vmatprep.mubr.f32.mxu1 %v20562_v1 }
0x129e   :  { %11534 = vmatmul.mubr.f32.gmra.mrb[70].mxu1 %v23264_v48 }
0x129f   :  { %11612 = vmatprep.mubr.f32.mxu1 %v20562_v1 }
0x12a2   :  { %11614 = vmatmul.mubr.f32.vlgmr.msra.gmra.mrb[64].mxu1 %v23194_v53  ;;  %v18362_v53 = vld [vmem:[%s24970_s2 + $0x7] ss:$8 sm:$0x3] }
0x12a3   :  { %11619 = vmatprep.mubr.f32.mxu1 %v20562_v1  ;;  %v11649_v7 = vrot.slane %v18362_v53, %v20877_v41  ;;  %v11653_v42 = vrot.slane %v18362_v53, %v20884_v59 }
0x12a5   :  { %v11656_v61 = vmul.f32 %v11649_v7, %v23200_v55  ;;  %v11657_v6 = vmul.f32 %v11653_v42, %v23208_v38  ;;  %v11658_v46 = vmul.f32 %v11649_v7, %v23218_v17  ;;  %v11659_v36 = vmul.f32 %v11653_v42, %v23229_v9  ;;  %v18367_v55 = vld [vmem:[%s24968_s0 + $0x118] sm:$0xff] }
0x12a6   :  { %11621 = vmatmul.mubr.f32.gmra.mrb[66].mxu1 %v23205_v47  ;;  %v11697_v47 = vsel %vm34_vm0, %v18364_v19, 0  ;;  %v11660_v38 = vmul.f32 %v11649_v7, %v23244_v12  ;;  %v23412_v17 = vand.u32 4294901760, %v11703_v13  ;;  %v11661_v9 = vmul.f32 %v11653_v42, %v23255_v30 }
0x12a7   :  { %11626 = vmatprep.mubr.f32.mxu1 %v20562_v1  ;;  %v11662_v54 = vmul.f32 %v11649_v7, %v23278_v28  ;;  %v11663_v45 = vmul.f32 %v11653_v42, %v23287_v32  ;;  %v23420_v18 = vsel %vm34_vm0, %v18367_v55, 0  ;;  %v11794_v28 = vand.u32 4294901760, %v23406_v58 }
0x12a8   :  { %v23432_v5 = vsub.f32 %v11703_v13, %v23412_v17  ;;  %v23436_v40 = vand.u32 4294901760, %v23420_v18 }
0x12aa   :  { %11628 = vmatmul.mubr.f32.gmra.mrb[68].mxu1 %v23231_v21  ;;  %v23384_v21 = vand.u32 4294901760, %v11697_v47 }
0x12ab   :  { %11633 = vmatprep.mubr.f32.mxu1 %v20562_v1 }
0x12ac   :  { %v23395_v4 = vsub.f32 %v11697_v47, %v23384_v21 }
0x12ae   :  { %11635 = vmatmul.mubr.f32.gmra.mrb[70].mxu1 %v23264_v48  ;;  %v11672_v48 = vrot.slane %v18363_v33, %v20884_v59  ;;  %v11783_v23 = vand.u32 4294901760, %v23395_v4 }
0x12af   :  { %12487 = vmatprep.mubr.f32.mxu1 %v20562_v1 }
0x12b0   :  { %v23427_v30 = vsub.f32 %v23395_v4, %v11783_v23 }
0x1375   :  { %v11615_v60 = vpop.f32.mrb[64].mxu1 }
0x1376   :  { %v11675_v15 = vmul.f32 %v11668_v43, %v11615_v60  ;;  %v11617_v22 = vpop.f32.mrb[65].mxu1 }
0x1377   :  { %v11676_v24 = vmul.f32 %v11672_v48, %v11617_v22 }
0x1378   :  { %v11683_v16 = vadd.f32 %v11675_v15, %v11656_v61 }
0x1379   :  { %v11684_v51 = vadd.f32 %v11676_v24, %v11657_v6  ;;  %v11622_v52 = vpop.f32.mrb[66].mxu1 }
0x137a   :  { %v11710_v50 = vand.u32 4294901760, %v11683_v16  ;;  %v11677_v49 = vmul.f32 %v11668_v43, %v11622_v52  ;;  %v11624_v0 = vpop.f32.mrb[67].mxu1 }
0x137b   :  { %v11708_v2 = vand.u32 4294901760, %v11684_v51  ;;  %v11678_v34 = vmul.f32 %v11672_v48, %v11624_v0 }
0x137c   :  { %v23417_v11 = vsub.f32 %v11683_v16, %v11710_v50  ;;  %v11685_v63 = vadd.f32 %v11677_v49, %v11658_v46 }
0x137d   :  { %v23422_v12 = vsub.f32 %v11684_v51, %v11708_v2  ;;  %v11686_v25 = vadd.f32 %v11678_v34, %v11659_v36  ;;  %v11629_v39 = vpop.f32.mrb[68].mxu1  ;;  %v11785_v34 = vand.u32 4294901760, %v23427_v30 }
0x137e   :  { %v11833_v62 = vand.u32 4294901760, %v23417_v11  ;;  %v11714_v32 = vand.u32 4294901760, %v11685_v63  ;;  %v11679_v26 = vmul.f32 %v11668_v43, %v11629_v39  ;;  %v11631_v3 = vpop.f32.mrb[69].mxu1 }
0x137f   :  { %v11712_v27 = vand.u32 4294901760, %v11686_v25  ;;  %v11680_v31 = vmul.f32 %v11672_v48, %v11631_v3  ;;  %v11827_v14 = vand.u32 4294901760, %v23422_v12 }
0x1380   :  { %v11834_v29 = vsub.f32 %v23417_v11, %v11833_v62  ;;  %v23439_v8 = vpack.c.bf16 %v11714_v32, %v11710_v50  ;;  %v23441_v37 = vsub.f32 %v11685_v63, %v11714_v32  ;;  %v11687_v10 = vadd.f32 %v11679_v26, %v11660_v38 }
0x1381   :  { %v23443_v57 = vsub.f32 %v11686_v25, %v11712_v27  ;;  %v11688_v19 = vadd.f32 %v11680_v31, %v11661_v9  ;;  %v11636_v53 = vpop.f32.mrb[70].mxu1  ;;  %v23445_v47 = vpack.c.bf16 %v11712_v27, %v11708_v2  ;;  %v11828_v33 = vsub.f32 %v23422_v12, %v11827_v14 }
0x1382   :  { %v11845_v56 = vand.u32 4294901760, %v23441_v37  ;;  %v11718_v7 = vand.u32 4294901760, %v11687_v10  ;;  %v11681_v44 = vmul.f32 %v11668_v43, %v11636_v53  ;;  %v11638_v42 = vpop.f32.mrb[71].mxu1  ;;  %v11835_v35 = vand.u32 4294901760, %v11834_v29 }
0x1383   :  { %v11716_v60 = vand.u32 4294901760, %v11688_v19  ;;  %v11682_v61 = vmul.f32 %v11672_v48, %v11638_v42  ;;  %19129 = vmatprep.subr.bf16.mxu0 %v23445_v47  ;;  %v11829_v15 = vand.u32 4294901760, %v11828_v33  ;;  %v11839_v22 = vand.u32 4294901760, %v23443_v57 }
0x1384   :  { %v11846_v6 = vsub.f32 %v23441_v37, %v11845_v56  ;;  %v23452_v24 = vsub.f32 %v11687_v10, %v11718_v7  ;;  %v11689_v13 = vadd.f32 %v11681_v44, %v11662_v54  ;;  %19131 = vmatpush1.bf16.msra.mxu0 %v23439_v8  ;;  %v19144_v46 = vpack.c.bf16 %v23443_v57, %v23422_v12 }
0x1385   :  { %v11850_v43 = vsub.f32 %v11688_v19, %v11716_v60  ;;  %v11690_v16 = vadd.f32 %v11682_v61, %v11663_v45  ;;  %v11840_v36 = vsub.f32 %v23443_v57, %v11839_v22  ;;  %v19146_v48 = vpack.c.bf16 %v23441_v37, %v23417_v11 }
0x1386   :  { %v11857_v51 = vand.u32 4294901760, %v23452_v24  ;;  %v11722_v52 = vand.u32 4294901760, %v11689_v13  ;;  %v11847_v55 = vand.u32 4294901760, %v11846_v6  ;;  %v23461_v38 = vpack.c.bf16 %v11839_v22, %v11827_v14 }
0x1387   :  { %v11720_v50 = vand.u32 4294901760, %v11690_v16  ;;  %v11841_v49 = vand.u32 4294901760, %v11840_v36  ;;  %v11851_v0 = vand.u32 4294901760, %v11850_v43  ;;  %v23463_v9 = vpack.c.bf16 %v11845_v56, %v11833_v62 }
0x1388   :  { %v23465_v54 = vpack.c.bf16 %v11722_v52, %v11718_v7  ;;  %v11868_v2 = vsub.f32 %v11689_v13, %v11722_v52  ;;  %v19138_v45 = vpack.c.bf16 %v11847_v55, %v11835_v35  ;;  %v11795_v25 = vsub.f32 %v23406_v58, %v11794_v28 }
0x1389   :  { %v11862_v63 = vsub.f32 %v11690_v16, %v11720_v50  ;;  %v23468_v12 = vpack.c.bf16 %v11720_v50, %v11716_v60  ;;  %v19136_v11 = vpack.c.bf16 %v11841_v49, %v11829_v15  ;;  %v11858_v39 = vsub.f32 %v23452_v24, %v11857_v51  ;;  %v18371_v16 = vld [vmem:[%s24969_s1 + $0x118] sm:$0xff] }
0x138a   :  { %v11869_v32 = vand.u32 4294901760, %v11868_v2  ;;  %v11805_v62 = vand.u32 4294901760, %v23432_v5  ;;  %v19150_v26 = vpack.c.bf16 %v11868_v2, %v23452_v24  ;;  %v11852_v3 = vsub.f32 %v11850_v43, %v11851_v0 }
0x138b   :  { %19133 = vmatprep.subr.bf16.mxu0 %v23468_v12  ;;  %v11863_v30 = vand.u32 4294901760, %v11862_v63  ;;  %v23479_v27 = vsub.f32 %v23420_v18, %v23436_v40  ;;  %v19148_v31 = vpack.c.bf16 %v11862_v63, %v11850_v43  ;;  %v11796_v57 = vand.u32 4294901760, %v11795_v25 }
0x138c   :  { %v11870_v14 = vsub.f32 %v11868_v2, %v11869_v32  ;;  %19135 = vmatpush1.bf16.msra.mxu0 %v23465_v54  ;;  %v19166_v29 = vpack.c.bf16 %v11869_v32, %v11857_v51  ;;  %v11859_v19 = vand.u32 4294901760, %v11858_v39  ;;  %v11853_v33 = vand.u32 4294901760, %v11852_v3 }
0x138d   :  { %19137 = vmatprep.subr.bf16.mxu0 %v19136_v11  ;;  %v11864_v37 = vsub.f32 %v11862_v63, %v11863_v30  ;;  %v19164_v10 = vpack.c.bf16 %v11863_v30, %v11851_v0  ;;  %v11806_v7 = vsub.f32 %v23432_v5, %v11805_v62  ;;  %v11816_v18 = vand.u32 4294901760, %v23479_v27 }
0x138e   :  { %v11871_v53 = vand.u32 4294901760, %v11870_v14  ;;  %v12413_v0 = vsel %vm34_vm0, %v18371_v16, 0 }
0x138f   :  { %11786 = vmatmul.mubr.f32.vlgmr.msra.gmra.mrb[64].mxu0 %v11785_v34  ;;  %v11865_v56 = vand.u32 4294901760, %v11864_v37  ;;  %v11807_v35 = vand.u32 4294901760, %v11806_v7  ;;  %v11817_v60 = vsub.f32 %v23479_v27, %v11816_v18  ;;  %v23620_v3 = vand.u32 4294901760, %v12413_v0 }
0x1390   :  { %19139 = vmatpush1.bf16.msra.mxu0 %v19138_v45  ;;  %11791 = vmatprep.mubr.f32.mxu0 %v20562_v1  ;;  %v19142_v44 = vpack.c.bf16 %v11871_v53, %v11859_v19 }
0x1391   :  { %v19140_v42 = vpack.c.bf16 %v11865_v56, %v11853_v33  ;;  %v11818_v61 = vand.u32 4294901760, %v11817_v60 }
0x1393   :  { %11797 = vmatmul.mubr.f32.gmra.mrb[66].mxu0 %v11796_v57  ;;  %19141 = vmatprep.subr.bf16.mxu0 %v19140_v42 }
0x1394   :  { %19143 = vmatpush1.bf16.msra.mxu0 %v19142_v44  ;;  %11802 = vmatprep.mubr.f32.mxu0 %v20562_v1 }
0x1395   :  { %19145 = vmatprep.subr.bf16.mxu0 %v19144_v46 }
0x1397   :  { %11808 = vmatmul.mubr.f32.gmra.mrb[68].mxu0 %v11807_v35 }
0x1398   :  { %11813 = vmatprep.mubr.f32.mxu0 %v20562_v1 }
0x139b   :  { %11819 = vmatmul.mubr.f32.gmra.mrb[70].mxu0 %v11818_v61 }
0x139c   :  { %11929 = vmatprep.mubr.f32.mxu0 %v20562_v1 }
0x139f   :  { %11931 = vmatmul.mubr.f32.vlgmr.msra.gmra.mrb[64].mxu0 %v23384_v21 }
0x13a0   :  { %19147 = vmatpush1.bf16.msra.mxu0 %v19146_v48  ;;  %11936 = vmatprep.mubr.f32.mxu0 %v20562_v1 }
0x13a1   :  { %19149 = vmatprep.subr.bf16.mxu0 %v19148_v31 }
0x13a3   :  { %11938 = vmatmul.mubr.f32.gmra.mrb[66].mxu0 %v23397_v20 }
0x13a4   :  { %19151 = vmatpush1.bf16.msra.mxu0 %v19150_v26  ;;  %11943 = vmatprep.mubr.f32.mxu0 %v20562_v1 }
0x13a5   :  { %19153 = vmatprep.subr.bf16.mxu0 %v23445_v47 }
0x13a7   :  { %11945 = vmatmul.mubr.f32.gmra.mrb[68].mxu0 %v23412_v17 }
0x13a8   :  { %11950 = vmatprep.mubr.f32.mxu0 %v20562_v1 }
0x13ab   :  { %11952 = vmatmul.mubr.f32.gmra.mrb[70].mxu0 %v23436_v40 }
0x13ac   :  { %12038 = vmatprep.mubr.f32.mxu0 %v20562_v1 }
0x13af   :  { %12041 = vmatmul.mubr.f32.vlgmr.msra.gmra.mrb[64].mxu0 %v23395_v4  ;;  %v18368_v4 = vld [vmem:[%s24969_s1 + $0x100] sm:$0xff] }
0x13b0   :  { %19155 = vmatpush1.bf16.msra.mxu0 %v23439_v8  ;;  %12046 = vmatprep.mubr.f32.mxu0 %v20562_v1 }
0x13b1   :  { %19157 = vmatprep.subr.bf16.mxu0 %v23468_v12 }
0x13b3   :  { %12049 = vmatmul.mubr.f32.gmra.mrb[66].mxu0 %v23406_v58 }
0x13b4   :  { %19159 = vmatpush1.bf16.msra.mxu0 %v23465_v54  ;;  %12054 = vmatprep.mubr.f32.mxu0 %v20562_v1 }
0x13b5   :  { %19161 = vmatprep.subr.bf16.mxu0 %v23461_v38 }
0x13b7   :  { %12057 = vmatmul.mubr.f32.gmra.mrb[68].mxu0 %v23432_v5 }
0x13b8   :  { %12062 = vmatprep.mubr.f32.mxu0 %v20562_v1 }
0x13bb   :  { %12065 = vmatmul.mubr.f32.gmra.mrb[70].mxu0 %v23479_v27 }
0x13bc   :  { %12143 = vmatprep.mubr.f32.mxu0 %v20562_v1 }
0x13bf   :  { %12147 = vmatmul.mubr.f32.vlgmr.msra.gmra.mrb[64].mxu0 %v11783_v23 }
0x13c0   :  { %19163 = vmatpush1.bf16.msra.mxu0 %v23463_v9  ;;  %12152 = vmatprep.mubr.f32.mxu0 %v20562_v1 }
0x13c1   :  { %19165 = vmatprep.subr.bf16.mxu0 %v19164_v10 }
0x13c3   :  { %12156 = vmatmul.mubr.f32.gmra.mrb[66].mxu0 %v11794_v28 }
0x13c4   :  { %19167 = vmatpush1.bf16.msra.mxu0 %v19166_v29  ;;  %12161 = vmatprep.mubr.f32.mxu0 %v20562_v1 }
0x13c5   :  { %19169 = vmatprep.subr.bf16.mxu0 %v23445_v47 }
0x13c7   :  { %12165 = vmatmul.mubr.f32.gmra.mrb[68].mxu0 %v11805_v62 }
0x13c8   :  { %12170 = vmatprep.mubr.f32.mxu0 %v20562_v1 }
0x13cb   :  { %12174 = vmatmul.mubr.f32.gmra.mrb[70].mxu0 %v11816_v18 }
0x13cc   :  { %12268 = vmatprep.mubr.f32.mxu0 %v20562_v1 }
0x13cf   :  { %12270 = vmatmul.mubr.f32.vlgmr.msra.gmra.mrb[64].mxu0 %v23384_v21 }
0x13d0   :  { %19171 = vmatpush1.bf16.msra.mxu0 %v23439_v8  ;;  %12275 = vmatprep.mubr.f32.mxu0 %v20562_v1 }
0x13d1   :  { %19173 = vmatprep.subr.bf16.mxu0 %v23468_v12 }
0x13d3   :  { %12277 = vmatmul.mubr.f32.gmra.mrb[66].mxu0 %v23397_v20 }
0x13d4   :  { %19175 = vmatpush1.bf16.msra.mxu0 %v23465_v54  ;;  %12282 = vmatprep.mubr.f32.mxu0 %v20562_v1 }
0x13d7   :  { %12284 = vmatmul.mubr.f32.gmra.mrb[68].mxu0 %v23412_v17 }
0x13d8   :  { %12289 = vmatprep.mubr.f32.mxu0 %v20562_v1 }
0x13db   :  { %12291 = vmatmul.mubr.f32.gmra.mrb[70].mxu0 %v23436_v40 }
0x13dc   :  { %12369 = vmatprep.mubr.f32.mxu0 %v20562_v1 }
0x13df   :  { %12371 = vmatmul.mubr.f32.vlgmr.msra.gmra.mrb[64].mxu0 %v23384_v21  ;;  %v12404_v21 = vsel %vm34_vm0, %v18368_v4, 0 }
0x13e0   :  { %12376 = vmatprep.mubr.f32.mxu0 %v20562_v1  ;;  %v23550_v23 = vand.u32 4294901760, %v12404_v21 }
0x13e2   :  { %v23559_v5 = vsub.f32 %v12404_v21, %v23550_v23 }
0x13e3   :  { %12378 = vmatmul.mubr.f32.gmra.mrb[66].mxu0 %v23397_v20  ;;  %v18369_v20 = vld [vmem:[%s24969_s1 + $0x108] sm:$0xff] }
0x13e4   :  { %12383 = vmatprep.mubr.f32.mxu0 %v20562_v1  ;;  %v12407_v58 = vsel %vm34_vm0, %v18369_v20, 0  ;;  %v12490_v46 = vand.u32 4294901760, %v23559_v5 }
0x13e6   :  { %v12491_v34 = vsub.f32 %v23559_v5, %v12490_v46 }
0x13e7   :  { %12385 = vmatmul.mubr.f32.gmra.mrb[68].mxu0 %v23412_v17  ;;  %v18370_v17 = vld [vmem:[%s24969_s1 + $0x110] sm:$0xff] }
0x13e8   :  { %12390 = vmatprep.mubr.f32.mxu0 %v20562_v1  ;;  %v12410_v22 = vsel %vm34_vm0, %v18370_v17, 0  ;;  %v12492_v21 = vand.u32 4294901760, %v12491_v34 }
0x13e9   :  { %v23587_v52 = vand.u32 4294901760, %v12410_v22 }
0x13eb   :  { %12392 = vmatmul.mubr.f32.gmra.mrb[70].mxu0 %v23436_v40  ;;  %v23561_v40 = vand.u32 4294901760, %v12407_v58  ;;  %v23614_v39 = vsub.f32 %v12410_v22, %v23587_v52 }
0x13ec   :  { %13244 = vmatprep.mubr.f32.mxu0 %v20562_v1 }
0x13ed   :  { %v23578_v43 = vsub.f32 %v12407_v58, %v23561_v40 }
0x13ef   :  { %v12501_v45 = vand.u32 4294901760, %v23578_v43 }
0x14b2   :  { %v23556_v28 = vpop.f32.mrb[64].mxu0 }
0x14b3   :  { %v12417_v8 = vand.u32 4294901760, %v23556_v28  ;;  %v23564_v47 = vpop.f32.mrb[65].mxu0 }
0x14b4   :  { %v12415_v15 = vand.u32 4294901760, %v23564_v47 }
0x14b5   :  { %v23569_v6 = vsub.f32 %v23556_v28, %v12417_v8 }
0x14b6   :  { %v23572_v24 = vsub.f32 %v23564_v47, %v12415_v15  ;;  %v23574_v13 = vpop.f32.mrb[66].mxu0 }
0x14b7   :  { %v12540_v36 = vand.u32 4294901760, %v23569_v6  ;;  %v12421_v48 = vand.u32 4294901760, %v23574_v13  ;;  %v23585_v51 = vpop.f32.mrb[67].mxu0 }
0x14b8   :  { %v12534_v55 = vand.u32 4294901760, %v23572_v24  ;;  %v12419_v38 = vand.u32 4294901760, %v23585_v51 }
0x14b9   :  { %v23591_v50 = vpack.c.bf16 %v12421_v48, %v12417_v8  ;;  %v23594_v49 = vsub.f32 %v23574_v13, %v12421_v48  ;;  %v12541_v63 = vsub.f32 %v23569_v6, %v12540_v36 }
0x14ba   :  { %v23598_v9 = vsub.f32 %v23585_v51, %v12419_v38  ;;  %v23600_v54 = vpop.f32.mrb[68].mxu0  ;;  %v23602_v2 = vpack.c.bf16 %v12419_v38, %v12415_v15  ;;  %v12535_v26 = vsub.f32 %v23572_v24, %v12534_v55  ;;  %v12502_v15 = vsub.f32 %v23578_v43, %v12501_v45 }
0x14bb   :  { %v12552_v12 = vand.u32 4294901760, %v23594_v49  ;;  %v12425_v11 = vand.u32 4294901760, %v23600_v54  ;;  %v23611_v25 = vpop.f32.mrb[69].mxu0  ;;  %v19194_v14 = vpack.c.bf16 %v23594_v49, %v23569_v6  ;;  %v12542_v53 = vand.u32 4294901760, %v12541_v63 }
0x14bc   :  { %v12546_v32 = vand.u32 4294901760, %v23598_v9  ;;  %v12423_v62 = vand.u32 4294901760, %v23611_v25  ;;  %19177 = vmatprep.subr.bf16.mxu1 %v23602_v2  ;;  %v19192_v31 = vpack.c.bf16 %v23598_v9, %v23572_v24  ;;  %v12536_v35 = vand.u32 4294901760, %v12535_v26 }
0x14bd   :  { %v12553_v30 = vsub.f32 %v23594_v49, %v12552_v12  ;;  %v23624_v27 = vsub.f32 %v23600_v54, %v12425_v11  ;;  %19179 = vmatpush1.bf16.msra.mxu1 %v23591_v50  ;;  %v23639_v19 = vpack.c.bf16 %v12552_v12, %v12540_v36  ;;  %v12512_v24 = vand.u32 4294901760, %v23614_v39 }
0x14be   :  { %v23632_v29 = vsub.f32 %v23611_v25, %v12423_v62  ;;  %v23634_v37 = vpop.f32.mrb[70].mxu0  ;;  %v12547_v10 = vsub.f32 %v23598_v9, %v12546_v32  ;;  %v23637_v57 = vpack.c.bf16 %v12546_v32, %v12534_v55  ;;  %v23662_v55 = vsub.f32 %v12413_v0, %v23620_v3 }
0x14bf   :  { %v12554_v33 = vand.u32 4294901760, %v12553_v30  ;;  %v12564_v56 = vand.u32 4294901760, %v23624_v27  ;;  %v12429_v7 = vand.u32 4294901760, %v23634_v37  ;;  %v23643_v18 = vpop.f32.mrb[71].mxu0  ;;  %v12503_v32 = vand.u32 4294901760, %v12502_v15 }
0x14c0   :  { %v12558_v44 = vand.u32 4294901760, %v23632_v29  ;;  %v12427_v42 = vand.u32 4294901760, %v23643_v18  ;;  %v12548_v60 = vand.u32 4294901760, %v12547_v10  ;;  %v12513_v0 = vsub.f32 %v23614_v39, %v12512_v24 }
0x14c1   :  { %v23647_v61 = vpack.c.bf16 %v12429_v7, %v12425_v11  ;;  %v12575_v4 = vsub.f32 %v23634_v37, %v12429_v7  ;;  %v19186_v20 = vpack.c.bf16 %v12554_v33, %v12542_v53  ;;  %v12565_v22 = vsub.f32 %v23624_v27, %v12564_v56 }
0x14c2   :  { %v12569_v58 = vsub.f32 %v23643_v18, %v12427_v42  ;;  %v23651_v17 = vpack.c.bf16 %v12427_v42, %v12423_v62  ;;  %v19184_v8 = vpack.c.bf16 %v12548_v60, %v12536_v35  ;;  %v12559_v48 = vsub.f32 %v23632_v29, %v12558_v44 }
0x14c3   :  { %v12576_v6 = vand.u32 4294901760, %v12575_v4  ;;  %v19198_v16 = vpack.c.bf16 %v12575_v4, %v23624_v27  ;;  %v12566_v12 = vand.u32 4294901760, %v12565_v22  ;;  %v12523_v30 = vand.u32 4294901760, %v23662_v55 }
0x14c4   :  { %v12570_v36 = vand.u32 4294901760, %v12569_v58  ;;  %19181 = vmatprep.subr.bf16.mxu1 %v23651_v17  ;;  %v19196_v38 = vpack.c.bf16 %v12569_v58, %v23632_v29  ;;  %v12560_v62 = vand.u32 4294901760, %v12559_v48  ;;  %v12514_v10 = vand.u32 4294901760, %v12513_v0 }
0x14c5   :  { %v12577_v49 = vsub.f32 %v12575_v4, %v12576_v6  ;;  %19183 = vmatpush1.bf16.msra.mxu1 %v23647_v61  ;;  %v19214_v9 = vpack.c.bf16 %v12576_v6, %v12564_v56  ;;  %v12524_v53 = vsub.f32 %v23662_v55, %v12523_v30 }
0x14c6   :  { %19185 = vmatprep.subr.bf16.mxu1 %v19184_v8  ;;  %v12571_v34 = vsub.f32 %v12569_v58, %v12570_v36  ;;  %v19212_v63 = vpack.c.bf16 %v12570_v36, %v12558_v44 }
0x14c7   :  { %v12578_v11 = vand.u32 4294901760, %v12577_v49  ;;  %v12525_v33 = vand.u32 4294901760, %v12524_v53 }
0x14c8   :  { %12493 = vmatmul.mubr.f32.vlgmr.msra.gmra.mrb[72].mxu1 %v12492_v21  ;;  %v12572_v26 = vand.u32 4294901760, %v12571_v34 }
0x14c9   :  { %19187 = vmatpush1.bf16.msra.mxu1 %v19186_v20  ;;  %12498 = vmatprep.mubr.f32.mxu1 %v20562_v1  ;;  %v19190_v27 = vpack.c.bf16 %v12578_v11, %v12566_v12 }
0x14ca   :  { %v19188_v29 = vpack.c.bf16 %v12572_v26, %v12560_v62 }
0x14cc   :  { %12504 = vmatmul.mubr.f32.gmra.mrb[74].mxu1 %v12503_v32  ;;  %19189 = vmatprep.subr.bf16.mxu1 %v19188_v29 }
0x14cd   :  { %19191 = vmatpush1.bf16.msra.mxu1 %v19190_v27  ;;  %12509 = vmatprep.mubr.f32.mxu1 %v20562_v1 }
0x14ce   :  { %19193 = vmatprep.subr.bf16.mxu1 %v19192_v31  ;;  %v18376_v31 = vld [vmem:[%s24968_s0 + $0x130] sm:$0xff] }
0x14cf   :  { %v13167_v60 = vsel %vm34_vm0, %v18376_v31, 0 }
0x14d0   :  { %12515 = vmatmul.mubr.f32.gmra.mrb[76].mxu1 %v12514_v10 }
0x14d1   :  { %12520 = vmatprep.mubr.f32.mxu1 %v20562_v1 }
0x14d4   :  { %12526 = vmatmul.mubr.f32.gmra.mrb[78].mxu1 %v12525_v33 }
0x14d5   :  { %12636 = vmatprep.mubr.f32.mxu1 %v20562_v1 }
0x14d8   :  { %12638 = vmatmul.mubr.f32.vlgmr.msra.gmra.mrb[72].mxu1 %v23550_v23 }
0x14d9   :  { %19195 = vmatpush1.bf16.msra.mxu1 %v19194_v14  ;;  %12643 = vmatprep.mubr.f32.mxu1 %v20562_v1 }
0x14da   :  { %19197 = vmatprep.subr.bf16.mxu1 %v19196_v38 }
0x14dc   :  { %12645 = vmatmul.mubr.f32.gmra.mrb[74].mxu1 %v23561_v40 }
0x14dd   :  { %19199 = vmatpush1.bf16.msra.mxu1 %v19198_v16  ;;  %12650 = vmatprep.mubr.f32.mxu1 %v20562_v1 }
0x14de   :  { %19201 = vmatprep.subr.bf16.mxu1 %v23602_v2 }
0x14e0   :  { %12652 = vmatmul.mubr.f32.gmra.mrb[76].mxu1 %v23587_v52 }
0x14e1   :  { %12657 = vmatprep.mubr.f32.mxu1 %v20562_v1 }
0x14e4   :  { %12659 = vmatmul.mubr.f32.gmra.mrb[78].mxu1 %v23620_v3 }
0x14e5   :  { %12745 = vmatprep.mubr.f32.mxu1 %v20562_v1 }
0x14e8   :  { %12748 = vmatmul.mubr.f32.vlgmr.msra.gmra.mrb[72].mxu1 %v23559_v5  ;;  %v18374_v5 = vld [vmem:[%s24968_s0 + $0x120] sm:$0xff] }
0x14e9   :  { %19203 = vmatpush1.bf16.msra.mxu1 %v23591_v50  ;;  %12753 = vmatprep.mubr.f32.mxu1 %v20562_v1 }
0x14ea   :  { %19205 = vmatprep.subr.bf16.mxu1 %v23651_v17 }
0x14ec   :  { %12756 = vmatmul.mubr.f32.gmra.mrb[74].mxu1 %v23578_v43  ;;  %v18375_v43 = vld [vmem:[%s24968_s0 + $0x128] sm:$0xff] }
0x14ed   :  { %19207 = vmatpush1.bf16.msra.mxu1 %v23647_v61  ;;  %12761 = vmatprep.mubr.f32.mxu1 %v20562_v1 }
0x14ee   :  { %19209 = vmatprep.subr.bf16.mxu1 %v23637_v57 }
0x14f0   :  { %12764 = vmatmul.mubr.f32.gmra.mrb[76].mxu1 %v23614_v39 }
0x14f1   :  { %12769 = vmatprep.mubr.f32.mxu1 %v20562_v1 }
0x14f4   :  { %12772 = vmatmul.mubr.f32.gmra.mrb[78].mxu1 %v23662_v55 }
0x14f5   :  { %12850 = vmatprep.mubr.f32.mxu1 %v20562_v1 }
0x14f8   :  { %12854 = vmatmul.mubr.f32.vlgmr.msra.gmra.mrb[72].mxu1 %v12490_v46  ;;  %v18373_v46 = vld [vmem:[%s24971_s3 + $0x10] ss:$8 sm:$0x3] }
0x14f9   :  { %19211 = vmatpush1.bf16.msra.mxu1 %v23639_v19  ;;  %12859 = vmatprep.mubr.f32.mxu1 %v20562_v1 }
0x14fa   :  { %19213 = vmatprep.subr.bf16.mxu1 %v19212_v63 }
0x14fc   :  { %12863 = vmatmul.mubr.f32.gmra.mrb[74].mxu1 %v12501_v45  ;;  %v13164_v45 = vsel %vm34_vm0, %v18375_v43, 0 }
0x14fd   :  { %19215 = vmatpush1.bf16.msra.mxu1 %v19214_v9  ;;  %12868 = vmatprep.mubr.f32.mxu1 %v20562_v1  ;;  %v23753_v19 = vand.u32 4294901760, %v13164_v45 }
0x14fe   :  { %19217 = vmatprep.subr.bf16.mxu1 %v23602_v2  ;;  %v13132_v2 = vrot.slane %v18373_v46, %v20877_v41 }
0x14ff   :  { %v23762_v8 = vsub.f32 %v13164_v45, %v23753_v19 }
0x1500   :  { %12872 = vmatmul.mubr.f32.gmra.mrb[76].mxu1 %v12512_v24 }
0x1501   :  { %12877 = vmatprep.mubr.f32.mxu1 %v20562_v1 }
0x1504   :  { %12881 = vmatmul.mubr.f32.gmra.mrb[78].mxu1 %v12523_v30 }
0x1505   :  { %12975 = vmatprep.mubr.f32.mxu1 %v20562_v1 }
0x1508   :  { %12977 = vmatmul.mubr.f32.vlgmr.msra.gmra.mrb[72].mxu1 %v23550_v23 }
0x1509   :  { %19219 = vmatpush1.bf16.msra.mxu1 %v23591_v50  ;;  %12982 = vmatprep.mubr.f32.mxu1 %v20562_v1 }
0x150a   :  { %19221 = vmatprep.subr.bf16.mxu1 %v23651_v17 }
0x150c   :  { %12984 = vmatmul.mubr.f32.gmra.mrb[74].mxu1 %v23561_v40 }
0x150d   :  { %19223 = vmatpush1.bf16.msra.mxu1 %v23647_v61  ;;  %12989 = vmatprep.mubr.f32.mxu1 %v20562_v1 }
0x1510   :  { %12991 = vmatmul.mubr.f32.gmra.mrb[76].mxu1 %v23587_v52 }
0x1511   :  { %12996 = vmatprep.mubr.f32.mxu1 %v20562_v1 }
0x1514   :  { %12998 = vmatmul.mubr.f32.gmra.mrb[78].mxu1 %v23620_v3 }
0x1515   :  { %13076 = vmatprep.mubr.f32.mxu1 %v20562_v1 }
0x1518   :  { %13078 = vmatmul.mubr.f32.vlgmr.msra.gmra.mrb[72].mxu1 %v23550_v23  ;;  %v18372_v23 = vld [vmem:[%s24970_s2 + $0x10] ss:$8 sm:$0x3] }
0x1519   :  { %13083 = vmatprep.mubr.f32.mxu1 %v20562_v1  ;;  %v13113_v50 = vrot.slane %v18372_v23, %v20877_v41  ;;  %v13117_v39 = vrot.slane %v18372_v23, %v20884_v59 }
0x151b   :  { %v13120_v56 = vmul.f32 %v13113_v50, %v23556_v28  ;;  %v13121_v42 = vmul.f32 %v13117_v39, %v23564_v47  ;;  %v13122_v61 = vmul.f32 %v13113_v50, %v23574_v13  ;;  %v13123_v21 = vmul.f32 %v13117_v39, %v23585_v51  ;;  %v18377_v28 = vld [vmem:[%s24968_s0 + $0x138] sm:$0xff] }
0x151c   :  { %13085 = vmatmul.mubr.f32.gmra.mrb[74].mxu1 %v23561_v40  ;;  %v13161_v40 = vsel %vm34_vm0, %v18374_v5, 0  ;;  %v13124_v47 = vmul.f32 %v13113_v50, %v23600_v54  ;;  %v23768_v13 = vand.u32 4294901760, %v13167_v60  ;;  %v13125_v51 = vmul.f32 %v13117_v39, %v23611_v25 }
0x151d   :  { %13090 = vmatprep.mubr.f32.mxu1 %v20562_v1  ;;  %v13126_v24 = vmul.f32 %v13113_v50, %v23634_v37  ;;  %v13127_v48 = vmul.f32 %v13117_v39, %v23643_v18  ;;  %v23776_v49 = vsel %vm34_vm0, %v18377_v28, 0  ;;  %v13258_v37 = vand.u32 4294901760, %v23762_v8 }
0x151e   :  { %v23788_v32 = vsub.f32 %v13167_v60, %v23768_v13  ;;  %v23792_v30 = vand.u32 4294901760, %v23776_v49 }
0x1520   :  { %13092 = vmatmul.mubr.f32.gmra.mrb[76].mxu1 %v23587_v52  ;;  %v23740_v52 = vand.u32 4294901760, %v13161_v40 }
0x1521   :  { %13097 = vmatprep.mubr.f32.mxu1 %v20562_v1 }
0x1522   :  { %v23751_v57 = vsub.f32 %v13161_v40, %v23740_v52 }
0x1524   :  { %13099 = vmatmul.mubr.f32.gmra.mrb[78].mxu1 %v23620_v3  ;;  %v13136_v3 = vrot.slane %v18373_v46, %v20884_v59  ;;  %v13247_v17 = vand.u32 4294901760, %v23751_v57 }
0x1525   :  { %13951 = vmatprep.mubr.f32.mxu1 %v20562_v1 }
0x1526   :  { %v23783_v25 = vsub.f32 %v23751_v57, %v13247_v17 }
0x15eb   :  { %v13079_v14 = vpop.f32.mrb[72].mxu1 }
0x15ec   :  { %v13139_v7 = vmul.f32 %v13132_v2, %v13079_v14  ;;  %v13081_v44 = vpop.f32.mrb[73].mxu1 }
0x15ed   :  { %v13140_v35 = vmul.f32 %v13136_v3, %v13081_v44 }
0x15ee   :  { %v13147_v4 = vadd.f32 %v13139_v7, %v13120_v56 }
0x15ef   :  { %v13148_v20 = vadd.f32 %v13140_v35, %v13121_v42  ;;  %v13086_v58 = vpop.f32.mrb[74].mxu1 }
0x15f0   :  { %v13174_v15 = vand.u32 4294901760, %v13147_v4  ;;  %v13141_v22 = vmul.f32 %v13132_v2, %v13086_v58  ;;  %v13088_v6 = vpop.f32.mrb[75].mxu1 }
0x15f1   :  { %v13172_v16 = vand.u32 4294901760, %v13148_v20  ;;  %v13142_v36 = vmul.f32 %v13136_v3, %v13088_v6 }
0x15f2   :  { %v23773_v55 = vsub.f32 %v13147_v4, %v13174_v15  ;;  %v13149_v38 = vadd.f32 %v13141_v22, %v13122_v61 }
0x15f3   :  { %v23778_v54 = vsub.f32 %v13148_v20, %v13172_v16  ;;  %v13150_v9 = vadd.f32 %v13142_v36, %v13123_v21  ;;  %v13093_v34 = vpop.f32.mrb[76].mxu1  ;;  %v13249_v36 = vand.u32 4294901760, %v23783_v25 }
0x15f4   :  { %v13297_v63 = vand.u32 4294901760, %v23773_v55  ;;  %v13178_v18 = vand.u32 4294901760, %v13149_v38  ;;  %v13143_v12 = vmul.f32 %v13132_v2, %v13093_v34  ;;  %v13095_v11 = vpop.f32.mrb[77].mxu1 }
0x15f5   :  { %v13176_v62 = vand.u32 4294901760, %v13150_v9  ;;  %v13144_v26 = vmul.f32 %v13136_v3, %v13095_v11  ;;  %v13291_v0 = vand.u32 4294901760, %v23778_v54 }
0x15f6   :  { %v13298_v27 = vsub.f32 %v23773_v55, %v13297_v63  ;;  %v23795_v29 = vpack.c.bf16 %v13178_v18, %v13174_v15  ;;  %v23797_v10 = vsub.f32 %v13149_v38, %v13178_v18  ;;  %v13151_v53 = vadd.f32 %v13143_v12, %v13124_v47 }
0x15f7   :  { %v23799_v33 = vsub.f32 %v13150_v9, %v13176_v62  ;;  %v13152_v5 = vadd.f32 %v13144_v26, %v13125_v51  ;;  %v13100_v23 = vpop.f32.mrb[78].mxu1  ;;  %v23801_v40 = vpack.c.bf16 %v13176_v62, %v13172_v16  ;;  %v13292_v46 = vsub.f32 %v23778_v54, %v13291_v0 }
0x15f8   :  { %v13309_v43 = vand.u32 4294901760, %v23797_v10  ;;  %v13182_v50 = vand.u32 4294901760, %v13151_v53  ;;  %v13145_v45 = vmul.f32 %v13132_v2, %v13100_v23  ;;  %v13102_v39 = vpop.f32.mrb[79].mxu1  ;;  %v13299_v31 = vand.u32 4294901760, %v13298_v27 }
0x15f9   :  { %v13180_v14 = vand.u32 4294901760, %v13152_v5  ;;  %v13146_v56 = vmul.f32 %v13136_v3, %v13102_v39  ;;  %19225 = vmatprep.subr.bf16.mxu0 %v23801_v40  ;;  %v13293_v7 = vand.u32 4294901760, %v13292_v46  ;;  %v13303_v44 = vand.u32 4294901760, %v23799_v33 }
0x15fa   :  { %v13310_v42 = vsub.f32 %v23797_v10, %v13309_v43  ;;  %v23808_v35 = vsub.f32 %v13151_v53, %v13182_v50  ;;  %v13153_v60 = vadd.f32 %v13145_v45, %v13126_v24  ;;  %19227 = vmatpush1.bf16.msra.mxu0 %v23795_v29  ;;  %v19240_v61 = vpack.c.bf16 %v23799_v33, %v23778_v54 }
0x15fb   :  { %v13314_v2 = vsub.f32 %v13152_v5, %v13180_v14  ;;  %v13154_v4 = vadd.f32 %v13146_v56, %v13127_v48  ;;  %v13304_v21 = vsub.f32 %v23799_v33, %v13303_v44  ;;  %v19242_v3 = vpack.c.bf16 %v23797_v10, %v23773_v55 }
0x15fc   :  { %v13321_v20 = vand.u32 4294901760, %v23808_v35  ;;  %v13186_v58 = vand.u32 4294901760, %v13153_v60  ;;  %v13311_v28 = vand.u32 4294901760, %v13310_v42  ;;  %v23817_v47 = vpack.c.bf16 %v13303_v44, %v13291_v0 }
0x15fd   :  { %v13184_v15 = vand.u32 4294901760, %v13154_v4  ;;  %v13305_v22 = vand.u32 4294901760, %v13304_v21  ;;  %v13315_v6 = vand.u32 4294901760, %v13314_v2  ;;  %v23819_v51 = vpack.c.bf16 %v13309_v43, %v13297_v63 }
0x15fe   :  { %v23821_v24 = vpack.c.bf16 %v13186_v58, %v13182_v50  ;;  %v13332_v16 = vsub.f32 %v13153_v60, %v13186_v58  ;;  %v19234_v48 = vpack.c.bf16 %v13311_v28, %v13299_v31  ;;  %v13259_v9 = vsub.f32 %v23762_v8, %v13258_v37 }
0x15ff   :  { %v13326_v38 = vsub.f32 %v13154_v4, %v13184_v15  ;;  %v23824_v54 = vpack.c.bf16 %v13184_v15, %v13180_v14  ;;  %v19232_v55 = vpack.c.bf16 %v13305_v22, %v13293_v7  ;;  %v13322_v34 = vsub.f32 %v23808_v35, %v13321_v20  ;;  %v18381_v4 = vld [vmem:[%s24969_s1 + $0x138] sm:$0xff] }
0x1600   :  { %v13333_v18 = vand.u32 4294901760, %v13332_v16  ;;  %v13269_v63 = vand.u32 4294901760, %v23788_v32  ;;  %v19246_v12 = vpack.c.bf16 %v13332_v16, %v23808_v35  ;;  %v13316_v11 = vsub.f32 %v13314_v2, %v13315_v6 }
0x1601   :  { %19229 = vmatprep.subr.bf16.mxu0 %v23824_v54  ;;  %v13327_v25 = vand.u32 4294901760, %v13326_v38  ;;  %v23835_v62 = vsub.f32 %v23776_v49, %v23792_v30  ;;  %v19244_v26 = vpack.c.bf16 %v13326_v38, %v13314_v2  ;;  %v13260_v33 = vand.u32 4294901760, %v13259_v9 }
0x1602   :  { %v13334_v0 = vsub.f32 %v13332_v16, %v13333_v18  ;;  %19231 = vmatpush1.bf16.msra.mxu0 %v23821_v24  ;;  %v19262_v27 = vpack.c.bf16 %v13333_v18, %v13321_v20  ;;  %v13323_v5 = vand.u32 4294901760, %v13322_v34  ;;  %v13317_v46 = vand.u32 4294901760, %v13316_v11 }
0x1603   :  { %19233 = vmatprep.subr.bf16.mxu0 %v19232_v55  ;;  %v13328_v10 = vsub.f32 %v13326_v38, %v13327_v25  ;;  %v19260_v53 = vpack.c.bf16 %v13327_v25, %v13315_v6  ;;  %v13270_v50 = vsub.f32 %v23788_v32, %v13269_v63  ;;  %v13280_v49 = vand.u32 4294901760, %v23835_v62 }
0x1604   :  { %v13335_v23 = vand.u32 4294901760, %v13334_v0  ;;  %v13877_v6 = vsel %vm34_vm0, %v18381_v4, 0 }
0x1605   :  { %13250 = vmatmul.mubr.f32.vlgmr.msra.gmra.mrb[72].mxu0 %v13249_v36  ;;  %v13329_v43 = vand.u32 4294901760, %v13328_v10  ;;  %v13271_v31 = vand.u32 4294901760, %v13270_v50  ;;  %v13281_v14 = vsub.f32 %v23835_v62, %v13280_v49  ;;  %v23976_v11 = vand.u32 4294901760, %v13877_v6 }
0x1606   :  { %19235 = vmatpush1.bf16.msra.mxu0 %v19234_v48  ;;  %13255 = vmatprep.mubr.f32.mxu0 %v20562_v1  ;;  %v19238_v45 = vpack.c.bf16 %v13335_v23, %v13323_v5 }
0x1607   :  { %v19236_v39 = vpack.c.bf16 %v13329_v43, %v13317_v46  ;;  %v13282_v56 = vand.u32 4294901760, %v13281_v14 }
0x1609   :  { %13261 = vmatmul.mubr.f32.gmra.mrb[74].mxu0 %v13260_v33  ;;  %19237 = vmatprep.subr.bf16.mxu0 %v19236_v39 }
0x160a   :  { %19239 = vmatpush1.bf16.msra.mxu0 %v19238_v45  ;;  %13266 = vmatprep.mubr.f32.mxu0 %v20562_v1 }
0x160b   :  { %19241 = vmatprep.subr.bf16.mxu0 %v19240_v61 }
0x160d   :  { %13272 = vmatmul.mubr.f32.gmra.mrb[76].mxu0 %v13271_v31 }
0x160e   :  { %13277 = vmatprep.mubr.f32.mxu0 %v20562_v1 }
0x1611   :  { %13283 = vmatmul.mubr.f32.gmra.mrb[78].mxu0 %v13282_v56 }
0x1612   :  { %13393 = vmatprep.mubr.f32.mxu0 %v20562_v1 }
0x1615   :  { %13395 = vmatmul.mubr.f32.vlgmr.msra.gmra.mrb[72].mxu0 %v23740_v52 }
0x1616   :  { %19243 = vmatpush1.bf16.msra.mxu0 %v19242_v3  ;;  %13400 = vmatprep.mubr.f32.mxu0 %v20562_v1 }
0x1617   :  { %19245 = vmatprep.subr.bf16.mxu0 %v19244_v26 }
0x1619   :  { %13402 = vmatmul.mubr.f32.gmra.mrb[74].mxu0 %v23753_v19 }
0x161a   :  { %19247 = vmatpush1.bf16.msra.mxu0 %v19246_v12  ;;  %13407 = vmatprep.mubr.f32.mxu0 %v20562_v1 }
0x161b   :  { %19249 = vmatprep.subr.bf16.mxu0 %v23801_v40 }
0x161d   :  { %13409 = vmatmul.mubr.f32.gmra.mrb[76].mxu0 %v23768_v13 }
0x161e   :  { %13414 = vmatprep.mubr.f32.mxu0 %v20562_v1 }
0x1621   :  { %13416 = vmatmul.mubr.f32.gmra.mrb[78].mxu0 %v23792_v30 }
0x1622   :  { %13502 = vmatprep.mubr.f32.mxu0 %v20562_v1 }
0x1625   :  { %13505 = vmatmul.mubr.f32.vlgmr.msra.gmra.mrb[72].mxu0 %v23751_v57  ;;  %v18378_v57 = vld [vmem:[%s24969_s1 + $0x120] sm:$0xff] }
0x1626   :  { %19251 = vmatpush1.bf16.msra.mxu0 %v23795_v29  ;;  %13510 = vmatprep.mubr.f32.mxu0 %v20562_v1 }
0x1627   :  { %19253 = vmatprep.subr.bf16.mxu0 %v23824_v54 }
0x1629   :  { %13513 = vmatmul.mubr.f32.gmra.mrb[74].mxu0 %v23762_v8 }
0x162a   :  { %19255 = vmatpush1.bf16.msra.mxu0 %v23821_v24  ;;  %13518 = vmatprep.mubr.f32.mxu0 %v20562_v1 }
0x162b   :  { %19257 = vmatprep.subr.bf16.mxu0 %v23817_v47 }
0x162d   :  { %13521 = vmatmul.mubr.f32.gmra.mrb[76].mxu0 %v23788_v32 }
0x162e   :  { %13526 = vmatprep.mubr.f32.mxu0 %v20562_v1 }
0x1631   :  { %13529 = vmatmul.mubr.f32.gmra.mrb[78].mxu0 %v23835_v62 }
0x1632   :  { %13607 = vmatprep.mubr.f32.mxu0 %v20562_v1 }
0x1635   :  { %13611 = vmatmul.mubr.f32.vlgmr.msra.gmra.mrb[72].mxu0 %v13247_v17 }
0x1636   :  { %19259 = vmatpush1.bf16.msra.mxu0 %v23819_v51  ;;  %13616 = vmatprep.mubr.f32.mxu0 %v20562_v1 }
0x1637   :  { %19261 = vmatprep.subr.bf16.mxu0 %v19260_v53 }
0x1639   :  { %13620 = vmatmul.mubr.f32.gmra.mrb[74].mxu0 %v13258_v37 }
0x163a   :  { %19263 = vmatpush1.bf16.msra.mxu0 %v19262_v27  ;;  %13625 = vmatprep.mubr.f32.mxu0 %v20562_v1 }
0x163b   :  { %19265 = vmatprep.subr.bf16.mxu0 %v23801_v40 }
0x163d   :  { %13629 = vmatmul.mubr.f32.gmra.mrb[76].mxu0 %v13269_v63 }
0x163e   :  { %13634 = vmatprep.mubr.f32.mxu0 %v20562_v1 }
0x1641   :  { %13638 = vmatmul.mubr.f32.gmra.mrb[78].mxu0 %v13280_v49 }
0x1642   :  { %13732 = vmatprep.mubr.f32.mxu0 %v20562_v1 }
0x1645   :  { %13734 = vmatmul.mubr.f32.vlgmr.msra.gmra.mrb[72].mxu0 %v23740_v52 }
0x1646   :  { %19267 = vmatpush1.bf16.msra.mxu0 %v23795_v29  ;;  %13739 = vmatprep.mubr.f32.mxu0 %v20562_v1 }
0x1647   :  { %19269 = vmatprep.subr.bf16.mxu0 %v23824_v54 }
0x1649   :  { %13741 = vmatmul.mubr.f32.gmra.mrb[74].mxu0 %v23753_v19 }
0x164a   :  { %19271 = vmatpush1.bf16.msra.mxu0 %v23821_v24  ;;  %13746 = vmatprep.mubr.f32.mxu0 %v20562_v1 }
0x164d   :  { %13748 = vmatmul.mubr.f32.gmra.mrb[76].mxu0 %v23768_v13 }
0x164e   :  { %13753 = vmatprep.mubr.f32.mxu0 %v20562_v1 }
0x1651   :  { %13755 = vmatmul.mubr.f32.gmra.mrb[78].mxu0 %v23792_v30 }
0x1652   :  { %13833 = vmatprep.mubr.f32.mxu0 %v20562_v1 }
0x1655   :  { %13835 = vmatmul.mubr.f32.vlgmr.msra.gmra.mrb[72].mxu0 %v23740_v52  ;;  %v13868_v52 = vsel %vm34_vm0, %v18378_v57, 0 }
0x1656   :  { %13840 = vmatprep.mubr.f32.mxu0 %v20562_v1  ;;  %v23906_v17 = vand.u32 4294901760, %v13868_v52 }
0x1658   :  { %v23915_v32 = vsub.f32 %v13868_v52, %v23906_v17 }
0x1659   :  { %13842 = vmatmul.mubr.f32.gmra.mrb[74].mxu0 %v23753_v19  ;;  %v18379_v19 = vld [vmem:[%s24969_s1 + $0x128] sm:$0xff] }
0x165a   :  { %13847 = vmatprep.mubr.f32.mxu0 %v20562_v1  ;;  %v13871_v8 = vsel %vm34_vm0, %v18379_v19, 0  ;;  %v13954_v61 = vand.u32 4294901760, %v23915_v32 }
0x165c   :  { %v13955_v36 = vsub.f32 %v23915_v32, %v13954_v61 }
0x165d   :  { %13849 = vmatmul.mubr.f32.gmra.mrb[76].mxu0 %v23768_v13  ;;  %v18380_v13 = vld [vmem:[%s24969_s1 + $0x130] sm:$0xff] }
0x165e   :  { %13854 = vmatprep.mubr.f32.mxu0 %v20562_v1  ;;  %v13874_v44 = vsel %vm34_vm0, %v18380_v13, 0  ;;  %v13956_v52 = vand.u32 4294901760, %v13955_v36 }
0x165f   :  { %v23943_v58 = vand.u32 4294901760, %v13874_v44 }
0x1661   :  { %13856 = vmatmul.mubr.f32.gmra.mrb[78].mxu0 %v23792_v30  ;;  %v23917_v30 = vand.u32 4294901760, %v13871_v8  ;;  %v23970_v34 = vsub.f32 %v13874_v44, %v23943_v58 }
0x1662   :  { %14708 = vmatprep.mubr.f32.mxu0 %v20562_v1 }
0x1663   :  { %v23934_v2 = vsub.f32 %v13871_v8, %v23917_v30 }
0x1665   :  { %v13965_v48 = vand.u32 4294901760, %v23934_v2 }
0x1728   :  { %v23912_v37 = vpop.f32.mrb[72].mxu0 }
0x1729   :  { %v13881_v29 = vand.u32 4294901760, %v23912_v37  ;;  %v23920_v40 = vpop.f32.mrb[73].mxu0 }
0x172a   :  { %v13879_v7 = vand.u32 4294901760, %v23920_v40 }
0x172b   :  { %v23925_v42 = vsub.f32 %v23912_v37, %v13881_v29 }
0x172c   :  { %v23928_v35 = vsub.f32 %v23920_v40, %v13879_v7  ;;  %v23930_v60 = vpop.f32.mrb[74].mxu0 }
0x172d   :  { %v14004_v21 = vand.u32 4294901760, %v23925_v42  ;;  %v13885_v3 = vand.u32 4294901760, %v23930_v60  ;;  %v23941_v20 = vpop.f32.mrb[75].mxu0 }
0x172e   :  { %v13998_v28 = vand.u32 4294901760, %v23928_v35  ;;  %v13883_v47 = vand.u32 4294901760, %v23941_v20 }
0x172f   :  { %v23947_v15 = vpack.c.bf16 %v13885_v3, %v13881_v29  ;;  %v23950_v22 = vsub.f32 %v23930_v60, %v13885_v3  ;;  %v14005_v38 = vsub.f32 %v23925_v42, %v14004_v21 }
0x1730   :  { %v23954_v51 = vsub.f32 %v23941_v20, %v13883_v47  ;;  %v23956_v24 = vpop.f32.mrb[76].mxu0  ;;  %v23958_v16 = vpack.c.bf16 %v13883_v47, %v13879_v7  ;;  %v13999_v12 = vsub.f32 %v23928_v35, %v13998_v28  ;;  %v13966_v7 = vsub.f32 %v23934_v2, %v13965_v48 }
0x1731   :  { %v14016_v54 = vand.u32 4294901760, %v23950_v22  ;;  %v13889_v55 = vand.u32 4294901760, %v23956_v24  ;;  %v23967_v9 = vpop.f32.mrb[77].mxu0  ;;  %v19290_v0 = vpack.c.bf16 %v23950_v22, %v23925_v42  ;;  %v14006_v23 = vand.u32 4294901760, %v14005_v38 }
0x1732   :  { %v14010_v18 = vand.u32 4294901760, %v23954_v51  ;;  %v13887_v63 = vand.u32 4294901760, %v23967_v9  ;;  %19273 = vmatprep.subr.bf16.mxu1 %v23958_v16  ;;  %v19288_v26 = vpack.c.bf16 %v23954_v51, %v23928_v35  ;;  %v14000_v31 = vand.u32 4294901760, %v13999_v12 }
0x1733   :  { %v14017_v25 = vsub.f32 %v23950_v22, %v14016_v54  ;;  %v23980_v62 = vsub.f32 %v23956_v24, %v13889_v55  ;;  %19275 = vmatpush1.bf16.msra.mxu1 %v23947_v15  ;;  %v23995_v5 = vpack.c.bf16 %v14016_v54, %v14004_v21  ;;  %v13976_v35 = vand.u32 4294901760, %v23970_v34 }
0x1734   :  { %v23988_v27 = vsub.f32 %v23967_v9, %v13887_v63  ;;  %v23990_v10 = vpop.f32.mrb[78].mxu0  ;;  %v14011_v53 = vsub.f32 %v23954_v51, %v14010_v18  ;;  %v23993_v33 = vpack.c.bf16 %v14010_v18, %v13998_v28  ;;  %v24018_v28 = vsub.f32 %v13877_v6, %v23976_v11 }
0x1735   :  { %v14018_v46 = vand.u32 4294901760, %v14017_v25  ;;  %v14028_v43 = vand.u32 4294901760, %v23980_v62  ;;  %v13893_v50 = vand.u32 4294901760, %v23990_v10  ;;  %v23999_v49 = vpop.f32.mrb[79].mxu0  ;;  %v13967_v18 = vand.u32 4294901760, %v13966_v7 }
0x1736   :  { %v14022_v45 = vand.u32 4294901760, %v23988_v27  ;;  %v13891_v39 = vand.u32 4294901760, %v23999_v49  ;;  %v14012_v14 = vand.u32 4294901760, %v14011_v53  ;;  %v13977_v6 = vsub.f32 %v23970_v34, %v13976_v35 }
0x1737   :  { %v24003_v56 = vpack.c.bf16 %v13893_v50, %v13889_v55  ;;  %v14039_v57 = vsub.f32 %v23990_v10, %v13893_v50  ;;  %v19282_v19 = vpack.c.bf16 %v14018_v46, %v14006_v23  ;;  %v14029_v44 = vsub.f32 %v23980_v62, %v14028_v43 }
0x1738   :  { %v14033_v8 = vsub.f32 %v23999_v49, %v13891_v39  ;;  %v24007_v13 = vpack.c.bf16 %v13891_v39, %v13887_v63  ;;  %v19280_v29 = vpack.c.bf16 %v14012_v14, %v14000_v31  ;;  %v14023_v3 = vsub.f32 %v23988_v27, %v14022_v45 }
0x1739   :  { %v14040_v42 = vand.u32 4294901760, %v14039_v57  ;;  %v19294_v4 = vpack.c.bf16 %v14039_v57, %v23980_v62  ;;  %v14030_v54 = vand.u32 4294901760, %v14029_v44  ;;  %v13987_v25 = vand.u32 4294901760, %v24018_v28 }
0x173a   :  { %v14034_v21 = vand.u32 4294901760, %v14033_v8  ;;  %19277 = vmatprep.subr.bf16.mxu1 %v24007_v13  ;;  %v19292_v47 = vpack.c.bf16 %v14033_v8, %v23988_v27  ;;  %v14024_v63 = vand.u32 4294901760, %v14023_v3  ;;  %v13978_v53 = vand.u32 4294901760, %v13977_v6 }
0x173b   :  { %v14041_v22 = vsub.f32 %v14039_v57, %v14040_v42  ;;  %19279 = vmatpush1.bf16.msra.mxu1 %v24003_v56  ;;  %v19310_v51 = vpack.c.bf16 %v14040_v42, %v14028_v43  ;;  %v13988_v23 = vsub.f32 %v24018_v28, %v13987_v25 }
0x173c   :  { %19281 = vmatprep.subr.bf16.mxu1 %v19280_v29  ;;  %v14035_v36 = vsub.f32 %v14033_v8, %v14034_v21  ;;  %v19308_v38 = vpack.c.bf16 %v14034_v21, %v14022_v45 }
0x173d   :  { %v14042_v55 = vand.u32 4294901760, %v14041_v22  ;;  %v13989_v46 = vand.u32 4294901760, %v13988_v23 }
0x173e   :  { %13957 = vmatmul.mubr.f32.vlgmr.msra.gmra.mrb[80].mxu1 %v13956_v52  ;;  %v14036_v12 = vand.u32 4294901760, %v14035_v36 }
0x173f   :  { %19283 = vmatpush1.bf16.msra.mxu1 %v19282_v19  ;;  %13962 = vmatprep.mubr.f32.mxu1 %v20562_v1  ;;  %v19286_v62 = vpack.c.bf16 %v14042_v55, %v14030_v54 }
0x1740   :  { %v19284_v27 = vpack.c.bf16 %v14036_v12, %v14024_v63 }
0x1742   :  { %13968 = vmatmul.mubr.f32.gmra.mrb[82].mxu1 %v13967_v18  ;;  %19285 = vmatprep.subr.bf16.mxu1 %v19284_v27 }
0x1743   :  { %19287 = vmatpush1.bf16.msra.mxu1 %v19286_v62  ;;  %13973 = vmatprep.mubr.f32.mxu1 %v20562_v1 }
0x1744   :  { %19289 = vmatprep.subr.bf16.mxu1 %v19288_v26  ;;  %v18386_v26 = vld [vmem:[%s24968_s0 + $0x150] sm:$0xff] }
0x1745   :  { %v14631_v14 = vsel %vm34_vm0, %v18386_v26, 0 }
0x1746   :  { %13979 = vmatmul.mubr.f32.gmra.mrb[84].mxu1 %v13978_v53 }
0x1747   :  { %13984 = vmatprep.mubr.f32.mxu1 %v20562_v1 }
0x174a   :  { %13990 = vmatmul.mubr.f32.gmra.mrb[86].mxu1 %v13989_v46 }
0x174b   :  { %14100 = vmatprep.mubr.f32.mxu1 %v20562_v1 }
0x174e   :  { %14102 = vmatmul.mubr.f32.vlgmr.msra.gmra.mrb[80].mxu1 %v23906_v17 }
0x174f   :  { %19291 = vmatpush1.bf16.msra.mxu1 %v19290_v0  ;;  %14107 = vmatprep.mubr.f32.mxu1 %v20562_v1 }
0x1750   :  { %19293 = vmatprep.subr.bf16.mxu1 %v19292_v47 }
0x1752   :  { %14109 = vmatmul.mubr.f32.gmra.mrb[82].mxu1 %v23917_v30 }
0x1753   :  { %19295 = vmatpush1.bf16.msra.mxu1 %v19294_v4  ;;  %14114 = vmatprep.mubr.f32.mxu1 %v20562_v1 }
0x1754   :  { %19297 = vmatprep.subr.bf16.mxu1 %v23958_v16 }
0x1756   :  { %14116 = vmatmul.mubr.f32.gmra.mrb[84].mxu1 %v23943_v58 }
0x1757   :  { %14121 = vmatprep.mubr.f32.mxu1 %v20562_v1 }
0x175a   :  { %14123 = vmatmul.mubr.f32.gmra.mrb[86].mxu1 %v23976_v11 }
0x175b   :  { %14209 = vmatprep.mubr.f32.mxu1 %v20562_v1 }
0x175e   :  { %14212 = vmatmul.mubr.f32.vlgmr.msra.gmra.mrb[80].mxu1 %v23915_v32  ;;  %v18384_v32 = vld [vmem:[%s24968_s0 + $0x140] sm:$0xff] }
0x175f   :  { %19299 = vmatpush1.bf16.msra.mxu1 %v23947_v15  ;;  %14217 = vmatprep.mubr.f32.mxu1 %v20562_v1 }
0x1760   :  { %19301 = vmatprep.subr.bf16.mxu1 %v24007_v13 }
0x1762   :  { %14220 = vmatmul.mubr.f32.gmra.mrb[82].mxu1 %v23934_v2  ;;  %v18385_v2 = vld [vmem:[%s24968_s0 + $0x148] sm:$0xff] }
0x1763   :  { %19303 = vmatpush1.bf16.msra.mxu1 %v24003_v56  ;;  %14225 = vmatprep.mubr.f32.mxu1 %v20562_v1 }
0x1764   :  { %19305 = vmatprep.subr.bf16.mxu1 %v23993_v33 }
0x1766   :  { %14228 = vmatmul.mubr.f32.gmra.mrb[84].mxu1 %v23970_v34 }
0x1767   :  { %14233 = vmatprep.mubr.f32.mxu1 %v20562_v1 }
0x176a   :  { %14236 = vmatmul.mubr.f32.gmra.mrb[86].mxu1 %v24018_v28 }
0x176b   :  { %14314 = vmatprep.mubr.f32.mxu1 %v20562_v1 }
0x176e   :  { %14318 = vmatmul.mubr.f32.vlgmr.msra.gmra.mrb[80].mxu1 %v13954_v61  ;;  %v18383_v61 = vld [vmem:[%s24971_s3 + $0x11] ss:$8 sm:$0x3] }
0x176f   :  { %19307 = vmatpush1.bf16.msra.mxu1 %v23995_v5  ;;  %14323 = vmatprep.mubr.f32.mxu1 %v20562_v1 }
0x1770   :  { %19309 = vmatprep.subr.bf16.mxu1 %v19308_v38 }
0x1772   :  { %14327 = vmatmul.mubr.f32.gmra.mrb[82].mxu1 %v13965_v48  ;;  %v14628_v48 = vsel %vm34_vm0, %v18385_v2, 0 }
0x1773   :  { %19311 = vmatpush1.bf16.msra.mxu1 %v19310_v51  ;;  %14332 = vmatprep.mubr.f32.mxu1 %v20562_v1  ;;  %v24109_v5 = vand.u32 4294901760, %v14628_v48 }
0x1774   :  { %19313 = vmatprep.subr.bf16.mxu1 %v23958_v16  ;;  %v14596_v16 = vrot.slane %v18383_v61, %v20877_v41 }
0x1775   :  { %v24118_v29 = vsub.f32 %v14628_v48, %v24109_v5 }
0x1776   :  { %14336 = vmatmul.mubr.f32.gmra.mrb[84].mxu1 %v13976_v35 }
0x1777   :  { %14341 = vmatprep.mubr.f32.mxu1 %v20562_v1 }
0x177a   :  { %14345 = vmatmul.mubr.f32.gmra.mrb[86].mxu1 %v13987_v25 }
0x177b   :  { %14439 = vmatprep.mubr.f32.mxu1 %v20562_v1 }
0x177e   :  { %14441 = vmatmul.mubr.f32.vlgmr.msra.gmra.mrb[80].mxu1 %v23906_v17 }
0x177f   :  { %19315 = vmatpush1.bf16.msra.mxu1 %v23947_v15  ;;  %14446 = vmatprep.mubr.f32.mxu1 %v20562_v1 }
0x1780   :  { %19317 = vmatprep.subr.bf16.mxu1 %v24007_v13 }
0x1782   :  { %14448 = vmatmul.mubr.f32.gmra.mrb[82].mxu1 %v23917_v30 }
0x1783   :  { %19319 = vmatpush1.bf16.msra.mxu1 %v24003_v56  ;;  %14453 = vmatprep.mubr.f32.mxu1 %v20562_v1 }
0x1786   :  { %14455 = vmatmul.mubr.f32.gmra.mrb[84].mxu1 %v23943_v58 }
0x1787   :  { %14460 = vmatprep.mubr.f32.mxu1 %v20562_v1 }
0x178a   :  { %14462 = vmatmul.mubr.f32.gmra.mrb[86].mxu1 %v23976_v11 }
0x178b   :  { %14540 = vmatprep.mubr.f32.mxu1 %v20562_v1 }
0x178e   :  { %14542 = vmatmul.mubr.f32.vlgmr.msra.gmra.mrb[80].mxu1 %v23906_v17  ;;  %v18382_v17 = vld [vmem:[%s24970_s2 + $0x11] ss:$8 sm:$0x3] }
0x178f   :  { %14547 = vmatprep.mubr.f32.mxu1 %v20562_v1  ;;  %v14577_v15 = vrot.slane %v18382_v17, %v20877_v41  ;;  %v14581_v34 = vrot.slane %v18382_v17, %v20884_v59 }
0x1791   :  { %v14584_v43 = vmul.f32 %v14577_v15, %v23912_v37  ;;  %v14585_v39 = vmul.f32 %v14581_v34, %v23920_v40  ;;  %v14586_v56 = vmul.f32 %v14577_v15, %v23930_v60  ;;  %v14587_v52 = vmul.f32 %v14581_v34, %v23941_v20  ;;  %v18387_v37 = vld [vmem:[%s24968_s0 + $0x158] sm:$0xff] }
0x1792   :  { %14549 = vmatmul.mubr.f32.gmra.mrb[82].mxu1 %v23917_v30  ;;  %v14625_v30 = vsel %vm34_vm0, %v18384_v32, 0  ;;  %v14588_v40 = vmul.f32 %v14577_v15, %v23956_v24  ;;  %v24124_v60 = vand.u32 4294901760, %v14631_v14  ;;  %v14589_v20 = vmul.f32 %v14581_v34, %v23967_v9 }
0x1793   :  { %14554 = vmatprep.mubr.f32.mxu1 %v20562_v1  ;;  %v14590_v35 = vmul.f32 %v14577_v15, %v23990_v10  ;;  %v14591_v3 = vmul.f32 %v14581_v34, %v23999_v49  ;;  %v24132_v22 = vsel %vm34_vm0, %v18387_v37, 0  ;;  %v14722_v10 = vand.u32 4294901760, %v24118_v29 }
0x1794   :  { %v24144_v18 = vsub.f32 %v14631_v14, %v24124_v60  ;;  %v24148_v25 = vand.u32 4294901760, %v24132_v22 }
0x1796   :  { %14556 = vmatmul.mubr.f32.gmra.mrb[84].mxu1 %v23943_v58  ;;  %v24096_v58 = vand.u32 4294901760, %v14625_v30 }
0x1797   :  { %14561 = vmatprep.mubr.f32.mxu1 %v20562_v1 }
0x1798   :  { %v24107_v33 = vsub.f32 %v14625_v30, %v24096_v58 }
0x179a   :  { %14563 = vmatmul.mubr.f32.gmra.mrb[86].mxu1 %v23976_v11  ;;  %v14600_v11 = vrot.slane %v18383_v61, %v20884_v59  ;;  %v14711_v13 = vand.u32 4294901760, %v24107_v33 }
0x179b   :  { %15415 = vmatprep.mubr.f32.mxu1 %v20562_v1 }
0x179c   :  { %v24139_v9 = vsub.f32 %v24107_v33, %v14711_v13 }
0x1861   :  { %v14543_v0 = vpop.f32.mrb[80].mxu1 }
0x1862   :  { %v14603_v50 = vmul.f32 %v14596_v16, %v14543_v0  ;;  %v14545_v45 = vpop.f32.mrb[81].mxu1 }
0x1863   :  { %v14604_v31 = vmul.f32 %v14600_v11, %v14545_v45 }
0x1864   :  { %v14611_v57 = vadd.f32 %v14603_v50, %v14584_v43 }
0x1865   :  { %v14612_v19 = vadd.f32 %v14604_v31, %v14585_v39  ;;  %v14550_v8 = vpop.f32.mrb[82].mxu1 }
0x1866   :  { %v14638_v7 = vand.u32 4294901760, %v14611_v57  ;;  %v14605_v44 = vmul.f32 %v14596_v16, %v14550_v8  ;;  %v14552_v42 = vpop.f32.mrb[83].mxu1 }
0x1867   :  { %v14636_v4 = vand.u32 4294901760, %v14612_v19  ;;  %v14606_v21 = vmul.f32 %v14600_v11, %v14552_v42 }
0x1868   :  { %v24129_v28 = vsub.f32 %v14611_v57, %v14638_v7  ;;  %v14613_v47 = vadd.f32 %v14605_v44, %v14586_v56 }
0x1869   :  { %v24134_v24 = vsub.f32 %v14612_v19, %v14636_v4  ;;  %v14614_v51 = vadd.f32 %v14606_v21, %v14587_v52  ;;  %v14557_v36 = vpop.f32.mrb[84].mxu1  ;;  %v14713_v21 = vand.u32 4294901760, %v24139_v9 }
0x186a   :  { %v14761_v38 = vand.u32 4294901760, %v24129_v28  ;;  %v14642_v49 = vand.u32 4294901760, %v14613_v47  ;;  %v14607_v54 = vmul.f32 %v14596_v16, %v14557_v36  ;;  %v14559_v55 = vpop.f32.mrb[85].mxu1 }
0x186b   :  { %v14640_v63 = vand.u32 4294901760, %v14614_v51  ;;  %v14608_v12 = vmul.f32 %v14600_v11, %v14559_v55  ;;  %v14755_v6 = vand.u32 4294901760, %v24134_v24 }
0x186c   :  { %v14762_v62 = vsub.f32 %v24129_v28, %v14761_v38  ;;  %v24151_v27 = vpack.c.bf16 %v14642_v49, %v14638_v7  ;;  %v24153_v53 = vsub.f32 %v14613_v47, %v14642_v49  ;;  %v14615_v23 = vadd.f32 %v14607_v54, %v14588_v40 }
0x186d   :  { %v24155_v46 = vsub.f32 %v14614_v51, %v14640_v63  ;;  %v14616_v32 = vadd.f32 %v14608_v12, %v14589_v20  ;;  %v14564_v17 = vpop.f32.mrb[86].mxu1  ;;  %v24157_v30 = vpack.c.bf16 %v14640_v63, %v14636_v4  ;;  %v14756_v61 = vsub.f32 %v24134_v24, %v14755_v6 }
0x186e   :  { %v14773_v2 = vand.u32 4294901760, %v24153_v53  ;;  %v14646_v15 = vand.u32 4294901760, %v14615_v23  ;;  %v14609_v48 = vmul.f32 %v14596_v16, %v14564_v17  ;;  %v14566_v34 = vpop.f32.mrb[87].mxu1  ;;  %v14763_v26 = vand.u32 4294901760, %v14762_v62 }
0x186f   :  { %v14644_v0 = vand.u32 4294901760, %v14616_v32  ;;  %v14610_v43 = vmul.f32 %v14600_v11, %v14566_v34  ;;  %19321 = vmatprep.subr.bf16.mxu0 %v24157_v30  ;;  %v14757_v50 = vand.u32 4294901760, %v14756_v61  ;;  %v14767_v45 = vand.u32 4294901760, %v24155_v46 }
0x1870   :  { %v14774_v39 = vsub.f32 %v24153_v53, %v14773_v2  ;;  %v24164_v31 = vsub.f32 %v14615_v23, %v14646_v15  ;;  %v14617_v14 = vadd.f32 %v14609_v48, %v14590_v35  ;;  %19323 = vmatpush1.bf16.msra.mxu0 %v24151_v27  ;;  %v19336_v56 = vpack.c.bf16 %v24155_v46, %v24134_v24 }
0x1871   :  { %v14778_v16 = vsub.f32 %v14616_v32, %v14644_v0  ;;  %v14618_v57 = vadd.f32 %v14610_v43, %v14591_v3  ;;  %v14768_v52 = vsub.f32 %v24155_v46, %v14767_v45  ;;  %v19338_v11 = vpack.c.bf16 %v24153_v53, %v24129_v28 }
0x1872   :  { %v14785_v19 = vand.u32 4294901760, %v24164_v31  ;;  %v14650_v8 = vand.u32 4294901760, %v14617_v14  ;;  %v14775_v37 = vand.u32 4294901760, %v14774_v39  ;;  %v24173_v40 = vpack.c.bf16 %v14767_v45, %v14755_v6 }
0x1873   :  { %v14648_v7 = vand.u32 4294901760, %v14618_v57  ;;  %v14769_v44 = vand.u32 4294901760, %v14768_v52  ;;  %v14779_v42 = vand.u32 4294901760, %v14778_v16  ;;  %v24175_v20 = vpack.c.bf16 %v14773_v2, %v14761_v38 }
0x1874   :  { %v24177_v35 = vpack.c.bf16 %v14650_v8, %v14646_v15  ;;  %v14796_v4 = vsub.f32 %v14617_v14, %v14650_v8  ;;  %v19330_v3 = vpack.c.bf16 %v14775_v37, %v14763_v26  ;;  %v14723_v51 = vsub.f32 %v24118_v29, %v14722_v10 }
0x1875   :  { %v14790_v47 = vsub.f32 %v14618_v57, %v14648_v7  ;;  %v24180_v24 = vpack.c.bf16 %v14648_v7, %v14644_v0  ;;  %v19328_v28 = vpack.c.bf16 %v14769_v44, %v14757_v50  ;;  %v14786_v36 = vsub.f32 %v24164_v31, %v14785_v19  ;;  %v18391_v57 = vld [vmem:[%s24969_s1 + $0x158] sm:$0xff] }
0x1876   :  { %v14797_v49 = vand.u32 4294901760, %v14796_v4  ;;  %v14733_v38 = vand.u32 4294901760, %v24144_v18  ;;  %v19342_v54 = vpack.c.bf16 %v14796_v4, %v24164_v31  ;;  %v14780_v55 = vsub.f32 %v14778_v16, %v14779_v42 }
0x1877   :  { %19325 = vmatprep.subr.bf16.mxu0 %v24180_v24  ;;  %v14791_v9 = vand.u32 4294901760, %v14790_v47  ;;  %v24191_v63 = vsub.f32 %v24132_v22, %v24148_v25  ;;  %v19340_v12 = vpack.c.bf16 %v14790_v47, %v14778_v16  ;;  %v14724_v46 = vand.u32 4294901760, %v14723_v51 }
0x1878   :  { %v14798_v6 = vsub.f32 %v14796_v4, %v14797_v49  ;;  %19327 = vmatpush1.bf16.msra.mxu0 %v24177_v35  ;;  %v19358_v62 = vpack.c.bf16 %v14797_v49, %v14785_v19  ;;  %v14787_v32 = vand.u32 4294901760, %v14786_v36  ;;  %v14781_v61 = vand.u32 4294901760, %v14780_v55 }
0x1879   :  { %19329 = vmatprep.subr.bf16.mxu0 %v19328_v28  ;;  %v14792_v53 = vsub.f32 %v14790_v47, %v14791_v9  ;;  %v19356_v23 = vpack.c.bf16 %v14791_v9, %v14779_v42  ;;  %v14734_v15 = vsub.f32 %v24144_v18, %v14733_v38  ;;  %v14744_v22 = vand.u32 4294901760, %v24191_v63 }
0x187a   :  { %v14799_v17 = vand.u32 4294901760, %v14798_v6  ;;  %v15341_v42 = vsel %vm34_vm0, %v18391_v57, 0 }
0x187b   :  { %14714 = vmatmul.mubr.f32.vlgmr.msra.gmra.mrb[80].mxu0 %v14713_v21  ;;  %v14793_v2 = vand.u32 4294901760, %v14792_v53  ;;  %v14735_v26 = vand.u32 4294901760, %v14734_v15  ;;  %v14745_v0 = vsub.f32 %v24191_v63, %v14744_v22  ;;  %v24332_v55 = vand.u32 4294901760, %v15341_v42 }
0x187c   :  { %19331 = vmatpush1.bf16.msra.mxu0 %v19330_v3  ;;  %14719 = vmatprep.mubr.f32.mxu0 %v20562_v1  ;;  %v19334_v48 = vpack.c.bf16 %v14799_v17, %v14787_v32 }
0x187d   :  { %v19332_v34 = vpack.c.bf16 %v14793_v2, %v14781_v61  ;;  %v14746_v43 = vand.u32 4294901760, %v14745_v0 }
0x187f   :  { %14725 = vmatmul.mubr.f32.gmra.mrb[82].mxu0 %v14724_v46  ;;  %19333 = vmatprep.subr.bf16.mxu0 %v19332_v34 }
0x1880   :  { %19335 = vmatpush1.bf16.msra.mxu0 %v19334_v48  ;;  %14730 = vmatprep.mubr.f32.mxu0 %v20562_v1 }
0x1881   :  { %19337 = vmatprep.subr.bf16.mxu0 %v19336_v56 }
0x1883   :  { %14736 = vmatmul.mubr.f32.gmra.mrb[84].mxu0 %v14735_v26 }
0x1884   :  { %14741 = vmatprep.mubr.f32.mxu0 %v20562_v1 }
0x1887   :  { %14747 = vmatmul.mubr.f32.gmra.mrb[86].mxu0 %v14746_v43 }
0x1888   :  { %14857 = vmatprep.mubr.f32.mxu0 %v20562_v1 }
0x188b   :  { %14859 = vmatmul.mubr.f32.vlgmr.msra.gmra.mrb[80].mxu0 %v24096_v58 }
0x188c   :  { %19339 = vmatpush1.bf16.msra.mxu0 %v19338_v11  ;;  %14864 = vmatprep.mubr.f32.mxu0 %v20562_v1 }
0x188d   :  { %19341 = vmatprep.subr.bf16.mxu0 %v19340_v12 }
0x188f   :  { %14866 = vmatmul.mubr.f32.gmra.mrb[82].mxu0 %v24109_v5 }
0x1890   :  { %19343 = vmatpush1.bf16.msra.mxu0 %v19342_v54  ;;  %14871 = vmatprep.mubr.f32.mxu0 %v20562_v1 }
0x1891   :  { %19345 = vmatprep.subr.bf16.mxu0 %v24157_v30 }
0x1893   :  { %14873 = vmatmul.mubr.f32.gmra.mrb[84].mxu0 %v24124_v60 }
0x1894   :  { %14878 = vmatprep.mubr.f32.mxu0 %v20562_v1 }
0x1897   :  { %14880 = vmatmul.mubr.f32.gmra.mrb[86].mxu0 %v24148_v25 }
0x1898   :  { %14966 = vmatprep.mubr.f32.mxu0 %v20562_v1 }
0x189b   :  { %14969 = vmatmul.mubr.f32.vlgmr.msra.gmra.mrb[80].mxu0 %v24107_v33  ;;  %v18388_v33 = vld [vmem:[%s24969_s1 + $0x140] sm:$0xff] }
0x189c   :  { %19347 = vmatpush1.bf16.msra.mxu0 %v24151_v27  ;;  %14974 = vmatprep.mubr.f32.mxu0 %v20562_v1 }
0x189d   :  { %19349 = vmatprep.subr.bf16.mxu0 %v24180_v24 }
0x189f   :  { %14977 = vmatmul.mubr.f32.gmra.mrb[82].mxu0 %v24118_v29 }
0x18a0   :  { %19351 = vmatpush1.bf16.msra.mxu0 %v24177_v35  ;;  %14982 = vmatprep.mubr.f32.mxu0 %v20562_v1 }
0x18a1   :  { %19353 = vmatprep.subr.bf16.mxu0 %v24173_v40 }
0x18a3   :  { %14985 = vmatmul.mubr.f32.gmra.mrb[84].mxu0 %v24144_v18 }
0x18a4   :  { %14990 = vmatprep.mubr.f32.mxu0 %v20562_v1 }
0x18a7   :  { %14993 = vmatmul.mubr.f32.gmra.mrb[86].mxu0 %v24191_v63 }
0x18a8   :  { %15071 = vmatprep.mubr.f32.mxu0 %v20562_v1 }
0x18ab   :  { %15075 = vmatmul.mubr.f32.vlgmr.msra.gmra.mrb[80].mxu0 %v14711_v13 }
0x18ac   :  { %19355 = vmatpush1.bf16.msra.mxu0 %v24175_v20  ;;  %15080 = vmatprep.mubr.f32.mxu0 %v20562_v1 }
0x18ad   :  { %19357 = vmatprep.subr.bf16.mxu0 %v19356_v23 }
0x18af   :  { %15084 = vmatmul.mubr.f32.gmra.mrb[82].mxu0 %v14722_v10 }
0x18b0   :  { %19359 = vmatpush1.bf16.msra.mxu0 %v19358_v62  ;;  %15089 = vmatprep.mubr.f32.mxu0 %v20562_v1 }
0x18b1   :  { %19361 = vmatprep.subr.bf16.mxu0 %v24157_v30 }
0x18b3   :  { %15093 = vmatmul.mubr.f32.gmra.mrb[84].mxu0 %v14733_v38 }
0x18b4   :  { %15098 = vmatprep.mubr.f32.mxu0 %v20562_v1 }
0x18b7   :  { %15102 = vmatmul.mubr.f32.gmra.mrb[86].mxu0 %v14744_v22 }
0x18b8   :  { %15196 = vmatprep.mubr.f32.mxu0 %v20562_v1 }
0x18bb   :  { %15198 = vmatmul.mubr.f32.vlgmr.msra.gmra.mrb[80].mxu0 %v24096_v58 }
0x18bc   :  { %19363 = vmatpush1.bf16.msra.mxu0 %v24151_v27  ;;  %15203 = vmatprep.mubr.f32.mxu0 %v20562_v1 }
0x18bd   :  { %19365 = vmatprep.subr.bf16.mxu0 %v24180_v24 }
0x18bf   :  { %15205 = vmatmul.mubr.f32.gmra.mrb[82].mxu0 %v24109_v5 }
0x18c0   :  { %19367 = vmatpush1.bf16.msra.mxu0 %v24177_v35  ;;  %15210 = vmatprep.mubr.f32.mxu0 %v20562_v1 }
0x18c3   :  { %15212 = vmatmul.mubr.f32.gmra.mrb[84].mxu0 %v24124_v60 }
0x18c4   :  { %15217 = vmatprep.mubr.f32.mxu0 %v20562_v1 }
0x18c7   :  { %15219 = vmatmul.mubr.f32.gmra.mrb[86].mxu0 %v24148_v25 }
0x18c8   :  { %15297 = vmatprep.mubr.f32.mxu0 %v20562_v1 }
0x18cb   :  { %15299 = vmatmul.mubr.f32.vlgmr.msra.gmra.mrb[80].mxu0 %v24096_v58  ;;  %v15332_v58 = vsel %vm34_vm0, %v18388_v33, 0 }
0x18cc   :  { %15304 = vmatprep.mubr.f32.mxu0 %v20562_v1  ;;  %v24262_v13 = vand.u32 4294901760, %v15332_v58 }
0x18ce   :  { %v24271_v18 = vsub.f32 %v15332_v58, %v24262_v13 }
0x18cf   :  { %15306 = vmatmul.mubr.f32.gmra.mrb[82].mxu0 %v24109_v5  ;;  %v18389_v5 = vld [vmem:[%s24969_s1 + $0x148] sm:$0xff] }
0x18d0   :  { %15311 = vmatprep.mubr.f32.mxu0 %v20562_v1  ;;  %v15335_v29 = vsel %vm34_vm0, %v18389_v5, 0  ;;  %v15418_v56 = vand.u32 4294901760, %v24271_v18 }
0x18d2   :  { %v15419_v21 = vsub.f32 %v24271_v18, %v15418_v56 }
0x18d3   :  { %15313 = vmatmul.mubr.f32.gmra.mrb[84].mxu0 %v24124_v60  ;;  %v18390_v60 = vld [vmem:[%s24969_s1 + $0x150] sm:$0xff] }
0x18d4   :  { %15318 = vmatprep.mubr.f32.mxu0 %v20562_v1  ;;  %v15338_v45 = vsel %vm34_vm0, %v18390_v60, 0  ;;  %v15420_v58 = vand.u32 4294901760, %v15419_v21 }
0x18d5   :  { %v24299_v8 = vand.u32 4294901760, %v15338_v45 }
0x18d7   :  { %15320 = vmatmul.mubr.f32.gmra.mrb[86].mxu0 %v24148_v25  ;;  %v24273_v25 = vand.u32 4294901760, %v15335_v29  ;;  %v24326_v36 = vsub.f32 %v15338_v45, %v24299_v8 }
0x18d8   :  { %16172 = vmatprep.mubr.f32.mxu0 %v20562_v1 }
0x18d9   :  { %v24290_v16 = vsub.f32 %v15335_v29, %v24273_v25 }
0x18db   :  { %v15429_v3 = vand.u32 4294901760, %v24290_v16 }
0x199e   :  { %v24268_v10 = vpop.f32.mrb[80].mxu0 }
0x199f   :  { %v15345_v27 = vand.u32 4294901760, %v24268_v10  ;;  %v24276_v30 = vpop.f32.mrb[81].mxu0 }
0x19a0   :  { %v15343_v50 = vand.u32 4294901760, %v24276_v30 }
0x19a1   :  { %v24281_v39 = vsub.f32 %v24268_v10, %v15345_v27 }
0x19a2   :  { %v24284_v31 = vsub.f32 %v24276_v30, %v15343_v50  ;;  %v24286_v14 = vpop.f32.mrb[82].mxu0 }
0x19a3   :  { %v15468_v52 = vand.u32 4294901760, %v24281_v39  ;;  %v15349_v11 = vand.u32 4294901760, %v24286_v14  ;;  %v24297_v19 = vpop.f32.mrb[83].mxu0 }
0x19a4   :  { %v15462_v37 = vand.u32 4294901760, %v24284_v31  ;;  %v15347_v40 = vand.u32 4294901760, %v24297_v19 }
0x19a5   :  { %v24303_v7 = vpack.c.bf16 %v15349_v11, %v15345_v27  ;;  %v24306_v44 = vsub.f32 %v24286_v14, %v15349_v11  ;;  %v15469_v47 = vsub.f32 %v24281_v39, %v15468_v52 }
0x19a6   :  { %v24310_v20 = vsub.f32 %v24297_v19, %v15347_v40  ;;  %v24312_v35 = vpop.f32.mrb[84].mxu0  ;;  %v24314_v4 = vpack.c.bf16 %v15347_v40, %v15343_v50  ;;  %v15463_v54 = vsub.f32 %v24284_v31, %v15462_v37  ;;  %v15430_v50 = vsub.f32 %v24290_v16, %v15429_v3 }
0x19a7   :  { %v15480_v24 = vand.u32 4294901760, %v24306_v44  ;;  %v15353_v28 = vand.u32 4294901760, %v24312_v35  ;;  %v24323_v51 = vpop.f32.mrb[85].mxu0  ;;  %v19386_v6 = vpack.c.bf16 %v24306_v44, %v24281_v39  ;;  %v15470_v17 = vand.u32 4294901760, %v15469_v47 }
0x19a8   :  { %v15474_v49 = vand.u32 4294901760, %v24310_v20  ;;  %v15351_v38 = vand.u32 4294901760, %v24323_v51  ;;  %19369 = vmatprep.subr.bf16.mxu1 %v24314_v4  ;;  %v19384_v12 = vpack.c.bf16 %v24310_v20, %v24284_v31  ;;  %v15464_v26 = vand.u32 4294901760, %v15463_v54 }
0x19a9   :  { %v15481_v9 = vsub.f32 %v24306_v44, %v15480_v24  ;;  %v24336_v63 = vsub.f32 %v24312_v35, %v15353_v28  ;;  %19371 = vmatpush1.bf16.msra.mxu1 %v24303_v7  ;;  %v24351_v32 = vpack.c.bf16 %v15480_v24, %v15468_v52  ;;  %v15440_v31 = vand.u32 4294901760, %v24326_v36 }
0x19aa   :  { %v24344_v62 = vsub.f32 %v24323_v51, %v15351_v38  ;;  %v24346_v53 = vpop.f32.mrb[86].mxu0  ;;  %v15475_v23 = vsub.f32 %v24310_v20, %v15474_v49  ;;  %v24349_v46 = vpack.c.bf16 %v15474_v49, %v15462_v37  ;;  %v24374_v37 = vsub.f32 %v15341_v42, %v24332_v55 }
0x19ab   :  { %v15482_v61 = vand.u32 4294901760, %v15481_v9  ;;  %v15492_v2 = vand.u32 4294901760, %v24336_v63  ;;  %v15357_v15 = vand.u32 4294901760, %v24346_v53  ;;  %v24355_v22 = vpop.f32.mrb[87].mxu0  ;;  %v15431_v49 = vand.u32 4294901760, %v15430_v50 }
0x19ac   :  { %v15486_v48 = vand.u32 4294901760, %v24344_v62  ;;  %v15355_v34 = vand.u32 4294901760, %v24355_v22  ;;  %v15476_v0 = vand.u32 4294901760, %v15475_v23  ;;  %v15441_v42 = vsub.f32 %v24326_v36, %v15440_v31 }
0x19ad   :  { %v24359_v43 = vpack.c.bf16 %v15357_v15, %v15353_v28  ;;  %v15503_v33 = vsub.f32 %v24346_v53, %v15357_v15  ;;  %v19378_v5 = vpack.c.bf16 %v15482_v61, %v15470_v17  ;;  %v15493_v45 = vsub.f32 %v24336_v63, %v15492_v2 }
0x19ae   :  { %v15497_v29 = vsub.f32 %v24355_v22, %v15355_v34  ;;  %v24363_v60 = vpack.c.bf16 %v15355_v34, %v15351_v38  ;;  %v19376_v27 = vpack.c.bf16 %v15476_v0, %v15464_v26  ;;  %v15487_v11 = vsub.f32 %v24344_v62, %v15486_v48 }
0x19af   :  { %v15504_v39 = vand.u32 4294901760, %v15503_v33  ;;  %v19390_v57 = vpack.c.bf16 %v15503_v33, %v24336_v63  ;;  %v15494_v24 = vand.u32 4294901760, %v15493_v45  ;;  %v15451_v9 = vand.u32 4294901760, %v24374_v37 }
0x19b0   :  { %v15498_v52 = vand.u32 4294901760, %v15497_v29  ;;  %19373 = vmatprep.subr.bf16.mxu1 %v24363_v60  ;;  %v19388_v40 = vpack.c.bf16 %v15497_v29, %v24344_v62  ;;  %v15488_v38 = vand.u32 4294901760, %v15487_v11  ;;  %v15442_v23 = vand.u32 4294901760, %v15441_v42 }
0x19b1   :  { %v15505_v44 = vsub.f32 %v15503_v33, %v15504_v39  ;;  %19375 = vmatpush1.bf16.msra.mxu1 %v24359_v43  ;;  %v19406_v20 = vpack.c.bf16 %v15504_v39, %v15492_v2  ;;  %v15452_v17 = vsub.f32 %v24374_v37, %v15451_v9 }
0x19b2   :  { %19377 = vmatprep.subr.bf16.mxu1 %v19376_v27  ;;  %v15499_v21 = vsub.f32 %v15497_v29, %v15498_v52  ;;  %v19404_v47 = vpack.c.bf16 %v15498_v52, %v15486_v48 }
0x19b3   :  { %v15506_v28 = vand.u32 4294901760, %v15505_v44  ;;  %v15453_v61 = vand.u32 4294901760, %v15452_v17 }
0x19b4   :  { %15421 = vmatmul.mubr.f32.vlgmr.msra.gmra.mrb[88].mxu1 %v15420_v58  ;;  %v15500_v54 = vand.u32 4294901760, %v15499_v21 }
0x19b5   :  { %19379 = vmatpush1.bf16.msra.mxu1 %v19378_v5  ;;  %15426 = vmatprep.mubr.f32.mxu1 %v20562_v1  ;;  %v19382_v63 = vpack.c.bf16 %v15506_v28, %v15494_v24 }
0x19b6   :  { %v19380_v62 = vpack.c.bf16 %v15500_v54, %v15488_v38 }
0x19b8   :  { %15432 = vmatmul.mubr.f32.gmra.mrb[90].mxu1 %v15431_v49  ;;  %19381 = vmatprep.subr.bf16.mxu1 %v19380_v62 }
0x19b9   :  { %19383 = vmatpush1.bf16.msra.mxu1 %v19382_v63  ;;  %15437 = vmatprep.mubr.f32.mxu1 %v20562_v1 }
0x19ba   :  { %19385 = vmatprep.subr.bf16.mxu1 %v19384_v12  ;;  %v18396_v12 = vld [vmem:[%s24968_s0 + $0x170] sm:$0xff] }
0x19bb   :  { %v16095_v0 = vsel %vm34_vm0, %v18396_v12, 0 }
0x19bc   :  { %15443 = vmatmul.mubr.f32.gmra.mrb[92].mxu1 %v15442_v23 }
0x19bd   :  { %15448 = vmatprep.mubr.f32.mxu1 %v20562_v1 }
0x19c0   :  { %15454 = vmatmul.mubr.f32.gmra.mrb[94].mxu1 %v15453_v61 }
0x19c1   :  { %15564 = vmatprep.mubr.f32.mxu1 %v20562_v1 }
0x19c4   :  { %15566 = vmatmul.mubr.f32.vlgmr.msra.gmra.mrb[88].mxu1 %v24262_v13 }
0x19c5   :  { %19387 = vmatpush1.bf16.msra.mxu1 %v19386_v6  ;;  %15571 = vmatprep.mubr.f32.mxu1 %v20562_v1 }
0x19c6   :  { %19389 = vmatprep.subr.bf16.mxu1 %v19388_v40 }
0x19c8   :  { %15573 = vmatmul.mubr.f32.gmra.mrb[90].mxu1 %v24273_v25 }
0x19c9   :  { %19391 = vmatpush1.bf16.msra.mxu1 %v19390_v57  ;;  %15578 = vmatprep.mubr.f32.mxu1 %v20562_v1 }
0x19ca   :  { %19393 = vmatprep.subr.bf16.mxu1 %v24314_v4 }
0x19cc   :  { %15580 = vmatmul.mubr.f32.gmra.mrb[92].mxu1 %v24299_v8 }
0x19cd   :  { %15585 = vmatprep.mubr.f32.mxu1 %v20562_v1 }
0x19d0   :  { %15587 = vmatmul.mubr.f32.gmra.mrb[94].mxu1 %v24332_v55 }
0x19d1   :  { %15673 = vmatprep.mubr.f32.mxu1 %v20562_v1 }
0x19d4   :  { %15676 = vmatmul.mubr.f32.vlgmr.msra.gmra.mrb[88].mxu1 %v24271_v18  ;;  %v18394_v18 = vld [vmem:[%s24968_s0 + $0x160] sm:$0xff] }
0x19d5   :  { %19395 = vmatpush1.bf16.msra.mxu1 %v24303_v7  ;;  %15681 = vmatprep.mubr.f32.mxu1 %v20562_v1 }
0x19d6   :  { %19397 = vmatprep.subr.bf16.mxu1 %v24363_v60 }
0x19d8   :  { %15684 = vmatmul.mubr.f32.gmra.mrb[90].mxu1 %v24290_v16  ;;  %v18395_v16 = vld [vmem:[%s24968_s0 + $0x168] sm:$0xff] }
0x19d9   :  { %19399 = vmatpush1.bf16.msra.mxu1 %v24359_v43  ;;  %15689 = vmatprep.mubr.f32.mxu1 %v20562_v1 }
0x19da   :  { %19401 = vmatprep.subr.bf16.mxu1 %v24349_v46 }
0x19dc   :  { %15692 = vmatmul.mubr.f32.gmra.mrb[92].mxu1 %v24326_v36 }
0x19dd   :  { %15697 = vmatprep.mubr.f32.mxu1 %v20562_v1 }
0x19e0   :  { %15700 = vmatmul.mubr.f32.gmra.mrb[94].mxu1 %v24374_v37 }
0x19e1   :  { %15778 = vmatprep.mubr.f32.mxu1 %v20562_v1 }
0x19e4   :  { %15782 = vmatmul.mubr.f32.vlgmr.msra.gmra.mrb[88].mxu1 %v15418_v56  ;;  %v18393_v56 = vld [vmem:[%s24971_s3 + $0x12] ss:$8 sm:$0x3] }
0x19e5   :  { %19403 = vmatpush1.bf16.msra.mxu1 %v24351_v32  ;;  %15787 = vmatprep.mubr.f32.mxu1 %v20562_v1 }
0x19e6   :  { %19405 = vmatprep.subr.bf16.mxu1 %v19404_v47 }
0x19e8   :  { %15791 = vmatmul.mubr.f32.gmra.mrb[90].mxu1 %v15429_v3  ;;  %v16092_v3 = vsel %vm34_vm0, %v18395_v16, 0 }
0x19e9   :  { %19407 = vmatpush1.bf16.msra.mxu1 %v19406_v20  ;;  %15796 = vmatprep.mubr.f32.mxu1 %v20562_v1  ;;  %v24465_v32 = vand.u32 4294901760, %v16092_v3 }
0x19ea   :  { %19409 = vmatprep.subr.bf16.mxu1 %v24314_v4  ;;  %v16060_v4 = vrot.slane %v18393_v56, %v20877_v41 }
0x19eb   :  { %v24474_v27 = vsub.f32 %v16092_v3, %v24465_v32 }
0x19ec   :  { %15800 = vmatmul.mubr.f32.gmra.mrb[92].mxu1 %v15440_v31 }
0x19ed   :  { %15805 = vmatprep.mubr.f32.mxu1 %v20562_v1 }
0x19f0   :  { %15809 = vmatmul.mubr.f32.gmra.mrb[94].mxu1 %v15451_v9 }
0x19f1   :  { %15903 = vmatprep.mubr.f32.mxu1 %v20562_v1 }
0x19f4   :  { %15905 = vmatmul.mubr.f32.vlgmr.msra.gmra.mrb[88].mxu1 %v24262_v13 }
0x19f5   :  { %19411 = vmatpush1.bf16.msra.mxu1 %v24303_v7  ;;  %15910 = vmatprep.mubr.f32.mxu1 %v20562_v1 }
0x19f6   :  { %19413 = vmatprep.subr.bf16.mxu1 %v24363_v60 }
0x19f8   :  { %15912 = vmatmul.mubr.f32.gmra.mrb[90].mxu1 %v24273_v25 }
0x19f9   :  { %19415 = vmatpush1.bf16.msra.mxu1 %v24359_v43  ;;  %15917 = vmatprep.mubr.f32.mxu1 %v20562_v1 }
0x19fc   :  { %15919 = vmatmul.mubr.f32.gmra.mrb[92].mxu1 %v24299_v8 }
0x19fd   :  { %15924 = vmatprep.mubr.f32.mxu1 %v20562_v1 }
0x1a00   :  { %15926 = vmatmul.mubr.f32.gmra.mrb[94].mxu1 %v24332_v55 }
0x1a01   :  { %16004 = vmatprep.mubr.f32.mxu1 %v20562_v1 }
0x1a04   :  { %16006 = vmatmul.mubr.f32.vlgmr.msra.gmra.mrb[88].mxu1 %v24262_v13  ;;  %v18392_v13 = vld [vmem:[%s24970_s2 + $0x12] ss:$8 sm:$0x3] }
0x1a05   :  { %16011 = vmatprep.mubr.f32.mxu1 %v20562_v1  ;;  %v16041_v7 = vrot.slane %v18392_v13, %v20877_v41  ;;  %v16045_v36 = vrot.slane %v18392_v13, %v20884_v59 }
0x1a07   :  { %v16048_v2 = vmul.f32 %v16041_v7, %v24268_v10  ;;  %v16049_v34 = vmul.f32 %v16045_v36, %v24276_v30  ;;  %v16050_v43 = vmul.f32 %v16041_v7, %v24286_v14  ;;  %v16051_v58 = vmul.f32 %v16045_v36, %v24297_v19  ;;  %v18397_v10 = vld [vmem:[%s24968_s0 + $0x178] sm:$0xff] }
0x1a08   :  { %16013 = vmatmul.mubr.f32.gmra.mrb[90].mxu1 %v24273_v25  ;;  %v16089_v25 = vsel %vm34_vm0, %v18394_v18, 0  ;;  %v16052_v30 = vmul.f32 %v16041_v7, %v24312_v35  ;;  %v24480_v14 = vand.u32 4294901760, %v16095_v0  ;;  %v16053_v19 = vmul.f32 %v16045_v36, %v24323_v51 }
0x1a09   :  { %16018 = vmatprep.mubr.f32.mxu1 %v20562_v1  ;;  %v16054_v31 = vmul.f32 %v16041_v7, %v24346_v53  ;;  %v16055_v11 = vmul.f32 %v16045_v36, %v24355_v22  ;;  %v24488_v44 = vsel %vm34_vm0, %v18397_v10, 0  ;;  %v16186_v53 = vand.u32 4294901760, %v24474_v27 }
0x1a0a   :  { %v24500_v49 = vsub.f32 %v16095_v0, %v24480_v14  ;;  %v24504_v9 = vand.u32 4294901760, %v24488_v44 }
0x1a0c   :  { %16020 = vmatmul.mubr.f32.gmra.mrb[92].mxu1 %v24299_v8  ;;  %v24452_v8 = vand.u32 4294901760, %v16089_v25 }
0x1a0d   :  { %16025 = vmatprep.mubr.f32.mxu1 %v20562_v1 }
0x1a0e   :  { %v24463_v46 = vsub.f32 %v16089_v25, %v24452_v8 }
0x1a10   :  { %16027 = vmatmul.mubr.f32.gmra.mrb[94].mxu1 %v24332_v55  ;;  %v16064_v55 = vrot.slane %v18393_v56, %v20884_v59  ;;  %v16175_v60 = vand.u32 4294901760, %v24463_v46 }
0x1a11   :  { %16879 = vmatprep.mubr.f32.mxu1 %v20562_v1 }
0x1a12   :  { %v24495_v51 = vsub.f32 %v24463_v46, %v16175_v60 }
0x1ad7   :  { %v16007_v6 = vpop.f32.mrb[88].mxu1 }
0x1ad8   :  { %v16067_v15 = vmul.f32 %v16060_v4, %v16007_v6  ;;  %v16009_v48 = vpop.f32.mrb[89].mxu1 }
0x1ad9   :  { %v16068_v26 = vmul.f32 %v16064_v55, %v16009_v48 }
0x1ada   :  { %v16075_v33 = vadd.f32 %v16067_v15, %v16048_v2 }
0x1adb   :  { %v16076_v5 = vadd.f32 %v16068_v26, %v16049_v34  ;;  %v16014_v29 = vpop.f32.mrb[90].mxu1 }
0x1adc   :  { %v16102_v50 = vand.u32 4294901760, %v16075_v33  ;;  %v16069_v45 = vmul.f32 %v16060_v4, %v16014_v29  ;;  %v16016_v39 = vpop.f32.mrb[91].mxu1 }
0x1add   :  { %v16100_v57 = vand.u32 4294901760, %v16076_v5  ;;  %v16070_v52 = vmul.f32 %v16064_v55, %v16016_v39 }
0x1ade   :  { %v24485_v37 = vsub.f32 %v16075_v33, %v16102_v50  ;;  %v16077_v40 = vadd.f32 %v16069_v45, %v16050_v43 }
0x1adf   :  { %v24490_v35 = vsub.f32 %v16076_v5, %v16100_v57  ;;  %v16078_v20 = vadd.f32 %v16070_v52, %v16051_v58  ;;  %v16021_v21 = vpop.f32.mrb[92].mxu1  ;;  %v16177_v52 = vand.u32 4294901760, %v24495_v51 }
0x1ae0   :  { %v16225_v47 = vand.u32 4294901760, %v24485_v37  ;;  %v16106_v22 = vand.u32 4294901760, %v16077_v40  ;;  %v16071_v24 = vmul.f32 %v16060_v4, %v16021_v21  ;;  %v16023_v28 = vpop.f32.mrb[93].mxu1 }
0x1ae1   :  { %v16104_v38 = vand.u32 4294901760, %v16078_v20  ;;  %v16072_v54 = vmul.f32 %v16064_v55, %v16023_v28  ;;  %v16219_v42 = vand.u32 4294901760, %v24490_v35 }
0x1ae2   :  { %v16226_v63 = vsub.f32 %v24485_v37, %v16225_v47  ;;  %v24507_v62 = vpack.c.bf16 %v16106_v22, %v16102_v50  ;;  %v24509_v23 = vsub.f32 %v16077_v40, %v16106_v22  ;;  %v16079_v17 = vadd.f32 %v16071_v24, %v16052_v30 }
0x1ae3   :  { %v24511_v61 = vsub.f32 %v16078_v20, %v16104_v38  ;;  %v16080_v18 = vadd.f32 %v16072_v54, %v16053_v19  ;;  %v16028_v13 = vpop.f32.mrb[94].mxu1  ;;  %v24513_v25 = vpack.c.bf16 %v16104_v38, %v16100_v57  ;;  %v16220_v56 = vsub.f32 %v24490_v35, %v16219_v42 }
0x1ae4   :  { %v16237_v16 = vand.u32 4294901760, %v24509_v23  ;;  %v16110_v7 = vand.u32 4294901760, %v16079_v17  ;;  %v16073_v3 = vmul.f32 %v16060_v4, %v16028_v13  ;;  %v16030_v36 = vpop.f32.mrb[95].mxu1  ;;  %v16227_v12 = vand.u32 4294901760, %v16226_v63 }
0x1ae5   :  { %v16108_v6 = vand.u32 4294901760, %v16080_v18  ;;  %v16074_v2 = vmul.f32 %v16064_v55, %v16030_v36  ;;  %19417 = vmatprep.subr.bf16.mxu0 %v24513_v25  ;;  %v16221_v15 = vand.u32 4294901760, %v16220_v56  ;;  %v16231_v48 = vand.u32 4294901760, %v24511_v61 }
0x1ae6   :  { %v16238_v34 = vsub.f32 %v24509_v23, %v16237_v16  ;;  %v24520_v26 = vsub.f32 %v16079_v17, %v16110_v7  ;;  %v16081_v0 = vadd.f32 %v16073_v3, %v16054_v31  ;;  %19419 = vmatpush1.bf16.msra.mxu0 %v24507_v62  ;;  %v19432_v43 = vpack.c.bf16 %v24511_v61, %v24490_v35 }
0x1ae7   :  { %v16242_v4 = vsub.f32 %v16080_v18, %v16108_v6  ;;  %v16082_v33 = vadd.f32 %v16074_v2, %v16055_v11  ;;  %v16232_v58 = vsub.f32 %v24511_v61, %v16231_v48  ;;  %v19434_v55 = vpack.c.bf16 %v24509_v23, %v24485_v37 }
0x1ae8   :  { %v16249_v5 = vand.u32 4294901760, %v24520_v26  ;;  %v16114_v29 = vand.u32 4294901760, %v16081_v0  ;;  %v16239_v10 = vand.u32 4294901760, %v16238_v34  ;;  %v24529_v30 = vpack.c.bf16 %v16231_v48, %v16219_v42 }
0x1ae9   :  { %v16112_v50 = vand.u32 4294901760, %v16082_v33  ;;  %v16233_v45 = vand.u32 4294901760, %v16232_v58  ;;  %v16243_v39 = vand.u32 4294901760, %v16242_v4  ;;  %v24531_v19 = vpack.c.bf16 %v16237_v16, %v16225_v47 }
0x1aea   :  { %v24533_v31 = vpack.c.bf16 %v16114_v29, %v16110_v7  ;;  %v16260_v57 = vsub.f32 %v16081_v0, %v16114_v29  ;;  %v19426_v11 = vpack.c.bf16 %v16239_v10, %v16227_v12  ;;  %v16187_v20 = vsub.f32 %v24474_v27, %v16186_v53 }
0x1aeb   :  { %v16254_v40 = vsub.f32 %v16082_v33, %v16112_v50  ;;  %v24536_v35 = vpack.c.bf16 %v16112_v50, %v16108_v6  ;;  %v19424_v37 = vpack.c.bf16 %v16233_v45, %v16221_v15  ;;  %v16250_v21 = vsub.f32 %v24520_v26, %v16249_v5  ;;  %v18401_v33 = vld [vmem:[%s24969_s1 + $0x178] sm:$0xff] }
0x1aec   :  { %v16261_v22 = vand.u32 4294901760, %v16260_v57  ;;  %v16197_v47 = vand.u32 4294901760, %v24500_v49  ;;  %v19438_v24 = vpack.c.bf16 %v16260_v57, %v24520_v26  ;;  %v16244_v28 = vsub.f32 %v16242_v4, %v16243_v39 }
0x1aed   :  { %19421 = vmatprep.subr.bf16.mxu0 %v24536_v35  ;;  %v16255_v51 = vand.u32 4294901760, %v16254_v40  ;;  %v24547_v38 = vsub.f32 %v24488_v44, %v24504_v9  ;;  %v19436_v54 = vpack.c.bf16 %v16254_v40, %v16242_v4  ;;  %v16188_v61 = vand.u32 4294901760, %v16187_v20 }
0x1aee   :  { %v16262_v42 = vsub.f32 %v16260_v57, %v16261_v22  ;;  %19423 = vmatpush1.bf16.msra.mxu0 %v24533_v31  ;;  %v19454_v63 = vpack.c.bf16 %v16261_v22, %v16249_v5  ;;  %v16251_v18 = vand.u32 4294901760, %v16250_v21  ;;  %v16245_v56 = vand.u32 4294901760, %v16244_v28 }
0x1aef   :  { %19425 = vmatprep.subr.bf16.mxu0 %v19424_v37  ;;  %v16256_v23 = vsub.f32 %v16254_v40, %v16255_v51  ;;  %v19452_v17 = vpack.c.bf16 %v16255_v51, %v16243_v39  ;;  %v16198_v7 = vsub.f32 %v24500_v49, %v16197_v47  ;;  %v16208_v44 = vand.u32 4294901760, %v24547_v38 }
0x1af0   :  { %v16263_v13 = vand.u32 4294901760, %v16262_v42  ;;  %v16805_v39 = vsel %vm34_vm0, %v18401_v33, 0 }
0x1af1   :  { %16178 = vmatmul.mubr.f32.vlgmr.msra.gmra.mrb[88].mxu0 %v16177_v52  ;;  %v16257_v16 = vand.u32 4294901760, %v16256_v23  ;;  %v16199_v12 = vand.u32 4294901760, %v16198_v7  ;;  %v16209_v6 = vsub.f32 %v24547_v38, %v16208_v44  ;;  %v24688_v28 = vand.u32 4294901760, %v16805_v39 }
0x1af2   :  { %19427 = vmatpush1.bf16.msra.mxu0 %v19426_v11  ;;  %16183 = vmatprep.mubr.f32.mxu0 %v20562_v1  ;;  %v19430_v3 = vpack.c.bf16 %v16263_v13, %v16251_v18 }
0x1af3   :  { %v19428_v36 = vpack.c.bf16 %v16257_v16, %v16245_v56  ;;  %v16210_v2 = vand.u32 4294901760, %v16209_v6 }
0x1af5   :  { %16189 = vmatmul.mubr.f32.gmra.mrb[90].mxu0 %v16188_v61  ;;  %19429 = vmatprep.subr.bf16.mxu0 %v19428_v36 }
0x1af6   :  { %19431 = vmatpush1.bf16.msra.mxu0 %v19430_v3  ;;  %16194 = vmatprep.mubr.f32.mxu0 %v20562_v1 }
0x1af7   :  { %19433 = vmatprep.subr.bf16.mxu0 %v19432_v43 }
0x1af9   :  { %16200 = vmatmul.mubr.f32.gmra.mrb[92].mxu0 %v16199_v12 }
0x1afa   :  { %16205 = vmatprep.mubr.f32.mxu0 %v20562_v1 }
0x1afd   :  { %16211 = vmatmul.mubr.f32.gmra.mrb[94].mxu0 %v16210_v2 }
0x1afe   :  { %16321 = vmatprep.mubr.f32.mxu0 %v20562_v1 }
0x1b01   :  { %16323 = vmatmul.mubr.f32.vlgmr.msra.gmra.mrb[88].mxu0 %v24452_v8 }
0x1b02   :  { %19435 = vmatpush1.bf16.msra.mxu0 %v19434_v55  ;;  %16328 = vmatprep.mubr.f32.mxu0 %v20562_v1 }
0x1b03   :  { %19437 = vmatprep.subr.bf16.mxu0 %v19436_v54 }
0x1b05   :  { %16330 = vmatmul.mubr.f32.gmra.mrb[90].mxu0 %v24465_v32 }
0x1b06   :  { %19439 = vmatpush1.bf16.msra.mxu0 %v19438_v24  ;;  %16335 = vmatprep.mubr.f32.mxu0 %v20562_v1 }
0x1b07   :  { %19441 = vmatprep.subr.bf16.mxu0 %v24513_v25 }
0x1b09   :  { %16337 = vmatmul.mubr.f32.gmra.mrb[92].mxu0 %v24480_v14 }
0x1b0a   :  { %16342 = vmatprep.mubr.f32.mxu0 %v20562_v1 }
0x1b0d   :  { %16344 = vmatmul.mubr.f32.gmra.mrb[94].mxu0 %v24504_v9 }
0x1b0e   :  { %16430 = vmatprep.mubr.f32.mxu0 %v20562_v1 }
0x1b11   :  { %16433 = vmatmul.mubr.f32.vlgmr.msra.gmra.mrb[88].mxu0 %v24463_v46  ;;  %v18398_v46 = vld [vmem:[%s24969_s1 + $0x160] sm:$0xff] }
0x1b12   :  { %19443 = vmatpush1.bf16.msra.mxu0 %v24507_v62  ;;  %16438 = vmatprep.mubr.f32.mxu0 %v20562_v1 }
0x1b13   :  { %19445 = vmatprep.subr.bf16.mxu0 %v24536_v35 }
0x1b15   :  { %16441 = vmatmul.mubr.f32.gmra.mrb[90].mxu0 %v24474_v27 }
0x1b16   :  { %19447 = vmatpush1.bf16.msra.mxu0 %v24533_v31  ;;  %16446 = vmatprep.mubr.f32.mxu0 %v20562_v1 }
0x1b17   :  { %19449 = vmatprep.subr.bf16.mxu0 %v24529_v30 }
0x1b19   :  { %16449 = vmatmul.mubr.f32.gmra.mrb[92].mxu0 %v24500_v49 }
0x1b1a   :  { %16454 = vmatprep.mubr.f32.mxu0 %v20562_v1 }
0x1b1d   :  { %16457 = vmatmul.mubr.f32.gmra.mrb[94].mxu0 %v24547_v38 }
0x1b1e   :  { %16535 = vmatprep.mubr.f32.mxu0 %v20562_v1 }
0x1b21   :  { %16539 = vmatmul.mubr.f32.vlgmr.msra.gmra.mrb[88].mxu0 %v16175_v60 }
0x1b22   :  { %19451 = vmatpush1.bf16.msra.mxu0 %v24531_v19  ;;  %16544 = vmatprep.mubr.f32.mxu0 %v20562_v1 }
0x1b23   :  { %19453 = vmatprep.subr.bf16.mxu0 %v19452_v17 }
0x1b25   :  { %16548 = vmatmul.mubr.f32.gmra.mrb[90].mxu0 %v16186_v53 }
0x1b26   :  { %19455 = vmatpush1.bf16.msra.mxu0 %v19454_v63  ;;  %16553 = vmatprep.mubr.f32.mxu0 %v20562_v1 }
0x1b27   :  { %19457 = vmatprep.subr.bf16.mxu0 %v24513_v25 }
0x1b29   :  { %16557 = vmatmul.mubr.f32.gmra.mrb[92].mxu0 %v16197_v47 }
0x1b2a   :  { %16562 = vmatprep.mubr.f32.mxu0 %v20562_v1 }
0x1b2d   :  { %16566 = vmatmul.mubr.f32.gmra.mrb[94].mxu0 %v16208_v44 }
0x1b2e   :  { %16660 = vmatprep.mubr.f32.mxu0 %v20562_v1 }
0x1b31   :  { %16662 = vmatmul.mubr.f32.vlgmr.msra.gmra.mrb[88].mxu0 %v24452_v8 }
0x1b32   :  { %19459 = vmatpush1.bf16.msra.mxu0 %v24507_v62  ;;  %16667 = vmatprep.mubr.f32.mxu0 %v20562_v1 }
0x1b33   :  { %19461 = vmatprep.subr.bf16.mxu0 %v24536_v35 }
0x1b35   :  { %16669 = vmatmul.mubr.f32.gmra.mrb[90].mxu0 %v24465_v32 }
0x1b36   :  { %19463 = vmatpush1.bf16.msra.mxu0 %v24533_v31  ;;  %16674 = vmatprep.mubr.f32.mxu0 %v20562_v1 }
0x1b39   :  { %16676 = vmatmul.mubr.f32.gmra.mrb[92].mxu0 %v24480_v14 }
0x1b3a   :  { %16681 = vmatprep.mubr.f32.mxu0 %v20562_v1 }
0x1b3d   :  { %16683 = vmatmul.mubr.f32.gmra.mrb[94].mxu0 %v24504_v9 }
0x1b3e   :  { %16761 = vmatprep.mubr.f32.mxu0 %v20562_v1 }
0x1b41   :  { %16763 = vmatmul.mubr.f32.vlgmr.msra.gmra.mrb[88].mxu0 %v24452_v8  ;;  %v16796_v8 = vsel %vm34_vm0, %v18398_v46, 0 }
0x1b42   :  { %16768 = vmatprep.mubr.f32.mxu0 %v20562_v1  ;;  %v24618_v60 = vand.u32 4294901760, %v16796_v8 }
0x1b44   :  { %v24627_v49 = vsub.f32 %v16796_v8, %v24618_v60 }
0x1b45   :  { %16770 = vmatmul.mubr.f32.gmra.mrb[90].mxu0 %v24465_v32  ;;  %v18399_v32 = vld [vmem:[%s24969_s1 + $0x168] sm:$0xff] }
0x1b46   :  { %16775 = vmatprep.mubr.f32.mxu0 %v20562_v1  ;;  %v16799_v27 = vsel %vm34_vm0, %v18399_v32, 0  ;;  %v16882_v43 = vand.u32 4294901760, %v24627_v49 }
0x1b48   :  { %v16883_v52 = vsub.f32 %v24627_v49, %v16882_v43 }
0x1b49   :  { %16777 = vmatmul.mubr.f32.gmra.mrb[92].mxu0 %v24480_v14  ;;  %v18400_v14 = vld [vmem:[%s24969_s1 + $0x170] sm:$0xff] }
0x1b4a   :  { %16782 = vmatprep.mubr.f32.mxu0 %v20562_v1  ;;  %v16802_v48 = vsel %vm34_vm0, %v18400_v14, 0  ;;  %v16884_v8 = vand.u32 4294901760, %v16883_v52 }
0x1b4b   :  { %v24655_v29 = vand.u32 4294901760, %v16802_v48 }
0x1b4d   :  { %16784 = vmatmul.mubr.f32.gmra.mrb[94].mxu0 %v24504_v9  ;;  %v24629_v9 = vand.u32 4294901760, %v16799_v27  ;;  %v24682_v21 = vsub.f32 %v16802_v48, %v24655_v29 }
0x1b4e   :  { %17636 = vmatprep.mubr.f32.mxu0 %v20562_v1 }
0x1b4f   :  { %v24646_v4 = vsub.f32 %v16799_v27, %v24629_v9 }
0x1b51   :  { %v16893_v11 = vand.u32 4294901760, %v24646_v4 }
0x1c14   :  { %v24624_v53 = vpop.f32.mrb[88].mxu0 }
0x1c15   :  { %v16809_v62 = vand.u32 4294901760, %v24624_v53  ;;  %v24632_v25 = vpop.f32.mrb[89].mxu0 }
0x1c16   :  { %v16807_v15 = vand.u32 4294901760, %v24632_v25 }
0x1c17   :  { %v24637_v34 = vsub.f32 %v24624_v53, %v16809_v62 }
0x1c18   :  { %v24640_v26 = vsub.f32 %v24632_v25, %v16807_v15  ;;  %v24642_v0 = vpop.f32.mrb[90].mxu0 }
0x1c19   :  { %v16932_v58 = vand.u32 4294901760, %v24637_v34  ;;  %v16813_v55 = vand.u32 4294901760, %v24642_v0  ;;  %v24653_v5 = vpop.f32.mrb[91].mxu0 }
0x1c1a   :  { %v16926_v10 = vand.u32 4294901760, %v24640_v26  ;;  %v16811_v30 = vand.u32 4294901760, %v24653_v5 }
0x1c1b   :  { %v24659_v50 = vpack.c.bf16 %v16813_v55, %v16809_v62  ;;  %v24662_v45 = vsub.f32 %v24642_v0, %v16813_v55  ;;  %v16933_v40 = vsub.f32 %v24637_v34, %v16932_v58 }
0x1c1c   :  { %v24666_v19 = vsub.f32 %v24653_v5, %v16811_v30  ;;  %v24668_v31 = vpop.f32.mrb[92].mxu0  ;;  %v24670_v57 = vpack.c.bf16 %v16811_v30, %v16807_v15  ;;  %v16927_v24 = vsub.f32 %v24640_v26, %v16926_v10  ;;  %v16894_v15 = vsub.f32 %v24646_v4, %v16893_v11 }
0x1c1d   :  { %v16944_v35 = vand.u32 4294901760, %v24662_v45  ;;  %v16817_v37 = vand.u32 4294901760, %v24668_v31  ;;  %v24679_v20 = vpop.f32.mrb[93].mxu0  ;;  %v19482_v42 = vpack.c.bf16 %v24662_v45, %v24637_v34  ;;  %v16934_v13 = vand.u32 4294901760, %v16933_v40 }
0x1c1e   :  { %v16938_v22 = vand.u32 4294901760, %v24666_v19  ;;  %v16815_v47 = vand.u32 4294901760, %v24679_v20  ;;  %19465 = vmatprep.subr.bf16.mxu1 %v24670_v57  ;;  %v19480_v54 = vpack.c.bf16 %v24666_v19, %v24640_v26  ;;  %v16928_v12 = vand.u32 4294901760, %v16927_v24 }
0x1c1f   :  { %v16945_v51 = vsub.f32 %v24662_v45, %v16944_v35  ;;  %v24692_v38 = vsub.f32 %v24668_v31, %v16817_v37  ;;  %19467 = vmatpush1.bf16.msra.mxu1 %v24659_v50  ;;  %v24707_v18 = vpack.c.bf16 %v16944_v35, %v16932_v58  ;;  %v16904_v26 = vand.u32 4294901760, %v24682_v21 }
0x1c20   :  { %v24700_v63 = vsub.f32 %v24679_v20, %v16815_v47  ;;  %v24702_v23 = vpop.f32.mrb[94].mxu0  ;;  %v16939_v17 = vsub.f32 %v24666_v19, %v16938_v22  ;;  %v24705_v61 = vpack.c.bf16 %v16938_v22, %v16926_v10  ;;  %v24730_v10 = vsub.f32 %v16805_v39, %v24688_v28 }
0x1c21   :  { %v16946_v56 = vand.u32 4294901760, %v16945_v51  ;;  %v16956_v16 = vand.u32 4294901760, %v24692_v38  ;;  %v16821_v7 = vand.u32 4294901760, %v24702_v23  ;;  %v24711_v44 = vpop.f32.mrb[95].mxu0  ;;  %v16895_v22 = vand.u32 4294901760, %v16894_v15 }
0x1c22   :  { %v16950_v3 = vand.u32 4294901760, %v24700_v63  ;;  %v16819_v36 = vand.u32 4294901760, %v24711_v44  ;;  %v16940_v6 = vand.u32 4294901760, %v16939_v17  ;;  %v16905_v39 = vsub.f32 %v24682_v21, %v16904_v26 }
0x1c23   :  { %v24715_v2 = vpack.c.bf16 %v16821_v7, %v16817_v37  ;;  %v16967_v46 = vsub.f32 %v24702_v23, %v16821_v7  ;;  %v19474_v32 = vpack.c.bf16 %v16946_v56, %v16934_v13  ;;  %v16957_v48 = vsub.f32 %v24692_v38, %v16956_v16 }
0x1c24   :  { %v16961_v27 = vsub.f32 %v24711_v44, %v16819_v36  ;;  %v24719_v14 = vpack.c.bf16 %v16819_v36, %v16815_v47  ;;  %v19472_v62 = vpack.c.bf16 %v16940_v6, %v16928_v12  ;;  %v16951_v55 = vsub.f32 %v24700_v63, %v16950_v3 }
0x1c25   :  { %v16968_v34 = vand.u32 4294901760, %v16967_v46  ;;  %v19486_v33 = vpack.c.bf16 %v16967_v46, %v24692_v38  ;;  %v16958_v35 = vand.u32 4294901760, %v16957_v48  ;;  %v16915_v51 = vand.u32 4294901760, %v24730_v10 }
0x1c26   :  { %v16962_v58 = vand.u32 4294901760, %v16961_v27  ;;  %19469 = vmatprep.subr.bf16.mxu1 %v24719_v14  ;;  %v19484_v30 = vpack.c.bf16 %v16961_v27, %v24700_v63  ;;  %v16952_v47 = vand.u32 4294901760, %v16951_v55  ;;  %v16906_v17 = vand.u32 4294901760, %v16905_v39 }
0x1c27   :  { %v16969_v45 = vsub.f32 %v16967_v46, %v16968_v34  ;;  %19471 = vmatpush1.bf16.msra.mxu1 %v24715_v2  ;;  %v19502_v19 = vpack.c.bf16 %v16968_v34, %v16956_v16  ;;  %v16916_v13 = vsub.f32 %v24730_v10, %v16915_v51 }
0x1c28   :  { %19473 = vmatprep.subr.bf16.mxu1 %v19472_v62  ;;  %v16963_v52 = vsub.f32 %v16961_v27, %v16962_v58  ;;  %v19500_v40 = vpack.c.bf16 %v16962_v58, %v16950_v3 }
0x1c29   :  { %v16970_v37 = vand.u32 4294901760, %v16969_v45  ;;  %v16917_v56 = vand.u32 4294901760, %v16916_v13 }
0x1c2a   :  { %16885 = vmatmul.mubr.f32.vlgmr.msra.gmra.mrb[96].mxu1 %v16884_v8  ;;  %v16964_v24 = vand.u32 4294901760, %v16963_v52 }
0x1c2b   :  { %19475 = vmatpush1.bf16.msra.mxu1 %v19474_v32  ;;  %16890 = vmatprep.mubr.f32.mxu1 %v20562_v1  ;;  %v19478_v38 = vpack.c.bf16 %v16970_v37, %v16958_v35 }
0x1c2c   :  { %v19476_v63 = vpack.c.bf16 %v16964_v24, %v16952_v47 }
0x1c2e   :  { %16896 = vmatmul.mubr.f32.gmra.mrb[98].mxu1 %v16895_v22  ;;  %19477 = vmatprep.subr.bf16.mxu1 %v19476_v63 }
0x1c2f   :  { %19479 = vmatpush1.bf16.msra.mxu1 %v19478_v38  ;;  %16901 = vmatprep.mubr.f32.mxu1 %v20562_v1 }
0x1c30   :  { %19481 = vmatprep.subr.bf16.mxu1 %v19480_v54  ;;  %v18406_v54 = vld [vmem:[%s24968_s0 + $0x190] sm:$0xff] }
0x1c31   :  { %v17559_v12 = vsel %vm34_vm0, %v18406_v54, 0 }
0x1c32   :  { %16907 = vmatmul.mubr.f32.gmra.mrb[100].mxu1 %v16906_v17 }
0x1c33   :  { %16912 = vmatprep.mubr.f32.mxu1 %v20562_v1 }
0x1c36   :  { %16918 = vmatmul.mubr.f32.gmra.mrb[102].mxu1 %v16917_v56 }
0x1c37   :  { %17028 = vmatprep.mubr.f32.mxu1 %v20562_v1 }
0x1c3a   :  { %17030 = vmatmul.mubr.f32.vlgmr.msra.gmra.mrb[96].mxu1 %v24618_v60 }
0x1c3b   :  { %19483 = vmatpush1.bf16.msra.mxu1 %v19482_v42  ;;  %17035 = vmatprep.mubr.f32.mxu1 %v20562_v1 }
0x1c3c   :  { %19485 = vmatprep.subr.bf16.mxu1 %v19484_v30 }
0x1c3e   :  { %17037 = vmatmul.mubr.f32.gmra.mrb[98].mxu1 %v24629_v9 }
0x1c3f   :  { %19487 = vmatpush1.bf16.msra.mxu1 %v19486_v33  ;;  %17042 = vmatprep.mubr.f32.mxu1 %v20562_v1 }
0x1c40   :  { %19489 = vmatprep.subr.bf16.mxu1 %v24670_v57 }
0x1c42   :  { %17044 = vmatmul.mubr.f32.gmra.mrb[100].mxu1 %v24655_v29 }
0x1c43   :  { %17049 = vmatprep.mubr.f32.mxu1 %v20562_v1 }
0x1c46   :  { %17051 = vmatmul.mubr.f32.gmra.mrb[102].mxu1 %v24688_v28 }
0x1c47   :  { %17137 = vmatprep.mubr.f32.mxu1 %v20562_v1 }
0x1c4a   :  { %17140 = vmatmul.mubr.f32.vlgmr.msra.gmra.mrb[96].mxu1 %v24627_v49  ;;  %v18404_v49 = vld [vmem:[%s24968_s0 + $0x180] sm:$0xff] }
0x1c4b   :  { %19491 = vmatpush1.bf16.msra.mxu1 %v24659_v50  ;;  %17145 = vmatprep.mubr.f32.mxu1 %v20562_v1 }
0x1c4c   :  { %19493 = vmatprep.subr.bf16.mxu1 %v24719_v14 }
0x1c4e   :  { %17148 = vmatmul.mubr.f32.gmra.mrb[98].mxu1 %v24646_v4  ;;  %v18405_v4 = vld [vmem:[%s24968_s0 + $0x188] sm:$0xff] }
0x1c4f   :  { %19495 = vmatpush1.bf16.msra.mxu1 %v24715_v2  ;;  %17153 = vmatprep.mubr.f32.mxu1 %v20562_v1 }
0x1c50   :  { %19497 = vmatprep.subr.bf16.mxu1 %v24705_v61 }
0x1c52   :  { %17156 = vmatmul.mubr.f32.gmra.mrb[100].mxu1 %v24682_v21 }
0x1c53   :  { %17161 = vmatprep.mubr.f32.mxu1 %v20562_v1 }
0x1c56   :  { %17164 = vmatmul.mubr.f32.gmra.mrb[102].mxu1 %v24730_v10 }
0x1c57   :  { %17242 = vmatprep.mubr.f32.mxu1 %v20562_v1 }
0x1c5a   :  { %17246 = vmatmul.mubr.f32.vlgmr.msra.gmra.mrb[96].mxu1 %v16882_v43  ;;  %v17553_v43 = vsel %vm34_vm0, %v18404_v49, 0 }
0x1c5b   :  { %19499 = vmatpush1.bf16.msra.mxu1 %v24707_v18  ;;  %17251 = vmatprep.mubr.f32.mxu1 %v20562_v1 }
0x1c5c   :  { %19501 = vmatprep.subr.bf16.mxu1 %v19500_v40 }
0x1c5e   :  { %17255 = vmatmul.mubr.f32.gmra.mrb[98].mxu1 %v16893_v11  ;;  %v17556_v11 = vsel %vm34_vm0, %v18405_v4, 0 }
0x1c5f   :  { %19503 = vmatpush1.bf16.msra.mxu1 %v19502_v19  ;;  %17260 = vmatprep.mubr.f32.mxu1 %v20562_v1  ;;  %v24820_v18 = vand.u32 4294901760, %v17556_v11 }
0x1c60   :  { %19505 = vmatprep.subr.bf16.mxu1 %v24670_v57 }
0x1c61   :  { %v24829_v27 = vsub.f32 %v17556_v11, %v24820_v18 }
0x1c62   :  { %17264 = vmatmul.mubr.f32.gmra.mrb[100].mxu1 %v16904_v26 }
0x1c63   :  { %17269 = vmatprep.mubr.f32.mxu1 %v20562_v1 }
0x1c66   :  { %17273 = vmatmul.mubr.f32.gmra.mrb[102].mxu1 %v16915_v51 }
0x1c67   :  { %17367 = vmatprep.mubr.f32.mxu1 %v20562_v1 }
0x1c6a   :  { %17369 = vmatmul.mubr.f32.vlgmr.msra.gmra.mrb[96].mxu1 %v24618_v60 }
0x1c6b   :  { %19507 = vmatpush1.bf16.msra.mxu1 %v24659_v50  ;;  %17374 = vmatprep.mubr.f32.mxu1 %v20562_v1 }
0x1c6c   :  { %19509 = vmatprep.subr.bf16.mxu1 %v24719_v14 }
0x1c6e   :  { %17376 = vmatmul.mubr.f32.gmra.mrb[98].mxu1 %v24629_v9 }
0x1c6f   :  { %19511 = vmatpush1.bf16.msra.mxu1 %v24715_v2  ;;  %17381 = vmatprep.mubr.f32.mxu1 %v20562_v1 }
0x1c72   :  { %17383 = vmatmul.mubr.f32.gmra.mrb[100].mxu1 %v24655_v29 }
0x1c73   :  { %17388 = vmatprep.mubr.f32.mxu1 %v20562_v1 }
0x1c76   :  { %17390 = vmatmul.mubr.f32.gmra.mrb[102].mxu1 %v24688_v28 }
0x1c77   :  { %17468 = vmatprep.mubr.f32.mxu1 %v20562_v1 }
0x1c7a   :  { %17470 = vmatmul.mubr.f32.vlgmr.msra.gmra.mrb[96].mxu1 %v24618_v60  ;;  %v18402_v60 = vld [vmem:[%s24970_s2 + $0x13] ss:$8 sm:$0x3] }
0x1c7b   :  { %17475 = vmatprep.mubr.f32.mxu1 %v20562_v1  ;;  %v17505_v50 = vrot.slane %v18402_v60, %v20877_v41  ;;  %v17509_v21 = vrot.slane %v18402_v60, %v20884_v59 }
0x1c7d   :  { %v17512_v16 = vmul.f32 %v17505_v50, %v24624_v53  ;;  %v17513_v3 = vmul.f32 %v17509_v21, %v24632_v25  ;;  %v17515_v2 = vmul.f32 %v17509_v21, %v24653_v5  ;;  %v18407_v53 = vld [vmem:[%s24968_s0 + $0x198] sm:$0xff]  ;;  %v17516_v25 = vmul.f32 %v17505_v50, %v24668_v31 }
0x1c7e   :  { %17477 = vmatmul.mubr.f32.gmra.mrb[98].mxu1 %v24629_v9  ;;  %v18403_v9 = vld [vmem:[%s24971_s3 + $0x13] ss:$8 sm:$0x3]  ;;  %v17517_v5 = vmul.f32 %v17509_v21, %v24679_v20  ;;  %v17518_v48 = vmul.f32 %v17505_v50, %v24702_v23  ;;  %v17519_v33 = vmul.f32 %v17509_v21, %v24711_v44  ;;  %v24843_v10 = vsel %vm34_vm0, %v18407_v53, 0 }
0x1c7f   :  { %17482 = vmatprep.mubr.f32.mxu1 %v20562_v1  ;;  %v17524_v57 = vrot.slane %v18403_v9, %v20877_v41  ;;  %v17650_v23 = vand.u32 4294901760, %v24829_v27  ;;  %v24859_v24 = vand.u32 4294901760, %v24843_v10 }
0x1c82   :  { %17484 = vmatmul.mubr.f32.gmra.mrb[100].mxu1 %v24655_v29  ;;  %v24807_v29 = vand.u32 4294901760, %v17553_v43 }
0x1c83   :  { %17489 = vmatprep.mubr.f32.mxu1 %v20562_v1 }
0x1c84   :  { %v24818_v61 = vsub.f32 %v17553_v43, %v24807_v29 }
0x1c86   :  { %17491 = vmatmul.mubr.f32.gmra.mrb[102].mxu1 %v24688_v28  ;;  %v17528_v28 = vrot.slane %v18403_v9, %v20884_v59  ;;  %v17514_v59 = vmul.f32 %v17505_v50, %v24642_v0  ;;  %v17639_v32 = vand.u32 4294901760, %v24818_v61  ;;  %v24835_v0 = vand.u32 4294901760, %v17559_v12 }
0x1c88   :  { %v24850_v20 = vsub.f32 %v24818_v61, %v17639_v32  ;;  %v24855_v35 = vsub.f32 %v17559_v12, %v24835_v0 }
0x1d4d   :  { %v17471_v42 = vpop.f32.mrb[96].mxu1 }
0x1d4e   :  { %v17531_v7 = vmul.f32 %v17524_v57, %v17471_v42  ;;  %v17473_v41 = vpop.f32.mrb[97].mxu1 }
0x1d4f   :  { %v17532_v36 = vmul.f32 %v17528_v28, %v17473_v41 }
0x1d50   :  { %v17539_v6 = vadd.f32 %v17531_v7, %v17512_v16 }
0x1d51   :  { %v17540_v46 = vadd.f32 %v17532_v36, %v17513_v3  ;;  %v17478_v8 = vpop.f32.mrb[98].mxu1 }
0x1d52   :  { %v17566_v14 = vand.u32 4294901760, %v17539_v6  ;;  %v17533_v62 = vmul.f32 %v17524_v57, %v17478_v8  ;;  %v17480_v15 = vpop.f32.mrb[99].mxu1 }
0x1d53   :  { %v17564_v34 = vand.u32 4294901760, %v17540_v46  ;;  %v17534_v26 = vmul.f32 %v17528_v28, %v17480_v15 }
0x1d54   :  { %v24840_v58 = vsub.f32 %v17539_v6, %v17566_v14  ;;  %v17541_v55 = vadd.f32 %v17533_v62, %v17514_v59 }
0x1d55   :  { %v24845_v31 = vsub.f32 %v17540_v46, %v17564_v34  ;;  %v17542_v30 = vadd.f32 %v17534_v26, %v17515_v2  ;;  %v17485_v45 = vpop.f32.mrb[100].mxu1 }
0x1d56   :  { %v17689_v19 = vand.u32 4294901760, %v24840_v58  ;;  %v17570_v44 = vand.u32 4294901760, %v17541_v55  ;;  %v17535_v52 = vmul.f32 %v17524_v57, %v17485_v45  ;;  %v17487_v40 = vpop.f32.mrb[101].mxu1  ;;  %v17661_v45 = vand.u32 4294901760, %v24855_v35 }
0x1d57   :  { %v17568_v37 = vand.u32 4294901760, %v17542_v30  ;;  %v17536_v22 = vmul.f32 %v17528_v28, %v17487_v40  ;;  %v17683_v47 = vand.u32 4294901760, %v24845_v31 }
0x1d58   :  { %v17690_v39 = vsub.f32 %v24840_v58, %v17689_v19  ;;  %v24862_v51 = vpack.c.bf16 %v17570_v44, %v17566_v14  ;;  %v24864_v38 = vsub.f32 %v17541_v55, %v17570_v44  ;;  %v17543_v63 = vadd.f32 %v17535_v52, %v17516_v25 }
0x1d59   :  { %v24866_v17 = vsub.f32 %v17542_v30, %v17568_v37  ;;  %v17544_v13 = vadd.f32 %v17536_v22, %v17517_v5  ;;  %v17492_v56 = vpop.f32.mrb[102].mxu1  ;;  %v24868_v49 = vpack.c.bf16 %v17568_v37, %v17564_v34  ;;  %v17684_v60 = vsub.f32 %v24845_v31, %v17683_v47 }
0x1d5a   :  { %v17701_v43 = vand.u32 4294901760, %v24864_v38  ;;  %v17574_v9 = vand.u32 4294901760, %v17543_v63  ;;  %v17537_v4 = vmul.f32 %v17524_v57, %v17492_v56  ;;  %v17494_v50 = vpop.f32.mrb[103].mxu1  ;;  %v17691_v11 = vand.u32 4294901760, %v17690_v39 }
0x1d5b   :  { %v17572_v21 = vand.u32 4294901760, %v17544_v13  ;;  %v17538_v54 = vmul.f32 %v17528_v28, %v17494_v50  ;;  %19513 = vmatprep.subr.bf16.mxu0 %v24868_v49  ;;  %v17685_v42 = vand.u32 4294901760, %v17684_v60  ;;  %v17695_v16 = vand.u32 4294901760, %v24866_v17 }
0x1d5c   :  { %v17702_v7 = vsub.f32 %v24864_v38, %v17701_v43  ;;  %v24875_v41 = vsub.f32 %v17543_v63, %v17574_v9  ;;  %v17545_v3 = vadd.f32 %v17537_v4, %v17518_v48  ;;  %19515 = vmatpush1.bf16.msra.mxu0 %v24862_v51  ;;  %v19528_v36 = vpack.c.bf16 %v24866_v17, %v24845_v31 }
0x1d5d   :  { %v17706_v57 = vsub.f32 %v17544_v13, %v17572_v21  ;;  %v17546_v12 = vadd.f32 %v17538_v54, %v17519_v33  ;;  %v17696_v59 = vsub.f32 %v24866_v17, %v17695_v16  ;;  %v19530_v28 = vpack.c.bf16 %v24864_v38, %v24840_v58 }
0x1d5e   :  { %v17713_v6 = vand.u32 4294901760, %v24875_v41  ;;  %v17578_v2 = vand.u32 4294901760, %v17545_v3  ;;  %v17703_v46 = vand.u32 4294901760, %v17702_v7  ;;  %v24884_v8 = vpack.c.bf16 %v17695_v16, %v17683_v47 }
0x1d5f   :  { %v17576_v53 = vand.u32 4294901760, %v17546_v12  ;;  %v17697_v25 = vand.u32 4294901760, %v17696_v59  ;;  %v17707_v14 = vand.u32 4294901760, %v17706_v57  ;;  %v24886_v62 = vpack.c.bf16 %v17701_v43, %v17689_v19 }
0x1d60   :  { %v24888_v15 = vpack.c.bf16 %v17578_v2, %v17574_v9  ;;  %v17724_v5 = vsub.f32 %v17545_v3, %v17578_v2  ;;  %v17641_v48 = vand.u32 4294901760, %v24850_v20  ;;  %v19522_v34 = vpack.c.bf16 %v17703_v46, %v17691_v11 }
0x1d61   :  { %v17718_v26 = vsub.f32 %v17546_v12, %v17576_v53  ;;  %v24891_v33 = vpack.c.bf16 %v17576_v53, %v17572_v21  ;;  %v19520_v58 = vpack.c.bf16 %v17697_v25, %v17685_v42  ;;  %v17651_v55 = vsub.f32 %v24829_v27, %v17650_v23 }
0x1d62   :  { %v17714_v31 = vsub.f32 %v24875_v41, %v17713_v6  ;;  %v17725_v30 = vand.u32 4294901760, %v17724_v5  ;;  %v19534_v19 = vpack.c.bf16 %v17724_v5, %v24875_v41  ;;  %v17708_v44 = vsub.f32 %v17706_v57, %v17707_v14 }
0x1d63   :  { %19517 = vmatprep.subr.bf16.mxu0 %v24891_v33  ;;  %v17719_v20 = vand.u32 4294901760, %v17718_v26  ;;  %v24902_v52 = vsub.f32 %v24843_v10, %v24859_v24  ;;  %v19532_v40 = vpack.c.bf16 %v17718_v26, %v17706_v57  ;;  %v17652_v38 = vand.u32 4294901760, %v17651_v55 }
0x1d64   :  { %v17726_v37 = vsub.f32 %v17724_v5, %v17725_v30  ;;  %19519 = vmatpush1.bf16.msra.mxu0 %v24888_v15  ;;  %v19550_v22 = vpack.c.bf16 %v17725_v30, %v17713_v6  ;;  %v17715_v63 = vand.u32 4294901760, %v17714_v31  ;;  %v17709_v13 = vand.u32 4294901760, %v17708_v44 }
0x1d65   :  { %19521 = vmatprep.subr.bf16.mxu0 %v19520_v58  ;;  %v17720_v47 = vsub.f32 %v17718_v26, %v17719_v20  ;;  %v19548_v39 = vpack.c.bf16 %v17719_v20, %v17707_v14  ;;  %v17662_v60 = vsub.f32 %v24855_v35, %v17661_v45  ;;  %v17672_v10 = vand.u32 4294901760, %v24902_v52 }
0x1d66   :  { %v17727_v17 = vand.u32 4294901760, %v17726_v37 }
0x1d67   :  { %17642 = vmatmul.mubr.f32.vlgmr.msra.gmra.mrb[96].mxu0 %v17641_v48  ;;  %v17721_v56 = vand.u32 4294901760, %v17720_v47  ;;  %v17663_v4 = vand.u32 4294901760, %v17662_v60  ;;  %v17673_v50 = vsub.f32 %v24902_v52, %v17672_v10 }
0x1d68   :  { %19523 = vmatpush1.bf16.msra.mxu0 %v19522_v34  ;;  %17647 = vmatprep.mubr.f32.mxu0 %v20562_v1  ;;  %v19526_v43 = vpack.c.bf16 %v17727_v17, %v17715_v63 }
0x1d69   :  { %v19524_v9 = vpack.c.bf16 %v17721_v56, %v17709_v13  ;;  %v17674_v11 = vand.u32 4294901760, %v17673_v50 }
0x1d6b   :  { %17653 = vmatmul.mubr.f32.gmra.mrb[98].mxu0 %v17652_v38  ;;  %19525 = vmatprep.subr.bf16.mxu0 %v19524_v9 }
0x1d6c   :  { %19527 = vmatpush1.bf16.msra.mxu0 %v19526_v43  ;;  %17658 = vmatprep.mubr.f32.mxu0 %v20562_v1 }
0x1d6d   :  { %19529 = vmatprep.subr.bf16.mxu0 %v19528_v36 }
0x1d6f   :  { %17664 = vmatmul.mubr.f32.gmra.mrb[100].mxu0 %v17663_v4 }
0x1d70   :  { %17669 = vmatprep.mubr.f32.mxu0 %v20562_v1 }
0x1d73   :  { %17675 = vmatmul.mubr.f32.gmra.mrb[102].mxu0 %v17674_v11 }
0x1d74   :  { %17785 = vmatprep.mubr.f32.mxu0 %v20562_v1 }
0x1d77   :  { %17787 = vmatmul.mubr.f32.vlgmr.msra.gmra.mrb[96].mxu0 %v24807_v29 }
0x1d78   :  { %19531 = vmatpush1.bf16.msra.mxu0 %v19530_v28  ;;  %17792 = vmatprep.mubr.f32.mxu0 %v20562_v1 }
0x1d79   :  { %19533 = vmatprep.subr.bf16.mxu0 %v19532_v40 }
0x1d7b   :  { %17794 = vmatmul.mubr.f32.gmra.mrb[98].mxu0 %v24820_v18 }
0x1d7c   :  { %19535 = vmatpush1.bf16.msra.mxu0 %v19534_v19  ;;  %17799 = vmatprep.mubr.f32.mxu0 %v20562_v1 }
0x1d7d   :  { %19537 = vmatprep.subr.bf16.mxu0 %v24868_v49 }
0x1d7f   :  { %17801 = vmatmul.mubr.f32.gmra.mrb[100].mxu0 %v24835_v0 }
0x1d80   :  { %17806 = vmatprep.mubr.f32.mxu0 %v20562_v1 }
0x1d83   :  { %17808 = vmatmul.mubr.f32.gmra.mrb[102].mxu0 %v24859_v24 }
0x1d84   :  { %17894 = vmatprep.mubr.f32.mxu0 %v20562_v1 }
0x1d87   :  { %17897 = vmatmul.mubr.f32.vlgmr.msra.gmra.mrb[96].mxu0 %v24818_v61 }
0x1d88   :  { %19539 = vmatpush1.bf16.msra.mxu0 %v24862_v51  ;;  %17902 = vmatprep.mubr.f32.mxu0 %v20562_v1 }
0x1d89   :  { %19541 = vmatprep.subr.bf16.mxu0 %v24891_v33 }
0x1d8b   :  { %17905 = vmatmul.mubr.f32.gmra.mrb[98].mxu0 %v24829_v27 }
0x1d8c   :  { %19543 = vmatpush1.bf16.msra.mxu0 %v24888_v15  ;;  %17910 = vmatprep.mubr.f32.mxu0 %v20562_v1 }
0x1d8d   :  { %19545 = vmatprep.subr.bf16.mxu0 %v24884_v8 }
0x1d8f   :  { %17913 = vmatmul.mubr.f32.gmra.mrb[100].mxu0 %v24855_v35 }
0x1d90   :  { %17918 = vmatprep.mubr.f32.mxu0 %v20562_v1 }
0x1d93   :  { %17921 = vmatmul.mubr.f32.gmra.mrb[102].mxu0 %v24902_v52 }
0x1d94   :  { %17999 = vmatprep.mubr.f32.mxu0 %v20562_v1 }
0x1d97   :  { %18003 = vmatmul.mubr.f32.vlgmr.msra.gmra.mrb[96].mxu0 %v17639_v32 }
0x1d98   :  { %19547 = vmatpush1.bf16.msra.mxu0 %v24886_v62  ;;  %18008 = vmatprep.mubr.f32.mxu0 %v20562_v1 }
0x1d99   :  { %19549 = vmatprep.subr.bf16.mxu0 %v19548_v39 }
0x1d9b   :  { %18012 = vmatmul.mubr.f32.gmra.mrb[98].mxu0 %v17650_v23 }
0x1d9c   :  { %19551 = vmatpush1.bf16.msra.mxu0 %v19550_v22  ;;  %18017 = vmatprep.mubr.f32.mxu0 %v20562_v1 }
0x1d9d   :  { %19553 = vmatprep.subr.bf16.mxu0 %v24868_v49 }
0x1d9f   :  { %18021 = vmatmul.mubr.f32.gmra.mrb[100].mxu0 %v17661_v45 }
0x1da0   :  { %18026 = vmatprep.mubr.f32.mxu0 %v20562_v1 }
0x1da3   :  { %18030 = vmatmul.mubr.f32.gmra.mrb[102].mxu0 %v17672_v10 }
0x1da4   :  { %18124 = vmatprep.mubr.f32.mxu0 %v20562_v1 }
0x1da7   :  { %18126 = vmatmul.mubr.f32.vlgmr.msra.gmra.mrb[96].mxu0 %v24807_v29 }
0x1da8   :  { %19555 = vmatpush1.bf16.msra.mxu0 %v24862_v51  ;;  %18131 = vmatprep.mubr.f32.mxu0 %v20562_v1 }
0x1da9   :  { %19557 = vmatprep.subr.bf16.mxu0 %v24891_v33 }
0x1dab   :  { %18133 = vmatmul.mubr.f32.gmra.mrb[98].mxu0 %v24820_v18 }
0x1dac   :  { %19559 = vmatpush1.bf16.msra.mxu0 %v24888_v15  ;;  %18138 = vmatprep.mubr.f32.mxu0 %v20562_v1 }
0x1daf   :  { %18140 = vmatmul.mubr.f32.gmra.mrb[100].mxu0 %v24835_v0 }
0x1db0   :  { %18145 = vmatprep.mubr.f32.mxu0 %v20562_v1 }
0x1db3   :  { %18147 = vmatmul.mubr.f32.gmra.mrb[102].mxu0 %v24859_v24 }
0x1db4   :  { %18225 = vmatprep.mubr.f32.mxu0 %v20562_v1 }
0x1db7   :  { %18227 = vmatmul.mubr.f32.vlgmr.msra.gmra.mrb[96].mxu0 %v24807_v29 }
0x1db8   :  { %18232 = vmatprep.mubr.f32.mxu0 %v20562_v1 }
0x1dbb   :  { %18234 = vmatmul.mubr.f32.gmra.mrb[98].mxu0 %v24820_v18 }
0x1dbc   :  { %18239 = vmatprep.mubr.f32.mxu0 %v20562_v1 }
0x1dbf   :  { %18241 = vmatmul.mubr.f32.gmra.mrb[100].mxu0 %v24835_v0 }
0x1dc0   :  { %18246 = vmatprep.mubr.f32.mxu0 %v20562_v1 }
0x1dc3   :  { %18248 = vmatmul.mubr.f32.gmra.mrb[102].mxu0 %v24859_v24 }
0x1e8a   :  { %v18228_v61 = vpop.f32.mrb[96].mxu0 }
0x1e8b   :  { %v18230_v32 = vpop.f32.mrb[97].mxu0 }
0x1e8c   :  { %v18254_v27 = vmul.f32 %v18230_v32, %v18228_v61 }
0x1e8e   :  { %v18235_v23 = vpop.f32.mrb[98].mxu0 }
0x1e8f   :  { %v18237_v35 = vpop.f32.mrb[99].mxu0 }
0x1e90   :  { %v18255_v51 = vmul.f32 %v18237_v35, %v18235_v23 }
0x1e92   :  { %v18242_v49 = vpop.f32.mrb[100].mxu0 }
0x1e93   :  { %v18267_v29 = vmul.f32 %v18242_v49, %v18230_v32  ;;  %v18244_v21 = vpop.f32.mrb[101].mxu0 }
0x1e94   :  { %v18256_v54 = vmul.f32 %v18244_v21, %v18242_v49  ;;  %v18269_v42 = vmul.f32 %v18244_v21, %v18228_v61 }
0x1e96   :  { %v18258_v18 = vadd.f32 %v18256_v54, %v18254_v27  ;;  %v18271_v16 = vsub.f32 %v18267_v29, %v18269_v42  ;;  %v18249_v7 = vpop.f32.mrb[102].mxu0 }
0x1e97   :  { %v18268_v41 = vmul.f32 %v18249_v7, %v18237_v35  ;;  %v18251_v0 = vpop.f32.mrb[103].mxu0 }
0x1e98   :  { %v18257_v3 = vmul.f32 %v18251_v0, %v18249_v7  ;;  %v18270_v1 = vmul.f32 %v18251_v0, %v18235_v23 }
0x1e9a   :  { %v18259_v36 = vadd.f32 %v18257_v3, %v18255_v51  ;;  %v18272_v24 = vsub.f32 %v18268_v41, %v18270_v1 }
0x1e9c   :  { %v18260_v57 = vadd.f32 %v18259_v36, %v18258_v18  ;;  %v18273_v12 = vadd.f32 %v18272_v24, %v18271_v16 }
0x1e9e   :  { %v18261_v59 = vrot.slane %v18260_v57, 4  ;;  %v18274_v28 = vrot.slane %v18273_v12, 4 }
0x1ea0   :  { %v18262_v6 = vadd.f32 %v18261_v59, %v18260_v57  ;;  %v18275_v2 = vadd.f32 %v18274_v28, %v18273_v12 }
0x1ea2   :  { %v18263_v46 = vrot.slane %v18262_v6, 2  ;;  %v18276_v8 = vrot.slane %v18275_v2, 2 }
0x1ea4   :  { %v18264_v53 = vadd.f32 %v18263_v46, %v18262_v6  ;;  %v18277_v25 = vadd.f32 %v18276_v8, %v18275_v2 }
0x1ea6   :  { %v18265_v14 = vrot.slane %v18264_v53, 1  ;;  %v18278_v62 = vrot.slane %v18277_v25, 1 }
0x1ea8   :  { %v18266_v15 = vadd.f32 %v18265_v14, %v18264_v53  ;;  %v18279_v5 = vadd.f32 %v18278_v62, %v18277_v25 }
0x1eaa   :  { %v18280_v48 = vmul.f32 %v18266_v15, %v18266_v15  ;;  %v18281_v34 = vmul.f32 %v18279_v5, %v18279_v5 }
0x1eac   :  { %v18282_v26 = vadd.f32 %v18281_v34, %v18280_v48 }
0x1eae   :  { %18283 = vst [vmem:[%s24972_s4] sm:$0x1] %v18282_v26 }

</bundles_post_ra>
